<compile_context>
chip_gen: v5e
topology: v5e:2x2
jax: 0.10.0
libtpu: 0.0.40
codegen_flags: <defaults>
</compile_context>

<pallas_src>
import functools

import jax
import jax.numpy as jnp
import numpy as np
from jax import lax
from jax.experimental import pallas as pl
from jax.experimental.pallas import tpu as pltpu

_BOX_CODE_SIZE = 7 + 2 + 9  # == 18, the global used by the PyTorch forward


# ----------------------------------------------------------------------------
# BlockSpec helpers
# ----------------------------------------------------------------------------
def _batch_spec(shape):
    """Per-batch (B, R, C) array: one squeezed batch slab per grid step."""
    return pl.BlockSpec((pl.Squeezed(),) + tuple(shape[1:]), lambda b: (b, 0, 0))


def _shared_spec(arr):
    """Shared (weights / scales / masks): full array every grid step."""
    zero_idx = (0,) * arr.ndim
    return pl.BlockSpec(arr.shape, lambda b, _z=zero_idx: _z)


# ----------------------------------------------------------------------------
# Fully fused HugeHead kernel.
#
# Layout conventions (per batch element):
#   * "phase-major" map (conv1 / conv2 outputs): 4 blocks, one per (row-parity,
#     col-parity) of the 8x8 map.  Each block is a flattened (hp x pw) grid with
#     pw = wp_core + 2 (1 left-pad slot, wp_core real cols, 1 right-pad slot) plus
#     halo rows, so phase position (i, j) lives at block row (i+1)*pw + (j+1).
#   * "raster" map (conv3 / conv4 outputs): same flattening, single block.
#   With this layout every 3x3 tap of every layer (stride 1 or 2) is ONE contiguous
#   slice of a scratch buffer -> one MXU dot, accumulated in f32.
# ----------------------------------------------------------------------------
def _hugehead_kernel(xi, mk, w1, s1, b1, w2, s2, b2, w3, s3, b3,
                     w4, s4, b4, w5, s5, b5, wh, bh,
                     o_ref, scr1, scr2, scr3, scr4, *, hp, pw):
    mp = hp * pw                 # rows per phase block == rows of the raster maps
    top = pw + 1                 # interior start offset inside every padded buffer
    nrows = scr3.shape[0]        # (hp + 3) * pw
    cpad = scr3.shape[1]         # 128

    # ---- zero ONLY the halo rows of each padded scratch (every step) ----------
    zt = jnp.zeros((top, cpad), jnp.bfloat16)
    zb = jnp.zeros((nrows - top - mp, cpad), jnp.bfloat16)
    for ph in range(4):
        base = ph * nrows
        scr1[base:base + top, :] = zt
        scr1[base + top + mp:base + nrows, :] = zb
        scr2[base:base + top, :] = zt
        scr2[base + top + mp:base + nrows, :] = zb
    scr3[0:top, :] = zt
    scr3[top + mp:nrows, :] = zb
    scr4[0:top, :] = zt
    scr4[top + mp:nrows, :] = zb

    mrow = mk[0:mp, :]           # (mp, 1) junk-column mask (identical per phase)

    # ---- conv1 (3x3, stride 2): wrapper tap-stacked the input, so the whole
    #      layer is ONE (4*mp, 9*cin) @ (9*cin, 128) MXU dot; output phase-major.
    acc = jnp.dot(xi[...], w1[...], preferred_element_type=jnp.float32)
    y1 = jnp.maximum(acc * s1[...] + b1[...], 0.0) * mk[...]
    y1 = y1.astype(jnp.bfloat16)
    for ph in range(4):
        base = ph * nrows
        scr1[base + top:base + top + mp, :] = y1[ph * mp:(ph + 1) * mp, :]

    # ---- conv2 (3x3, stride 1): phase-major in -> phase-major out --------------
    for oa in range(2):
        for ob in range(2):
            acc = jnp.zeros((mp, cpad), jnp.float32)
            for dy in range(3):
                for dx in range(3):
                    pa = (oa + dy - 1) % 2
                    pb = (ob + dx - 1) % 2
                    base = (pa * 2 + pb) * nrows
                    off = (((oa + dy - 1) // 2) + 1) * pw + (((ob + dx - 1) // 2) + 1)
                    acc = acc + jnp.dot(scr1[base + off:base + off + mp, :],
                                        w2[dy * 3 + dx],
                                        preferred_element_type=jnp.float32)
            yp = jnp.maximum(acc * s2[...] + b2[...], 0.0) * mrow
            obase = (oa * 2 + ob) * nrows
            scr2[obase + top:obase + top + mp, :] = yp.astype(jnp.bfloat16)

    # ---- conv3 (3x3, stride 2): contiguous-slice reads of conv2's phases,
    #      plain raster output (its consumers are stride-1). ---------------------
    acc = jnp.zeros((mp, cpad), jnp.float32)
    for dy in range(3):
        for dx in range(3):
            pa = (dy - 1) % 2
            pb = (dx - 1) % 2
            base = (pa * 2 + pb) * nrows
            off = (((dy - 1) // 2) + 1) * pw + (((dx - 1) // 2) + 1)
            acc = acc + jnp.dot(scr2[base + off:base + off + mp, :],
                                w3[dy * 3 + dx], preferred_element_type=jnp.float32)
    y3 = jnp.maximum(acc * s3[...] + b3[...], 0.0) * mrow
    scr3[top:top + mp, :] = y3.astype(jnp.bfloat16)

    # ---- conv4 (3x3, stride 1) on the raster map --------------------------------
    acc = jnp.zeros((mp, cpad), jnp.float32)
    for dy in range(3):
        for dx in range(3):
            off = dy * pw + dx
            acc = acc + jnp.dot(scr3[off:off + mp, :], w4[dy * 3 + dx],
                                preferred_element_type=jnp.float32)
    y4 = jnp.maximum(acc * s4[...] + b4[...], 0.0) * mrow
    scr4[top:top + mp, :] = y4.astype(jnp.bfloat16)

    # ---- conv5 (3x3, stride 1) ---------------------------------------------------
    acc = jnp.zeros((mp, cpad), jnp.float32)
    for dy in range(3):
        for dx in range(3):
            off = dy * pw + dx
            acc = acc + jnp.dot(scr4[off:off + mp, :], w5[dy * 3 + dx],
                                preferred_element_type=jnp.float32)
    y5 = jnp.maximum(acc * s5[...] + b5[...], 0.0)

    # ---- fused lane-dense 1x1 heads: columns = [cls | box | dir | zero pad] ------
    out = jnp.dot(y5.astype(jnp.bfloat16), wh[...],
                  preferred_element_type=jnp.float32) + bh[...]
    o_ref[...] = out.astype(o_ref.dtype)


# ----------------------------------------------------------------------------
# Wrapper-side layout plumbing for conv1 only (tiny tap-stacked im2col of the
# 4-channel input, in conv1-OUTPUT-phase-major order).
# ----------------------------------------------------------------------------
def _conv1_phase_im2col(x_nhwc, h2, w2):
    """Returns (B, 4 * h2 * (w2+2), 9*C) bf16.  Row order: phase (a,b) blocks (a
    major), row within a block = p*(w2+2) + q (2 junk cols per row).  Channel order
    per row = (dy, dx, c), matching w1 packed as reshape(3*3*C, 128)."""
    B, H, W, C = x_nhwc.shape
    pw = w2 + 2
    xp = jnp.pad(x_nhwc, ((0, 0), (1, 3), (1, 11), (0, 0)))
    blocks = []
    for a in (0, 1):
        for b in (0, 1):
            taps = []
            for dy in range(3):
                for dx in range(3):
                    r0 = 2 * a + dy           # padded row of input row 2a+dy-1
                    c0 = 2 * b + dx
                    taps.append(xp[:, r0:r0 + 4 * h2:4, c0:c0 + 4 * pw:4, :])
            blk = jnp.concatenate(taps, axis=-1)           # (B, h2, pw, 9C)
            blocks.append(blk.reshape(B, h2 * pw, 9 * C))
    return jnp.concatenate(blocks, axis=1).astype(jnp.bfloat16)


def _junk_col_mask(h2, w2):
    """(4 * h2 * (w2+2), 1) f32: 1 for valid columns, 0 for the 2 junk columns."""
    pw = w2 + 2
    mp = h2 * pw
    col = np.arange(mp) % pw
    m = (col < w2).astype(np.float32).reshape(mp, 1)
    return jnp.asarray(np.tile(m, (4, 1)))


# ----------------------------------------------------------------------------
# Parameter construction (deterministic, synthetic).  BN folded to (scale, bias):
#   scale = gamma / sqrt(running_var + eps),  bias = beta - running_mean * scale.
# Kernel packing: conv weights as (9, 128, 128) bf16 taps (cin/cout zero-padded to
# 128), conv1 as a single (9*cin, 128) tap-stacked matrix, heads fused+lane-padded.
# ----------------------------------------------------------------------------
def make_params(key, num_filters, num_class, num_anchor_per_loc, num_direction_bins,
                encode_background_as_zeros=True):
    eps = 0.001
    if encode_background_as_zeros:
        num_cls = num_anchor_per_loc * num_class
    else:
        num_cls = num_anchor_per_loc * (num_class + 1)
    num_box = num_anchor_per_loc * _BOX_CODE_SIZE
    num_dir = num_anchor_per_loc * num_direction_bins

    net_cfg = [  # (cin, cout, stride)
        (num_filters, 128, 2),
        (128, 128, 1),
        (128, 64, 2),
        (64, 64, 1),
        (64, 64, 1),
    ]
    keys = jax.random.split(key, 5 * len(net_cfg) + 6)
    ki = iter(range(len(keys)))

    ref_net = []
    for cin, cout, stride in net_cfg:
        w = 0.05 * jax.random.normal(keys[next(ki)], (3, 3, cin, cout), jnp.float32)
        gamma = 1.0 + 0.1 * jax.random.normal(keys[next(ki)], (cout,), jnp.float32)
        beta = 0.1 * jax.random.normal(keys[next(ki)], (cout,), jnp.float32)
        rmean = 0.05 * jax.random.normal(keys[next(ki)], (cout,), jnp.float32)
        rvar = 0.5 + jnp.abs(jax.random.normal(keys[next(ki)], (cout,), jnp.float32))
        scale = gamma / jnp.sqrt(rvar + eps)
        bias = beta - rmean * scale
        ref_net.append({"w": w, "scale": scale, "bias": bias, "stride": stride})

    final = 64
    cls_w = 0.05 * jax.random.normal(keys[next(ki)], (final, num_cls), jnp.float32)
    cls_b = jnp.full((num_cls,), -np.log((1 - 0.01) / 0.01), jnp.float32)  # constant_
    box_w = 0.05 * jax.random.normal(keys[next(ki)], (final, num_box), jnp.float32)
    box_b = 0.05 * jax.random.normal(keys[next(ki)], (num_box,), jnp.float32)
    dir_w = 0.05 * jax.random.normal(keys[next(ki)], (final, num_dir), jnp.float32)
    dir_b = 0.05 * jax.random.normal(keys[next(ki)], (num_dir,), jnp.float32)
    ref_heads = {"cls_w": cls_w, "cls_b": cls_b, "box_w": box_w, "box_b": box_b,
                 "dir_w": dir_w, "dir_b": dir_b}

    cpad = 128

    def pack_conv(layer):
        w, scale, bias = layer["w"], layer["scale"], layer["bias"]
        cin, cout = w.shape[2], w.shape[3]
        wt = w.reshape(9, cin, cout)
        wt = jnp.pad(wt, ((0, 0), (0, cpad - cin), (0, cpad - cout)))
        s = jnp.pad(scale, (0, cpad - cout)).reshape(1, cpad)
        b = jnp.pad(bias, (0, cpad - cout)).reshape(1, cpad)
        return wt.astype(jnp.bfloat16), s.astype(jnp.float32), b.astype(jnp.float32)

    kp = {}
    # conv1: single tap-stacked K = 9*cin dot
    kp["w1"] = ref_net[0]["w"].reshape(9 * num_filters, 128).astype(jnp.bfloat16)
    kp["s1"] = ref_net[0]["scale"].reshape(1, 128).astype(jnp.float32)
    kp["b1"] = ref_net[0]["bias"].reshape(1, 128).astype(jnp.float32)
    kp["w2"], kp["s2"], kp["b2"] = pack_conv(ref_net[1])
    kp["w3"], kp["s3"], kp["b3"] = pack_conv(ref_net[2])
    kp["w4"], kp["s4"], kp["b4"] = pack_conv(ref_net[3])
    kp["w5"], kp["s5"], kp["b5"] = pack_conv(ref_net[4])

    n_tot = num_cls + num_box + num_dir
    n_pad = ((n_tot + 127) // 128) * 128               # lane-dense fused head output
    wh = jnp.concatenate([cls_w, box_w, dir_w], axis=1)
    wh = jnp.pad(wh, ((0, cpad - final), (0, n_pad - n_tot))).astype(jnp.bfloat16)
    bh = jnp.concatenate([cls_b, box_b, dir_b])
    bh = jnp.pad(bh, (0, n_pad - n_tot)).reshape(1, n_pad).astype(jnp.float32)
    kp["wh"] = wh
    kp["bh"] = bh

    params = {"kernel": kp, "ref": {"net": ref_net, "heads": ref_heads}}
    meta = {"num_cls": num_cls, "n_pad": n_pad}
    return params, meta


# ----------------------------------------------------------------------------
# HugeHead forward: ONE fused pallas_call (NHWC internally; matches the PyTorch
# NCHW view/permute math on the way out).
# ----------------------------------------------------------------------------
def huge_head_forward(x_nhwc, kparams, *, num_class, num_anchor_per_loc,
                      num_direction_bins, num_cls, n_pad,
                      use_direction_classifier=True):
    B, H, W, C = x_nhwc.shape
    assert H % 4 == 0 and W % 4 == 0, "spatial dims must be divisible by 4"
    H2, W2 = H // 4, W // 4                 # final spatial (== conv1-output phase core)
    pw = W2 + 2
    mp = H2 * pw
    nrows = (H2 + 3) * pw

    xi = _conv1_phase_im2col(x_nhwc.astype(jnp.float32), H2, W2)   # (B, 4*mp, 9C) bf16
    mk = _junk_col_mask(H2, W2)                                     # (4*mp, 1) f32

    args = (xi, mk,
            kparams["w1"], kparams["s1"], kparams["b1"],
            kparams["w2"], kparams["s2"], kparams["b2"],
            kparams["w3"], kparams["s3"], kparams["b3"],
            kparams["w4"], kparams["s4"], kparams["b4"],
            kparams["w5"], kparams["s5"], kparams["b5"],
            kparams["wh"], kparams["bh"])
    in_specs = [_batch_spec(xi.shape)] + [_shared_spec(a) for a in args[1:]]

    kernel = functools.partial(_hugehead_kernel, hp=H2, pw=pw)
    out = pl.pallas_call(
        kernel,
        out_shape=jax.ShapeDtypeStruct((B, mp, n_pad), jnp.float32),
        grid=(B,),
        in_specs=in_specs,
        out_specs=pl.BlockSpec((pl.Squeezed(), mp, n_pad), lambda b: (b, 0, 0)),
        scratch_shapes=[pltpu.VMEM((4 * nrows, 128), jnp.bfloat16),   # conv1 phases
                        pltpu.VMEM((4 * nrows, 128), jnp.bfloat16),   # conv2 phases
                        pltpu.VMEM((nrows, 128), jnp.bfloat16),       # conv3 raster
                        pltpu.VMEM((nrows, 128), jnp.bfloat16)],      # conv4 raster
        compiler_params=pltpu.CompilerParams(
            dimension_semantics=("parallel",),
            vmem_limit_bytes=32 * 1024 * 1024),
    )(*args)

    h = out.reshape(B, H2, pw, n_pad)[:, :, :W2, :]     # drop the 2 junk columns

    A = num_anchor_per_loc
    num_box = A * _BOX_CODE_SIZE
    num_dir = A * num_direction_bins
    cls = h[..., :num_cls]
    box = h[..., num_cls:num_cls + num_box]
    dircls = h[..., num_cls + num_box:num_cls + num_box + num_dir]

    def head_reshape(y, per):
        # NHWC head output (B,H,W,A*per) == NCHW (B,A*per,H,W) channels;
        # reproduces: view(-1, A, per, H, W).permute(0,1,3,4,2).view(B, -1, per)
        y = y.reshape(B, H2, W2, A, per)
        y = jnp.transpose(y, (0, 3, 1, 2, 4))            # (B, A, H, W, per)
        return y.reshape(B, A * H2 * W2, per)

    ret = {
        "box_preds": head_reshape(box, _BOX_CODE_SIZE),
        "cls_preds": head_reshape(cls, num_class),
    }
    if use_direction_classifier:
        ret["dir_cls_preds"] = head_reshape(dircls, num_direction_bins)
    return ret


# ----------------------------------------------------------------------------
# Pure-XLA reference (lax.conv) with the same bf16-operand / f32-accumulate
# precision, for the numerical golden check.
# ----------------------------------------------------------------------------
def reference_forward(x_nhwc, ref, *, num_class, num_anchor_per_loc,
                      num_direction_bins, use_direction_classifier=True):
    B, H, W, _ = x_nhwc.shape
    y = x_nhwc.astype(jnp.float32)
    for layer in ref["net"]:
        s = layer["stride"]
        y = lax.conv_general_dilated(
            y.astype(jnp.bfloat16), layer["w"].astype(jnp.bfloat16),
            window_strides=(s, s), padding=((1, 1), (1, 1)),
            dimension_numbers=("NHWC", "HWIO", "NHWC"),
            preferred_element_type=jnp.float32)
        y = jnp.maximum(y * layer["scale"].reshape(1, 1, 1, -1)
                        + layer["bias"].reshape(1, 1, 1, -1), 0.0)
    H2, W2 = H // 4, W // 4
    yb = y.astype(jnp.bfloat16)
    heads = ref["heads"]

    def lin(w, b):
        o = jnp.einsum("bhwc,cn->bhwn", yb, w.astype(jnp.bfloat16),
                       preferred_element_type=jnp.float32)
        return o + b.reshape(1, 1, 1, -1)

    cls = lin(heads["cls_w"], heads["cls_b"])
    box = lin(heads["box_w"], heads["box_b"])
    dircls = lin(heads["dir_w"], heads["dir_b"])

    A = num_anchor_per_loc

    def head_reshape(t, per):
        t = t.reshape(B, H2, W2, A, per)
        t = jnp.transpose(t, (0, 3, 1, 2, 4))
        return t.reshape(B, A * H2 * W2, per)

    ret = {"box_preds": head_reshape(box, _BOX_CODE_SIZE),
           "cls_preds": head_reshape(cls, num_class)}
    if use_direction_classifier:
        ret["dir_cls_preds"] = head_reshape(dircls, num_direction_bins)
    return ret


# ----------------------------------------------------------------------------
if __name__ == "__main__":
    # Module hyperparameters (small, consistent with the PyTorch __init__)
    num_filters = 4
    num_class = 3
    num_anchor_per_loc = 2
    num_direction_bins = 2
    use_direction_classifier = True
    encode_background_as_zeros = True

    B, H, W = 2, 16, 16
    key = jax.random.PRNGKey(0)
    kx, kp = jax.random.split(key)

    # Reference input is NCHW (2, 4, 16, 16); kernels use NHWC internally.
    x_nchw = jax.random.normal(kx, (B, num_filters, H, W), jnp.float32)
    x_nhwc = jnp.transpose(x_nchw, (0, 2, 3, 1))

    params, meta = make_params(kp, num_filters, num_class, num_anchor_per_loc,
                               num_direction_bins, encode_background_as_zeros)

    fwd = jax.jit(functools.partial(
        huge_head_forward,
        num_class=num_class,
        num_anchor_per_loc=num_anchor_per_loc,
        num_direction_bins=num_direction_bins,
        num_cls=meta["num_cls"],
        n_pad=meta["n_pad"],
        use_direction_classifier=use_direction_classifier))

    out = fwd(x_nhwc, params["kernel"])
    out = jax.tree_util.tree_map(jax.block_until_ready, out)

    # Shape checks against the PyTorch semantics: spatial 16 -> 8 -> 8 -> 4 -> 4 -> 4
    Hf = Wf = H // 4
    assert out["box_preds"].shape == (B, num_anchor_per_loc * Hf * Wf, _BOX_CODE_SIZE)
    assert out["cls_preds"].shape == (B, num_anchor_per_loc * Hf * Wf, num_class)
    assert out["dir_cls_preds"].shape == (B, num_anchor_per_loc * Hf * Wf,
                                          num_direction_bins)
    assert all(bool(jnp.all(jnp.isfinite(v))) for v in out.values())

    # Numerical golden check vs a pure-XLA reference (same bf16/f32 precision).
    ref_out = reference_forward(x_nhwc, params["ref"],
                                num_class=num_class,
                                num_anchor_per_loc=num_anchor_per_loc,
                                num_direction_bins=num_direction_bins,
                                use_direction_classifier=use_direction_classifier)
    for k in sorted(ref_out):
        np.testing.assert_allclose(np.asarray(out[k]), np.asarray(ref_out[k]),
                                   rtol=1e-2, atol=1e-2)

    print("KERNEL_OK")
</pallas_src>

<mosaic_0001>
module attributes {stable_mosaic.version = 11 : i64} {
  func.func @_hugehead_kernel(%arg0: i32, %arg1: memref<1x96x36xbf16, #tpu.memory_space<vmem>>, %arg2: memref<96x1xf32, #tpu.memory_space<vmem>>, %arg3: memref<36x128xbf16, #tpu.memory_space<vmem>>, %arg4: memref<1x128xf32, #tpu.memory_space<vmem>>, %arg5: memref<1x128xf32, #tpu.memory_space<vmem>>, %arg6: memref<9x128x128xbf16, #tpu.memory_space<vmem>>, %arg7: memref<1x128xf32, #tpu.memory_space<vmem>>, %arg8: memref<1x128xf32, #tpu.memory_space<vmem>>, %arg9: memref<9x128x128xbf16, #tpu.memory_space<vmem>>, %arg10: memref<1x128xf32, #tpu.memory_space<vmem>>, %arg11: memref<1x128xf32, #tpu.memory_space<vmem>>, %arg12: memref<9x128x128xbf16, #tpu.memory_space<vmem>>, %arg13: memref<1x128xf32, #tpu.memory_space<vmem>>, %arg14: memref<1x128xf32, #tpu.memory_space<vmem>>, %arg15: memref<9x128x128xbf16, #tpu.memory_space<vmem>>, %arg16: memref<1x128xf32, #tpu.memory_space<vmem>>, %arg17: memref<1x128xf32, #tpu.memory_space<vmem>>, %arg18: memref<128x128xbf16, #tpu.memory_space<vmem>>, %arg19: memref<1x128xf32, #tpu.memory_space<vmem>>, %arg20: memref<1x24x128xf32, #tpu.memory_space<vmem>>, %arg21: memref<168x128xbf16, #tpu.memory_space<vmem>>, %arg22: memref<168x128xbf16, #tpu.memory_space<vmem>>, %arg23: memref<42x128xbf16, #tpu.memory_space<vmem>>, %arg24: memref<42x128xbf16, #tpu.memory_space<vmem>>) attributes {dimension_semantics = [#tpu.dimension_semantics<parallel>], iteration_bounds = array<i64: 2>, scalar_prefetch = 0 : i64, scratch_operands = 4 : i64, tpu.core_type = #tpu.core_type<tc>, window_params = [{transform_indices = @transform_0, window_bounds = array<i64: 1, 96, 36>}, {pipeline_mode = #tpu.pipeline_mode<synchronous>, transform_indices = @transform_1, window_bounds = array<i64: 96, 1>}, {pipeline_mode = #tpu.pipeline_mode<synchronous>, transform_indices = @transform_2, window_bounds = array<i64: 36, 128>}, {pipeline_mode = #tpu.pipeline_mode<synchronous>, transform_indices = @transform_3, window_bounds = array<i64: 1, 128>}, {pipeline_mode = #tpu.pipeline_mode<synchronous>, transform_indices = @transform_4, window_bounds = array<i64: 1, 128>}, {pipeline_mode = #tpu.pipeline_mode<synchronous>, transform_indices = @transform_5, window_bounds = array<i64: 9, 128, 128>}, {pipeline_mode = #tpu.pipeline_mode<synchronous>, transform_indices = @transform_6, window_bounds = array<i64: 1, 128>}, {pipeline_mode = #tpu.pipeline_mode<synchronous>, transform_indices = @transform_7, window_bounds = array<i64: 1, 128>}, {pipeline_mode = #tpu.pipeline_mode<synchronous>, transform_indices = @transform_8, window_bounds = array<i64: 9, 128, 128>}, {pipeline_mode = #tpu.pipeline_mode<synchronous>, transform_indices = @transform_9, window_bounds = array<i64: 1, 128>}, {pipeline_mode = #tpu.pipeline_mode<synchronous>, transform_indices = @transform_10, window_bounds = array<i64: 1, 128>}, {pipeline_mode = #tpu.pipeline_mode<synchronous>, transform_indices = @transform_11, window_bounds = array<i64: 9, 128, 128>}, {pipeline_mode = #tpu.pipeline_mode<synchronous>, transform_indices = @transform_12, window_bounds = array<i64: 1, 128>}, {pipeline_mode = #tpu.pipeline_mode<synchronous>, transform_indices = @transform_13, window_bounds = array<i64: 1, 128>}, {pipeline_mode = #tpu.pipeline_mode<synchronous>, transform_indices = @transform_14, window_bounds = array<i64: 9, 128, 128>}, {pipeline_mode = #tpu.pipeline_mode<synchronous>, transform_indices = @transform_15, window_bounds = array<i64: 1, 128>}, {pipeline_mode = #tpu.pipeline_mode<synchronous>, transform_indices = @transform_16, window_bounds = array<i64: 1, 128>}, {pipeline_mode = #tpu.pipeline_mode<synchronous>, transform_indices = @transform_17, window_bounds = array<i64: 128, 128>}, {pipeline_mode = #tpu.pipeline_mode<synchronous>, transform_indices = @transform_18, window_bounds = array<i64: 1, 128>}, {transform_indices = @transform_19, window_bounds = array<i64: 1, 24, 128>}]} {
    %cst = arith.constant 0.000000e+00 : bf16
    %0 = vector.broadcast %cst : bf16 to vector<7x128xbf16>
    %cst_0 = arith.constant 0.000000e+00 : bf16
    %1 = vector.broadcast %cst_0 : bf16 to vector<11x128xbf16>
    %c0 = arith.constant 0 : index
    %c0_1 = arith.constant 0 : index
    %2 = vector.load %arg21[%c0, %c0_1] : memref<168x128xbf16, #tpu.memory_space<vmem>>, vector<7x128xbf16>
    tpu.vector_store %arg21[%c0, %c0_1], %0 {strides = array<i32>} : memref<168x128xbf16, #tpu.memory_space<vmem>>, vector<7x128xbf16>,
    %c31 = arith.constant 31 : index
    %c0_2 = arith.constant 0 : index
    %3 = vector.load %arg21[%c31, %c0_2] : memref<168x128xbf16, #tpu.memory_space<vmem>>, vector<11x128xbf16>
    tpu.vector_store %arg21[%c31, %c0_2], %1 {strides = array<i32>} : memref<168x128xbf16, #tpu.memory_space<vmem>>, vector<11x128xbf16>,
    %c0_3 = arith.constant 0 : index
    %c0_4 = arith.constant 0 : index
    %4 = vector.load %arg22[%c0_3, %c0_4] : memref<168x128xbf16, #tpu.memory_space<vmem>>, vector<7x128xbf16>
    tpu.vector_store %arg22[%c0_3, %c0_4], %0 {strides = array<i32>} : memref<168x128xbf16, #tpu.memory_space<vmem>>, vector<7x128xbf16>,
    %c31_5 = arith.constant 31 : index
    %c0_6 = arith.constant 0 : index
    %5 = vector.load %arg22[%c31_5, %c0_6] : memref<168x128xbf16, #tpu.memory_space<vmem>>, vector<11x128xbf16>
    tpu.vector_store %arg22[%c31_5, %c0_6], %1 {strides = array<i32>} : memref<168x128xbf16, #tpu.memory_space<vmem>>, vector<11x128xbf16>,
    %c42 = arith.constant 42 : index
    %c0_7 = arith.constant 0 : index
    %6 = vector.load %arg21[%c42, %c0_7] : memref<168x128xbf16, #tpu.memory_space<vmem>>, vector<7x128xbf16>
    tpu.vector_store %arg21[%c42, %c0_7], %0 {strides = array<i32>} : memref<168x128xbf16, #tpu.memory_space<vmem>>, vector<7x128xbf16>,
    %c73 = arith.constant 73 : index
    %c0_8 = arith.constant 0 : index
    %7 = vector.load %arg21[%c73, %c0_8] : memref<168x128xbf16, #tpu.memory_space<vmem>>, vector<11x128xbf16>
    tpu.vector_store %arg21[%c73, %c0_8], %1 {strides = array<i32>} : memref<168x128xbf16, #tpu.memory_space<vmem>>, vector<11x128xbf16>,
    %c42_9 = arith.constant 42 : index
    %c0_10 = arith.constant 0 : index
    %8 = vector.load %arg22[%c42_9, %c0_10] : memref<168x128xbf16, #tpu.memory_space<vmem>>, vector<7x128xbf16>
    tpu.vector_store %arg22[%c42_9, %c0_10], %0 {strides = array<i32>} : memref<168x128xbf16, #tpu.memory_space<vmem>>, vector<7x128xbf16>,
    %c73_11 = arith.constant 73 : index
    %c0_12 = arith.constant 0 : index
    %9 = vector.load %arg22[%c73_11, %c0_12] : memref<168x128xbf16, #tpu.memory_space<vmem>>, vector<11x128xbf16>
    tpu.vector_store %arg22[%c73_11, %c0_12], %1 {strides = array<i32>} : memref<168x128xbf16, #tpu.memory_space<vmem>>, vector<11x128xbf16>,
    %c84 = arith.constant 84 : index
    %c0_13 = arith.constant 0 : index
    %10 = vector.load %arg21[%c84, %c0_13] : memref<168x128xbf16, #tpu.memory_space<vmem>>, vector<7x128xbf16>
    tpu.vector_store %arg21[%c84, %c0_13], %0 {strides = array<i32>} : memref<168x128xbf16, #tpu.memory_space<vmem>>, vector<7x128xbf16>,
    %c115 = arith.constant 115 : index
    %c0_14 = arith.constant 0 : index
    %11 = vector.load %arg21[%c115, %c0_14] : memref<168x128xbf16, #tpu.memory_space<vmem>>, vector<11x128xbf16>
    tpu.vector_store %arg21[%c115, %c0_14], %1 {strides = array<i32>} : memref<168x128xbf16, #tpu.memory_space<vmem>>, vector<11x128xbf16>,
    %c84_15 = arith.constant 84 : index
    %c0_16 = arith.constant 0 : index
    %12 = vector.load %arg22[%c84_15, %c0_16] : memref<168x128xbf16, #tpu.memory_space<vmem>>, vector<7x128xbf16>
    tpu.vector_store %arg22[%c84_15, %c0_16], %0 {strides = array<i32>} : memref<168x128xbf16, #tpu.memory_space<vmem>>, vector<7x128xbf16>,
    %c115_17 = arith.constant 115 : index
    %c0_18 = arith.constant 0 : index
    %13 = vector.load %arg22[%c115_17, %c0_18] : memref<168x128xbf16, #tpu.memory_space<vmem>>, vector<11x128xbf16>
    tpu.vector_store %arg22[%c115_17, %c0_18], %1 {strides = array<i32>} : memref<168x128xbf16, #tpu.memory_space<vmem>>, vector<11x128xbf16>,
    %c126 = arith.constant 126 : index
    %c0_19 = arith.constant 0 : index
    %14 = vector.load %arg21[%c126, %c0_19] : memref<168x128xbf16, #tpu.memory_space<vmem>>, vector<7x128xbf16>
    tpu.vector_store %arg21[%c126, %c0_19], %0 {strides = array<i32>} : memref<168x128xbf16, #tpu.memory_space<vmem>>, vector<7x128xbf16>,
    %c157 = arith.constant 157 : index
    %c0_20 = arith.constant 0 : index
    %15 = vector.load %arg21[%c157, %c0_20] : memref<168x128xbf16, #tpu.memory_space<vmem>>, vector<11x128xbf16>
    tpu.vector_store %arg21[%c157, %c0_20], %1 {strides = array<i32>} : memref<168x128xbf16, #tpu.memory_space<vmem>>, vector<11x128xbf16>,
    %c126_21 = arith.constant 126 : index
    %c0_22 = arith.constant 0 : index
    %16 = vector.load %arg22[%c126_21, %c0_22] : memref<168x128xbf16, #tpu.memory_space<vmem>>, vector<7x128xbf16>
    tpu.vector_store %arg22[%c126_21, %c0_22], %0 {strides = array<i32>} : memref<168x128xbf16, #tpu.memory_space<vmem>>, vector<7x128xbf16>,
    %c157_23 = arith.constant 157 : index
    %c0_24 = arith.constant 0 : index
    %17 = vector.load %arg22[%c157_23, %c0_24] : memref<168x128xbf16, #tpu.memory_space<vmem>>, vector<11x128xbf16>
    tpu.vector_store %arg22[%c157_23, %c0_24], %1 {strides = array<i32>} : memref<168x128xbf16, #tpu.memory_space<vmem>>, vector<11x128xbf16>,
    %c0_25 = arith.constant 0 : index
    %c0_26 = arith.constant 0 : index
    %18 = vector.load %arg23[%c0_25, %c0_26] : memref<42x128xbf16, #tpu.memory_space<vmem>>, vector<7x128xbf16>
    tpu.vector_store %arg23[%c0_25, %c0_26], %0 {strides = array<i32>} : memref<42x128xbf16, #tpu.memory_space<vmem>>, vector<7x128xbf16>,
    %c31_27 = arith.constant 31 : index
    %c0_28 = arith.constant 0 : index
    %19 = vector.load %arg23[%c31_27, %c0_28] : memref<42x128xbf16, #tpu.memory_space<vmem>>, vector<11x128xbf16>
    tpu.vector_store %arg23[%c31_27, %c0_28], %1 {strides = array<i32>} : memref<42x128xbf16, #tpu.memory_space<vmem>>, vector<11x128xbf16>,
    %c0_29 = arith.constant 0 : index
    %c0_30 = arith.constant 0 : index
    %20 = vector.load %arg24[%c0_29, %c0_30] : memref<42x128xbf16, #tpu.memory_space<vmem>>, vector<7x128xbf16>
    tpu.vector_store %arg24[%c0_29, %c0_30], %0 {strides = array<i32>} : memref<42x128xbf16, #tpu.memory_space<vmem>>, vector<7x128xbf16>,
    %c31_31 = arith.constant 31 : index
    %c0_32 = arith.constant 0 : index
    %21 = vector.load %arg24[%c31_31, %c0_32] : memref<42x128xbf16, #tpu.memory_space<vmem>>, vector<11x128xbf16>
    tpu.vector_store %arg24[%c31_31, %c0_32], %1 {strides = array<i32>} : memref<42x128xbf16, #tpu.memory_space<vmem>>, vector<11x128xbf16>,
    %c0_33 = arith.constant 0 : index
    %c0_34 = arith.constant 0 : index
    %22 = vector.load %arg2[%c0_33, %c0_34] : memref<96x1xf32, #tpu.memory_space<vmem>>, vector<24x1xf32>
    %c0_35 = arith.constant 0 : index
    %c0_36 = arith.constant 0 : index
    %c0_37 = arith.constant 0 : index
    %23 = vector.load %arg1[%c0_35, %c0_36, %c0_37] : memref<1x96x36xbf16, #tpu.memory_space<vmem>>, vector<1x96x36xbf16>
    %24 = vector.shape_cast %23 : vector<1x96x36xbf16> to vector<96x36xbf16>
    %c0_38 = arith.constant 0 : index
    %c0_39 = arith.constant 0 : index
    %25 = vector.load %arg3[%c0_38, %c0_39] : memref<36x128xbf16, #tpu.memory_space<vmem>>, vector<36x128xbf16>
    %cst_40 = arith.constant dense<0.000000e+00> : vector<96x128xf32>
    %26 = tpu.matmul %24, %25, %cst_40 {dimension_numbers = #tpu.dot_dimension_numbers<[1], [0], [0], [1], [0, 0, 1, 1], [], []>} : vector<96x36xbf16>, vector<36x128xbf16>, vector<96x128xf32> -> vector<96x128xf32>
    %c0_41 = arith.constant 0 : index
    %c0_42 = arith.constant 0 : index
    %27 = vector.load %arg4[%c0_41, %c0_42] : memref<1x128xf32, #tpu.memory_space<vmem>>, vector<1x128xf32>
    %28 = vector.broadcast %27 : vector<1x128xf32> to vector<96x128xf32>
    %29 = arith.mulf %26, %28 : vector<96x128xf32>
    %c0_43 = arith.constant 0 : index
    %c0_44 = arith.constant 0 : index
    %30 = vector.load %arg5[%c0_43, %c0_44] : memref<1x128xf32, #tpu.memory_space<vmem>>, vector<1x128xf32>
    %31 = vector.broadcast %30 : vector<1x128xf32> to vector<96x128xf32>
    %32 = arith.addf %29, %31 : vector<96x128xf32>
    %cst_45 = arith.constant 0.000000e+00 : f32
    %33 = vector.broadcast %cst_45 : f32 to vector<96x128xf32>
    %34 = arith.maximumf %32, %33 : vector<96x128xf32>
    %c0_46 = arith.constant 0 : index
    %c0_47 = arith.constant 0 : index
    %35 = vector.load %arg2[%c0_46, %c0_47] : memref<96x1xf32, #tpu.memory_space<vmem>>, vector<96x1xf32>
    %36 = vector.broadcast %35 : vector<96x1xf32> to vector<96x128xf32>
    %37 = arith.mulf %34, %36 : vector<96x128xf32>
    %38 = arith.truncf %37 : vector<96x128xf32> to vector<96x128xbf16>
    %39 = vector.extract_strided_slice %38 {offsets = [0, 0], sizes = [24, 128], strides = [1, 1]} : vector<96x128xbf16> to vector<24x128xbf16>
    %c7 = arith.constant 7 : index
    %c0_48 = arith.constant 0 : index
    %40 = vector.load %arg21[%c7, %c0_48] : memref<168x128xbf16, #tpu.memory_space<vmem>>, vector<24x128xbf16>
    tpu.vector_store %arg21[%c7, %c0_48], %39 {strides = array<i32>} : memref<168x128xbf16, #tpu.memory_space<vmem>>, vector<24x128xbf16>,
    %41 = vector.extract_strided_slice %38 {offsets = [24, 0], sizes = [24, 128], strides = [1, 1]} : vector<96x128xbf16> to vector<24x128xbf16>
    %c49 = arith.constant 49 : index
    %c0_49 = arith.constant 0 : index
    %42 = vector.load %arg21[%c49, %c0_49] : memref<168x128xbf16, #tpu.memory_space<vmem>>, vector<24x128xbf16>
    tpu.vector_store %arg21[%c49, %c0_49], %41 {strides = array<i32>} : memref<168x128xbf16, #tpu.memory_space<vmem>>, vector<24x128xbf16>,
    %43 = vector.extract_strided_slice %38 {offsets = [48, 0], sizes = [24, 128], strides = [1, 1]} : vector<96x128xbf16> to vector<24x128xbf16>
    %c91 = arith.constant 91 : index
    %c0_50 = arith.constant 0 : index
    %44 = vector.load %arg21[%c91, %c0_50] : memref<168x128xbf16, #tpu.memory_space<vmem>>, vector<24x128xbf16>
    tpu.vector_store %arg21[%c91, %c0_50], %43 {strides = array<i32>} : memref<168x128xbf16, #tpu.memory_space<vmem>>, vector<24x128xbf16>,
    %45 = vector.extract_strided_slice %38 {offsets = [72, 0], sizes = [24, 128], strides = [1, 1]} : vector<96x128xbf16> to vector<24x128xbf16>
    %c133 = arith.constant 133 : index
    %c0_51 = arith.constant 0 : index
    %46 = vector.load %arg21[%c133, %c0_51] : memref<168x128xbf16, #tpu.memory_space<vmem>>, vector<24x128xbf16>
    tpu.vector_store %arg21[%c133, %c0_51], %45 {strides = array<i32>} : memref<168x128xbf16, #tpu.memory_space<vmem>>, vector<24x128xbf16>,
    %cst_52 = arith.constant 0.000000e+00 : f32
    %47 = vector.broadcast %cst_52 : f32 to vector<24x128xf32>
    %c126_53 = arith.constant 126 : index
    %c0_54 = arith.constant 0 : index
    %48 = vector.load %arg21[%c126_53, %c0_54] : memref<168x128xbf16, #tpu.memory_space<vmem>>, vector<24x128xbf16>
    %c0_55 = arith.constant 0 : index
    %c0_56 = arith.constant 0 : index
    %c0_57 = arith.constant 0 : index
    %49 = vector.load %arg6[%c0_55, %c0_56, %c0_57] : memref<9x128x128xbf16, #tpu.memory_space<vmem>>, vector<1x128x128xbf16>
    %50 = vector.shape_cast %49 : vector<1x128x128xbf16> to vector<128x128xbf16>
    %cst_58 = arith.constant dense<0.000000e+00> : vector<24x128xf32>
    %51 = tpu.matmul %48, %50, %cst_58 {dimension_numbers = #tpu.dot_dimension_numbers<[1], [0], [0], [1], [0, 0, 1, 1], [], []>} : vector<24x128xbf16>, vector<128x128xbf16>, vector<24x128xf32> -> vector<24x128xf32>
    %52 = arith.addf %47, %51 : vector<24x128xf32>
    %c85 = arith.constant 85 : index
    %c0_59 = arith.constant 0 : index
    %53 = vector.load %arg21[%c85, %c0_59] : memref<168x128xbf16, #tpu.memory_space<vmem>>, vector<24x128xbf16>
    %c1 = arith.constant 1 : index
    %c0_60 = arith.constant 0 : index
    %c0_61 = arith.constant 0 : index
    %54 = vector.load %arg6[%c1, %c0_60, %c0_61] : memref<9x128x128xbf16, #tpu.memory_space<vmem>>, vector<1x128x128xbf16>
    %55 = vector.shape_cast %54 : vector<1x128x128xbf16> to vector<128x128xbf16>
    %cst_62 = arith.constant dense<0.000000e+00> : vector<24x128xf32>
    %56 = tpu.matmul %53, %55, %cst_62 {dimension_numbers = #tpu.dot_dimension_numbers<[1], [0], [0], [1], [0, 0, 1, 1], [], []>} : vector<24x128xbf16>, vector<128x128xbf16>, vector<24x128xf32> -> vector<24x128xf32>
    %57 = arith.addf %52, %56 : vector<24x128xf32>
    %c127 = arith.constant 127 : index
    %c0_63 = arith.constant 0 : index
    %58 = vector.load %arg21[%c127, %c0_63] : memref<168x128xbf16, #tpu.memory_space<vmem>>, vector<24x128xbf16>
    %c2 = arith.constant 2 : index
    %c0_64 = arith.constant 0 : index
    %c0_65 = arith.constant 0 : index
    %59 = vector.load %arg6[%c2, %c0_64, %c0_65] : memref<9x128x128xbf16, #tpu.memory_space<vmem>>, vector<1x128x128xbf16>
    %60 = vector.shape_cast %59 : vector<1x128x128xbf16> to vector<128x128xbf16>
    %cst_66 = arith.constant dense<0.000000e+00> : vector<24x128xf32>
    %61 = tpu.matmul %58, %60, %cst_66 {dimension_numbers = #tpu.dot_dimension_numbers<[1], [0], [0], [1], [0, 0, 1, 1], [], []>} : vector<24x128xbf16>, vector<128x128xbf16>, vector<24x128xf32> -> vector<24x128xf32>
    %62 = arith.addf %57, %61 : vector<24x128xf32>
    %c48 = arith.constant 48 : index
    %c0_67 = arith.constant 0 : index
    %63 = vector.load %arg21[%c48, %c0_67] : memref<168x128xbf16, #tpu.memory_space<vmem>>, vector<24x128xbf16>
    %c3 = arith.constant 3 : index
    %c0_68 = arith.constant 0 : index
    %c0_69 = arith.constant 0 : index
    %64 = vector.load %arg6[%c3, %c0_68, %c0_69] : memref<9x128x128xbf16, #tpu.memory_space<vmem>>, vector<1x128x128xbf16>
    %65 = vector.shape_cast %64 : vector<1x128x128xbf16> to vector<128x128xbf16>
    %cst_70 = arith.constant dense<0.000000e+00> : vector<24x128xf32>
    %66 = tpu.matmul %63, %65, %cst_70 {dimension_numbers = #tpu.dot_dimension_numbers<[1], [0], [0], [1], [0, 0, 1, 1], [], []>} : vector<24x128xbf16>, vector<128x128xbf16>, vector<24x128xf32> -> vector<24x128xf32>
    %67 = arith.addf %62, %66 : vector<24x128xf32>
    %c7_71 = arith.constant 7 : index
    %c0_72 = arith.constant 0 : index
    %68 = vector.load %arg21[%c7_71, %c0_72] : memref<168x128xbf16, #tpu.memory_space<vmem>>, vector<24x128xbf16>
    %c4 = arith.constant 4 : index
    %c0_73 = arith.constant 0 : index
    %c0_74 = arith.constant 0 : index
    %69 = vector.load %arg6[%c4, %c0_73, %c0_74] : memref<9x128x128xbf16, #tpu.memory_space<vmem>>, vector<1x128x128xbf16>
    %70 = vector.shape_cast %69 : vector<1x128x128xbf16> to vector<128x128xbf16>
    %cst_75 = arith.constant dense<0.000000e+00> : vector<24x128xf32>
    %71 = tpu.matmul %68, %70, %cst_75 {dimension_numbers = #tpu.dot_dimension_numbers<[1], [0], [0], [1], [0, 0, 1, 1], [], []>} : vector<24x128xbf16>, vector<128x128xbf16>, vector<24x128xf32> -> vector<24x128xf32>
    %72 = arith.addf %67, %71 : vector<24x128xf32>
    %c49_76 = arith.constant 49 : index
    %c0_77 = arith.constant 0 : index
    %73 = vector.load %arg21[%c49_76, %c0_77] : memref<168x128xbf16, #tpu.memory_space<vmem>>, vector<24x128xbf16>
    %c5 = arith.constant 5 : index
    %c0_78 = arith.constant 0 : index
    %c0_79 = arith.constant 0 : index
    %74 = vector.load %arg6[%c5, %c0_78, %c0_79] : memref<9x128x128xbf16, #tpu.memory_space<vmem>>, vector<1x128x128xbf16>
    %75 = vector.shape_cast %74 : vector<1x128x128xbf16> to vector<128x128xbf16>
    %cst_80 = arith.constant dense<0.000000e+00> : vector<24x128xf32>
    %76 = tpu.matmul %73, %75, %cst_80 {dimension_numbers = #tpu.dot_dimension_numbers<[1], [0], [0], [1], [0, 0, 1, 1], [], []>} : vector<24x128xbf16>, vector<128x128xbf16>, vector<24x128xf32> -> vector<24x128xf32>
    %77 = arith.addf %72, %76 : vector<24x128xf32>
    %c132 = arith.constant 132 : index
    %c0_81 = arith.constant 0 : index
    %78 = vector.load %arg21[%c132, %c0_81] : memref<168x128xbf16, #tpu.memory_space<vmem>>, vector<24x128xbf16>
    %c6 = arith.constant 6 : index
    %c0_82 = arith.constant 0 : index
    %c0_83 = arith.constant 0 : index
    %79 = vector.load %arg6[%c6, %c0_82, %c0_83] : memref<9x128x128xbf16, #tpu.memory_space<vmem>>, vector<1x128x128xbf16>
    %80 = vector.shape_cast %79 : vector<1x128x128xbf16> to vector<128x128xbf16>
    %cst_84 = arith.constant dense<0.000000e+00> : vector<24x128xf32>
    %81 = tpu.matmul %78, %80, %cst_84 {dimension_numbers = #tpu.dot_dimension_numbers<[1], [0], [0], [1], [0, 0, 1, 1], [], []>} : vector<24x128xbf16>, vector<128x128xbf16>, vector<24x128xf32> -> vector<24x128xf32>
    %82 = arith.addf %77, %81 : vector<24x128xf32>
    %c91_85 = arith.constant 91 : index
    %c0_86 = arith.constant 0 : index
    %83 = vector.load %arg21[%c91_85, %c0_86] : memref<168x128xbf16, #tpu.memory_space<vmem>>, vector<24x128xbf16>
    %c7_87 = arith.constant 7 : index
    %c0_88 = arith.constant 0 : index
    %c0_89 = arith.constant 0 : index
    %84 = vector.load %arg6[%c7_87, %c0_88, %c0_89] : memref<9x128x128xbf16, #tpu.memory_space<vmem>>, vector<1x128x128xbf16>
    %85 = vector.shape_cast %84 : vector<1x128x128xbf16> to vector<128x128xbf16>
    %cst_90 = arith.constant dense<0.000000e+00> : vector<24x128xf32>
    %86 = tpu.matmul %83, %85, %cst_90 {dimension_numbers = #tpu.dot_dimension_numbers<[1], [0], [0], [1], [0, 0, 1, 1], [], []>} : vector<24x128xbf16>, vector<128x128xbf16>, vector<24x128xf32> -> vector<24x128xf32>
    %87 = arith.addf %82, %86 : vector<24x128xf32>
    %c133_91 = arith.constant 133 : index
    %c0_92 = arith.constant 0 : index
    %88 = vector.load %arg21[%c133_91, %c0_92] : memref<168x128xbf16, #tpu.memory_space<vmem>>, vector<24x128xbf16>
    %c8 = arith.constant 8 : index
    %c0_93 = arith.constant 0 : index
    %c0_94 = arith.constant 0 : index
    %89 = vector.load %arg6[%c8, %c0_93, %c0_94] : memref<9x128x128xbf16, #tpu.memory_space<vmem>>, vector<1x128x128xbf16>
    %90 = vector.shape_cast %89 : vector<1x128x128xbf16> to vector<128x128xbf16>
    %cst_95 = arith.constant dense<0.000000e+00> : vector<24x128xf32>
    %91 = tpu.matmul %88, %90, %cst_95 {dimension_numbers = #tpu.dot_dimension_numbers<[1], [0], [0], [1], [0, 0, 1, 1], [], []>} : vector<24x128xbf16>, vector<128x128xbf16>, vector<24x128xf32> -> vector<24x128xf32>
    %92 = arith.addf %87, %91 : vector<24x128xf32>
    %c0_96 = arith.constant 0 : index
    %c0_97 = arith.constant 0 : index
    %93 = vector.load %arg7[%c0_96, %c0_97] : memref<1x128xf32, #tpu.memory_space<vmem>>, vector<1x128xf32>
    %94 = vector.broadcast %93 : vector<1x128xf32> to vector<24x128xf32>
    %95 = arith.mulf %92, %94 : vector<24x128xf32>
    %c0_98 = arith.constant 0 : index
    %c0_99 = arith.constant 0 : index
    %96 = vector.load %arg8[%c0_98, %c0_99] : memref<1x128xf32, #tpu.memory_space<vmem>>, vector<1x128xf32>
    %97 = vector.broadcast %96 : vector<1x128xf32> to vector<24x128xf32>
    %98 = arith.addf %95, %97 : vector<24x128xf32>
    %cst_100 = arith.constant 0.000000e+00 : f32
    %99 = vector.broadcast %cst_100 : f32 to vector<24x128xf32>
    %100 = arith.maximumf %98, %99 : vector<24x128xf32>
    %101 = vector.broadcast %22 : vector<24x1xf32> to vector<24x128xf32>
    %102 = arith.mulf %100, %101 : vector<24x128xf32>
    %103 = arith.truncf %102 : vector<24x128xf32> to vector<24x128xbf16>
    %c7_101 = arith.constant 7 : index
    %c0_102 = arith.constant 0 : index
    %104 = vector.load %arg22[%c7_101, %c0_102] : memref<168x128xbf16, #tpu.memory_space<vmem>>, vector<24x128xbf16>
    tpu.vector_store %arg22[%c7_101, %c0_102], %103 {strides = array<i32>} : memref<168x128xbf16, #tpu.memory_space<vmem>>, vector<24x128xbf16>,
    %cst_103 = arith.constant 0.000000e+00 : f32
    %105 = vector.broadcast %cst_103 : f32 to vector<24x128xf32>
    %c85_104 = arith.constant 85 : index
    %c0_105 = arith.constant 0 : index
    %106 = vector.load %arg21[%c85_104, %c0_105] : memref<168x128xbf16, #tpu.memory_space<vmem>>, vector<24x128xbf16>
    %c0_106 = arith.constant 0 : index
    %c0_107 = arith.constant 0 : index
    %c0_108 = arith.constant 0 : index
    %107 = vector.load %arg6[%c0_106, %c0_107, %c0_108] : memref<9x128x128xbf16, #tpu.memory_space<vmem>>, vector<1x128x128xbf16>
    %108 = vector.shape_cast %107 : vector<1x128x128xbf16> to vector<128x128xbf16>
    %cst_109 = arith.constant dense<0.000000e+00> : vector<24x128xf32>
    %109 = tpu.matmul %106, %108, %cst_109 {dimension_numbers = #tpu.dot_dimension_numbers<[1], [0], [0], [1], [0, 0, 1, 1], [], []>} : vector<24x128xbf16>, vector<128x128xbf16>, vector<24x128xf32> -> vector<24x128xf32>
    %110 = arith.addf %105, %109 : vector<24x128xf32>
    %c127_110 = arith.constant 127 : index
    %c0_111 = arith.constant 0 : index
    %111 = vector.load %arg21[%c127_110, %c0_111] : memref<168x128xbf16, #tpu.memory_space<vmem>>, vector<24x128xbf16>
    %c1_112 = arith.constant 1 : index
    %c0_113 = arith.constant 0 : index
    %c0_114 = arith.constant 0 : index
    %112 = vector.load %arg6[%c1_112, %c0_113, %c0_114] : memref<9x128x128xbf16, #tpu.memory_space<vmem>>, vector<1x128x128xbf16>
    %113 = vector.shape_cast %112 : vector<1x128x128xbf16> to vector<128x128xbf16>
    %cst_115 = arith.constant dense<0.000000e+00> : vector<24x128xf32>
    %114 = tpu.matmul %111, %113, %cst_115 {dimension_numbers = #tpu.dot_dimension_numbers<[1], [0], [0], [1], [0, 0, 1, 1], [], []>} : vector<24x128xbf16>, vector<128x128xbf16>, vector<24x128xf32> -> vector<24x128xf32>
    %115 = arith.addf %110, %114 : vector<24x128xf32>
    %c86 = arith.constant 86 : index
    %c0_116 = arith.constant 0 : index
    %116 = vector.load %arg21[%c86, %c0_116] : memref<168x128xbf16, #tpu.memory_space<vmem>>, vector<24x128xbf16>
    %c2_117 = arith.constant 2 : index
    %c0_118 = arith.constant 0 : index
    %c0_119 = arith.constant 0 : index
    %117 = vector.load %arg6[%c2_117, %c0_118, %c0_119] : memref<9x128x128xbf16, #tpu.memory_space<vmem>>, vector<1x128x128xbf16>
    %118 = vector.shape_cast %117 : vector<1x128x128xbf16> to vector<128x128xbf16>
    %cst_120 = arith.constant dense<0.000000e+00> : vector<24x128xf32>
    %119 = tpu.matmul %116, %118, %cst_120 {dimension_numbers = #tpu.dot_dimension_numbers<[1], [0], [0], [1], [0, 0, 1, 1], [], []>} : vector<24x128xbf16>, vector<128x128xbf16>, vector<24x128xf32> -> vector<24x128xf32>
    %120 = arith.addf %115, %119 : vector<24x128xf32>
    %c7_121 = arith.constant 7 : index
    %c0_122 = arith.constant 0 : index
    %121 = vector.load %arg21[%c7_121, %c0_122] : memref<168x128xbf16, #tpu.memory_space<vmem>>, vector<24x128xbf16>
    %c3_123 = arith.constant 3 : index
    %c0_124 = arith.constant 0 : index
    %c0_125 = arith.constant 0 : index
    %122 = vector.load %arg6[%c3_123, %c0_124, %c0_125] : memref<9x128x128xbf16, #tpu.memory_space<vmem>>, vector<1x128x128xbf16>
    %123 = vector.shape_cast %122 : vector<1x128x128xbf16> to vector<128x128xbf16>
    %cst_126 = arith.constant dense<0.000000e+00> : vector<24x128xf32>
    %124 = tpu.matmul %121, %123, %cst_126 {dimension_numbers = #tpu.dot_dimension_numbers<[1], [0], [0], [1], [0, 0, 1, 1], [], []>} : vector<24x128xbf16>, vector<128x128xbf16>, vector<24x128xf32> -> vector<24x128xf32>
    %125 = arith.addf %120, %124 : vector<24x128xf32>
    %c49_127 = arith.constant 49 : index
    %c0_128 = arith.constant 0 : index
    %126 = vector.load %arg21[%c49_127, %c0_128] : memref<168x128xbf16, #tpu.memory_space<vmem>>, vector<24x128xbf16>
    %c4_129 = arith.constant 4 : index
    %c0_130 = arith.constant 0 : index
    %c0_131 = arith.constant 0 : index
    %127 = vector.load %arg6[%c4_129, %c0_130, %c0_131] : memref<9x128x128xbf16, #tpu.memory_space<vmem>>, vector<1x128x128xbf16>
    %128 = vector.shape_cast %127 : vector<1x128x128xbf16> to vector<128x128xbf16>
    %cst_132 = arith.constant dense<0.000000e+00> : vector<24x128xf32>
    %129 = tpu.matmul %126, %128, %cst_132 {dimension_numbers = #tpu.dot_dimension_numbers<[1], [0], [0], [1], [0, 0, 1, 1], [], []>} : vector<24x128xbf16>, vector<128x128xbf16>, vector<24x128xf32> -> vector<24x128xf32>
    %130 = arith.addf %125, %129 : vector<24x128xf32>
    %c8_133 = arith.constant 8 : index
    %c0_134 = arith.constant 0 : index
    %131 = vector.load %arg21[%c8_133, %c0_134] : memref<168x128xbf16, #tpu.memory_space<vmem>>, vector<24x128xbf16>
    %c5_135 = arith.constant 5 : index
    %c0_136 = arith.constant 0 : index
    %c0_137 = arith.constant 0 : index
    %132 = vector.load %arg6[%c5_135, %c0_136, %c0_137] : memref<9x128x128xbf16, #tpu.memory_space<vmem>>, vector<1x128x128xbf16>
    %133 = vector.shape_cast %132 : vector<1x128x128xbf16> to vector<128x128xbf16>
    %cst_138 = arith.constant dense<0.000000e+00> : vector<24x128xf32>
    %134 = tpu.matmul %131, %133, %cst_138 {dimension_numbers = #tpu.dot_dimension_numbers<[1], [0], [0], [1], [0, 0, 1, 1], [], []>} : vector<24x128xbf16>, vector<128x128xbf16>, vector<24x128xf32> -> vector<24x128xf32>
    %135 = arith.addf %130, %134 : vector<24x128xf32>
    %c91_139 = arith.constant 91 : index
    %c0_140 = arith.constant 0 : index
    %136 = vector.load %arg21[%c91_139, %c0_140] : memref<168x128xbf16, #tpu.memory_space<vmem>>, vector<24x128xbf16>
    %c6_141 = arith.constant 6 : index
    %c0_142 = arith.constant 0 : index
    %c0_143 = arith.constant 0 : index
    %137 = vector.load %arg6[%c6_141, %c0_142, %c0_143] : memref<9x128x128xbf16, #tpu.memory_space<vmem>>, vector<1x128x128xbf16>
    %138 = vector.shape_cast %137 : vector<1x128x128xbf16> to vector<128x128xbf16>
    %cst_144 = arith.constant dense<0.000000e+00> : vector<24x128xf32>
    %139 = tpu.matmul %136, %138, %cst_144 {dimension_numbers = #tpu.dot_dimension_numbers<[1], [0], [0], [1], [0, 0, 1, 1], [], []>} : vector<24x128xbf16>, vector<128x128xbf16>, vector<24x128xf32> -> vector<24x128xf32>
    %140 = arith.addf %135, %139 : vector<24x128xf32>
    %c133_145 = arith.constant 133 : index
    %c0_146 = arith.constant 0 : index
    %141 = vector.load %arg21[%c133_145, %c0_146] : memref<168x128xbf16, #tpu.memory_space<vmem>>, vector<24x128xbf16>
    %c7_147 = arith.constant 7 : index
    %c0_148 = arith.constant 0 : index
    %c0_149 = arith.constant 0 : index
    %142 = vector.load %arg6[%c7_147, %c0_148, %c0_149] : memref<9x128x128xbf16, #tpu.memory_space<vmem>>, vector<1x128x128xbf16>
    %143 = vector.shape_cast %142 : vector<1x128x128xbf16> to vector<128x128xbf16>
    %cst_150 = arith.constant dense<0.000000e+00> : vector<24x128xf32>
    %144 = tpu.matmul %141, %143, %cst_150 {dimension_numbers = #tpu.dot_dimension_numbers<[1], [0], [0], [1], [0, 0, 1, 1], [], []>} : vector<24x128xbf16>, vector<128x128xbf16>, vector<24x128xf32> -> vector<24x128xf32>
    %145 = arith.addf %140, %144 : vector<24x128xf32>
    %c92 = arith.constant 92 : index
    %c0_151 = arith.constant 0 : index
    %146 = vector.load %arg21[%c92, %c0_151] : memref<168x128xbf16, #tpu.memory_space<vmem>>, vector<24x128xbf16>
    %c8_152 = arith.constant 8 : index
    %c0_153 = arith.constant 0 : index
    %c0_154 = arith.constant 0 : index
    %147 = vector.load %arg6[%c8_152, %c0_153, %c0_154] : memref<9x128x128xbf16, #tpu.memory_space<vmem>>, vector<1x128x128xbf16>
    %148 = vector.shape_cast %147 : vector<1x128x128xbf16> to vector<128x128xbf16>
    %cst_155 = arith.constant dense<0.000000e+00> : vector<24x128xf32>
    %149 = tpu.matmul %146, %148, %cst_155 {dimension_numbers = #tpu.dot_dimension_numbers<[1], [0], [0], [1], [0, 0, 1, 1], [], []>} : vector<24x128xbf16>, vector<128x128xbf16>, vector<24x128xf32> -> vector<24x128xf32>
    %150 = arith.addf %145, %149 : vector<24x128xf32>
    %c0_156 = arith.constant 0 : index
    %c0_157 = arith.constant 0 : index
    %151 = vector.load %arg7[%c0_156, %c0_157] : memref<1x128xf32, #tpu.memory_space<vmem>>, vector<1x128xf32>
    %152 = vector.broadcast %151 : vector<1x128xf32> to vector<24x128xf32>
    %153 = arith.mulf %150, %152 : vector<24x128xf32>
    %c0_158 = arith.constant 0 : index
    %c0_159 = arith.constant 0 : index
    %154 = vector.load %arg8[%c0_158, %c0_159] : memref<1x128xf32, #tpu.memory_space<vmem>>, vector<1x128xf32>
    %155 = vector.broadcast %154 : vector<1x128xf32> to vector<24x128xf32>
    %156 = arith.addf %153, %155 : vector<24x128xf32>
    %cst_160 = arith.constant 0.000000e+00 : f32
    %157 = vector.broadcast %cst_160 : f32 to vector<24x128xf32>
    %158 = arith.maximumf %156, %157 : vector<24x128xf32>
    %159 = vector.broadcast %22 : vector<24x1xf32> to vector<24x128xf32>
    %160 = arith.mulf %158, %159 : vector<24x128xf32>
    %161 = arith.truncf %160 : vector<24x128xf32> to vector<24x128xbf16>
    %c49_161 = arith.constant 49 : index
    %c0_162 = arith.constant 0 : index
    %162 = vector.load %arg22[%c49_161, %c0_162] : memref<168x128xbf16, #tpu.memory_space<vmem>>, vector<24x128xbf16>
    tpu.vector_store %arg22[%c49_161, %c0_162], %161 {strides = array<i32>} : memref<168x128xbf16, #tpu.memory_space<vmem>>, vector<24x128xbf16>,
    %cst_163 = arith.constant 0.000000e+00 : f32
    %163 = vector.broadcast %cst_163 : f32 to vector<24x128xf32>
    %c48_164 = arith.constant 48 : index
    %c0_165 = arith.constant 0 : index
    %164 = vector.load %arg21[%c48_164, %c0_165] : memref<168x128xbf16, #tpu.memory_space<vmem>>, vector<24x128xbf16>
    %c0_166 = arith.constant 0 : index
    %c0_167 = arith.constant 0 : index
    %c0_168 = arith.constant 0 : index
    %165 = vector.load %arg6[%c0_166, %c0_167, %c0_168] : memref<9x128x128xbf16, #tpu.memory_space<vmem>>, vector<1x128x128xbf16>
    %166 = vector.shape_cast %165 : vector<1x128x128xbf16> to vector<128x128xbf16>
    %cst_169 = arith.constant dense<0.000000e+00> : vector<24x128xf32>
    %167 = tpu.matmul %164, %166, %cst_169 {dimension_numbers = #tpu.dot_dimension_numbers<[1], [0], [0], [1], [0, 0, 1, 1], [], []>} : vector<24x128xbf16>, vector<128x128xbf16>, vector<24x128xf32> -> vector<24x128xf32>
    %168 = arith.addf %163, %167 : vector<24x128xf32>
    %c7_170 = arith.constant 7 : index
    %c0_171 = arith.constant 0 : index
    %169 = vector.load %arg21[%c7_170, %c0_171] : memref<168x128xbf16, #tpu.memory_space<vmem>>, vector<24x128xbf16>
    %c1_172 = arith.constant 1 : index
    %c0_173 = arith.constant 0 : index
    %c0_174 = arith.constant 0 : index
    %170 = vector.load %arg6[%c1_172, %c0_173, %c0_174] : memref<9x128x128xbf16, #tpu.memory_space<vmem>>, vector<1x128x128xbf16>
    %171 = vector.shape_cast %170 : vector<1x128x128xbf16> to vector<128x128xbf16>
    %cst_175 = arith.constant dense<0.000000e+00> : vector<24x128xf32>
    %172 = tpu.matmul %169, %171, %cst_175 {dimension_numbers = #tpu.dot_dimension_numbers<[1], [0], [0], [1], [0, 0, 1, 1], [], []>} : vector<24x128xbf16>, vector<128x128xbf16>, vector<24x128xf32> -> vector<24x128xf32>
    %173 = arith.addf %168, %172 : vector<24x128xf32>
    %c49_176 = arith.constant 49 : index
    %c0_177 = arith.constant 0 : index
    %174 = vector.load %arg21[%c49_176, %c0_177] : memref<168x128xbf16, #tpu.memory_space<vmem>>, vector<24x128xbf16>
    %c2_178 = arith.constant 2 : index
    %c0_179 = arith.constant 0 : index
    %c0_180 = arith.constant 0 : index
    %175 = vector.load %arg6[%c2_178, %c0_179, %c0_180] : memref<9x128x128xbf16, #tpu.memory_space<vmem>>, vector<1x128x128xbf16>
    %176 = vector.shape_cast %175 : vector<1x128x128xbf16> to vector<128x128xbf16>
    %cst_181 = arith.constant dense<0.000000e+00> : vector<24x128xf32>
    %177 = tpu.matmul %174, %176, %cst_181 {dimension_numbers = #tpu.dot_dimension_numbers<[1], [0], [0], [1], [0, 0, 1, 1], [], []>} : vector<24x128xbf16>, vector<128x128xbf16>, vector<24x128xf32> -> vector<24x128xf32>
    %178 = arith.addf %173, %177 : vector<24x128xf32>
    %c132_182 = arith.constant 132 : index
    %c0_183 = arith.constant 0 : index
    %179 = vector.load %arg21[%c132_182, %c0_183] : memref<168x128xbf16, #tpu.memory_space<vmem>>, vector<24x128xbf16>
    %c3_184 = arith.constant 3 : index
    %c0_185 = arith.constant 0 : index
    %c0_186 = arith.constant 0 : index
    %180 = vector.load %arg6[%c3_184, %c0_185, %c0_186] : memref<9x128x128xbf16, #tpu.memory_space<vmem>>, vector<1x128x128xbf16>
    %181 = vector.shape_cast %180 : vector<1x128x128xbf16> to vector<128x128xbf16>
    %cst_187 = arith.constant dense<0.000000e+00> : vector<24x128xf32>
    %182 = tpu.matmul %179, %181, %cst_187 {dimension_numbers = #tpu.dot_dimension_numbers<[1], [0], [0], [1], [0, 0, 1, 1], [], []>} : vector<24x128xbf16>, vector<128x128xbf16>, vector<24x128xf32> -> vector<24x128xf32>
    %183 = arith.addf %178, %182 : vector<24x128xf32>
    %c91_188 = arith.constant 91 : index
    %c0_189 = arith.constant 0 : index
    %184 = vector.load %arg21[%c91_188, %c0_189] : memref<168x128xbf16, #tpu.memory_space<vmem>>, vector<24x128xbf16>
    %c4_190 = arith.constant 4 : index
    %c0_191 = arith.constant 0 : index
    %c0_192 = arith.constant 0 : index
    %185 = vector.load %arg6[%c4_190, %c0_191, %c0_192] : memref<9x128x128xbf16, #tpu.memory_space<vmem>>, vector<1x128x128xbf16>
    %186 = vector.shape_cast %185 : vector<1x128x128xbf16> to vector<128x128xbf16>
    %cst_193 = arith.constant dense<0.000000e+00> : vector<24x128xf32>
    %187 = tpu.matmul %184, %186, %cst_193 {dimension_numbers = #tpu.dot_dimension_numbers<[1], [0], [0], [1], [0, 0, 1, 1], [], []>} : vector<24x128xbf16>, vector<128x128xbf16>, vector<24x128xf32> -> vector<24x128xf32>
    %188 = arith.addf %183, %187 : vector<24x128xf32>
    %c133_194 = arith.constant 133 : index
    %c0_195 = arith.constant 0 : index
    %189 = vector.load %arg21[%c133_194, %c0_195] : memref<168x128xbf16, #tpu.memory_space<vmem>>, vector<24x128xbf16>
    %c5_196 = arith.constant 5 : index
    %c0_197 = arith.constant 0 : index
    %c0_198 = arith.constant 0 : index
    %190 = vector.load %arg6[%c5_196, %c0_197, %c0_198] : memref<9x128x128xbf16, #tpu.memory_space<vmem>>, vector<1x128x128xbf16>
    %191 = vector.shape_cast %190 : vector<1x128x128xbf16> to vector<128x128xbf16>
    %cst_199 = arith.constant dense<0.000000e+00> : vector<24x128xf32>
    %192 = tpu.matmul %189, %191, %cst_199 {dimension_numbers = #tpu.dot_dimension_numbers<[1], [0], [0], [1], [0, 0, 1, 1], [], []>} : vector<24x128xbf16>, vector<128x128xbf16>, vector<24x128xf32> -> vector<24x128xf32>
    %193 = arith.addf %188, %192 : vector<24x128xf32>
    %c54 = arith.constant 54 : index
    %c0_200 = arith.constant 0 : index
    %194 = vector.load %arg21[%c54, %c0_200] : memref<168x128xbf16, #tpu.memory_space<vmem>>, vector<24x128xbf16>
    %c6_201 = arith.constant 6 : index
    %c0_202 = arith.constant 0 : index
    %c0_203 = arith.constant 0 : index
    %195 = vector.load %arg6[%c6_201, %c0_202, %c0_203] : memref<9x128x128xbf16, #tpu.memory_space<vmem>>, vector<1x128x128xbf16>
    %196 = vector.shape_cast %195 : vector<1x128x128xbf16> to vector<128x128xbf16>
    %cst_204 = arith.constant dense<0.000000e+00> : vector<24x128xf32>
    %197 = tpu.matmul %194, %196, %cst_204 {dimension_numbers = #tpu.dot_dimension_numbers<[1], [0], [0], [1], [0, 0, 1, 1], [], []>} : vector<24x128xbf16>, vector<128x128xbf16>, vector<24x128xf32> -> vector<24x128xf32>
    %198 = arith.addf %193, %197 : vector<24x128xf32>
    %c13 = arith.constant 13 : index
    %c0_205 = arith.constant 0 : index
    %199 = vector.load %arg21[%c13, %c0_205] : memref<168x128xbf16, #tpu.memory_space<vmem>>, vector<24x128xbf16>
    %c7_206 = arith.constant 7 : index
    %c0_207 = arith.constant 0 : index
    %c0_208 = arith.constant 0 : index
    %200 = vector.load %arg6[%c7_206, %c0_207, %c0_208] : memref<9x128x128xbf16, #tpu.memory_space<vmem>>, vector<1x128x128xbf16>
    %201 = vector.shape_cast %200 : vector<1x128x128xbf16> to vector<128x128xbf16>
    %cst_209 = arith.constant dense<0.000000e+00> : vector<24x128xf32>
    %202 = tpu.matmul %199, %201, %cst_209 {dimension_numbers = #tpu.dot_dimension_numbers<[1], [0], [0], [1], [0, 0, 1, 1], [], []>} : vector<24x128xbf16>, vector<128x128xbf16>, vector<24x128xf32> -> vector<24x128xf32>
    %203 = arith.addf %198, %202 : vector<24x128xf32>
    %c55 = arith.constant 55 : index
    %c0_210 = arith.constant 0 : index
    %204 = vector.load %arg21[%c55, %c0_210] : memref<168x128xbf16, #tpu.memory_space<vmem>>, vector<24x128xbf16>
    %c8_211 = arith.constant 8 : index
    %c0_212 = arith.constant 0 : index
    %c0_213 = arith.constant 0 : index
    %205 = vector.load %arg6[%c8_211, %c0_212, %c0_213] : memref<9x128x128xbf16, #tpu.memory_space<vmem>>, vector<1x128x128xbf16>
    %206 = vector.shape_cast %205 : vector<1x128x128xbf16> to vector<128x128xbf16>
    %cst_214 = arith.constant dense<0.000000e+00> : vector<24x128xf32>
    %207 = tpu.matmul %204, %206, %cst_214 {dimension_numbers = #tpu.dot_dimension_numbers<[1], [0], [0], [1], [0, 0, 1, 1], [], []>} : vector<24x128xbf16>, vector<128x128xbf16>, vector<24x128xf32> -> vector<24x128xf32>
    %208 = arith.addf %203, %207 : vector<24x128xf32>
    %c0_215 = arith.constant 0 : index
    %c0_216 = arith.constant 0 : index
    %209 = vector.load %arg7[%c0_215, %c0_216] : memref<1x128xf32, #tpu.memory_space<vmem>>, vector<1x128xf32>
    %210 = vector.broadcast %209 : vector<1x128xf32> to vector<24x128xf32>
    %211 = arith.mulf %208, %210 : vector<24x128xf32>
    %c0_217 = arith.constant 0 : index
    %c0_218 = arith.constant 0 : index
    %212 = vector.load %arg8[%c0_217, %c0_218] : memref<1x128xf32, #tpu.memory_space<vmem>>, vector<1x128xf32>
    %213 = vector.broadcast %212 : vector<1x128xf32> to vector<24x128xf32>
    %214 = arith.addf %211, %213 : vector<24x128xf32>
    %cst_219 = arith.constant 0.000000e+00 : f32
    %215 = vector.broadcast %cst_219 : f32 to vector<24x128xf32>
    %216 = arith.maximumf %214, %215 : vector<24x128xf32>
    %217 = vector.broadcast %22 : vector<24x1xf32> to vector<24x128xf32>
    %218 = arith.mulf %216, %217 : vector<24x128xf32>
    %219 = arith.truncf %218 : vector<24x128xf32> to vector<24x128xbf16>
    %c91_220 = arith.constant 91 : index
    %c0_221 = arith.constant 0 : index
    %220 = vector.load %arg22[%c91_220, %c0_221] : memref<168x128xbf16, #tpu.memory_space<vmem>>, vector<24x128xbf16>
    tpu.vector_store %arg22[%c91_220, %c0_221], %219 {strides = array<i32>} : memref<168x128xbf16, #tpu.memory_space<vmem>>, vector<24x128xbf16>,
    %cst_222 = arith.constant 0.000000e+00 : f32
    %221 = vector.broadcast %cst_222 : f32 to vector<24x128xf32>
    %c7_223 = arith.constant 7 : index
    %c0_224 = arith.constant 0 : index
    %222 = vector.load %arg21[%c7_223, %c0_224] : memref<168x128xbf16, #tpu.memory_space<vmem>>, vector<24x128xbf16>
    %c0_225 = arith.constant 0 : index
    %c0_226 = arith.constant 0 : index
    %c0_227 = arith.constant 0 : index
    %223 = vector.load %arg6[%c0_225, %c0_226, %c0_227] : memref<9x128x128xbf16, #tpu.memory_space<vmem>>, vector<1x128x128xbf16>
    %224 = vector.shape_cast %223 : vector<1x128x128xbf16> to vector<128x128xbf16>
    %cst_228 = arith.constant dense<0.000000e+00> : vector<24x128xf32>
    %225 = tpu.matmul %222, %224, %cst_228 {dimension_numbers = #tpu.dot_dimension_numbers<[1], [0], [0], [1], [0, 0, 1, 1], [], []>} : vector<24x128xbf16>, vector<128x128xbf16>, vector<24x128xf32> -> vector<24x128xf32>
    %226 = arith.addf %221, %225 : vector<24x128xf32>
    %c49_229 = arith.constant 49 : index
    %c0_230 = arith.constant 0 : index
    %227 = vector.load %arg21[%c49_229, %c0_230] : memref<168x128xbf16, #tpu.memory_space<vmem>>, vector<24x128xbf16>
    %c1_231 = arith.constant 1 : index
    %c0_232 = arith.constant 0 : index
    %c0_233 = arith.constant 0 : index
    %228 = vector.load %arg6[%c1_231, %c0_232, %c0_233] : memref<9x128x128xbf16, #tpu.memory_space<vmem>>, vector<1x128x128xbf16>
    %229 = vector.shape_cast %228 : vector<1x128x128xbf16> to vector<128x128xbf16>
    %cst_234 = arith.constant dense<0.000000e+00> : vector<24x128xf32>
    %230 = tpu.matmul %227, %229, %cst_234 {dimension_numbers = #tpu.dot_dimension_numbers<[1], [0], [0], [1], [0, 0, 1, 1], [], []>} : vector<24x128xbf16>, vector<128x128xbf16>, vector<24x128xf32> -> vector<24x128xf32>
    %231 = arith.addf %226, %230 : vector<24x128xf32>
    %c8_235 = arith.constant 8 : index
    %c0_236 = arith.constant 0 : index
    %232 = vector.load %arg21[%c8_235, %c0_236] : memref<168x128xbf16, #tpu.memory_space<vmem>>, vector<24x128xbf16>
    %c2_237 = arith.constant 2 : index
    %c0_238 = arith.constant 0 : index
    %c0_239 = arith.constant 0 : index
    %233 = vector.load %arg6[%c2_237, %c0_238, %c0_239] : memref<9x128x128xbf16, #tpu.memory_space<vmem>>, vector<1x128x128xbf16>
    %234 = vector.shape_cast %233 : vector<1x128x128xbf16> to vector<128x128xbf16>
    %cst_240 = arith.constant dense<0.000000e+00> : vector<24x128xf32>
    %235 = tpu.matmul %232, %234, %cst_240 {dimension_numbers = #tpu.dot_dimension_numbers<[1], [0], [0], [1], [0, 0, 1, 1], [], []>} : vector<24x128xbf16>, vector<128x128xbf16>, vector<24x128xf32> -> vector<24x128xf32>
    %236 = arith.addf %231, %235 : vector<24x128xf32>
    %c91_241 = arith.constant 91 : index
    %c0_242 = arith.constant 0 : index
    %237 = vector.load %arg21[%c91_241, %c0_242] : memref<168x128xbf16, #tpu.memory_space<vmem>>, vector<24x128xbf16>
    %c3_243 = arith.constant 3 : index
    %c0_244 = arith.constant 0 : index
    %c0_245 = arith.constant 0 : index
    %238 = vector.load %arg6[%c3_243, %c0_244, %c0_245] : memref<9x128x128xbf16, #tpu.memory_space<vmem>>, vector<1x128x128xbf16>
    %239 = vector.shape_cast %238 : vector<1x128x128xbf16> to vector<128x128xbf16>
    %cst_246 = arith.constant dense<0.000000e+00> : vector<24x128xf32>
    %240 = tpu.matmul %237, %239, %cst_246 {dimension_numbers = #tpu.dot_dimension_numbers<[1], [0], [0], [1], [0, 0, 1, 1], [], []>} : vector<24x128xbf16>, vector<128x128xbf16>, vector<24x128xf32> -> vector<24x128xf32>
    %241 = arith.addf %236, %240 : vector<24x128xf32>
    %c133_247 = arith.constant 133 : index
    %c0_248 = arith.constant 0 : index
    %242 = vector.load %arg21[%c133_247, %c0_248] : memref<168x128xbf16, #tpu.memory_space<vmem>>, vector<24x128xbf16>
    %c4_249 = arith.constant 4 : index
    %c0_250 = arith.constant 0 : index
    %c0_251 = arith.constant 0 : index
    %243 = vector.load %arg6[%c4_249, %c0_250, %c0_251] : memref<9x128x128xbf16, #tpu.memory_space<vmem>>, vector<1x128x128xbf16>
    %244 = vector.shape_cast %243 : vector<1x128x128xbf16> to vector<128x128xbf16>
    %cst_252 = arith.constant dense<0.000000e+00> : vector<24x128xf32>
    %245 = tpu.matmul %242, %244, %cst_252 {dimension_numbers = #tpu.dot_dimension_numbers<[1], [0], [0], [1], [0, 0, 1, 1], [], []>} : vector<24x128xbf16>, vector<128x128xbf16>, vector<24x128xf32> -> vector<24x128xf32>
    %246 = arith.addf %241, %245 : vector<24x128xf32>
    %c92_253 = arith.constant 92 : index
    %c0_254 = arith.constant 0 : index
    %247 = vector.load %arg21[%c92_253, %c0_254] : memref<168x128xbf16, #tpu.memory_space<vmem>>, vector<24x128xbf16>
    %c5_255 = arith.constant 5 : index
    %c0_256 = arith.constant 0 : index
    %c0_257 = arith.constant 0 : index
    %248 = vector.load %arg6[%c5_255, %c0_256, %c0_257] : memref<9x128x128xbf16, #tpu.memory_space<vmem>>, vector<1x128x128xbf16>
    %249 = vector.shape_cast %248 : vector<1x128x128xbf16> to vector<128x128xbf16>
    %cst_258 = arith.constant dense<0.000000e+00> : vector<24x128xf32>
    %250 = tpu.matmul %247, %249, %cst_258 {dimension_numbers = #tpu.dot_dimension_numbers<[1], [0], [0], [1], [0, 0, 1, 1], [], []>} : vector<24x128xbf16>, vector<128x128xbf16>, vector<24x128xf32> -> vector<24x128xf32>
    %251 = arith.addf %246, %250 : vector<24x128xf32>
    %c13_259 = arith.constant 13 : index
    %c0_260 = arith.constant 0 : index
    %252 = vector.load %arg21[%c13_259, %c0_260] : memref<168x128xbf16, #tpu.memory_space<vmem>>, vector<24x128xbf16>
    %c6_261 = arith.constant 6 : index
    %c0_262 = arith.constant 0 : index
    %c0_263 = arith.constant 0 : index
    %253 = vector.load %arg6[%c6_261, %c0_262, %c0_263] : memref<9x128x128xbf16, #tpu.memory_space<vmem>>, vector<1x128x128xbf16>
    %254 = vector.shape_cast %253 : vector<1x128x128xbf16> to vector<128x128xbf16>
    %cst_264 = arith.constant dense<0.000000e+00> : vector<24x128xf32>
    %255 = tpu.matmul %252, %254, %cst_264 {dimension_numbers = #tpu.dot_dimension_numbers<[1], [0], [0], [1], [0, 0, 1, 1], [], []>} : vector<24x128xbf16>, vector<128x128xbf16>, vector<24x128xf32> -> vector<24x128xf32>
    %256 = arith.addf %251, %255 : vector<24x128xf32>
    %c55_265 = arith.constant 55 : index
    %c0_266 = arith.constant 0 : index
    %257 = vector.load %arg21[%c55_265, %c0_266] : memref<168x128xbf16, #tpu.memory_space<vmem>>, vector<24x128xbf16>
    %c7_267 = arith.constant 7 : index
    %c0_268 = arith.constant 0 : index
    %c0_269 = arith.constant 0 : index
    %258 = vector.load %arg6[%c7_267, %c0_268, %c0_269] : memref<9x128x128xbf16, #tpu.memory_space<vmem>>, vector<1x128x128xbf16>
    %259 = vector.shape_cast %258 : vector<1x128x128xbf16> to vector<128x128xbf16>
    %cst_270 = arith.constant dense<0.000000e+00> : vector<24x128xf32>
    %260 = tpu.matmul %257, %259, %cst_270 {dimension_numbers = #tpu.dot_dimension_numbers<[1], [0], [0], [1], [0, 0, 1, 1], [], []>} : vector<24x128xbf16>, vector<128x128xbf16>, vector<24x128xf32> -> vector<24x128xf32>
    %261 = arith.addf %256, %260 : vector<24x128xf32>
    %c14 = arith.constant 14 : index
    %c0_271 = arith.constant 0 : index
    %262 = vector.load %arg21[%c14, %c0_271] : memref<168x128xbf16, #tpu.memory_space<vmem>>, vector<24x128xbf16>
    %c8_272 = arith.constant 8 : index
    %c0_273 = arith.constant 0 : index
    %c0_274 = arith.constant 0 : index
    %263 = vector.load %arg6[%c8_272, %c0_273, %c0_274] : memref<9x128x128xbf16, #tpu.memory_space<vmem>>, vector<1x128x128xbf16>
    %264 = vector.shape_cast %263 : vector<1x128x128xbf16> to vector<128x128xbf16>
    %cst_275 = arith.constant dense<0.000000e+00> : vector<24x128xf32>
    %265 = tpu.matmul %262, %264, %cst_275 {dimension_numbers = #tpu.dot_dimension_numbers<[1], [0], [0], [1], [0, 0, 1, 1], [], []>} : vector<24x128xbf16>, vector<128x128xbf16>, vector<24x128xf32> -> vector<24x128xf32>
    %266 = arith.addf %261, %265 : vector<24x128xf32>
    %c0_276 = arith.constant 0 : index
    %c0_277 = arith.constant 0 : index
    %267 = vector.load %arg7[%c0_276, %c0_277] : memref<1x128xf32, #tpu.memory_space<vmem>>, vector<1x128xf32>
    %268 = vector.broadcast %267 : vector<1x128xf32> to vector<24x128xf32>
    %269 = arith.mulf %266, %268 : vector<24x128xf32>
    %c0_278 = arith.constant 0 : index
    %c0_279 = arith.constant 0 : index
    %270 = vector.load %arg8[%c0_278, %c0_279] : memref<1x128xf32, #tpu.memory_space<vmem>>, vector<1x128xf32>
    %271 = vector.broadcast %270 : vector<1x128xf32> to vector<24x128xf32>
    %272 = arith.addf %269, %271 : vector<24x128xf32>
    %cst_280 = arith.constant 0.000000e+00 : f32
    %273 = vector.broadcast %cst_280 : f32 to vector<24x128xf32>
    %274 = arith.maximumf %272, %273 : vector<24x128xf32>
    %275 = vector.broadcast %22 : vector<24x1xf32> to vector<24x128xf32>
    %276 = arith.mulf %274, %275 : vector<24x128xf32>
    %277 = arith.truncf %276 : vector<24x128xf32> to vector<24x128xbf16>
    %c133_281 = arith.constant 133 : index
    %c0_282 = arith.constant 0 : index
    %278 = vector.load %arg22[%c133_281, %c0_282] : memref<168x128xbf16, #tpu.memory_space<vmem>>, vector<24x128xbf16>
    tpu.vector_store %arg22[%c133_281, %c0_282], %277 {strides = array<i32>} : memref<168x128xbf16, #tpu.memory_space<vmem>>, vector<24x128xbf16>,
    %cst_283 = arith.constant 0.000000e+00 : f32
    %279 = vector.broadcast %cst_283 : f32 to vector<24x128xf32>
    %c126_284 = arith.constant 126 : index
    %c0_285 = arith.constant 0 : index
    %280 = vector.load %arg22[%c126_284, %c0_285] : memref<168x128xbf16, #tpu.memory_space<vmem>>, vector<24x128xbf16>
    %c0_286 = arith.constant 0 : index
    %c0_287 = arith.constant 0 : index
    %c0_288 = arith.constant 0 : index
    %281 = vector.load %arg9[%c0_286, %c0_287, %c0_288] : memref<9x128x128xbf16, #tpu.memory_space<vmem>>, vector<1x128x128xbf16>
    %282 = vector.shape_cast %281 : vector<1x128x128xbf16> to vector<128x128xbf16>
    %cst_289 = arith.constant dense<0.000000e+00> : vector<24x128xf32>
    %283 = tpu.matmul %280, %282, %cst_289 {dimension_numbers = #tpu.dot_dimension_numbers<[1], [0], [0], [1], [0, 0, 1, 1], [], []>} : vector<24x128xbf16>, vector<128x128xbf16>, vector<24x128xf32> -> vector<24x128xf32>
    %284 = arith.addf %279, %283 : vector<24x128xf32>
    %c85_290 = arith.constant 85 : index
    %c0_291 = arith.constant 0 : index
    %285 = vector.load %arg22[%c85_290, %c0_291] : memref<168x128xbf16, #tpu.memory_space<vmem>>, vector<24x128xbf16>
    %c1_292 = arith.constant 1 : index
    %c0_293 = arith.constant 0 : index
    %c0_294 = arith.constant 0 : index
    %286 = vector.load %arg9[%c1_292, %c0_293, %c0_294] : memref<9x128x128xbf16, #tpu.memory_space<vmem>>, vector<1x128x128xbf16>
    %287 = vector.shape_cast %286 : vector<1x128x128xbf16> to vector<128x128xbf16>
    %cst_295 = arith.constant dense<0.000000e+00> : vector<24x128xf32>
    %288 = tpu.matmul %285, %287, %cst_295 {dimension_numbers = #tpu.dot_dimension_numbers<[1], [0], [0], [1], [0, 0, 1, 1], [], []>} : vector<24x128xbf16>, vector<128x128xbf16>, vector<24x128xf32> -> vector<24x128xf32>
    %289 = arith.addf %284, %288 : vector<24x128xf32>
    %c127_296 = arith.constant 127 : index
    %c0_297 = arith.constant 0 : index
    %290 = vector.load %arg22[%c127_296, %c0_297] : memref<168x128xbf16, #tpu.memory_space<vmem>>, vector<24x128xbf16>
    %c2_298 = arith.constant 2 : index
    %c0_299 = arith.constant 0 : index
    %c0_300 = arith.constant 0 : index
    %291 = vector.load %arg9[%c2_298, %c0_299, %c0_300] : memref<9x128x128xbf16, #tpu.memory_space<vmem>>, vector<1x128x128xbf16>
    %292 = vector.shape_cast %291 : vector<1x128x128xbf16> to vector<128x128xbf16>
    %cst_301 = arith.constant dense<0.000000e+00> : vector<24x128xf32>
    %293 = tpu.matmul %290, %292, %cst_301 {dimension_numbers = #tpu.dot_dimension_numbers<[1], [0], [0], [1], [0, 0, 1, 1], [], []>} : vector<24x128xbf16>, vector<128x128xbf16>, vector<24x128xf32> -> vector<24x128xf32>
    %294 = arith.addf %289, %293 : vector<24x128xf32>
    %c48_302 = arith.constant 48 : index
    %c0_303 = arith.constant 0 : index
    %295 = vector.load %arg22[%c48_302, %c0_303] : memref<168x128xbf16, #tpu.memory_space<vmem>>, vector<24x128xbf16>
    %c3_304 = arith.constant 3 : index
    %c0_305 = arith.constant 0 : index
    %c0_306 = arith.constant 0 : index
    %296 = vector.load %arg9[%c3_304, %c0_305, %c0_306] : memref<9x128x128xbf16, #tpu.memory_space<vmem>>, vector<1x128x128xbf16>
    %297 = vector.shape_cast %296 : vector<1x128x128xbf16> to vector<128x128xbf16>
    %cst_307 = arith.constant dense<0.000000e+00> : vector<24x128xf32>
    %298 = tpu.matmul %295, %297, %cst_307 {dimension_numbers = #tpu.dot_dimension_numbers<[1], [0], [0], [1], [0, 0, 1, 1], [], []>} : vector<24x128xbf16>, vector<128x128xbf16>, vector<24x128xf32> -> vector<24x128xf32>
    %299 = arith.addf %294, %298 : vector<24x128xf32>
    %c7_308 = arith.constant 7 : index
    %c0_309 = arith.constant 0 : index
    %300 = vector.load %arg22[%c7_308, %c0_309] : memref<168x128xbf16, #tpu.memory_space<vmem>>, vector<24x128xbf16>
    %c4_310 = arith.constant 4 : index
    %c0_311 = arith.constant 0 : index
    %c0_312 = arith.constant 0 : index
    %301 = vector.load %arg9[%c4_310, %c0_311, %c0_312] : memref<9x128x128xbf16, #tpu.memory_space<vmem>>, vector<1x128x128xbf16>
    %302 = vector.shape_cast %301 : vector<1x128x128xbf16> to vector<128x128xbf16>
    %cst_313 = arith.constant dense<0.000000e+00> : vector<24x128xf32>
    %303 = tpu.matmul %300, %302, %cst_313 {dimension_numbers = #tpu.dot_dimension_numbers<[1], [0], [0], [1], [0, 0, 1, 1], [], []>} : vector<24x128xbf16>, vector<128x128xbf16>, vector<24x128xf32> -> vector<24x128xf32>
    %304 = arith.addf %299, %303 : vector<24x128xf32>
    %c49_314 = arith.constant 49 : index
    %c0_315 = arith.constant 0 : index
    %305 = vector.load %arg22[%c49_314, %c0_315] : memref<168x128xbf16, #tpu.memory_space<vmem>>, vector<24x128xbf16>
    %c5_316 = arith.constant 5 : index
    %c0_317 = arith.constant 0 : index
    %c0_318 = arith.constant 0 : index
    %306 = vector.load %arg9[%c5_316, %c0_317, %c0_318] : memref<9x128x128xbf16, #tpu.memory_space<vmem>>, vector<1x128x128xbf16>
    %307 = vector.shape_cast %306 : vector<1x128x128xbf16> to vector<128x128xbf16>
    %cst_319 = arith.constant dense<0.000000e+00> : vector<24x128xf32>
    %308 = tpu.matmul %305, %307, %cst_319 {dimension_numbers = #tpu.dot_dimension_numbers<[1], [0], [0], [1], [0, 0, 1, 1], [], []>} : vector<24x128xbf16>, vector<128x128xbf16>, vector<24x128xf32> -> vector<24x128xf32>
    %309 = arith.addf %304, %308 : vector<24x128xf32>
    %c132_320 = arith.constant 132 : index
    %c0_321 = arith.constant 0 : index
    %310 = vector.load %arg22[%c132_320, %c0_321] : memref<168x128xbf16, #tpu.memory_space<vmem>>, vector<24x128xbf16>
    %c6_322 = arith.constant 6 : index
    %c0_323 = arith.constant 0 : index
    %c0_324 = arith.constant 0 : index
    %311 = vector.load %arg9[%c6_322, %c0_323, %c0_324] : memref<9x128x128xbf16, #tpu.memory_space<vmem>>, vector<1x128x128xbf16>
    %312 = vector.shape_cast %311 : vector<1x128x128xbf16> to vector<128x128xbf16>
    %cst_325 = arith.constant dense<0.000000e+00> : vector<24x128xf32>
    %313 = tpu.matmul %310, %312, %cst_325 {dimension_numbers = #tpu.dot_dimension_numbers<[1], [0], [0], [1], [0, 0, 1, 1], [], []>} : vector<24x128xbf16>, vector<128x128xbf16>, vector<24x128xf32> -> vector<24x128xf32>
    %314 = arith.addf %309, %313 : vector<24x128xf32>
    %c91_326 = arith.constant 91 : index
    %c0_327 = arith.constant 0 : index
    %315 = vector.load %arg22[%c91_326, %c0_327] : memref<168x128xbf16, #tpu.memory_space<vmem>>, vector<24x128xbf16>
    %c7_328 = arith.constant 7 : index
    %c0_329 = arith.constant 0 : index
    %c0_330 = arith.constant 0 : index
    %316 = vector.load %arg9[%c7_328, %c0_329, %c0_330] : memref<9x128x128xbf16, #tpu.memory_space<vmem>>, vector<1x128x128xbf16>
    %317 = vector.shape_cast %316 : vector<1x128x128xbf16> to vector<128x128xbf16>
    %cst_331 = arith.constant dense<0.000000e+00> : vector<24x128xf32>
    %318 = tpu.matmul %315, %317, %cst_331 {dimension_numbers = #tpu.dot_dimension_numbers<[1], [0], [0], [1], [0, 0, 1, 1], [], []>} : vector<24x128xbf16>, vector<128x128xbf16>, vector<24x128xf32> -> vector<24x128xf32>
    %319 = arith.addf %314, %318 : vector<24x128xf32>
    %c133_332 = arith.constant 133 : index
    %c0_333 = arith.constant 0 : index
    %320 = vector.load %arg22[%c133_332, %c0_333] : memref<168x128xbf16, #tpu.memory_space<vmem>>, vector<24x128xbf16>
    %c8_334 = arith.constant 8 : index
    %c0_335 = arith.constant 0 : index
    %c0_336 = arith.constant 0 : index
    %321 = vector.load %arg9[%c8_334, %c0_335, %c0_336] : memref<9x128x128xbf16, #tpu.memory_space<vmem>>, vector<1x128x128xbf16>
    %322 = vector.shape_cast %321 : vector<1x128x128xbf16> to vector<128x128xbf16>
    %cst_337 = arith.constant dense<0.000000e+00> : vector<24x128xf32>
    %323 = tpu.matmul %320, %322, %cst_337 {dimension_numbers = #tpu.dot_dimension_numbers<[1], [0], [0], [1], [0, 0, 1, 1], [], []>} : vector<24x128xbf16>, vector<128x128xbf16>, vector<24x128xf32> -> vector<24x128xf32>
    %324 = arith.addf %319, %323 : vector<24x128xf32>
    %c0_338 = arith.constant 0 : index
    %c0_339 = arith.constant 0 : index
    %325 = vector.load %arg10[%c0_338, %c0_339] : memref<1x128xf32, #tpu.memory_space<vmem>>, vector<1x128xf32>
    %326 = vector.broadcast %325 : vector<1x128xf32> to vector<24x128xf32>
    %327 = arith.mulf %324, %326 : vector<24x128xf32>
    %c0_340 = arith.constant 0 : index
    %c0_341 = arith.constant 0 : index
    %328 = vector.load %arg11[%c0_340, %c0_341] : memref<1x128xf32, #tpu.memory_space<vmem>>, vector<1x128xf32>
    %329 = vector.broadcast %328 : vector<1x128xf32> to vector<24x128xf32>
    %330 = arith.addf %327, %329 : vector<24x128xf32>
    %cst_342 = arith.constant 0.000000e+00 : f32
    %331 = vector.broadcast %cst_342 : f32 to vector<24x128xf32>
    %332 = arith.maximumf %330, %331 : vector<24x128xf32>
    %333 = vector.broadcast %22 : vector<24x1xf32> to vector<24x128xf32>
    %334 = arith.mulf %332, %333 : vector<24x128xf32>
    %335 = arith.truncf %334 : vector<24x128xf32> to vector<24x128xbf16>
    %c7_343 = arith.constant 7 : index
    %c0_344 = arith.constant 0 : index
    %336 = vector.load %arg23[%c7_343, %c0_344] : memref<42x128xbf16, #tpu.memory_space<vmem>>, vector<24x128xbf16>
    tpu.vector_store %arg23[%c7_343, %c0_344], %335 {strides = array<i32>} : memref<42x128xbf16, #tpu.memory_space<vmem>>, vector<24x128xbf16>,
    %cst_345 = arith.constant 0.000000e+00 : f32
    %337 = vector.broadcast %cst_345 : f32 to vector<24x128xf32>
    %c0_346 = arith.constant 0 : index
    %c0_347 = arith.constant 0 : index
    %338 = vector.load %arg23[%c0_346, %c0_347] : memref<42x128xbf16, #tpu.memory_space<vmem>>, vector<24x128xbf16>
    %c0_348 = arith.constant 0 : index
    %c0_349 = arith.constant 0 : index
    %c0_350 = arith.constant 0 : index
    %339 = vector.load %arg12[%c0_348, %c0_349, %c0_350] : memref<9x128x128xbf16, #tpu.memory_space<vmem>>, vector<1x128x128xbf16>
    %340 = vector.shape_cast %339 : vector<1x128x128xbf16> to vector<128x128xbf16>
    %cst_351 = arith.constant dense<0.000000e+00> : vector<24x128xf32>
    %341 = tpu.matmul %338, %340, %cst_351 {dimension_numbers = #tpu.dot_dimension_numbers<[1], [0], [0], [1], [0, 0, 1, 1], [], []>} : vector<24x128xbf16>, vector<128x128xbf16>, vector<24x128xf32> -> vector<24x128xf32>
    %342 = arith.addf %337, %341 : vector<24x128xf32>
    %c1_352 = arith.constant 1 : index
    %c0_353 = arith.constant 0 : index
    %343 = vector.load %arg23[%c1_352, %c0_353] : memref<42x128xbf16, #tpu.memory_space<vmem>>, vector<24x128xbf16>
    %c1_354 = arith.constant 1 : index
    %c0_355 = arith.constant 0 : index
    %c0_356 = arith.constant 0 : index
    %344 = vector.load %arg12[%c1_354, %c0_355, %c0_356] : memref<9x128x128xbf16, #tpu.memory_space<vmem>>, vector<1x128x128xbf16>
    %345 = vector.shape_cast %344 : vector<1x128x128xbf16> to vector<128x128xbf16>
    %cst_357 = arith.constant dense<0.000000e+00> : vector<24x128xf32>
    %346 = tpu.matmul %343, %345, %cst_357 {dimension_numbers = #tpu.dot_dimension_numbers<[1], [0], [0], [1], [0, 0, 1, 1], [], []>} : vector<24x128xbf16>, vector<128x128xbf16>, vector<24x128xf32> -> vector<24x128xf32>
    %347 = arith.addf %342, %346 : vector<24x128xf32>
    %c2_358 = arith.constant 2 : index
    %c0_359 = arith.constant 0 : index
    %348 = vector.load %arg23[%c2_358, %c0_359] : memref<42x128xbf16, #tpu.memory_space<vmem>>, vector<24x128xbf16>
    %c2_360 = arith.constant 2 : index
    %c0_361 = arith.constant 0 : index
    %c0_362 = arith.constant 0 : index
    %349 = vector.load %arg12[%c2_360, %c0_361, %c0_362] : memref<9x128x128xbf16, #tpu.memory_space<vmem>>, vector<1x128x128xbf16>
    %350 = vector.shape_cast %349 : vector<1x128x128xbf16> to vector<128x128xbf16>
    %cst_363 = arith.constant dense<0.000000e+00> : vector<24x128xf32>
    %351 = tpu.matmul %348, %350, %cst_363 {dimension_numbers = #tpu.dot_dimension_numbers<[1], [0], [0], [1], [0, 0, 1, 1], [], []>} : vector<24x128xbf16>, vector<128x128xbf16>, vector<24x128xf32> -> vector<24x128xf32>
    %352 = arith.addf %347, %351 : vector<24x128xf32>
    %c6_364 = arith.constant 6 : index
    %c0_365 = arith.constant 0 : index
    %353 = vector.load %arg23[%c6_364, %c0_365] : memref<42x128xbf16, #tpu.memory_space<vmem>>, vector<24x128xbf16>
    %c3_366 = arith.constant 3 : index
    %c0_367 = arith.constant 0 : index
    %c0_368 = arith.constant 0 : index
    %354 = vector.load %arg12[%c3_366, %c0_367, %c0_368] : memref<9x128x128xbf16, #tpu.memory_space<vmem>>, vector<1x128x128xbf16>
    %355 = vector.shape_cast %354 : vector<1x128x128xbf16> to vector<128x128xbf16>
    %cst_369 = arith.constant dense<0.000000e+00> : vector<24x128xf32>
    %356 = tpu.matmul %353, %355, %cst_369 {dimension_numbers = #tpu.dot_dimension_numbers<[1], [0], [0], [1], [0, 0, 1, 1], [], []>} : vector<24x128xbf16>, vector<128x128xbf16>, vector<24x128xf32> -> vector<24x128xf32>
    %357 = arith.addf %352, %356 : vector<24x128xf32>
    %c7_370 = arith.constant 7 : index
    %c0_371 = arith.constant 0 : index
    %358 = vector.load %arg23[%c7_370, %c0_371] : memref<42x128xbf16, #tpu.memory_space<vmem>>, vector<24x128xbf16>
    %c4_372 = arith.constant 4 : index
    %c0_373 = arith.constant 0 : index
    %c0_374 = arith.constant 0 : index
    %359 = vector.load %arg12[%c4_372, %c0_373, %c0_374] : memref<9x128x128xbf16, #tpu.memory_space<vmem>>, vector<1x128x128xbf16>
    %360 = vector.shape_cast %359 : vector<1x128x128xbf16> to vector<128x128xbf16>
    %cst_375 = arith.constant dense<0.000000e+00> : vector<24x128xf32>
    %361 = tpu.matmul %358, %360, %cst_375 {dimension_numbers = #tpu.dot_dimension_numbers<[1], [0], [0], [1], [0, 0, 1, 1], [], []>} : vector<24x128xbf16>, vector<128x128xbf16>, vector<24x128xf32> -> vector<24x128xf32>
    %362 = arith.addf %357, %361 : vector<24x128xf32>
    %c8_376 = arith.constant 8 : index
    %c0_377 = arith.constant 0 : index
    %363 = vector.load %arg23[%c8_376, %c0_377] : memref<42x128xbf16, #tpu.memory_space<vmem>>, vector<24x128xbf16>
    %c5_378 = arith.constant 5 : index
    %c0_379 = arith.constant 0 : index
    %c0_380 = arith.constant 0 : index
    %364 = vector.load %arg12[%c5_378, %c0_379, %c0_380] : memref<9x128x128xbf16, #tpu.memory_space<vmem>>, vector<1x128x128xbf16>
    %365 = vector.shape_cast %364 : vector<1x128x128xbf16> to vector<128x128xbf16>
    %cst_381 = arith.constant dense<0.000000e+00> : vector<24x128xf32>
    %366 = tpu.matmul %363, %365, %cst_381 {dimension_numbers = #tpu.dot_dimension_numbers<[1], [0], [0], [1], [0, 0, 1, 1], [], []>} : vector<24x128xbf16>, vector<128x128xbf16>, vector<24x128xf32> -> vector<24x128xf32>
    %367 = arith.addf %362, %366 : vector<24x128xf32>
    %c12 = arith.constant 12 : index
    %c0_382 = arith.constant 0 : index
    %368 = vector.load %arg23[%c12, %c0_382] : memref<42x128xbf16, #tpu.memory_space<vmem>>, vector<24x128xbf16>
    %c6_383 = arith.constant 6 : index
    %c0_384 = arith.constant 0 : index
    %c0_385 = arith.constant 0 : index
    %369 = vector.load %arg12[%c6_383, %c0_384, %c0_385] : memref<9x128x128xbf16, #tpu.memory_space<vmem>>, vector<1x128x128xbf16>
    %370 = vector.shape_cast %369 : vector<1x128x128xbf16> to vector<128x128xbf16>
    %cst_386 = arith.constant dense<0.000000e+00> : vector<24x128xf32>
    %371 = tpu.matmul %368, %370, %cst_386 {dimension_numbers = #tpu.dot_dimension_numbers<[1], [0], [0], [1], [0, 0, 1, 1], [], []>} : vector<24x128xbf16>, vector<128x128xbf16>, vector<24x128xf32> -> vector<24x128xf32>
    %372 = arith.addf %367, %371 : vector<24x128xf32>
    %c13_387 = arith.constant 13 : index
    %c0_388 = arith.constant 0 : index
    %373 = vector.load %arg23[%c13_387, %c0_388] : memref<42x128xbf16, #tpu.memory_space<vmem>>, vector<24x128xbf16>
    %c7_389 = arith.constant 7 : index
    %c0_390 = arith.constant 0 : index
    %c0_391 = arith.constant 0 : index
    %374 = vector.load %arg12[%c7_389, %c0_390, %c0_391] : memref<9x128x128xbf16, #tpu.memory_space<vmem>>, vector<1x128x128xbf16>
    %375 = vector.shape_cast %374 : vector<1x128x128xbf16> to vector<128x128xbf16>
    %cst_392 = arith.constant dense<0.000000e+00> : vector<24x128xf32>
    %376 = tpu.matmul %373, %375, %cst_392 {dimension_numbers = #tpu.dot_dimension_numbers<[1], [0], [0], [1], [0, 0, 1, 1], [], []>} : vector<24x128xbf16>, vector<128x128xbf16>, vector<24x128xf32> -> vector<24x128xf32>
    %377 = arith.addf %372, %376 : vector<24x128xf32>
    %c14_393 = arith.constant 14 : index
    %c0_394 = arith.constant 0 : index
    %378 = vector.load %arg23[%c14_393, %c0_394] : memref<42x128xbf16, #tpu.memory_space<vmem>>, vector<24x128xbf16>
    %c8_395 = arith.constant 8 : index
    %c0_396 = arith.constant 0 : index
    %c0_397 = arith.constant 0 : index
    %379 = vector.load %arg12[%c8_395, %c0_396, %c0_397] : memref<9x128x128xbf16, #tpu.memory_space<vmem>>, vector<1x128x128xbf16>
    %380 = vector.shape_cast %379 : vector<1x128x128xbf16> to vector<128x128xbf16>
    %cst_398 = arith.constant dense<0.000000e+00> : vector<24x128xf32>
    %381 = tpu.matmul %378, %380, %cst_398 {dimension_numbers = #tpu.dot_dimension_numbers<[1], [0], [0], [1], [0, 0, 1, 1], [], []>} : vector<24x128xbf16>, vector<128x128xbf16>, vector<24x128xf32> -> vector<24x128xf32>
    %382 = arith.addf %377, %381 : vector<24x128xf32>
    %c0_399 = arith.constant 0 : index
    %c0_400 = arith.constant 0 : index
    %383 = vector.load %arg13[%c0_399, %c0_400] : memref<1x128xf32, #tpu.memory_space<vmem>>, vector<1x128xf32>
    %384 = vector.broadcast %383 : vector<1x128xf32> to vector<24x128xf32>
    %385 = arith.mulf %382, %384 : vector<24x128xf32>
    %c0_401 = arith.constant 0 : index
    %c0_402 = arith.constant 0 : index
    %386 = vector.load %arg14[%c0_401, %c0_402] : memref<1x128xf32, #tpu.memory_space<vmem>>, vector<1x128xf32>
    %387 = vector.broadcast %386 : vector<1x128xf32> to vector<24x128xf32>
    %388 = arith.addf %385, %387 : vector<24x128xf32>
    %cst_403 = arith.constant 0.000000e+00 : f32
    %389 = vector.broadcast %cst_403 : f32 to vector<24x128xf32>
    %390 = arith.maximumf %388, %389 : vector<24x128xf32>
    %391 = vector.broadcast %22 : vector<24x1xf32> to vector<24x128xf32>
    %392 = arith.mulf %390, %391 : vector<24x128xf32>
    %393 = arith.truncf %392 : vector<24x128xf32> to vector<24x128xbf16>
    %c7_404 = arith.constant 7 : index
    %c0_405 = arith.constant 0 : index
    %394 = vector.load %arg24[%c7_404, %c0_405] : memref<42x128xbf16, #tpu.memory_space<vmem>>, vector<24x128xbf16>
    tpu.vector_store %arg24[%c7_404, %c0_405], %393 {strides = array<i32>} : memref<42x128xbf16, #tpu.memory_space<vmem>>, vector<24x128xbf16>,
    %cst_406 = arith.constant 0.000000e+00 : f32
    %395 = vector.broadcast %cst_406 : f32 to vector<24x128xf32>
    %c0_407 = arith.constant 0 : index
    %c0_408 = arith.constant 0 : index
    %396 = vector.load %arg24[%c0_407, %c0_408] : memref<42x128xbf16, #tpu.memory_space<vmem>>, vector<24x128xbf16>
    %c0_409 = arith.constant 0 : index
    %c0_410 = arith.constant 0 : index
    %c0_411 = arith.constant 0 : index
    %397 = vector.load %arg15[%c0_409, %c0_410, %c0_411] : memref<9x128x128xbf16, #tpu.memory_space<vmem>>, vector<1x128x128xbf16>
    %398 = vector.shape_cast %397 : vector<1x128x128xbf16> to vector<128x128xbf16>
    %cst_412 = arith.constant dense<0.000000e+00> : vector<24x128xf32>
    %399 = tpu.matmul %396, %398, %cst_412 {dimension_numbers = #tpu.dot_dimension_numbers<[1], [0], [0], [1], [0, 0, 1, 1], [], []>} : vector<24x128xbf16>, vector<128x128xbf16>, vector<24x128xf32> -> vector<24x128xf32>
    %400 = arith.addf %395, %399 : vector<24x128xf32>
    %c1_413 = arith.constant 1 : index
    %c0_414 = arith.constant 0 : index
    %401 = vector.load %arg24[%c1_413, %c0_414] : memref<42x128xbf16, #tpu.memory_space<vmem>>, vector<24x128xbf16>
    %c1_415 = arith.constant 1 : index
    %c0_416 = arith.constant 0 : index
    %c0_417 = arith.constant 0 : index
    %402 = vector.load %arg15[%c1_415, %c0_416, %c0_417] : memref<9x128x128xbf16, #tpu.memory_space<vmem>>, vector<1x128x128xbf16>
    %403 = vector.shape_cast %402 : vector<1x128x128xbf16> to vector<128x128xbf16>
    %cst_418 = arith.constant dense<0.000000e+00> : vector<24x128xf32>
    %404 = tpu.matmul %401, %403, %cst_418 {dimension_numbers = #tpu.dot_dimension_numbers<[1], [0], [0], [1], [0, 0, 1, 1], [], []>} : vector<24x128xbf16>, vector<128x128xbf16>, vector<24x128xf32> -> vector<24x128xf32>
    %405 = arith.addf %400, %404 : vector<24x128xf32>
    %c2_419 = arith.constant 2 : index
    %c0_420 = arith.constant 0 : index
    %406 = vector.load %arg24[%c2_419, %c0_420] : memref<42x128xbf16, #tpu.memory_space<vmem>>, vector<24x128xbf16>
    %c2_421 = arith.constant 2 : index
    %c0_422 = arith.constant 0 : index
    %c0_423 = arith.constant 0 : index
    %407 = vector.load %arg15[%c2_421, %c0_422, %c0_423] : memref<9x128x128xbf16, #tpu.memory_space<vmem>>, vector<1x128x128xbf16>
    %408 = vector.shape_cast %407 : vector<1x128x128xbf16> to vector<128x128xbf16>
    %cst_424 = arith.constant dense<0.000000e+00> : vector<24x128xf32>
    %409 = tpu.matmul %406, %408, %cst_424 {dimension_numbers = #tpu.dot_dimension_numbers<[1], [0], [0], [1], [0, 0, 1, 1], [], []>} : vector<24x128xbf16>, vector<128x128xbf16>, vector<24x128xf32> -> vector<24x128xf32>
    %410 = arith.addf %405, %409 : vector<24x128xf32>
    %c6_425 = arith.constant 6 : index
    %c0_426 = arith.constant 0 : index
    %411 = vector.load %arg24[%c6_425, %c0_426] : memref<42x128xbf16, #tpu.memory_space<vmem>>, vector<24x128xbf16>
    %c3_427 = arith.constant 3 : index
    %c0_428 = arith.constant 0 : index
    %c0_429 = arith.constant 0 : index
    %412 = vector.load %arg15[%c3_427, %c0_428, %c0_429] : memref<9x128x128xbf16, #tpu.memory_space<vmem>>, vector<1x128x128xbf16>
    %413 = vector.shape_cast %412 : vector<1x128x128xbf16> to vector<128x128xbf16>
    %cst_430 = arith.constant dense<0.000000e+00> : vector<24x128xf32>
    %414 = tpu.matmul %411, %413, %cst_430 {dimension_numbers = #tpu.dot_dimension_numbers<[1], [0], [0], [1], [0, 0, 1, 1], [], []>} : vector<24x128xbf16>, vector<128x128xbf16>, vector<24x128xf32> -> vector<24x128xf32>
    %415 = arith.addf %410, %414 : vector<24x128xf32>
    %c7_431 = arith.constant 7 : index
    %c0_432 = arith.constant 0 : index
    %416 = vector.load %arg24[%c7_431, %c0_432] : memref<42x128xbf16, #tpu.memory_space<vmem>>, vector<24x128xbf16>
    %c4_433 = arith.constant 4 : index
    %c0_434 = arith.constant 0 : index
    %c0_435 = arith.constant 0 : index
    %417 = vector.load %arg15[%c4_433, %c0_434, %c0_435] : memref<9x128x128xbf16, #tpu.memory_space<vmem>>, vector<1x128x128xbf16>
    %418 = vector.shape_cast %417 : vector<1x128x128xbf16> to vector<128x128xbf16>
    %cst_436 = arith.constant dense<0.000000e+00> : vector<24x128xf32>
    %419 = tpu.matmul %416, %418, %cst_436 {dimension_numbers = #tpu.dot_dimension_numbers<[1], [0], [0], [1], [0, 0, 1, 1], [], []>} : vector<24x128xbf16>, vector<128x128xbf16>, vector<24x128xf32> -> vector<24x128xf32>
    %420 = arith.addf %415, %419 : vector<24x128xf32>
    %c8_437 = arith.constant 8 : index
    %c0_438 = arith.constant 0 : index
    %421 = vector.load %arg24[%c8_437, %c0_438] : memref<42x128xbf16, #tpu.memory_space<vmem>>, vector<24x128xbf16>
    %c5_439 = arith.constant 5 : index
    %c0_440 = arith.constant 0 : index
    %c0_441 = arith.constant 0 : index
    %422 = vector.load %arg15[%c5_439, %c0_440, %c0_441] : memref<9x128x128xbf16, #tpu.memory_space<vmem>>, vector<1x128x128xbf16>
    %423 = vector.shape_cast %422 : vector<1x128x128xbf16> to vector<128x128xbf16>
    %cst_442 = arith.constant dense<0.000000e+00> : vector<24x128xf32>
    %424 = tpu.matmul %421, %423, %cst_442 {dimension_numbers = #tpu.dot_dimension_numbers<[1], [0], [0], [1], [0, 0, 1, 1], [], []>} : vector<24x128xbf16>, vector<128x128xbf16>, vector<24x128xf32> -> vector<24x128xf32>
    %425 = arith.addf %420, %424 : vector<24x128xf32>
    %c12_443 = arith.constant 12 : index
    %c0_444 = arith.constant 0 : index
    %426 = vector.load %arg24[%c12_443, %c0_444] : memref<42x128xbf16, #tpu.memory_space<vmem>>, vector<24x128xbf16>
    %c6_445 = arith.constant 6 : index
    %c0_446 = arith.constant 0 : index
    %c0_447 = arith.constant 0 : index
    %427 = vector.load %arg15[%c6_445, %c0_446, %c0_447] : memref<9x128x128xbf16, #tpu.memory_space<vmem>>, vector<1x128x128xbf16>
    %428 = vector.shape_cast %427 : vector<1x128x128xbf16> to vector<128x128xbf16>
    %cst_448 = arith.constant dense<0.000000e+00> : vector<24x128xf32>
    %429 = tpu.matmul %426, %428, %cst_448 {dimension_numbers = #tpu.dot_dimension_numbers<[1], [0], [0], [1], [0, 0, 1, 1], [], []>} : vector<24x128xbf16>, vector<128x128xbf16>, vector<24x128xf32> -> vector<24x128xf32>
    %430 = arith.addf %425, %429 : vector<24x128xf32>
    %c13_449 = arith.constant 13 : index
    %c0_450 = arith.constant 0 : index
    %431 = vector.load %arg24[%c13_449, %c0_450] : memref<42x128xbf16, #tpu.memory_space<vmem>>, vector<24x128xbf16>
    %c7_451 = arith.constant 7 : index
    %c0_452 = arith.constant 0 : index
    %c0_453 = arith.constant 0 : index
    %432 = vector.load %arg15[%c7_451, %c0_452, %c0_453] : memref<9x128x128xbf16, #tpu.memory_space<vmem>>, vector<1x128x128xbf16>
    %433 = vector.shape_cast %432 : vector<1x128x128xbf16> to vector<128x128xbf16>
    %cst_454 = arith.constant dense<0.000000e+00> : vector<24x128xf32>
    %434 = tpu.matmul %431, %433, %cst_454 {dimension_numbers = #tpu.dot_dimension_numbers<[1], [0], [0], [1], [0, 0, 1, 1], [], []>} : vector<24x128xbf16>, vector<128x128xbf16>, vector<24x128xf32> -> vector<24x128xf32>
    %435 = arith.addf %430, %434 : vector<24x128xf32>
    %c14_455 = arith.constant 14 : index
    %c0_456 = arith.constant 0 : index
    %436 = vector.load %arg24[%c14_455, %c0_456] : memref<42x128xbf16, #tpu.memory_space<vmem>>, vector<24x128xbf16>
    %c8_457 = arith.constant 8 : index
    %c0_458 = arith.constant 0 : index
    %c0_459 = arith.constant 0 : index
    %437 = vector.load %arg15[%c8_457, %c0_458, %c0_459] : memref<9x128x128xbf16, #tpu.memory_space<vmem>>, vector<1x128x128xbf16>
    %438 = vector.shape_cast %437 : vector<1x128x128xbf16> to vector<128x128xbf16>
    %cst_460 = arith.constant dense<0.000000e+00> : vector<24x128xf32>
    %439 = tpu.matmul %436, %438, %cst_460 {dimension_numbers = #tpu.dot_dimension_numbers<[1], [0], [0], [1], [0, 0, 1, 1], [], []>} : vector<24x128xbf16>, vector<128x128xbf16>, vector<24x128xf32> -> vector<24x128xf32>
    %440 = arith.addf %435, %439 : vector<24x128xf32>
    %c0_461 = arith.constant 0 : index
    %c0_462 = arith.constant 0 : index
    %441 = vector.load %arg16[%c0_461, %c0_462] : memref<1x128xf32, #tpu.memory_space<vmem>>, vector<1x128xf32>
    %442 = vector.broadcast %441 : vector<1x128xf32> to vector<24x128xf32>
    %443 = arith.mulf %440, %442 : vector<24x128xf32>
    %c0_463 = arith.constant 0 : index
    %c0_464 = arith.constant 0 : index
    %444 = vector.load %arg17[%c0_463, %c0_464] : memref<1x128xf32, #tpu.memory_space<vmem>>, vector<1x128xf32>
    %445 = vector.broadcast %444 : vector<1x128xf32> to vector<24x128xf32>
    %446 = arith.addf %443, %445 : vector<24x128xf32>
    %cst_465 = arith.constant 0.000000e+00 : f32
    %447 = vector.broadcast %cst_465 : f32 to vector<24x128xf32>
    %448 = arith.maximumf %446, %447 : vector<24x128xf32>
    %449 = arith.truncf %448 : vector<24x128xf32> to vector<24x128xbf16>
    %c0_466 = arith.constant 0 : index
    %c0_467 = arith.constant 0 : index
    %450 = vector.load %arg18[%c0_466, %c0_467] : memref<128x128xbf16, #tpu.memory_space<vmem>>, vector<128x128xbf16>
    %cst_468 = arith.constant dense<0.000000e+00> : vector<24x128xf32>
    %451 = tpu.matmul %449, %450, %cst_468 {dimension_numbers = #tpu.dot_dimension_numbers<[1], [0], [0], [1], [0, 0, 1, 1], [], []>} : vector<24x128xbf16>, vector<128x128xbf16>, vector<24x128xf32> -> vector<24x128xf32>
    %c0_469 = arith.constant 0 : index
    %c0_470 = arith.constant 0 : index
    %452 = vector.load %arg19[%c0_469, %c0_470] : memref<1x128xf32, #tpu.memory_space<vmem>>, vector<1x128xf32>
    %453 = vector.broadcast %452 : vector<1x128xf32> to vector<24x128xf32>
    %454 = arith.addf %451, %453 : vector<24x128xf32>
    %c0_471 = arith.constant 0 : index
    %c0_472 = arith.constant 0 : index
    %c0_473 = arith.constant 0 : index
    %455 = vector.load %arg20[%c0_471, %c0_472, %c0_473] : memref<1x24x128xf32, #tpu.memory_space<vmem>>, vector<1x24x128xf32>
    %456 = vector.shape_cast %455 : vector<1x24x128xf32> to vector<24x128xf32>
    %457 = vector.shape_cast %454 : vector<24x128xf32> to vector<1x24x128xf32>
    tpu.vector_store %arg20[%c0_471, %c0_472, %c0_473], %457 {strides = array<i32>} : memref<1x24x128xf32, #tpu.memory_space<vmem>>, vector<1x24x128xf32>,
    return
  }
  func.func @transform_0(%arg0: i32) -> (i32, i32, i32) {
    %c0_i32 = arith.constant 0 : i32
    %c0_i32_0 = arith.constant 0 : i32
    %c0_i32_1 = arith.constant 0 : i32
    return %arg0, %c0_i32, %c0_i32_0 : i32, i32, i32
  }
  func.func @transform_1(%arg0: i32) -> (i32, i32) {
    %c0_i32 = arith.constant 0 : i32
    %c0_i32_0 = arith.constant 0 : i32
    %c0_i32_1 = arith.constant 0 : i32
    return %c0_i32, %c0_i32_0 : i32, i32
  }
  func.func @transform_2(%arg0: i32) -> (i32, i32) {
    %c0_i32 = arith.constant 0 : i32
    %c0_i32_0 = arith.constant 0 : i32
    %c0_i32_1 = arith.constant 0 : i32
    return %c0_i32, %c0_i32_0 : i32, i32
  }
  func.func @transform_3(%arg0: i32) -> (i32, i32) {
    %c0_i32 = arith.constant 0 : i32
    %c0_i32_0 = arith.constant 0 : i32
    %c0_i32_1 = arith.constant 0 : i32
    return %c0_i32, %c0_i32_0 : i32, i32
  }
  func.func @transform_4(%arg0: i32) -> (i32, i32) {
    %c0_i32 = arith.constant 0 : i32
    %c0_i32_0 = arith.constant 0 : i32
    %c0_i32_1 = arith.constant 0 : i32
    return %c0_i32, %c0_i32_0 : i32, i32
  }
  func.func @transform_5(%arg0: i32) -> (i32, i32, i32) {
    %c0_i32 = arith.constant 0 : i32
    %c0_i32_0 = arith.constant 0 : i32
    %c0_i32_1 = arith.constant 0 : i32
    %c0_i32_2 = arith.constant 0 : i32
    return %c0_i32, %c0_i32_0, %c0_i32_1 : i32, i32, i32
  }
  func.func @transform_6(%arg0: i32) -> (i32, i32) {
    %c0_i32 = arith.constant 0 : i32
    %c0_i32_0 = arith.constant 0 : i32
    %c0_i32_1 = arith.constant 0 : i32
    return %c0_i32, %c0_i32_0 : i32, i32
  }
  func.func @transform_7(%arg0: i32) -> (i32, i32) {
    %c0_i32 = arith.constant 0 : i32
    %c0_i32_0 = arith.constant 0 : i32
    %c0_i32_1 = arith.constant 0 : i32
    return %c0_i32, %c0_i32_0 : i32, i32
  }
  func.func @transform_8(%arg0: i32) -> (i32, i32, i32) {
    %c0_i32 = arith.constant 0 : i32
    %c0_i32_0 = arith.constant 0 : i32
    %c0_i32_1 = arith.constant 0 : i32
    %c0_i32_2 = arith.constant 0 : i32
    return %c0_i32, %c0_i32_0, %c0_i32_1 : i32, i32, i32
  }
  func.func @transform_9(%arg0: i32) -> (i32, i32) {
    %c0_i32 = arith.constant 0 : i32
    %c0_i32_0 = arith.constant 0 : i32
    %c0_i32_1 = arith.constant 0 : i32
    return %c0_i32, %c0_i32_0 : i32, i32
  }
  func.func @transform_10(%arg0: i32) -> (i32, i32) {
    %c0_i32 = arith.constant 0 : i32
    %c0_i32_0 = arith.constant 0 : i32
    %c0_i32_1 = arith.constant 0 : i32
    return %c0_i32, %c0_i32_0 : i32, i32
  }
  func.func @transform_11(%arg0: i32) -> (i32, i32, i32) {
    %c0_i32 = arith.constant 0 : i32
    %c0_i32_0 = arith.constant 0 : i32
    %c0_i32_1 = arith.constant 0 : i32
    %c0_i32_2 = arith.constant 0 : i32
    return %c0_i32, %c0_i32_0, %c0_i32_1 : i32, i32, i32
  }
  func.func @transform_12(%arg0: i32) -> (i32, i32) {
    %c0_i32 = arith.constant 0 : i32
    %c0_i32_0 = arith.constant 0 : i32
    %c0_i32_1 = arith.constant 0 : i32
    return %c0_i32, %c0_i32_0 : i32, i32
  }
  func.func @transform_13(%arg0: i32) -> (i32, i32) {
    %c0_i32 = arith.constant 0 : i32
    %c0_i32_0 = arith.constant 0 : i32
    %c0_i32_1 = arith.constant 0 : i32
    return %c0_i32, %c0_i32_0 : i32, i32
  }
  func.func @transform_14(%arg0: i32) -> (i32, i32, i32) {
    %c0_i32 = arith.constant 0 : i32
    %c0_i32_0 = arith.constant 0 : i32
    %c0_i32_1 = arith.constant 0 : i32
    %c0_i32_2 = arith.constant 0 : i32
    return %c0_i32, %c0_i32_0, %c0_i32_1 : i32, i32, i32
  }
  func.func @transform_15(%arg0: i32) -> (i32, i32) {
    %c0_i32 = arith.constant 0 : i32
    %c0_i32_0 = arith.constant 0 : i32
    %c0_i32_1 = arith.constant 0 : i32
    return %c0_i32, %c0_i32_0 : i32, i32
  }
  func.func @transform_16(%arg0: i32) -> (i32, i32) {
    %c0_i32 = arith.constant 0 : i32
    %c0_i32_0 = arith.constant 0 : i32
    %c0_i32_1 = arith.constant 0 : i32
    return %c0_i32, %c0_i32_0 : i32, i32
  }
  func.func @transform_17(%arg0: i32) -> (i32, i32) {
    %c0_i32 = arith.constant 0 : i32
    %c0_i32_0 = arith.constant 0 : i32
    %c0_i32_1 = arith.constant 0 : i32
    return %c0_i32, %c0_i32_0 : i32, i32
  }
  func.func @transform_18(%arg0: i32) -> (i32, i32) {
    %c0_i32 = arith.constant 0 : i32
    %c0_i32_0 = arith.constant 0 : i32
    %c0_i32_1 = arith.constant 0 : i32
    return %c0_i32, %c0_i32_0 : i32, i32
  }
  func.func @transform_19(%arg0: i32) -> (i32, i32, i32) {
    %c0_i32 = arith.constant 0 : i32
    %c0_i32_0 = arith.constant 0 : i32
    %c0_i32_1 = arith.constant 0 : i32
    return %arg0, %c0_i32, %c0_i32_0 : i32, i32, i32
  }
}

</mosaic_0001>

<bundles_post_ra>
// kernel: huge_head_forward.1
= control target key start
LH: loop header
LB: loop body
LE: loop exit
PB: predicated region body
PF: predicated region fallthrough
CT: control target
= control target key end

     0   :  { %s14923_s0 = inlined_call_operand.vmem [shape: bf16[2,96,36], index: 0, kind: input, shape index: {}]   ;;  %s14924_s1 = inlined_call_operand.vmem [shape: f32[96,1], index: 1, kind: input, shape index: {}]   ;;  %s14925_s2 = inlined_call_operand.vmem [shape: bf16[36,128], index: 2, kind: input, shape index: {}]   ;;  %s14926_s3 = inlined_call_operand.vmem [shape: f32[1,128], index: 3, kind: input, shape index: {}]   ;;  %s14927_s4 = inlined_call_operand.vmem [shape: f32[1,128], index: 4, kind: input, shape index: {}]   ;;  %s14928_s5 = inlined_call_operand.vmem [shape: bf16[9,128,128], index: 5, kind: input, shape index: {}]   ;;  %s14929_s6 = inlined_call_operand.vmem [shape: f32[1,128], index: 6, kind: input, shape index: {}]   ;;  %s14930_s7 = inlined_call_operand.vmem [shape: f32[1,128], index: 7, kind: input, shape index: {}]   ;;  %s14931_s8 = inlined_call_operand.vmem [shape: bf16[9,128,128], index: 8, kind: input, shape index: {}]   ;;  %s14932_s9 = inlined_call_operand.vmem [shape: f32[1,128], index: 9, kind: input, shape index: {}]   ;;  %s14933_s10 = inlined_call_operand.vmem [shape: f32[1,128], index: 10, kind: input, shape index: {}]   ;;  %s14934_s11 = inlined_call_operand.vmem [shape: bf16[9,128,128], index: 11, kind: input, shape index: {}]   ;;  %s14935_s12 = inlined_call_operand.vmem [shape: f32[1,128], index: 12, kind: input, shape index: {}]   ;;  %s14936_s13 = inlined_call_operand.vmem [shape: f32[1,128], index: 13, kind: input, shape index: {}]   ;;  %s14937_s14 = inlined_call_operand.vmem [shape: bf16[9,128,128], index: 14, kind: input, shape index: {}]   ;;  %s14938_s15 = inlined_call_operand.vmem [shape: f32[1,128], index: 15, kind: input, shape index: {}]   ;;  %s14939_s16 = inlined_call_operand.vmem [shape: f32[1,128], index: 16, kind: input, shape index: {}]   ;;  %s14940_s17 = inlined_call_operand.vmem [shape: bf16[128,128], index: 17, kind: input, shape index: {}]   ;;  %s14941_s18 = inlined_call_operand.vmem [shape: f32[1,128], index: 18, kind: input, shape index: {}]   ;;  %s14942_s19 = inlined_call_operand.vmem [shape: f32[2,24,128], index: 19, kind: output, shape index: {}]  }
   0x1   :  { %14949 = sst [smem:[#allocation6_spill]] %s14923_s0  ;;  %s12364_s0 = smov 0  }
   0x2   :  { %14950 = sst [smem:[#allocation7_spill]] %s14924_s1 }
   0x3   :  { %14951 = sst [smem:[#allocation8_spill]] %s14925_s2 }
   0x4   :  { %14952 = sst [smem:[#allocation9_spill]] %s14926_s3 }
   0x5 LB: > { %s8427_s30 = sadd.s32 4294967295, %s12261_s0   ;;  %p8431_p0 = scmp.ge.s32.totalorder %s12261_s0, 1  ;;  %s12261_s0 = sphi %s12364_s0, %s29_s0  }
   0x6   : > { %p537_p1 = scmp.lt.s32.totalorder %s12261_s0, 3 }
   0x8   : > { %p538_p2 = pnand %p8431_p0, %p537_p1 }
   0x9   : > { %s14955_s1 = sld [smem:[#allocation8_spill]] (!%p538_p2)  ;;  %p593_p3 = scmp.lt.s32.totalorder (!%p538_p2), %s8427_s30, 1 }
   0xa   : > { %541 = sbr.rel (%p538_p2) target bundleno = 1556 (0x614), region = 96  ;;  %s14956_s23 = sld [smem:[#allocation7_spill]] (!%p538_p2) }
   0xb   : > { %s14957_s22 = sld [smem:[#allocation6_spill]] (!%p538_p2) }
   0xc   : > { %s14962_s25 = sld [smem:[#allocation9_spill]] (!%p538_p2) }
   0xf   : > { %vm648_vm0 = vcmask 1041408   ;;  %vm649_vm1 = vsmask.f32 1280  ;;  %v651_v0 = vld [vmem:[#allocation2 + $0x2c] sm:$0x3]  ;;  %v12263_v8 = vmov 0  }
  0x10   : > { %vm12374_vm2 = vmand %vm648_vm0, %vm649_vm1  ;;  %v662_v2 = vld [vmem:[#allocation3 + $0x2c] sm:$0x3]  ;;  %v726_v3 = vld [vmem:[%s14955_s1 + $0x10] sm:$0x3]  ;;  %12219 = vset.pattern.permute.xlu0 %v12263_v8  ;;  %12220 = vset.pattern.permute.xlu1 %v12263_v8  ;;  %s15002_s30 = smov (!%p593_p3, %s8427_s30), 1  ;;  %vm772_vm3 = vcmask 293888  }
  0x11   : > { %v652_v4 = vsel %vm12374_vm2, 0, %v651_v0  ;;  %v663_v5 = vsel %vm12374_vm2, 0, %v662_v2  ;;  %v766_v6 = vunpack.c.l.b16 %v726_v3  ;;  %v887_v7 = vld [vmem:[%s14956_s23 + $0x48] sm:$0xff]  ;;  %v884_v9 = vld [vmem:[%s14956_s23 + $0x30] sm:$0xff]  ;;  %12221 = vset.pattern.permute.xlu2 %v12263_v8  ;;  %s12208_s27 = smul.u32 48, %s15002_s30  ;;  %v11592_v13 = vld [vmem:[%s14955_s1] sm:$0xff] }
  0x12   : > { %653 = vst [vmem:[#allocation2 + $0x2c] sm:$0x3] %v652_v4  ;;  %937 = vperm.xlu0 %12219, %v887_v7   ;;  %922 = vperm.xlu1 %12220, %v884_v9   ;;  %v11593_v11 = vld [vmem:[%s14955_s1 + $0x8] sm:$0xff]  ;;  %v888_v14 = vld [vmem:[%s14956_s23 + $0x50] sm:$0xff]  ;;  %v885_v15 = vld [vmem:[%s14956_s23 + $0x38] sm:$0xff]  ;;  %vm604_vm4 = vcmask 1043456  }
  0x13   : > { %664 = vst [vmem:[#allocation3 + $0x2c] sm:$0x3] %v663_v5  ;;  %v769_v10 = vpack.c.b16 %v766_v6, %v766_v6  ;;  %s12404_s2 = scalar_lea.vmem %s14957_s22, %s12208_s27  ;;  %v878_v17 = vld [vmem:[%s14956_s23] sm:$0xff]  ;;  %v879_v18 = vld [vmem:[%s14956_s23 + $0x8] sm:$0xff]  ;;  %v889_v19 = vld [vmem:[%s14956_s23 + $0x58] sm:$0xff]  ;;  %vm610_vm7 = vcmask 1043459  }
  0x14   : > { %v11586_v16 = vld [vmem:[%s12404_s2] sm:$0xff]  ;;  %616 = vst [vmem:[#allocation2 + $0x10] sm:$0xf] %v12263_v8  ;;  %947 = vperm.xlu2 %12221, %v889_v19   ;;  %v881_v20 = vld [vmem:[%s14956_s23 + $0x18] sm:$0xff]  ;;  %v11587_v21 = vld [vmem:[%s12404_s2 + $0x8] sm:$0xff]  ;;  %vm627_vm10 = vcmask 1040384  }
  0x15   : > { %v793_v12 = vsel %vm648_vm0, %v769_v10, 0  ;;  %647 = vst [vmem:[#allocation2 + $0x28] sm:$0xc] %v12263_v8  ;;  %v886_v22 = vld [vmem:[%s14956_s23 + $0x40] sm:$0xff]  ;;  %v880_v24 = vld [vmem:[%s14956_s23 + $0x10] sm:$0xff]  ;;  %v11589_v26 = vld [vmem:[%s12404_s2 + $0x18] sm:$0xff] }
  0x16   : > { %800 = vmatpush.bf16.msra.mxu0 %v793_v12  ;;  %661 = vst [vmem:[#allocation3 + $0x28] sm:$0xc] %v12263_v8  ;;  %v882_v23 = vld [vmem:[%s14956_s23 + $0x20] sm:$0xff]  ;;  %v11588_v25 = vld [vmem:[%s12404_s2 + $0x10] sm:$0xff]  ;;  %v883_v27 = vld [vmem:[%s14956_s23 + $0x28] sm:$0xff]  ;;  %s12209_s24 = smul.u32 24, %s15002_s30 }
  0x17   : > { %669 = vst [vmem:[#allocation2 + $0x3c] sm:$0x8] %v12263_v8  ;;  %v11590_v28 = vld [vmem:[%s12404_s2 + $0x20] sm:$0xff]  ;;  %v11591_v29 = vld [vmem:[%s12404_s2 + $0x28] sm:$0xff]  ;;  %vm605_vm5 = vsmask.f32 3328 }
  0x18   : > { %683 = vst [vmem:[#allocation3 + $0x3c] sm:$0x8] %v12263_v8  ;;  %v607_v30 = vld [vmem:[#allocation2] sm:$0xf]  ;;  %vm12450_vm6 = vmand %vm604_vm4, %vm605_vm5  ;;  %vm611_vm8 = vsmask.f32 7950  ;;  %s602_s29 = scalar_lea.vmem %s14942_s19, %s12209_s24 }
  0x19   : > { %697 = vst [vmem:[#allocation4 + $0x10] sm:$0xf] %v12263_v8  ;;  %v608_v32 = vsel %vm12450_vm6, 0, %v607_v30  ;;  %vm12460_vm9 = vmand %vm610_vm7, %vm611_vm8  ;;  %v613_v36 = vld [vmem:[#allocation2 + $0xc] sm:$0x8]  ;;  %v12130_v31 = vld [vmem:[%s14937_s14 + $0x1f0] sm:$0xff] }
  0x1a   : > { %801 = vmatpush.bf16.msra.mxu0 %v11593_v11  ;;  %942 = vperm.xlu0 %12219, %v888_v14   ;;  %705 = vst [vmem:[#allocation5 + $0x10] sm:$0xf] %v12263_v8  ;;  %v614_v38 = vsel %vm12460_vm9, 0, %v613_v36  ;;  %v12471_v39 = vld [vmem:[%s14962_s25] ss:$0 sm:$0xff] }
  0x1b   : > { %927 = vperm.xlu1 %12220, %v885_v15   ;;  %609 = vst [vmem:[#allocation2] sm:$0xf] %v608_v32  ;;  %vm628_vm11 = vsmask.f32 256  ;;  %v12476_v40 = vld [vmem:[%s14927_s4] ss:$0 sm:$0xff] }
  0x1c   : > { %932 = vperm.xlu2 %12221, %v886_v22   ;;  %615 = vst [vmem:[#allocation2 + $0xc] sm:$0x8] %v614_v38  ;;  %vm12479_vm12 = vmand %vm627_vm10, %vm628_vm11  ;;  %v630_v42 = vld [vmem:[#allocation2 + $0x18] sm:$0x1]  ;;  %vm633_vm13 = vsmask.f32 7938 }
  0x1d   : > { %v631_v45 = vsel %vm12479_vm12, 0, %v630_v42  ;;  %v635_v50 = vld [vmem:[#allocation2 + $0x24] sm:$0xf]  ;;  %v643_v51 = vld [vmem:[#allocation3 + $0x24] sm:$0xf]  ;;  %vm12492_vm14 = vmand %vm604_vm4, %vm633_vm13  ;;  %vm670_vm10 = vcmask 1042432  }
  0x1e   : > { %802 = vmatpush.bf16.msra.mxu0 %v11592_v13  ;;  %632 = vst [vmem:[#allocation2 + $0x18] sm:$0x1] %v631_v45  ;;  %v636_v54 = vsel %vm12492_vm14, 0, %v635_v50  ;;  %v644_v55 = vsel %vm12492_vm14, 0, %v643_v51  ;;  %vm974_vm15 = vsmask.f32 7440 }
  0x1f   : > { %637 = vst [vmem:[#allocation2 + $0x24] sm:$0xf] %v636_v54  ;;  %vm12509_vm0 = vmor %vm605_vm5, %vm974_vm15  ;;  %v657_v30 = vld [vmem:[#allocation2 + $0x38] sm:$0xe]  ;;  %vm655_vm4 = vsmask.f32 7942 }
  0x20   : > { %645 = vst [vmem:[#allocation3 + $0x24] sm:$0xf] %v644_v55  ;;  %v665_v36 = vld [vmem:[#allocation3 + $0x38] sm:$0xe]  ;;  %vm1017_vm7 = vsmask.f32 4368 }
  0x21   : > { %8466 = vmatmul.msk.bf16.vlgmr.msra.gmra.mxu0 %vm772_vm3, %v11586_v16  ;;  %vm12545_vm8 = vmor %vm628_vm11, %vm1017_vm7  ;;  %vm671_vm13 = vsmask.f32 2304  ;;  %vm676_vm15 = vcmask 1043458   ;;  %vm1057_vm7 = vsmask.f32 5392  ;;  %v12076_v15 = vld [vmem:[%s14937_s14 + $0x40] sm:$0xff] }
  0x22   : > { %892 = vperm.xlu0 %12219, %v878_v17   ;;  %v1009_v0 = vld [vmem:[#allocation2] sm:$0x8]  ;;  %vm12556_vm11 = vmand %vm670_vm10, %vm671_vm13 }
  0x23   : > { %897 = vperm.xlu1 %12220, %v879_v18   ;;  %v1014_v54 = vld [vmem:[#allocation2 + $0xc] sm:$0xf]  ;;  %vm12629_vm10 = vmor %vm649_vm1, %vm1057_vm7  ;;  %vm1100_vm1 = vsmask.f32 6416  ;;  %vm14946_vm7 = vsmask.f32 4352 }
  0x24   : > { %902 = vperm.xlu2 %12221, %v880_v24  }
  0x2a   : > { %907 = vperm.xlu0 %12219, %v881_v20  }
  0x2b   : > { %912 = vperm.xlu1 %12220, %v882_v23  }
  0x2c   : > { %917 = vperm.xlu2 %12221, %v883_v27  }
  0x31   : > { %8467 = vmatmul.msk.bf16.gmra.mxu0 %vm772_vm3, %v11587_v21 }
  0x32   : > { %2162 = vperm.xlu0 %12219, %v878_v17  }
  0x33   : > { %2167 = vperm.xlu1 %12220, %v879_v18  }
  0x34   : > { %2172 = vperm.xlu2 %12221, %v880_v24  }
  0x41   : > { %8468 = vmatmul.msk.bf16.gmra.mxu0 %vm772_vm3, %v11588_v25 }
  0x51   : > { %8469 = vmatmul.msk.bf16.gmra.mxu0 %vm772_vm3, %v11589_v26 }
  0x61   : > { %8470 = vmatmul.msk.bf16.gmra.mxu0 %vm772_vm3, %v11590_v28 }
  0x6e   : > { %v12483_v44 = vpop.permute.xlu2 %947 }
  0x71   : > { %8471 = vmatmul.msk.bf16.gmra.mxu0 %vm772_vm3, %v11591_v29  ;;  %vm654_vm3 = vcmask 1043457  }
  0x72   : > { %vm12517_vm5 = vmand %vm654_vm3, %vm655_vm4  ;;  %vm677_vm3 = vsmask.f32 7946 }
  0x73   : > { %vm12566_vm4 = vmand %vm676_vm15, %vm677_vm3  ;;  %vm14947_vm3 = vcmask 1044480  }
  0x74   : > { %vm12727_vm15 = vmor %vm671_vm13, %vm1100_vm1  ;;  %vm1194_vm13 = vsmask.f32 5376  ;;  %vm14945_vm1 = vsmask.f32 7424 }
  0x76   : > { %v12501_v60 = vpop.permute.xlu2 %932 }
  0x7e   : > { %v903_v16 = vpop.permute.xlu2 %902 }
  0x84   : > { %v12456_v33 = vpop.permute.xlu0 %937  ;;  %v12458_v34 = vpop.permute.xlu1 %922 }
  0x8c   : > { %v12464_v37 = vpop.permute.xlu0 %942 }
  0x8d   : > { %v12488_v47 = vpop.permute.xlu1 %927 }
  0x94   : > { %v893_v49 = vpop.permute.xlu0 %892 }
  0x95   : > { %v898_v2 = vpop.permute.xlu1 %897 }
  0x9c   : > { %v908_v32 = vpop.permute.xlu0 %907 }
  0x9e   : > { %v804_v43 = vpop.f32.mrf.mxu0 }
  0x9f   : > { %v838_v46 = vmul.f32 %v12471_v39, %v804_v43 }
  0xa1   : > { %v854_v48 = vadd.f32 %v12476_v40, %v838_v46 }
  0xa3   : > { %v866_v52 = vmax.f32 %v854_v48, 0.0  ;;  %v658_v48 = vsel %vm12517_vm5, 0, %v657_v30 }
  0xa4   : > { %659 = vst [vmem:[#allocation2 + $0x38] sm:$0xe] %v658_v48 }
  0xa5   : > { %v950_v56 = vmul.f32 %v893_v49, %v866_v52  ;;  %v666_v49 = vsel %vm12517_vm5, 0, %v665_v36 }
  0xa6   : > { %v806_v57 = vpop.f32.mrf.mxu0  ;;  %667 = vst [vmem:[#allocation3 + $0x38] sm:$0xe] %v666_v49 }
  0xa7   : > { %v962_v58 = vpack.c.bf16 %v950_v56, %v950_v56  ;;  %v839_v59 = vmul.f32 %v12471_v39, %v806_v57 }
  0xa9   : > { %v977_v61 = vshll.u32 %v962_v58, 16  ;;  %v980_v62 = vshrl.u32 %v962_v58, 16  ;;  %v855_v63 = vadd.f32 %v12476_v40, %v839_v59 }
  0xab   : > { %v979_v3 = vrot.slane %v977_v61, 5  ;;  %v982_v4 = vrot.slane %v980_v62, 4  ;;  %v867_v5 = vmax.f32 %v855_v63, 0.0  ;;  %v11612_v63 = vld [vmem:[%s14928_s5 + $0x78] sm:$0xff] }
  0xac   : > { %1262 = vmatpush.bf16.msra.mxu1 %v11612_v63 }
  0xad   : > { %v1010_v6 = vsel %vm12460_vm9, %v979_v3, %v1009_v0  ;;  %v951_v7 = vmul.f32 %v898_v2, %v867_v5  ;;  %v983_v9 = vor.u32 %v982_v4, %v979_v3  ;;  %v913_v0 = vpop.permute.xlu1 %912  ;;  %v1049_v5 = vld [vmem:[#allocation2 + $0x18] sm:$0xf] }
  0xae   : > { %1011 = vst [vmem:[#allocation2] sm:$0x8] %v1010_v6  ;;  %v809_v8 = vpop.f32.mrf.mxu0 }
  0xaf   : > { %v963_v10 = vpack.c.bf16 %v951_v7, %v951_v7  ;;  %v840_v11 = vmul.f32 %v12471_v39, %v809_v8  ;;  %v984_v17 = vrot.slane %v983_v9, 4  ;;  %v11611_v8 = vld [vmem:[%s14928_s5 + $0x70] sm:$0xff] }
  0xb0   : > { %1263 = vmatpush.bf16.msra.mxu1 %v11611_v8  ;;  %v11606_v8 = vld [vmem:[%s14928_s5 + $0x48] sm:$0xff] }
  0xb1   : > { %v986_v12 = vshll.u32 %v963_v10, 16  ;;  %v990_v13 = vshrl.u32 %v963_v10, 16  ;;  %v856_v14 = vadd.f32 %v12476_v40, %v840_v11 }
  0xb3   : > { %v988_v18 = vrot.slane %v986_v12, 5  ;;  %v992_v19 = vrot.slane %v990_v13, 4  ;;  %v868_v20 = vmax.f32 %v856_v14, 0.0 }
  0xb5   : > { %v989_v21 = vsel %vm12509_vm0, %v984_v17, %v988_v18  ;;  %v952_v22 = vmul.f32 %v903_v16, %v868_v20  ;;  %v993_v24 = vor.u32 %v992_v19, %v988_v18  ;;  %v11610_v16 = vld [vmem:[%s14928_s5 + $0x68] sm:$0xff]  ;;  %v918_v17 = vpop.permute.xlu2 %917 }
  0xb6   : > { %1012 = vst [vmem:[#allocation2 + $0x4] sm:$0xf] %v989_v21  ;;  %v811_v23 = vpop.f32.mrf.mxu0  ;;  %1264 = vmatpush.bf16.msra.mxu1 %v11610_v16  ;;  %v1092_v16 = vld [vmem:[#allocation2 + $0x2c] sm:$0xe] }
  0xb7   : > { %v964_v25 = vpack.c.bf16 %v952_v22, %v952_v22  ;;  %v841_v26 = vmul.f32 %v12471_v39, %v811_v23  ;;  %v994_v38 = vrot.slane %v993_v24, 4 }
  0xb9   : > { %v996_v27 = vshll.u32 %v964_v25, 16  ;;  %v1000_v28 = vshrl.u32 %v964_v25, 16  ;;  %v857_v29 = vadd.f32 %v12476_v40, %v841_v26  ;;  %v11609_v25 = vld [vmem:[%s14928_s5 + $0x60] sm:$0xff] }
  0xba   : > { %1265 = vmatpush.bf16.msra.mxu1 %v11609_v25 }
  0xbb   : > { %v998_v42 = vrot.slane %v996_v27, 5  ;;  %v1002_v43 = vrot.slane %v1000_v28, 4  ;;  %v869_v45 = vmax.f32 %v857_v29, 0.0  ;;  %v673_v27 = vld [vmem:[#allocation2 + $0x40] sm:$0x7] }
  0xbc   : > { %v674_v36 = vsel %vm12556_vm11, 0, %v673_v27  ;;  %v11693_v27 = vld [vmem:[%s14928_s5 + $0x68] sm:$0xff] }
  0xbd   : > { %v999_v50 = vsel %vm12509_vm0, %v994_v38, %v998_v42  ;;  %v1003_v51 = vor.u32 %v1002_v43, %v998_v42  ;;  %v953_v52 = vmul.f32 %v908_v32, %v869_v45  ;;  %675 = vst [vmem:[#allocation2 + $0x40] sm:$0x7] %v674_v36  ;;  %v11608_v43 = vld [vmem:[%s14928_s5 + $0x58] sm:$0xff]  ;;  %v679_v45 = vld [vmem:[#allocation2 + $0x4c] sm:$0xc] }
  0xbe   : > { %1013 = vst [vmem:[#allocation2 + $0x8] sm:$0xf] %v999_v50  ;;  %v814_v55 = vpop.f32.mrf.mxu0  ;;  %1266 = vmatpush.bf16.msra.mxu1 %v11608_v43  ;;  %v11629_v36 = vld [vmem:[%s14928_s5 + $0xf8] sm:$0xff]  ;;  %v11966_v32 = vld [vmem:[%s14931_s8 + $0x168] sm:$0xff] }
  0xbf   : > { %v1004_v56 = vrot.slane %v1003_v51, 4  ;;  %v965_v57 = vpack.c.bf16 %v953_v52, %v953_v52  ;;  %v842_v58 = vmul.f32 %v12471_v39, %v814_v55  ;;  %v687_v52 = vld [vmem:[#allocation3 + $0x4c] sm:$0xc]  ;;  %v680_v55 = vsel %vm12566_vm4, 0, %v679_v45  ;;  %v11991_v51 = vld [vmem:[%s14931_s8 + $0x218] sm:$0xff] }
  0xc0   : > { %681 = vst [vmem:[#allocation2 + $0x4c] sm:$0xc] %v680_v55  ;;  %v11599_v45 = vld [vmem:[%s14928_s5 + $0x20] sm:$0xff] }
  0xc1   : > { %v1015_v59 = vsel %vm12450_vm6, %v1004_v56, %v1014_v54  ;;  %v1020_v61 = vshrl.u32 %v965_v57, 16  ;;  %v858_v62 = vadd.f32 %v12476_v40, %v842_v58  ;;  %v1023_v3 = vshll.u32 %v965_v57, 16  ;;  %v1054_v54 = vld [vmem:[#allocation2 + $0x24] sm:$0x1] }
  0xc2   : > { %1016 = vst [vmem:[#allocation2 + $0xc] sm:$0xf] %v1015_v59  ;;  %v688_v56 = vsel %vm12566_vm4, 0, %v687_v52 }
  0xc3   : > { %v1022_v2 = vrot.slane %v1020_v61, 7  ;;  %v870_v4 = vmax.f32 %v858_v62, 0.0  ;;  %v11607_v62 = vld [vmem:[%s14928_s5 + $0x50] sm:$0xff]  ;;  %689 = vst [vmem:[#allocation3 + $0x4c] sm:$0xc] %v688_v56 }
  0xc4   : > { %1267 = vmatpush.bf16.msra.mxu1 %v11607_v62  ;;  %v11628_v56 = vld [vmem:[%s14928_s5 + $0xf0] sm:$0xff]  ;;  %v11598_v62 = vld [vmem:[%s14928_s5 + $0x18] sm:$0xff] }
  0xc5   : > { %v1025_v6 = vor.u32 %v1023_v3, %v1022_v2  ;;  %v954_v7 = vmul.f32 %v913_v0, %v870_v4  ;;  %v1026_v22 = vrot.slane %v1022_v2, 4 }
  0xc6   : > { %v816_v9 = vpop.f32.mrf.mxu0 }
  0xc7   : > { %v1050_v10 = vsel %vm12492_vm14, %v1025_v6, %v1049_v5  ;;  %v966_v11 = vpack.c.bf16 %v954_v7, %v954_v7  ;;  %v843_v12 = vmul.f32 %v12471_v39, %v816_v9  ;;  %v11695_v9 = vld [vmem:[%s14928_s5 + $0x78] sm:$0xff] }
  0xc8   : > { %1051 = vst [vmem:[#allocation2 + $0x18] sm:$0xf] %v1050_v10  ;;  %1268 = vmatpush.bf16.msra.mxu1 %v11606_v8  ;;  %2339 = vmatpush.bf16.msrb.mxu0 %v11695_v9  ;;  %v11626_v9 = vld [vmem:[%s14928_s5 + $0xe0] sm:$0xff] }
  0xc9   : > { %v1028_v13 = vshrl.u32 %v966_v11, 16  ;;  %v859_v14 = vadd.f32 %v12476_v40, %v843_v12  ;;  %v1031_v19 = vshll.u32 %v966_v11, 16 }
  0xcb   : > { %v1030_v18 = vrot.slane %v1028_v13, 7  ;;  %v871_v20 = vmax.f32 %v859_v14, 0.0  ;;  %v11601_v13 = vld [vmem:[%s14928_s5 + $0x30] sm:$0xff]  ;;  %v11620_v14 = vld [vmem:[%s14928_s5 + $0xb8] sm:$0xff] }
  0xcc   : > { %1451 = vmatpush.bf16.msra.mxu3 %v11620_v14  ;;  %v11596_v14 = vld [vmem:[%s14928_s5 + $0x8] sm:$0xff] }
  0xcd   : > { %v1033_v23 = vor.u32 %v1031_v19, %v1030_v18  ;;  %v955_v24 = vmul.f32 %v918_v17, %v871_v20  ;;  %v1035_v57 = vrot.slane %v1030_v18, 4  ;;  %v11694_v17 = vld [vmem:[%s14928_s5 + $0x70] sm:$0xff]  ;;  %v11605_v20 = vld [vmem:[%s14928_s5 + $0x40] sm:$0xff] }
  0xce   : > { %v819_v26 = vpop.f32.mrf.mxu0  ;;  %1269 = vmatpush.bf16.msra.mxu1 %v11605_v20  ;;  %2340 = vmatpush.bf16.msrb.mxu0 %v11694_v17  ;;  %v1097_v17 = vld [vmem:[#allocation2 + $0x38] sm:$0x3] }
  0xcf   : > { %v1034_v28 = vsel %vm12545_vm8, %v1026_v22, %v1033_v23  ;;  %v967_v29 = vpack.c.bf16 %v955_v24, %v955_v24  ;;  %v844_v30 = vmul.f32 %v12471_v39, %v819_v26  ;;  %v11600_v26 = vld [vmem:[%s14928_s5 + $0x28] sm:$0xff] }
  0xd0   : > { %1052 = vst [vmem:[#allocation2 + $0x1c] sm:$0xf] %v1034_v28 }
  0xd1   : > { %v1037_v38 = vshrl.u32 %v967_v29, 16  ;;  %v860_v42 = vadd.f32 %v12476_v40, %v844_v30  ;;  %v1040_v49 = vshll.u32 %v967_v29, 16 }
  0xd2   : > { %1550 = vmatpush.bf16.msrb.mxu1 %v11629_v36  ;;  %2341 = vmatpush.bf16.msrb.mxu0 %v11693_v27  ;;  %v11614_v36 = vld [vmem:[%s14928_s5 + $0x88] sm:$0xff] }
  0xd3   : > { %v1039_v48 = vrot.slane %v1037_v38, 7  ;;  %v872_v50 = vmax.f32 %v860_v42, 0.0 }
  0xd5   : > { %v1042_v58 = vor.u32 %v1040_v49, %v1039_v48  ;;  %v1044_v59 = vrot.slane %v1039_v48, 4  ;;  %v956_v61 = vmul.f32 %v12458_v34, %v872_v50  ;;  %v11602_v34 = vld [vmem:[%s14928_s5 + $0x38] sm:$0xff]  ;;  %v11618_v48 = vld [vmem:[%s14928_s5 + $0xa8] sm:$0xff]  ;;  %v11692_v50 = vld [vmem:[%s14928_s5 + $0x60] sm:$0xff] }
  0xd6   : > { %v821_v63 = vpop.f32.mrf.mxu0  ;;  %1344 = vmatpush.bf16.msra.mxu2 %v11602_v34  ;;  %1551 = vmatpush.bf16.msrb.mxu1 %v11628_v56  ;;  %v11597_v34 = vld [vmem:[%s14928_s5 + $0x10] sm:$0xff] }
  0xd7   : > { %v1043_v0 = vsel %vm12545_vm8, %v1035_v57, %v1042_v58  ;;  %v1055_v2 = vsel %vm12479_vm12, %v1044_v59, %v1054_v54  ;;  %v968_v3 = vpack.c.bf16 %v956_v61, %v956_v61  ;;  %v845_v4 = vmul.f32 %v12471_v39, %v821_v63  ;;  %2342 = vmatpush.bf16.msrb.mxu0 %v11692_v50  ;;  %v11691_v63 = vld [vmem:[%s14928_s5 + $0x58] sm:$0xff]  ;;  %v11688_v50 = vld [vmem:[%s14928_s5 + $0x40] sm:$0xff] }
  0xd8   : > { %1053 = vst [vmem:[#allocation2 + $0x20] sm:$0xf] %v1043_v0 }
  0xd9   : > { %1056 = vst [vmem:[#allocation2 + $0x24] sm:$0x1] %v1055_v2  ;;  %v1060_v5 = vshrl.u32 %v968_v3, 16  ;;  %v1063_v6 = vshll.u32 %v968_v3, 16  ;;  %v861_v7 = vadd.f32 %v12476_v40, %v845_v4  ;;  %v11627_v4 = vld [vmem:[%s14928_s5 + $0xe8] sm:$0xff] }
  0xda   : > { %1345 = vmatpush.bf16.msra.mxu2 %v11601_v13  ;;  %1552 = vmatpush.bf16.msrb.mxu1 %v11627_v4 }
  0xdb   : > { %v1062_v10 = vrot.slane %v1060_v5, 6  ;;  %v1065_v11 = vrot.slane %v1063_v6, 7  ;;  %v873_v12 = vmax.f32 %v861_v7, 0.0  ;;  %v11616_v5 = vld [vmem:[%s14928_s5 + $0x98] sm:$0xff]  ;;  %2343 = vmatpush.bf16.msrb.mxu0 %v11691_v63 }
  0xdd   : > { %v1066_v18 = vor.u32 %v1065_v11, %v1062_v10  ;;  %v957_v19 = vmul.f32 %v12488_v47, %v873_v12  ;;  %v11619_v47 = vld [vmem:[%s14928_s5 + $0xb0] sm:$0xff] }
  0xde   : > { %v824_v22 = vpop.f32.mrf.mxu0  ;;  %1346 = vmatpush.bf16.msra.mxu2 %v11600_v26  ;;  %1452 = vmatpush.bf16.msra.mxu3 %v11619_v47  ;;  %v11690_v10 = vld [vmem:[%s14928_s5 + $0x50] sm:$0xff] }
  0xdf   : > { %v1093_v23 = vsel %vm12517_vm5, %v1066_v18, %v1092_v16  ;;  %v969_v24 = vpack.c.bf16 %v957_v19, %v957_v19  ;;  %v846_v25 = vmul.f32 %v12471_v39, %v824_v22  ;;  %v1067_v52 = vrot.slane %v1066_v18, 4  ;;  %v11615_v16 = vld [vmem:[%s14928_s5 + $0x90] sm:$0xff]  ;;  %1553 = vmatpush.bf16.msrb.mxu1 %v11626_v9  ;;  %2344 = vmatpush.bf16.msrb.mxu0 %v11690_v10 }
  0xe0   : > { %1094 = vst [vmem:[#allocation2 + $0x2c] sm:$0xe] %v1093_v23 }
  0xe1   : > { %v1069_v28 = vshrl.u32 %v969_v24, 16  ;;  %v1072_v29 = vshll.u32 %v969_v24, 16  ;;  %v862_v30 = vadd.f32 %v12476_v40, %v846_v25  ;;  %v11689_v25 = vld [vmem:[%s14928_s5 + $0x48] sm:$0xff] }
  0xe2   : > { %1347 = vmatpush.bf16.msra.mxu2 %v11599_v45  ;;  %1453 = vmatpush.bf16.msra.mxu3 %v11618_v48  ;;  %v11624_v48 = vld [vmem:[%s14928_s5 + $0xd0] sm:$0xff] }
  0xe3   : > { %v1071_v38 = vrot.slane %v1069_v28, 6  ;;  %v1074_v42 = vrot.slane %v1072_v29, 7  ;;  %v874_v43 = vmax.f32 %v862_v30, 0.0  ;;  %v11625_v29 = vld [vmem:[%s14928_s5 + $0xd8] sm:$0xff]  ;;  %v11595_v30 = vld [vmem:[%s14928_s5] sm:$0xff]  ;;  %2345 = vmatpush.bf16.msrb.mxu0 %v11689_v25 }
  0xe4   : > { %1554 = vmatpush.bf16.msrb.mxu1 %v11625_v29 }
  0xe5   : > { %v1075_v54 = vor.u32 %v1074_v42, %v1071_v38  ;;  %v958_v55 = vmul.f32 %v12501_v60, %v874_v43  ;;  %v11617_v60 = vld [vmem:[%s14928_s5 + $0xa0] sm:$0xff] }
  0xe6   : > { %v826_v57 = vpop.f32.mrf.mxu0  ;;  %1348 = vmatpush.bf16.msra.mxu2 %v11598_v62  ;;  %1454 = vmatpush.bf16.msra.mxu3 %v11617_v60 }
  0xe7   : > { %v1076_v58 = vsel %vm12629_vm10, %v1067_v52, %v1075_v54  ;;  %v970_v59 = vpack.c.bf16 %v958_v55, %v958_v55  ;;  %v847_v61 = vmul.f32 %v12471_v39, %v826_v57  ;;  %v1077_v11 = vrot.slane %v1075_v54, 4  ;;  %v11603_v24 = vld [vmem:[#allocation2 + $0x28] sm:$0xf0]  ;;  %v1135_v52 = vld [vmem:[#allocation2 + $0x40] sm:$0xc]  ;;  %2346 = vmatpush.bf16.msrb.mxu0 %v11688_v50  ;;  %v11657_v50 = vld [vmem:[%s14928_s5 + $0x1b0] sm:$0xff] }
  0xe8   : > { %1095 = vst [vmem:[#allocation2 + $0x30] sm:$0xf] %v1076_v58  ;;  %1555 = vmatpush.bf16.msrb.mxu1 %v11624_v48 }
  0xe9   : > { %v1079_v0 = vshrl.u32 %v970_v59, 16  ;;  %v1082_v2 = vshll.u32 %v970_v59, 16  ;;  %v863_v3 = vadd.f32 %v12476_v40, %v847_v61 }
  0xea   : > { %1349 = vmatpush.bf16.msra.mxu2 %v11597_v34  ;;  %1455 = vmatpush.bf16.msra.mxu3 %v11616_v5 }
  0xeb   : > { %v1081_v6 = vrot.slane %v1079_v0, 6  ;;  %v1084_v7 = vrot.slane %v1082_v2, 7  ;;  %v875_v8 = vmax.f32 %v863_v3, 0.0  ;;  %v11639_v0 = vld [vmem:[%s14928_s5 + $0x138] sm:$0xff]  ;;  %v11623_v3 = vld [vmem:[%s14928_s5 + $0xc8] sm:$0xff] }
  0xec   : > { %1556 = vmatpush.bf16.msrb.mxu1 %v11623_v3 }
  0xed   : > { %v1085_v12 = vor.u32 %v1084_v7, %v1081_v6  ;;  %v959_v13 = vmul.f32 %v12456_v33, %v875_v8  ;;  %v8490_v33 = vld [vmem:[#allocation2 + $0x28] sm:$0xc] }
  0xee   : > { %v829_v18 = vpop.f32.mrf.mxu0  ;;  %1350 = vmatpush.bf16.msra.mxu2 %v11596_v14  ;;  %1456 = vmatpush.bf16.msra.mxu3 %v11615_v16  ;;  %v8491_v38 = vor.u32 %v11603_v24, %v8490_v33  ;;  %v11649_v14 = vld [vmem:[%s14928_s5 + $0x178] sm:$0xff]  ;;  %v11637_v33 = vld [vmem:[%s14928_s5 + $0x128] sm:$0xff]  ;;  %v11976_v16 = vld [vmem:[%s14931_s8 + $0x1b0] sm:$0xff] }
  0xef   : > { %v1086_v19 = vsel %vm12629_vm10, %v1077_v11, %v1085_v12  ;;  %v1087_v20 = vrot.slane %v1085_v12, 4  ;;  %v971_v22 = vpack.c.bf16 %v959_v13, %v959_v13  ;;  %v848_v23 = vmul.f32 %v12471_v39, %v829_v18  ;;  %v8494_v57 = vld [vmem:[#allocation2 + $0x30] sm:$0xf] }
  0xf0   : > { %1096 = vst [vmem:[#allocation2 + $0x34] sm:$0xf] %v1086_v19  ;;  %v1196_v58 = vshrl.u32 %v8491_v38, 16  ;;  %v1199_v59 = vshll.u32 %v8491_v38, 16  ;;  %v11638_v13 = vld [vmem:[%s14928_s5 + $0x130] sm:$0xff]  ;;  %v11636_v38 = vld [vmem:[%s14928_s5 + $0x120] sm:$0xff] }
  0xf1   : > { %v1098_v26 = vsel %vm12374_vm2, %v1087_v20, %v1097_v17  ;;  %v1103_v47 = vshrl.u32 %v971_v22, 16  ;;  %v1106_v27 = vshll.u32 %v971_v22, 16  ;;  %v864_v28 = vadd.f32 %v12476_v40, %v848_v23  ;;  %v11720_v19 = vld [vmem:[%s14928_s5 + $0x130] sm:$0xff] }
  0xf2   : > { %1099 = vst [vmem:[#allocation2 + $0x38] sm:$0x3] %v1098_v26  ;;  %1351 = vmatpush.bf16.msra.mxu2 %v11595_v30  ;;  %1457 = vmatpush.bf16.msra.mxu3 %v11614_v36  ;;  %v1198_v6 = vrot.slane %v1196_v58, 2  ;;  %v1201_v7 = vrot.slane %v1199_v59, 3  ;;  %v11648_v26 = vld [vmem:[%s14928_s5 + $0x170] sm:$0xff]  ;;  %v11658_v36 = vld [vmem:[%s14928_s5 + $0x1b8] sm:$0xff] }
  0xf3   : > { %v1105_v42 = vrot.slane %v1103_v47, 5  ;;  %v1108_v43 = vrot.slane %v1106_v27, 6  ;;  %v876_v45 = vmax.f32 %v864_v28, 0.0  ;;  %v11719_v28 = vld [vmem:[%s14928_s5 + $0x128] sm:$0xff] }
  0xf4   : > { %v1202_v24 = vor.u32 %v1201_v7, %v1198_v6  ;;  %v11716_v6 = vld [vmem:[%s14928_s5 + $0x110] sm:$0xff] }
  0xf5   : > { %v1109_v54 = vor.u32 %v1108_v43, %v1105_v42  ;;  %v960_v55 = vmul.f32 %v12464_v37, %v876_v45  ;;  %v11613_v37 = vld [vmem:[%s14928_s5 + $0x80] sm:$0xff]  ;;  %v11647_v42 = vld [vmem:[%s14928_s5 + $0x168] sm:$0xff] }
  0xf6   : > { %v831_v56 = vpop.f32.mrf.mxu0  ;;  %1669 = vmatpush.bf16.msrb.mxu2 %v11639_v0  ;;  %1458 = vmatpush.bf16.msra.mxu3 %v11613_v37  ;;  %v11718_v43 = vld [vmem:[%s14928_s5 + $0x120] sm:$0xff]  ;;  %v11656_v0 = vld [vmem:[%s14928_s5 + $0x1a8] sm:$0xff]  ;;  %v11717_v37 = vld [vmem:[%s14928_s5 + $0x118] sm:$0xff] }
  0xf7   : > { %v1136_v61 = vsel %vm12566_vm4, %v1109_v54, %v1135_v52  ;;  %v972_v62 = vpack.c.bf16 %v960_v55, %v960_v55  ;;  %v849_v60 = vmul.f32 %v12471_v39, %v831_v56  ;;  %v11604_v63 = vld [vmem:[#allocation2 + $0x30] sm:$0x70]  ;;  %v11721_v39 = vld [vmem:[%s14928_s5 + $0x138] sm:$0xff]  ;;  %v1110_v20 = vrot.slane %v1109_v54, 4  ;;  %v1140_v55 = vld [vmem:[#allocation2 + $0x4c] sm:$0x7] }
  0xf8   : > { %1137 = vst [vmem:[#allocation2 + $0x40] sm:$0xc] %v1136_v61  ;;  %v8495_v2 = vor.u32 %v11604_v63, %v8494_v57  ;;  %2759 = vmatpush.bf16.msra.mxu0 %v11721_v39  ;;  %v8950_v56 = vld [vmem:[#allocation2 + $0x3c] sm:$0x8] }
  0xf9   : > { %v1112_v4 = vshrl.u32 %v972_v62, 16  ;;  %v1115_v34 = vshll.u32 %v972_v62, 16  ;;  %v865_v5 = vadd.f32 %v12476_v40, %v849_v60  ;;  %v11622_v40 = vld [vmem:[%s14928_s5 + $0xc0] sm:$0xff]  ;;  %v8530_v61 = vld [vmem:[#allocation2 + $0x3c] sm:$0x8] }
  0xfa   : > { %v1204_v8 = vshrl.u32 %v8495_v2, 16  ;;  %v1207_v9 = vshll.u32 %v8495_v2, 16  ;;  %1670 = vmatpush.bf16.msrb.mxu2 %v11638_v13  ;;  %1787 = vmatpush.bf16.msrb.mxu3 %v11649_v14  ;;  %v11635_v62 = vld [vmem:[%s14928_s5 + $0x118] sm:$0xff]  ;;  %v11646_v60 = vld [vmem:[%s14928_s5 + $0x160] sm:$0xff] }
  0xfb   : > { %v1114_v10 = vrot.slane %v1112_v4, 5  ;;  %v1117_v11 = vrot.slane %v1115_v34, 6  ;;  %v877_v12 = vmax.f32 %v865_v5, 0.0  ;;  %1557 = vmatpush.bf16.msrb.mxu1 %v11622_v40  ;;  %v11634_v4 = vld [vmem:[%s14928_s5 + $0x110] sm:$0xff]  ;;  %v11645_v34 = vld [vmem:[%s14928_s5 + $0x158] sm:$0xff]  ;;  %v11655_v5 = vld [vmem:[%s14928_s5 + $0x1a0] sm:$0xff] }
  0xfc   : > { %v1206_v17 = vrot.slane %v1204_v8, 2  ;;  %v1209_v18 = vrot.slane %v1207_v9, 3  ;;  %2760 = vmatpush.bf16.msra.mxu0 %v11720_v19  ;;  %v11633_v9 = vld [vmem:[%s14928_s5 + $0x108] sm:$0xff] }
  0xfd   : > { %v1118_v22 = vor.u32 %v1117_v11, %v1114_v10  ;;  %v961_v23 = vmul.f32 %v12483_v44, %v877_v12  ;;  %v11644_v10 = vld [vmem:[%s14928_s5 + $0x150] sm:$0xff] }
  0xfe   : > { %v12738_v25 = vor.u32 %v1209_v18, %v1206_v17  ;;  %1671 = vmatpush.bf16.msrb.mxu2 %v11637_v33  ;;  %1788 = vmatpush.bf16.msrb.mxu3 %v11648_v26  ;;  %v11715_v18 = vld [vmem:[%s14928_s5 + $0x108] sm:$0xff]  ;;  %v11654_v33 = vld [vmem:[%s14928_s5 + $0x198] sm:$0xff] }
  0xff   : > { %v1119_v47 = vsel %vm12727_vm15, %v1110_v20, %v1118_v22  ;;  %v973_v27 = vpack.c.bf16 %v961_v23, %v961_v23  ;;  %v1120_v52 = vrot.slane %v1118_v22, 4  ;;  %v11686_v57 = vld [vmem:[#allocation2 + $0x3c] sm:$0xf0] }
 0x100   : > { %1138 = vst [vmem:[#allocation2 + $0x44] sm:$0xf] %v1119_v47  ;;  %v1211_v44 = vsel %vm1194_vm13, %v1202_v24, %v12738_v25  ;;  %2761 = vmatpush.bf16.msra.mxu0 %v11719_v28  ;;  %v11594_v63 = vld [vmem:[#allocation2 + $0x3c] sm:$0xf0]  ;;  %v8951_v3 = vor.u32 %v11686_v57, %v8950_v56  ;;  %v11668_v56 = vld [vmem:[%s14928_s5 + $0x1f8] sm:$0xff] }
 0x101   : > { %v1122_v29 = vshrl.u32 %v973_v27, 16  ;;  %v1125_v30 = vshll.u32 %v973_v27, 16  ;;  %1270 = vmatmul.bf16.vlgmr.msra.gmra.mxu1 %v1211_v44  ;;  %v8531_v39 = vor.u32 %v11594_v63, %v8530_v61  ;;  %v11632_v24 = vld [vmem:[%s14928_s5 + $0x100] sm:$0xff]  ;;  %v11652_v61 = vld [vmem:[%s14928_s5 + $0x188] sm:$0xff]  ;;  %v11667_v63 = vld [vmem:[%s14928_s5 + $0x1f0] sm:$0xff] }
 0x102   : > { %1893 = vmatpush.bf16.msra.mxu1 %v11658_v36  ;;  %1672 = vmatpush.bf16.msrb.mxu2 %v11636_v38  ;;  %v2273_v7 = vshrl.u32 %v8951_v3, 16  ;;  %v2276_v8 = vshll.u32 %v8951_v3, 16  ;;  %v11714_v47 = vld [vmem:[%s14928_s5 + $0x100] sm:$0xff]  ;;  %v11666_v3 = vld [vmem:[%s14928_s5 + $0x1e8] sm:$0xff] }
 0x103   : > { %v1124_v45 = vrot.slane %v1122_v29, 5  ;;  %v1127_v48 = vrot.slane %v1125_v30, 6  ;;  %1789 = vmatpush.bf16.msrb.mxu3 %v11647_v42  ;;  %v1385_v40 = vshrl.u32 %v8531_v39, 16  ;;  %v1388_v17 = vshll.u32 %v8531_v39, 16  ;;  %v11653_v30 = vld [vmem:[%s14928_s5 + $0x190] sm:$0xff]  ;;  %v11642_v57 = vld [vmem:[%s14928_s5 + $0x140] sm:$0xff] }
 0x104   : > { %2762 = vmatpush.bf16.msra.mxu0 %v11718_v43  ;;  %v2275_v19 = vrot.slane %v2273_v7, 3  ;;  %v2278_v20 = vrot.slane %v2276_v8, 4  ;;  %v1291_v27 = vrot.slane %v8531_v39, 3  ;;  %v11675_v39 = vld [vmem:[%s14928_s5 + $0x230] sm:$0xff]  ;;  %v11674_v7 = vld [vmem:[%s14928_s5 + $0x228] sm:$0xff] }
 0x105   : > { %v1128_v54 = vor.u32 %v1127_v48, %v1124_v45  ;;  %v1387_v29 = vrot.slane %v1385_v40, 3  ;;  %v1390_v38 = vrot.slane %v1388_v17, 4  ;;  %v1474_v17 = vld [vmem:[#allocation2 + $0x20] sm:$0xf] }
 0x106   : > { %1894 = vmatpush.bf16.msra.mxu1 %v11657_v50  ;;  %1673 = vmatpush.bf16.msrb.mxu2 %v11635_v62  ;;  %v2279_v45 = vor.u32 %v2278_v20, %v2275_v19  ;;  %v11756_v62 = vld [vmem:[%s14928_s5 + $0x238] sm:$0xff]  ;;  %v9142_v20 = vld [vmem:[#allocation2 + $0x20] sm:$0xf] }
 0x107   : > { %v1129_v58 = vsel %vm12727_vm15, %v1120_v52, %v1128_v54  ;;  %v1130_v59 = vrot.slane %v1128_v54, 4  ;;  %1790 = vmatpush.bf16.msrb.mxu3 %v11646_v60  ;;  %v12246_v12 = vld [vmem:[#allocation2 + $0x44] sm:$0xf]  }
 0x108   : > { %1139 = vst [vmem:[#allocation2 + $0x48] sm:$0xf] %v1129_v58  ;;  %2763 = vmatpush.bf16.msra.mxu0 %v11717_v37  ;;  %v1391_v58 = vor.u32 %v1390_v38, %v1387_v29  ;;  %v11651_v37 = vld [vmem:[%s14928_s5 + $0x180] sm:$0xff] }
 0x109   : > { %v1141_v2 = vsel %vm12556_vm11, %v1130_v59, %v1140_v55  ;;  %v11784_v8 = vld [vmem:[#allocation2 + $0x40] sm:$0xf0]  ;;  %v8742_v38 = vld [vmem:[#allocation2 + $0x20] sm:$0xf] }
 0x10a   : > { %1142 = vst [vmem:[#allocation2 + $0x4c] sm:$0x7] %v1141_v2  ;;  %1895 = vmatpush.bf16.msra.mxu1 %v11656_v0  ;;  %1674 = vmatpush.bf16.msrb.mxu2 %v11634_v4  ;;  %v11676_v0 = vld [vmem:[%s14928_s5 + $0x238] sm:$0xff]  ;;  %v11755_v2 = vld [vmem:[%s14928_s5 + $0x230] sm:$0xff] }
 0x10b   : > { %1791 = vmatpush.bf16.msrb.mxu3 %v11645_v34  ;;  %v11621_v4 = vld [vmem:[#allocation2 + $0x18] sm:$0xff] }
 0x10c   : > { %2764 = vmatpush.bf16.msra.mxu0 %v11716_v6  ;;  %v11685_v34 = vld [vmem:[%s14928_s5 + $0x38] sm:$0xff]  ;;  %v11665_v6 = vld [vmem:[%s14928_s5 + $0x1e0] sm:$0xff] }
 0x10e   : > { %1896 = vmatpush.bf16.msra.mxu1 %v11655_v5  ;;  %1675 = vmatpush.bf16.msrb.mxu2 %v11633_v9  ;;  %v11754_v5 = vld [vmem:[%s14928_s5 + $0x228] sm:$0xff]  ;;  %v11684_v9 = vld [vmem:[%s14928_s5 + $0x30] sm:$0xff] }
 0x10f   : > { %v1145_v11 = vld [vmem:[#allocation2 + $0x44] sm:$0xff]   ;;  %1792 = vmatpush.bf16.msrb.mxu3 %v11644_v10  ;;  %v9538_v10 = vld [vmem:[#allocation2 + $0x40] sm:$0xc] }
 0x110   : > { %v12256_v13 = vld [vmem:[#allocation2 + $0x44] sm:$0x70]  ;;  %2765 = vmatpush.bf16.msra.mxu0 %v11715_v18  ;;  %v1393_v42 = vshrl.u32 %v1145_v11, 16  ;;  %v1396_v43 = vshll.u32 %v1145_v11, 16  ;;  %v8682_v11 = vld [vmem:[#allocation2] sm:$0x8]  ;;  %v12872_v40 = vor.u32 %v11784_v8, %v9538_v10 }
 0x111   : > { %v11687_v14 = vld [vmem:[#allocation2 + $0x44] sm:$0xff]  ;;  %1275 = vmatmul.bf16.gmra.mxu1 %v12738_v25  ;;  %v12247_v26 = vor.u32 %v12256_v13, %v12246_v12  ;;  %v12874_v18 = vld [vmem:[#allocation2 + $0x18] sm:$0xff] }
 0x112   : > { %v2281_v22 = vshrl.u32 %v11687_v14, 16  ;;  %v2284_v23 = vshll.u32 %v11687_v14, 16  ;;  %v11643_v25 = vld [vmem:[%s14928_s5 + $0x148] sm:$0xff]  ;;  %1897 = vmatpush.bf16.msra.mxu1 %v11654_v33  ;;  %1676 = vmatpush.bf16.msrb.mxu2 %v11632_v24  ;;  %v1395_v52 = vrot.slane %v1393_v42, 3  ;;  %v1398_v54 = vrot.slane %v1396_v43, 4  ;;  %v11753_v14 = vld [vmem:[%s14928_s5 + $0x220] sm:$0xff] }
 0x113   : > { %v1292_v36 = vrot.slane %v12247_v26, 3  ;;  %1793 = vmatpush.bf16.msrb.mxu3 %v11643_v25  ;;  %v11630_v12 = vld [vmem:[#allocation2] sm:$0xf0]  ;;  %v11631_v13 = vld [vmem:[#allocation2 + $0x8] sm:$0xff]  ;;  %v3832_v29 = vshll.u32 %v12872_v40, 16  ;;  %v1497_v43 = vunpack.c.l.b16 %v1474_v17 }
 0x114   : > { %v2283_v44 = vrot.slane %v2281_v22, 3  ;;  %v2286_v28 = vrot.slane %v2284_v23, 4  ;;  %2766 = vmatpush.bf16.msra.mxu0 %v11714_v47  ;;  %v12826_v59 = vor.u32 %v1398_v54, %v1395_v52  ;;  %v12876_v19 = vld [vmem:[#allocation2 + $0x48] sm:$0xf]  ;;  %v11664_v22 = vld [vmem:[%s14928_s5 + $0x1d8] sm:$0xff]  ;;  %v11673_v23 = vld [vmem:[%s14928_s5 + $0x220] sm:$0xff]  ;;  %v8683_v33 = vor.u32 %v11630_v12, %v8682_v11 }
 0x115   : > { %v1293_v50 = vsel %vm14947_vm3, %v1291_v27, %v1292_v36  ;;  %v11713_v24 = vld [vmem:[#allocation2 + $0x20] sm:$0x10]  ;;  %v11683_v26 = vld [vmem:[%s14928_s5 + $0x28] sm:$0xff]  ;;  %v11752_v47 = vld [vmem:[%s14928_s5 + $0x218] sm:$0xff]  ;;  %v3612_v27 = vunpack.c.l.b16 %v12876_v19 }
 0x116   : > { %v2287_v48 = vor.u32 %v2286_v28, %v2283_v44  ;;  %1352 = vmatmul.bf16.vlgmr.msra.gmra.mxu2 %v1293_v50  ;;  %1898 = vmatpush.bf16.msra.mxu1 %v11653_v30  ;;  %v1400_v60 = vsel %vm14946_vm7, %v1391_v58, %v12826_v59  ;;  %v3808_v25 = vld [vmem:[#allocation2 + $0x4c] sm:$0x7]  ;;  %v3829_v28 = vshrl.u32 %v12872_v40, 16  ;;  %v1611_v30 = vshrl.u32 %v11631_v13, 16  ;;  %v11641_v42 = vld [vmem:[#allocation2 + $0x20] sm:$0x10] }
 0x117   : > { %2013 = vmatpush.bf16.msra.mxu2 %v11668_v56  ;;  %1794 = vmatpush.bf16.msrb.mxu3 %v11642_v57  ;;  %v3826_v44 = vunpack.c.l.b16 %v3808_v25  ;;  %v11672_v50 = vld [vmem:[%s14928_s5 + $0x218] sm:$0xff]  ;;  %v11682_v52 = vld [vmem:[%s14928_s5 + $0x20] sm:$0xff]  ;;  %v1606_v56 = vshll.u32 %v8683_v33, 16  ;;  %v2697_v57 = vshll.u32 %v12874_v18, 16  ;;  %v1811_v11 = vld [vmem:[#allocation2 + $0x4c] sm:$0x3] }
 0x118   : > { %v2288_v55 = vsel %vm14946_vm7, %v2279_v45, %v2287_v48  ;;  %1459 = vmatmul.bf16.vlgmr.msra.gmra.mxu3 %v1400_v60  ;;  %v12894_v45 = vor.u32 %v11713_v24, %v9142_v20  ;;  %v12908_v58 = vld [vmem:[#allocation2 + $0x18] sm:$0xff]  ;;  %v2695_v24 = vshrl.u32 %v12874_v18, 16  ;;  %v12943_v25 = vld [vmem:[#allocation2 + $0x48] sm:$0xf]  ;;  %v11749_v18 = vld [vmem:[%s14928_s5 + $0x200] sm:$0xff] }
 0x119   : > { %2347 = vmatmul.bf16.vlgmr.msrb.gmra.mxu0 %v2288_v55  ;;  %v3827_v54 = vpack.c.b16 %v3826_v44, %v3612_v27  ;;  %v1603_v55 = vshrl.u32 %v8683_v33, 16  ;;  %v1608_v8 = vrot.slane %v1606_v56, 4  ;;  %v2699_v10 = vrot.slane %v2697_v57, 1  ;;  %v11681_v12 = vld [vmem:[%s14928_s5 + $0x18] sm:$0xff]  ;;  %v11670_v33 = vld [vmem:[%s14928_s5 + $0x208] sm:$0xff] }
 0x11a   : > { %3178 = vmatpush.bf16.msrb.mxu0 %v11756_v62  ;;  %1899 = vmatpush.bf16.msra.mxu1 %v11652_v61  ;;  %v3831_v61 = vrot.slane %v3829_v28, 2  ;;  %v3834_v62 = vrot.slane %v3832_v29, 3  ;;  %v11822_v19 = vld [vmem:[%s14928_s5 + $0x1c8] sm:$0xff] }
 0x11b   : > { %2014 = vmatpush.bf16.msra.mxu2 %v11667_v63  ;;  %2122 = vmatpush.bf16.msra.mxu3 %v11676_v0  ;;  %v3837_v60 = vshrl.u32 %v3827_v54, 16  ;;  %v3840_v63 = vshll.u32 %v3827_v54, 16  ;;  %v1613_v0 = vrot.slane %v1611_v30, 3  ;;  %v1836_v30 = vunpack.c.l.b16 %v1811_v11  ;;  %v11703_v54 = vld [vmem:[%s14928_s5 + $0xb8] sm:$0xff] }
 0x11c   : > { %v11660_v11 = vld [vmem:[#allocation2 + $0x34] sm:$0x30] }
 0x11e   : > { %3179 = vmatpush.bf16.msrb.mxu0 %v11755_v2  ;;  %1900 = vmatpush.bf16.msra.mxu1 %v11651_v37  ;;  %v12913_v2 = vor.u32 %v11641_v42, %v8742_v38  ;;  %v1723_v42 = vshrl.u32 %v12908_v58, 16 }
 0x11f   : > { %2015 = vmatpush.bf16.msra.mxu2 %v11666_v3  ;;  %2123 = vmatpush.bf16.msra.mxu3 %v11675_v39  ;;  %v11662_v3 = vld [vmem:[%s14928_s5 + $0x1c8] sm:$0xff]  ;;  %v11671_v39 = vld [vmem:[%s14928_s5 + $0x210] sm:$0xff] }
 0x121   : > { %1558 = vmatmul.bf16.vlgmr.msrb.gmra.mxu1 %v11621_v4  ;;  %v1499_v4 = vpack.c.b16 %v1497_v43, %v1497_v43 }
 0x122   : > { %2434 = vmatpush.bf16.msrb.mxu1 %v11685_v34  ;;  %3180 = vmatpush.bf16.msrb.mxu0 %v11754_v5  ;;  %v2702_v34 = vshll.u32 %v12894_v45, 16  ;;  %v3839_v5 = vrot.slane %v3837_v60, 2 }
 0x123   : > { %2016 = vmatpush.bf16.msra.mxu2 %v11665_v6  ;;  %2124 = vmatpush.bf16.msra.mxu3 %v11674_v7  ;;  %v3842_v6 = vrot.slane %v3840_v63, 3  ;;  %v1605_v7 = vrot.slane %v1603_v55, 3  ;;  %v11669_v55 = vld [vmem:[%s14928_s5 + $0x200] sm:$0xff]  ;;  %v11702_v63 = vld [vmem:[%s14928_s5 + $0xb0] sm:$0xff] }
 0x125   : > { %v12929_v17 = vor.u32 %v3842_v6, %v3839_v5  ;;  %v1609_v28 = vor.u32 %v1608_v8, %v1605_v7  ;;  %v11710_v5 = vld [vmem:[%s14928_s5 + $0xf0] sm:$0xff]  ;;  %v11729_v7 = vld [vmem:[%s14928_s5 + $0x178] sm:$0xff]  ;;  %v11790_v8 = vld [vmem:[%s14928_s5 + $0xe8] sm:$0xff] }
 0x126   : > { %1357 = vmatmul.bf16.gmra.mxu2 %v1292_v36  ;;  %2435 = vmatpush.bf16.msrb.mxu1 %v11684_v9  ;;  %v1614_v36 = vshll.u32 %v11631_v13, 16  ;;  %v1725_v9 = vshll.u32 %v12908_v58, 16  ;;  %v11750_v13 = vld [vmem:[%s14928_s5 + $0x208] sm:$0xff] }
 0x127   : > { %3181 = vmatpush.bf16.msrb.mxu0 %v11753_v14  ;;  %2017 = vmatpush.bf16.msra.mxu2 %v11664_v22  ;;  %v3835_v14 = vor.u32 %v3834_v62, %v3831_v61  ;;  %v1730_v22 = vshll.u32 %v12913_v2, 16  ;;  %v11679_v58 = vld [vmem:[%s14928_s5 + $0x8] sm:$0xff]  ;;  %v8794_v61 = vld [vmem:[#allocation2 + $0x40] sm:$0xc] }
 0x128   : > { %2125 = vmatpush.bf16.msra.mxu3 %v11673_v23  ;;  %v1616_v37 = vrot.slane %v1614_v36, 4  ;;  %v11661_v23 = vld [vmem:[%s14928_s5 + $0x1c0] sm:$0xff]  ;;  %v1727_v29 = vrot.slane %v1725_v9, 1  ;;  %v2700_v36 = vor.u32 %v2699_v10, %v2695_v24  ;;  %v11709_v10 = vld [vmem:[%s14928_s5 + $0xe8] sm:$0xff] }
 0x129   : > { %2352 = vmatmul.bf16.gmra.mxu0 %v2287_v48  ;;  %1464 = vmatmul.bf16.gmra.mxu3 %v12826_v59  ;;  %v11663_v48 = vld [vmem:[%s14928_s5 + $0x1d0] sm:$0xff]  ;;  %v12950_v44 = vsel %vm1194_vm13, %v3835_v14, %v12929_v17  ;;  %v12958_v43 = vrot.slane %v1730_v22, 1  ;;  %v11700_v9 = vld [vmem:[%s14928_s5 + $0xa0] sm:$0xff]  ;;  %v2706_v14 = vshrl.u32 %v12894_v45, 16  ;;  %v11699_v45 = vld [vmem:[%s14928_s5 + $0x98] sm:$0xff] }
 0x12a   : > { %2436 = vmatpush.bf16.msrb.mxu1 %v11683_v26  ;;  %v11751_v59 = vld [vmem:[%s14928_s5 + $0x210] sm:$0xff]  ;;  %v12931_v20 = vor.u32 %v1616_v37, %v1613_v0  ;;  %v12941_v26 = vrot.slane %v2702_v34, 1  ;;  %v1728_v56 = vor.u32 %v1727_v29, %v1723_v42  ;;  %v11711_v0 = vld [vmem:[%s14928_s5 + $0xf8] sm:$0xff]  ;;  %v11678_v37 = vld [vmem:[%s14928_s5] sm:$0xff] }
 0x12b   : > { %3182 = vmatpush.bf16.msrb.mxu0 %v11752_v47  ;;  %2018 = vmatpush.bf16.msra.mxu2 %v11663_v48  ;;  %v11680_v47 = vld [vmem:[%s14928_s5 + $0x10] sm:$0xff]  ;;  %v1835_v48 = vunpack.c.l.b16 %v12943_v25  ;;  %v11730_v25 = vld [vmem:[#allocation2 + $0x34] sm:$0x30] }
 0x12c   : > { %2126 = vmatpush.bf16.msra.mxu3 %v11672_v50  ;;  %v1618_v38 = vsel %vm14946_vm7, %v1609_v28, %v12931_v20  ;;  %v2705_v50 = vsel %vm14945_vm1, %v2700_v36, %v12941_v26  ;;  %v1733_v62 = vsel %vm14945_vm1, %v1728_v56, %v12958_v43  ;;  %vm1839_vm1 = vcmask 1045504   ;;  %v11659_v22 = vld [vmem:[#allocation2 + $0x2c] sm:$0xf0] }
 0x12d   : > { %v12971_v57 = vpack.c.b16 %v1836_v30, %v1835_v48  ;;  %v2708_v24 = vor.u32 %v2706_v14, %v12941_v26  ;;  %v1734_v30 = vshrl.u32 %v12913_v2, 16  ;;  %v11727_v26 = vld [vmem:[%s14928_s5 + $0x168] sm:$0xff]  ;;  %v11788_v2 = vld [vmem:[%s14928_s5 + $0xd8] sm:$0xff]  ;;  %vm1945_vm7 = vsmask.f32 6400 }
 0x12e   : > { %2437 = vmatpush.bf16.msrb.mxu1 %v11682_v52  ;;  %v11650_v52 = vld [vmem:[#allocation2 + $0x40] sm:$0xf0] }
 0x12f   : > { %3183 = vmatpush.bf16.msrb.mxu0 %v11751_v59  ;;  %2019 = vmatpush.bf16.msra.mxu2 %v11662_v3  ;;  %v11792_v59 = vld [vmem:[%s14928_s5 + $0xf8] sm:$0xff]  ;;  %v12981_v60 = vor.u32 %v11650_v52, %v8794_v61  ;;  %v1841_v3 = vrot.slane %v12971_v57, 2  ;;  %v9242_v61 = vld [vmem:[#allocation2 + $0x34] sm:$0xf] }
 0x130   : > { %2127 = vmatpush.bf16.msra.mxu3 %v11671_v39  ;;  %v11791_v39 = vld [vmem:[%s14928_s5 + $0xf0] sm:$0xff] }
 0x131   : > { %1563 = vmatmul.bf16.gmra.mxu1 %v1499_v4  ;;  %v11701_v4 = vld [vmem:[%s14928_s5 + $0xa8] sm:$0xff]  ;;  %v1840_v34 = vrot.slane %v12981_v60, 2  ;;  %v2056_v14 = vshrl.u32 %v12981_v60, 16 }
 0x132   : > { %2438 = vmatpush.bf16.msrb.mxu1 %v11681_v12  ;;  %v2034_v12 = vld [vmem:[#allocation2 + $0x4c] sm:$0x7] }
 0x133   : > { %3184 = vmatpush.bf16.msrb.mxu0 %v11750_v13  ;;  %2020 = vmatpush.bf16.msra.mxu2 %v11661_v23  ;;  %v1842_v6 = vsel %vm1839_vm1, %v1840_v34, %v1841_v3  ;;  %v11728_v13 = vld [vmem:[%s14928_s5 + $0x170] sm:$0xff]  ;;  %v2053_v29 = vunpack.c.l.b16 %v2034_v12 }
 0x134   : > { %2128 = vmatpush.bf16.msra.mxu3 %v11670_v33  ;;  %v8850_v23 = vld [vmem:[#allocation2 + $0x34] sm:$0xf]  ;;  %v11789_v33 = vld [vmem:[%s14928_s5 + $0xe0] sm:$0xff] }
 0x135   : > { %v8851_v28 = vor.u32 %v11660_v11, %v8850_v23  ;;  %v2054_v52 = vpack.c.b16 %v2053_v29, %v1835_v48  ;;  %v3105_v48 = vld [vmem:[#allocation2 + $0x2c] sm:$0xc]  ;;  %v13065_v11 = vor.u32 %v11730_v25, %v9242_v61  ;;  %v11704_v25 = vld [vmem:[%s14928_s5 + $0xc0] sm:$0xff] }
 0x136   : > { %1677 = vmatmul.bf16.vlgmr.msrb.gmra.mxu2 %v1618_v38  ;;  %2439 = vmatpush.bf16.msrb.mxu1 %v11680_v47  ;;  %v8846_v47 = vld [vmem:[#allocation2 + $0x2c] sm:$0xe]  ;;  %v1736_v38 = vor.u32 %v1734_v30, %v12958_v43  ;;  %v11698_v43 = vld [vmem:[%s14928_s5 + $0x90] sm:$0xff]  ;;  %v3123_v12 = vunpack.c.l.b16 %v3105_v48 }
 0x137   : > { %3185 = vmatpush.bf16.msrb.mxu0 %v11749_v18  ;;  %2525 = vmatpush.bf16.msrb.mxu2 %v11703_v54  ;;  %v8847_v36 = vor.u32 %v11659_v22, %v8846_v47  ;;  %v11708_v18 = vld [vmem:[%s14928_s5 + $0xe0] sm:$0xff]  ;;  %v1958_v42 = vshll.u32 %v8851_v28, 16  ;;  %v2222_v54 = vld [vmem:[#allocation2 + $0x28] sm:$0xc]  ;;  %v2059_v22 = vshll.u32 %v12981_v60, 16 }
 0x138   : > { %2129 = vmatpush.bf16.msra.mxu3 %v11669_v55  ;;  %v11786_v47 = vld [vmem:[%s14928_s5 + $0xc8] sm:$0xff] }
 0x139   : > { %2767 = vmatmul.bf16.vlgmr.msra.gmra.mxu0 %v2705_v50  ;;  %1795 = vmatmul.bf16.vlgmr.msrb.gmra.mxu3 %v1733_v62  ;;  %v13041_v50 = vld [vmem:[#allocation2 + $0x2c] sm:$0xff]   ;;  %v1947_v55 = vshrl.u32 %v8847_v36, 16  ;;  %v1950_v56 = vshll.u32 %v8847_v36, 16  ;;  %v1960_v34 = vrot.slane %v1958_v42, 2 }
 0x13a   : > { %2440 = vmatpush.bf16.msrb.mxu1 %v11679_v58  ;;  %v11707_v58 = vld [vmem:[%s14928_s5 + $0xd8] sm:$0xff]  ;;  %v2894_v62 = vunpack.c.h.b16 %v13041_v50  ;;  %v11705_v30 = vld [vmem:[%s14928_s5 + $0xc8] sm:$0xff] }
 0x13b   : > { %3669 = vmatpush.bf16.msra.mxu0 %v11792_v59  ;;  %2526 = vmatpush.bf16.msrb.mxu2 %v11702_v63  ;;  %v11726_v59 = vld [vmem:[%s14928_s5 + $0x160] sm:$0xff]  ;;  %v11677_v63 = vld [vmem:[#allocation2 + $0x30] sm:$0x70] }
 0x13c   : > { %2643 = vmatpush.bf16.msrb.mxu3 %v11711_v0  ;;  %v2361_v0 = vunpack.c.l.b16 %v2222_v54 }
 0x13e   : > { %2441 = vmatpush.bf16.msrb.mxu1 %v11678_v37  ;;  %v2362_v37 = vunpack.c.l.b16 %v13041_v50  ;;  %v2908_v50 = vshrl.u32 %v13065_v11, 16 }
 0x13f   : > { %3670 = vmatpush.bf16.msra.mxu0 %v11791_v39  ;;  %2527 = vmatpush.bf16.msrb.mxu2 %v11701_v4  ;;  %v11787_v39 = vld [vmem:[%s14928_s5 + $0xd0] sm:$0xff] }
 0x140   : > { %2644 = vmatpush.bf16.msrb.mxu3 %v11710_v5  ;;  %v2064_v5 = vshrl.u32 %v2054_v52, 16  ;;  %v2365_v57 = vpack.c.b16 %v2362_v37, %v2361_v0  ;;  %v11723_v0 = vld [vmem:[%s14928_s5 + $0x148] sm:$0xff] }
 0x141   : > { %1901 = vmatmul.bf16.vlgmr.msra.gmra.mxu1 %v1842_v6  ;;  %v2067_v6 = vshll.u32 %v2054_v52, 16  ;;  %v11785_v52 = vld [vmem:[%s14928_s5 + $0xc0] sm:$0xff] }
 0x142   : > { %2848 = vmatpush.bf16.msra.mxu1 %v11729_v7  ;;  %v11697_v7 = vld [vmem:[%s14928_s5 + $0x88] sm:$0xff]  ;;  %v2066_v60 = vrot.slane %v2064_v5, 2 }
 0x143   : > { %3671 = vmatpush.bf16.msra.mxu0 %v11790_v8  ;;  %2528 = vmatpush.bf16.msrb.mxu2 %v11700_v9  ;;  %v11706_v8 = vld [vmem:[%s14928_s5 + $0xd0] sm:$0xff]  ;;  %v1949_v9 = vrot.slane %v1947_v55, 1  ;;  %v2069_v29 = vrot.slane %v2067_v6, 3 }
 0x144   : > { %2645 = vmatpush.bf16.msrb.mxu3 %v11709_v10  ;;  %v1952_v10 = vrot.slane %v1950_v56, 2  ;;  %v2368_v56 = vshrl.u32 %v2365_v57, 16  ;;  %v11737_v6 = vld [vmem:[%s14928_s5 + $0x1b0] sm:$0xff] }
 0x145   : > { %v13102_v55 = vor.u32 %v2069_v29, %v2066_v60  ;;  %v11746_v60 = vld [vmem:[%s14928_s5 + $0x1e8] sm:$0xff]  ;;  %v13152_v29 = vld [vmem:[#allocation2 + $0x4] sm:$0xf] }
 0x146   : > { %1682 = vmatmul.bf16.gmra.mxu2 %v12931_v20  ;;  %2849 = vmatpush.bf16.msra.mxu1 %v11728_v13  ;;  %v1955_v20 = vshrl.u32 %v8851_v28, 16  ;;  %v8990_v13 = vld [vmem:[#allocation2 + $0x30] sm:$0xf]  ;;  %v1953_v36 = vor.u32 %v1952_v10, %v1949_v9  ;;  %v11722_v10 = vld [vmem:[%s14928_s5 + $0x140] sm:$0xff] }
 0x147   : > { %3672 = vmatpush.bf16.msra.mxu0 %v11789_v33  ;;  %2529 = vmatpush.bf16.msrb.mxu2 %v11699_v45  ;;  %v13069_v23 = vor.u32 %v11677_v63, %v8990_v13  ;;  %v3124_v33 = vpack.c.b16 %v2894_v62, %v3123_v12  ;;  %v3126_v45 = vrot.slane %v13065_v11, 2  ;;  %v11827_v12 = vld [vmem:[%s14928_s5 + $0x1f0] sm:$0xff]  ;;  %v11736_v13 = vld [vmem:[%s14928_s5 + $0x1a8] sm:$0xff] }
 0x148   : > { %2646 = vmatpush.bf16.msrb.mxu3 %v11708_v18  ;;  %v1957_v4 = vrot.slane %v1955_v20, 1  ;;  %v11724_v18 = vld [vmem:[%s14928_s5 + $0x150] sm:$0xff] }
 0x149   : > { %2772 = vmatmul.bf16.gmra.mxu0 %v2708_v24  ;;  %1800 = vmatmul.bf16.gmra.mxu3 %v1736_v38  ;;  %v11725_v24 = vld [vmem:[%s14928_s5 + $0x158] sm:$0xff]  ;;  %v2061_v38 = vrot.slane %v2059_v22, 3  ;;  %v2379_v20 = vshll.u32 %v13069_v23, 16  ;;  %v3125_v42 = vrot.slane %v3124_v33, 2 }
 0x14a   : > { %2850 = vmatpush.bf16.msra.mxu1 %v11727_v26  ;;  %v13081_v28 = vor.u32 %v1960_v34, %v1957_v4  ;;  %v2058_v26 = vrot.slane %v2056_v14, 2  ;;  %v2370_v34 = vrot.slane %v2368_v56, 2  ;;  %v11747_v14 = vld [vmem:[%s14928_s5 + $0x1f0] sm:$0xff]  ;;  %v11775_v33 = vld [vmem:[%s14928_s5 + $0x78] sm:$0xff] }
 0x14b   : > { %3673 = vmatpush.bf16.msra.mxu0 %v11788_v2  ;;  %2530 = vmatpush.bf16.msrb.mxu2 %v11698_v43  ;;  %v2376_v2 = vshrl.u32 %v13069_v23, 16  ;;  %v2371_v43 = vshll.u32 %v2365_v57, 16  ;;  %v2381_v63 = vrot.slane %v2379_v20, 3  ;;  %v11774_v57 = vld [vmem:[%s14928_s5 + $0x70] sm:$0xff]  ;;  %v11824_v20 = vld [vmem:[%s14928_s5 + $0x1d8] sm:$0xff] }
 0x14c   : > { %2647 = vmatpush.bf16.msrb.mxu3 %v11707_v58  ;;  %v1962_v54 = vsel %vm1945_vm7, %v1953_v36, %v13081_v28  ;;  %v3127_v58 = vsel %vm1839_vm1, %v3125_v42, %v3126_v45  ;;  %v2062_v48 = vor.u32 %v2061_v38, %v2058_v26  ;;  %v11734_v36 = vld [vmem:[%s14928_s5 + $0x198] sm:$0xff]  ;;  %v3589_v26 = vld [vmem:[#allocation2 + $0x4c] sm:$0x3]  ;;  %v2571_v38 = vunpack.c.l.b16 %v13152_v29  ;;  %v11782_v29 = vld [vmem:[%s14928_s5 + $0xb0] sm:$0xff] }
 0x14d   : > { %v2378_v61 = vrot.slane %v2376_v2, 2  ;;  %v2373_v5 = vrot.slane %v2371_v43, 3  ;;  %v2452_v2 = vld [vmem:[#allocation2 + $0x28] sm:$0x8]  ;;  %v11744_v56 = vld [vmem:[%s14928_s5 + $0x1d8] sm:$0xff] }
 0x14e   : > { %2851 = vmatpush.bf16.msra.mxu1 %v11726_v59  ;;  %v11738_v59 = vld [vmem:[%s14928_s5 + $0x1b8] sm:$0xff]  ;;  %v2071_v4 = vsel %vm1194_vm13, %v2062_v48, %v13102_v55  ;;  %v2470_v43 = vunpack.c.l.b16 %v2452_v2  ;;  %v11823_v48 = vld [vmem:[%s14928_s5 + $0x1d0] sm:$0xff] }
 0x14f   : > { %3674 = vmatpush.bf16.msra.mxu0 %v11787_v39  ;;  %2531 = vmatpush.bf16.msrb.mxu2 %v11697_v7  ;;  %v11828_v39 = vld [vmem:[%s14928_s5 + $0x1f8] sm:$0xff]  ;;  %v2374_v9 = vor.u32 %v2373_v5, %v2370_v34 }
 0x150   : > { %2648 = vmatpush.bf16.msrb.mxu3 %v11706_v8  ;;  %v11748_v7 = vld [vmem:[%s14928_s5 + $0x1f8] sm:$0xff]  ;;  %v2382_v8 = vor.u32 %v2381_v63, %v2378_v61  ;;  %v11732_v61 = vld [vmem:[%s14928_s5 + $0x188] sm:$0xff] }
 0x151   : > { %1906 = vmatmul.bf16.gmra.mxu1 %v1841_v3  ;;  %v11696_v3 = vld [vmem:[%s14928_s5 + $0x80] sm:$0xff]  ;;  %v11771_v5 = vld [vmem:[%s14928_s5 + $0x58] sm:$0xff] }
 0x152   : > { %2852 = vmatpush.bf16.msra.mxu1 %v11725_v24  ;;  %v2383_v22 = vsel %vm1194_vm13, %v2374_v9, %v2382_v8  ;;  %v11826_v24 = vld [vmem:[%s14928_s5 + $0x1e8] sm:$0xff] }
 0x153   : > { %3675 = vmatpush.bf16.msra.mxu0 %v11786_v47  ;;  %2532 = vmatpush.bf16.msrb.mxu2 %v11696_v3  ;;  %v11735_v47 = vld [vmem:[%s14928_s5 + $0x1a0] sm:$0xff] }
 0x154   : > { %2649 = vmatpush.bf16.msrb.mxu3 %v11705_v30  ;;  %v11825_v3 = vld [vmem:[%s14928_s5 + $0x1e0] sm:$0xff] }
 0x155   : > { %v2546_v30 = vld [vmem:[#allocation2] sm:$0x8] }
 0x156   : > { %2021 = vmatmul.bf16.vlgmr.msra.gmra.mxu2 %v1962_v54  ;;  %2853 = vmatpush.bf16.msra.mxu1 %v11724_v18  ;;  %v11745_v18 = vld [vmem:[%s14928_s5 + $0x1e0] sm:$0xff]  ;;  %v2570_v42 = vunpack.c.l.b16 %v2546_v30  ;;  %v11733_v54 = vld [vmem:[%s14928_s5 + $0x190] sm:$0xff] }
 0x157   : > { %3676 = vmatpush.bf16.msra.mxu0 %v11785_v52  ;;  %2966 = vmatpush.bf16.msra.mxu2 %v11738_v59  ;;  %v13177_v52 = vld [vmem:[#allocation2 + $0x8] sm:$0xff]  }
 0x158   : > { %2650 = vmatpush.bf16.msrb.mxu3 %v11704_v25  ;;  %v2588_v59 = vshll.u32 %v13177_v52, 16  ;;  %v11772_v25 = vld [vmem:[%s14928_s5 + $0x60] sm:$0xff]  ;;  %v12150_v30 = vunpack.c.l.b16 %v13177_v52 }
 0x159   : > { %3186 = vmatmul.bf16.vlgmr.msrb.gmra.mxu0 %v3127_v58  ;;  %2130 = vmatmul.bf16.vlgmr.msra.gmra.mxu3 %v2071_v4  ;;  %v2574_v58 = vpack.c.b16 %v2571_v38, %v2570_v42  ;;  %v11768_v42 = vld [vmem:[%s14928_s5 + $0x40] sm:$0xff] }
 0x15a   : > { %2854 = vmatpush.bf16.msra.mxu1 %v11723_v0  ;;  %v11743_v0 = vld [vmem:[%s14928_s5 + $0x1d0] sm:$0xff] }
 0x15b   : > { %4111 = vmatpush.bf16.msrb.mxu0 %v11828_v39  ;;  %2967 = vmatpush.bf16.msra.mxu2 %v11737_v6  ;;  %v2471_v39 = vpack.c.b16 %v2362_v37, %v2470_v43  ;;  %v2577_v4 = vshrl.u32 %v2574_v58, 16  ;;  %v2580_v34 = vshll.u32 %v2574_v58, 16  ;;  %v11731_v37 = vld [vmem:[%s14928_s5 + $0x180] sm:$0xff]  ;;  %v11858_v43 = vld [vmem:[%s14928_s5 + $0xa8] sm:$0xff] }
 0x15c   : > { %3084 = vmatpush.bf16.msra.mxu3 %v11748_v7  ;;  %v2590_v7 = vrot.slane %v2588_v59, 4  ;;  %v9746_v58 = vld [vmem:[#allocation2 + $0xc] sm:$0xf]  ;;  %v11762_v59 = vld [vmem:[%s14928_s5 + $0x20] sm:$0xff] }
 0x15e   : > { %2855 = vmatpush.bf16.msra.mxu1 %v11722_v10  ;;  %v2472_v10 = vrot.slane %v2471_v39, 3  ;;  %v11740_v39 = vld [vmem:[#allocation2 + $0x48] sm:$0x70] }
 0x15f   : > { %4112 = vmatpush.bf16.msrb.mxu0 %v11827_v12  ;;  %2968 = vmatpush.bf16.msra.mxu2 %v11736_v13  ;;  %v2579_v12 = vrot.slane %v2577_v4, 3  ;;  %v2582_v13 = vrot.slane %v2580_v34, 4  ;;  %v9742_v34 = vld [vmem:[#allocation2 + $0x4] sm:$0xc] }
 0x160   : > { %3085 = vmatpush.bf16.msra.mxu3 %v11747_v14 }
 0x161   : > { %2442 = vmatmul.bf16.vlgmr.msrb.gmra.mxu1 %v2383_v22 }
 0x162   : > { %3376 = vmatpush.bf16.msrb.mxu1 %v11775_v33  ;;  %v11770_v33 = vld [vmem:[%s14928_s5 + $0x50] sm:$0xff] }
 0x163   : > { %4113 = vmatpush.bf16.msrb.mxu0 %v11826_v24  ;;  %2969 = vmatpush.bf16.msra.mxu2 %v11735_v47  ;;  %v11821_v24 = vld [vmem:[%s14928_s5 + $0x1c0] sm:$0xff] }
 0x164   : > { %3086 = vmatpush.bf16.msra.mxu3 %v11746_v60  ;;  %v11741_v60 = vld [vmem:[%s14928_s5 + $0x1c0] sm:$0xff] }
 0x166   : > { %2026 = vmatmul.bf16.gmra.mxu2 %v13081_v28  ;;  %3377 = vmatpush.bf16.msrb.mxu1 %v11774_v57  ;;  %v11773_v28 = vld [vmem:[%s14928_s5 + $0x68] sm:$0xff]  ;;  %v2583_v57 = vor.u32 %v2582_v13, %v2579_v12 }
 0x167   : > { %4114 = vmatpush.bf16.msrb.mxu0 %v11825_v3  ;;  %2970 = vmatpush.bf16.msra.mxu2 %v11734_v36  ;;  %v11769_v36 = vld [vmem:[%s14928_s5 + $0x48] sm:$0xff] }
 0x168   : > { %3087 = vmatpush.bf16.msra.mxu3 %v11745_v18  ;;  %v11860_v18 = vld [vmem:[%s14928_s5 + $0xb8] sm:$0xff] }
 0x169   : > { %3191 = vmatmul.bf16.gmra.mxu0 %v3126_v45  ;;  %2135 = vmatmul.bf16.gmra.mxu3 %v13102_v55  ;;  %v3613_v45 = vunpack.c.l.b16 %v3589_v26  ;;  %v2585_v55 = vshrl.u32 %v13177_v52, 16  ;;  %v11764_v26 = vld [vmem:[%s14928_s5 + $0x30] sm:$0xff] }
 0x16a   : > { %3378 = vmatpush.bf16.msrb.mxu1 %v11773_v28  ;;  %v11783_v28 = vld [vmem:[%s14928_s5 + $0xb8] sm:$0xff] }
 0x16b   : > { %4115 = vmatpush.bf16.msrb.mxu0 %v11824_v20  ;;  %2971 = vmatpush.bf16.msra.mxu2 %v11733_v54  ;;  %v13200_v63 = vpack.c.b16 %v3613_v45, %v3612_v27  ;;  %v2473_v27 = vrot.slane %v13069_v23, 3  ;;  %v2587_v6 = vrot.slane %v2585_v55, 3  ;;  %v3616_v23 = vrot.slane %v12872_v40, 2  ;;  %v11765_v40 = vld [vmem:[%s14928_s5 + $0x38] sm:$0xff]  ;;  %v11859_v45 = vld [vmem:[%s14928_s5 + $0xb0] sm:$0xff]  ;;  %v11763_v54 = vld [vmem:[%s14928_s5 + $0x28] sm:$0xff] }
 0x16c   : > { %3088 = vmatpush.bf16.msra.mxu3 %v11744_v56  ;;  %v2796_v20 = vpack.c.b16 %v12150_v30, %v2571_v38  ;;  %v2869_v56 = vld [vmem:[#allocation2 + $0x2c] sm:$0xe]  ;;  %v11802_v38 = vld [vmem:[%s14928_s5 + $0x138] sm:$0xff]  ;;  %v11820_v55 = vld [vmem:[#allocation2 + $0xc] sm:$0x70] }
 0x16d   : > { %v3617_v9 = vrot.slane %v13200_v63, 2  ;;  %v2474_v14 = vsel %vm14947_vm3, %v2472_v10, %v2473_v27  ;;  %v13223_v22 = vor.u32 %v2590_v7, %v2587_v6  ;;  %vm14981_vm3 = vsmask.f32 4352  ;;  %v11819_v63 = vld [vmem:[#allocation2 + $0x4] sm:$0xf0]  ;;  %v11801_v7 = vld [vmem:[%s14928_s5 + $0x130] sm:$0xff] }
 0x16e   : > { %3379 = vmatpush.bf16.msrb.mxu1 %v11772_v25  ;;  %v11781_v25 = vld [vmem:[%s14928_s5 + $0xa8] sm:$0xff]  ;;  %v9743_v6 = vor.u32 %v11819_v63, %v9742_v34  ;;  %v12151_v10 = vunpack.c.h.b16 %v13177_v52  ;;  %v11855_v63 = vld [vmem:[%s14928_s5 + $0x90] sm:$0xff] }
 0x16f   : > { %4116 = vmatpush.bf16.msrb.mxu0 %v11823_v48  ;;  %2972 = vmatpush.bf16.msra.mxu2 %v11732_v61  ;;  %v3618_v47 = vsel %vm1839_vm1, %v3616_v23, %v3617_v9  ;;  %v2592_v3 = vsel %vm14981_vm3, %v2583_v57, %v13223_v22  ;;  %v2893_v61 = vunpack.c.l.b16 %v2869_v56  ;;  %v9294_v23 = vld [vmem:[#allocation2 + $0x40] sm:$0xc]  ;;  %v11779_v57 = vld [vmem:[%s14928_s5 + $0x98] sm:$0xff]  ;;  %v11831_v52 = vld [vmem:[%s14928_s5 + $0x210] sm:$0xff] }
 0x170   : > { %3089 = vmatpush.bf16.msra.mxu3 %v11743_v0  ;;  %v9747_v0 = vor.u32 %v11820_v55, %v9746_v58  ;;  %v9398_v55 = vld [vmem:[#allocation2] sm:$0x8] }
 0x171   : > { %2447 = vmatmul.bf16.gmra.mxu1 %v2382_v8  ;;  %v11742_v8 = vld [vmem:[%s14928_s5 + $0x1c8] sm:$0xff]  ;;  %v2897_v4 = vpack.c.b16 %v2894_v62, %v2893_v61  ;;  %v2911_v62 = vshll.u32 %v13065_v11, 16  ;;  %v11799_v61 = vld [vmem:[%s14928_s5 + $0x120] sm:$0xff] }
 0x172   : > { %3380 = vmatpush.bf16.msrb.mxu1 %v11771_v5  ;;  %v11739_v5 = vld [vmem:[#allocation2 + $0x40] sm:$0xf0]  ;;  %v4053_v12 = vshrl.u32 %v9747_v0, 16  ;;  %v4056_v13 = vshll.u32 %v9747_v0, 16  ;;  %v11759_v0 = vld [vmem:[%s14928_s5 + $0x8] sm:$0xff] }
 0x173   : > { %4117 = vmatpush.bf16.msrb.mxu0 %v11822_v19  ;;  %2973 = vmatpush.bf16.msra.mxu2 %v11731_v37  ;;  %v9298_v19 = vld [vmem:[#allocation2 + $0x48] sm:$0xf]  ;;  %v11761_v37 = vld [vmem:[%s14928_s5 + $0x18] sm:$0xff]  ;;  %v9295_v11 = vor.u32 %v11739_v5, %v9294_v23 }
 0x174   : > { %3090 = vmatpush.bf16.msra.mxu3 %v11742_v8  ;;  %v9299_v8 = vor.u32 %v11740_v39, %v9298_v19  ;;  %v11778_v19 = vld [vmem:[%s14928_s5 + $0x90] sm:$0xff]  ;;  %v11777_v23 = vld [vmem:[%s14928_s5 + $0x88] sm:$0xff] }
 0x175   : > { %v3021_v58 = vshll.u32 %v9295_v11, 16 }
 0x176   : > { %2533 = vmatmul.bf16.vlgmr.msrb.gmra.mxu2 %v2474_v14  ;;  %3381 = vmatpush.bf16.msrb.mxu1 %v11770_v33  ;;  %v11800_v14 = vld [vmem:[%s14928_s5 + $0x128] sm:$0xff]  ;;  %v2900_v33 = vshrl.u32 %v2897_v4, 16 }
 0x177   : > { %4118 = vmatpush.bf16.msrb.mxu0 %v11821_v24  ;;  %3452 = vmatpush.bf16.msrb.mxu2 %v11765_v40  ;;  %v2903_v24 = vshll.u32 %v2897_v4, 16  ;;  %v4045_v40 = vshrl.u32 %v9743_v6, 16 }
 0x178   : > { %3091 = vmatpush.bf16.msra.mxu3 %v11741_v60  ;;  %v4048_v60 = vshll.u32 %v9743_v6, 16  ;;  %v2902_v56 = vrot.slane %v2900_v33, 1 }
 0x179   : > { %3677 = vmatmul.bf16.vlgmr.msra.gmra.mxu0 %v3618_v47  ;;  %2651 = vmatmul.bf16.vlgmr.msrb.gmra.mxu3 %v2592_v3  ;;  %v11856_v47 = vld [vmem:[%s14928_s5 + $0x98] sm:$0xff] }
 0x17a   : > { %3382 = vmatpush.bf16.msrb.mxu1 %v11769_v36  ;;  %v2910_v36 = vrot.slane %v2908_v50, 1 }
 0x17b   : > { %4600 = vmatpush.bf16.msra.mxu0 %v11860_v18  ;;  %3453 = vmatpush.bf16.msrb.mxu2 %v11764_v26  ;;  %v2913_v18 = vrot.slane %v2911_v62, 2  ;;  %v3026_v26 = vshrl.u32 %v9299_v8, 16  ;;  %v3023_v62 = vrot.slane %v3021_v58, 3 }
 0x17c   : > { %3565 = vmatpush.bf16.msrb.mxu3 %v11783_v28  ;;  %v3029_v28 = vshll.u32 %v9299_v8, 16 }
 0x17d   : > { %v13329_v39 = vor.u32 %v2913_v18, %v2910_v36  ;;  %v3028_v4 = vrot.slane %v3026_v26, 2  ;;  %v11853_v26 = vld [vmem:[%s14928_s5 + $0x80] sm:$0xff] }
 0x17e   : > { %v13253_v2 = vpop.f32.mrf.mxu1  ;;  %3383 = vmatpush.bf16.msrb.mxu1 %v11768_v42  ;;  %v4055_v42 = vrot.slane %v4053_v12, 2  ;;  %v3031_v34 = vrot.slane %v3029_v28, 3  ;;  %v11776_v28 = vld [vmem:[%s14928_s5 + $0x80] sm:$0xff] }
 0x17f   : > { %4601 = vmatpush.bf16.msra.mxu0 %v11859_v45  ;;  %3454 = vmatpush.bf16.msrb.mxu2 %v11763_v54  ;;  %v4058_v45 = vrot.slane %v4056_v13, 3  ;;  %v11766_v54 = vld [vmem:[#allocation2] sm:$0xf0]  ;;  %v11854_v13 = vld [vmem:[%s14928_s5 + $0x88] sm:$0xff] }
 0x180   : > { %3566 = vmatpush.bf16.msrb.mxu3 %v11782_v29  ;;  %v11767_v29 = vld [vmem:[#allocation2 + $0x8] sm:$0xff]  ;;  %v9399_v5 = vor.u32 %v11766_v54, %v9398_v55  ;;  %v11818_v55 = vld [vmem:[%s14928_s5 + $0x1b8] sm:$0xff] }
 0x181   : > { %2856 = vmatmul.bf16.vlgmr.msra.gmra.mxu1 %v2796_v20  ;;  %v13317_v20 = vpack.c.b16 %v12151_v10, %v12151_v10  ;;  %v13334_v6 = vor.u32 %v4058_v45, %v4055_v42  ;;  %v3321_v8 = vshll.u32 %v11767_v29, 16 }
 0x182   : > { %3787 = vmatpush.bf16.msra.mxu1 %v11802_v38  ;;  %v2905_v38 = vrot.slane %v2903_v24, 2  ;;  %v13352_v24 = vor.u32 %v3031_v34, %v3028_v4  ;;  %v11795_v4 = vld [vmem:[%s14928_s5 + $0x100] sm:$0xff]  ;;  %v11895_v34 = vld [vmem:[%s14928_s5 + $0x1b0] sm:$0xff] }
 0x183   : > { %4602 = vmatpush.bf16.msra.mxu0 %v11858_v43  ;;  %3455 = vmatpush.bf16.msrb.mxu2 %v11762_v59  ;;  %v3018_v43 = vshrl.u32 %v9295_v11, 16  ;;  %v4047_v59 = vrot.slane %v4045_v40, 2  ;;  %v3310_v11 = vshrl.u32 %v9399_v5, 16  ;;  %v11797_v40 = vld [vmem:[%s14928_s5 + $0x110] sm:$0xff]  ;;  %v3323_v18 = vrot.slane %v3321_v8, 4  ;;  %v11816_v8 = vld [vmem:[%s14928_s5 + $0x1a8] sm:$0xff] }
 0x184   : > { %3567 = vmatpush.bf16.msrb.mxu3 %v11781_v25  ;;  %v4050_v25 = vrot.slane %v4048_v60, 3  ;;  %v11810_v60 = vld [vmem:[%s14928_s5 + $0x178] sm:$0xff] }
 0x185   : > { %v3020_v50 = vrot.slane %v3018_v43, 2  ;;  %v3312_v54 = vrot.slane %v3310_v11, 3  ;;  %v11809_v43 = vld [vmem:[%s14928_s5 + $0x170] sm:$0xff] }
 0x186   : > { %v13283_v48 = vpop.f32.mrf.mxu1  ;;  %2538 = vmatmul.bf16.gmra.mxu2 %v2473_v27  ;;  %v11857_v27 = vld [vmem:[%s14928_s5 + $0xa0] sm:$0xff]  ;;  %3788 = vmatpush.bf16.msra.mxu1 %v11801_v7  ;;  %v3318_v7 = vshrl.u32 %v11767_v29, 16  ;;  %v4051_v12 = vor.u32 %v4050_v25, %v4047_v59 }
 0x187   : > { %4603 = vmatpush.bf16.msra.mxu0 %v11857_v27  ;;  %3456 = vmatpush.bf16.msrb.mxu2 %v11761_v37  ;;  %v11798_v27 = vld [vmem:[%s14928_s5 + $0x118] sm:$0xff]  ;;  %v2906_v37 = vor.u32 %v2905_v38, %v2902_v56  ;;  %v11796_v56 = vld [vmem:[%s14928_s5 + $0x108] sm:$0xff] }
 0x188   : > { %v3320_v36 = vrot.slane %v3318_v7, 3  ;;  %v11896_v38 = vld [vmem:[%s14928_s5 + $0x1b8] sm:$0xff]  ;;  %v11817_v7 = vld [vmem:[%s14928_s5 + $0x1b0] sm:$0xff] }
 0x189   : > { %3682 = vmatmul.bf16.gmra.mxu0 %v3617_v9  ;;  %v11780_v9 = vld [vmem:[%s14928_s5 + $0xa0] sm:$0xff]  ;;  %2656 = vmatmul.bf16.gmra.mxu3 %v13223_v22  ;;  %v11760_v22 = vld [vmem:[%s14928_s5 + $0x10] sm:$0xff]  ;;  %v2915_v33 = vsel %vm1945_vm7, %v2906_v37, %v13329_v39  ;;  %v11894_v37 = vld [vmem:[%s14928_s5 + $0x1a8] sm:$0xff] }
 0x18a   : > { %3568 = vmatpush.bf16.msrb.mxu3 %v11780_v9  ;;  %3789 = vmatpush.bf16.msra.mxu1 %v11800_v14  ;;  %v11758_v9 = vld [vmem:[%s14928_s5] sm:$0xff]  ;;  %v13381_v58 = vor.u32 %v3323_v18, %v3320_v36  ;;  %v12181_v18 = vld [vmem:[#allocation2 + $0x18] sm:$0xff]  }
 0x18b   : > { %4604 = vmatpush.bf16.msra.mxu0 %v11856_v47  ;;  %3457 = vmatpush.bf16.msrb.mxu2 %v11760_v22  ;;  %v3313_v47 = vshll.u32 %v9399_v5, 16  ;;  %v4060_v22 = vsel %vm1194_vm13, %v4051_v12, %v13334_v6  ;;  %v11808_v5 = vld [vmem:[%s14928_s5 + $0x168] sm:$0xff] }
 0x18d   : > { %v3315_v29 = vrot.slane %v3313_v47, 4 }
 0x18e   : > { %v13315_v3 = vpop.f32.mrf.mxu1  ;;  %3569 = vmatpush.bf16.msrb.mxu3 %v11779_v57  ;;  %3790 = vmatpush.bf16.msra.mxu1 %v11799_v61  ;;  %v3024_v57 = vor.u32 %v3023_v62, %v3020_v50  ;;  %v11807_v50 = vld [vmem:[%s14928_s5 + $0x160] sm:$0xff] }
 0x18f   : > { %4605 = vmatpush.bf16.msra.mxu0 %v11855_v63  ;;  %3458 = vmatpush.bf16.msrb.mxu2 %v11759_v0  ;;  %v3316_v63 = vor.u32 %v3315_v29, %v3312_v54  ;;  %v11793_v29 = vld [vmem:[#allocation2 + $0x2c] sm:$0xf0] }
 0x190   : > { %v3033_v45 = vsel %vm1194_vm13, %v3024_v57, %v13352_v24  ;;  %v11805_v57 = vld [vmem:[%s14928_s5 + $0x150] sm:$0xff] }
 0x191   : > { %2861 = vmatmul.bf16.gmra.mxu1 %v13317_v20  ;;  %v3325_v0 = vsel %vm14981_vm3, %v3316_v63, %v13381_v58  ;;  %vm14982_vm3 = vsmask.f32 7424 }
 0x192   : > { %3570 = vmatpush.bf16.msrb.mxu3 %v11778_v19  ;;  %3791 = vmatpush.bf16.msra.mxu1 %v11798_v27  ;;  %v11836_v27 = vld [vmem:[%s14928_s5 + $0x238] sm:$0xff] }
 0x193   : > { %3459 = vmatpush.bf16.msrb.mxu2 %v11758_v9  ;;  %4606 = vmatpush.bf16.msra.mxu0 %v11854_v13  ;;  %v13427_v13 = vld [vmem:[#allocation2 + $0x20] sm:$0xff]  }
 0x194   : > { %v3496_v47 = vunpack.c.l.b16 %v13427_v13 }
 0x196   : > { %v13342_v10 = vpop.f32.mrf.mxu0  ;;  %v1278_v14 = vpop.f32.mrf.mxu1  ;;  %2974 = vmatmul.bf16.vlgmr.msra.gmra.mxu2 %v2915_v33  ;;  %3571 = vmatpush.bf16.msrb.mxu3 %v11777_v23  ;;  %v3473_v23 = vld [vmem:[#allocation2 + $0x24] sm:$0x1] }
 0x197   : > { %3895 = vmatpush.bf16.msra.mxu2 %v11810_v60  ;;  %3792 = vmatpush.bf16.msra.mxu1 %v11797_v40  ;;  %v11835_v14 = vld [vmem:[%s14928_s5 + $0x230] sm:$0xff]  ;;  %v11893_v33 = vld [vmem:[%s14928_s5 + $0x1a0] sm:$0xff]  ;;  %v11834_v40 = vld [vmem:[%s14928_s5 + $0x228] sm:$0xff] }
 0x198   : > { %4607 = vmatpush.bf16.msra.mxu0 %v11853_v26  ;;  %v11892_v60 = vld [vmem:[%s14928_s5 + $0x198] sm:$0xff] }
 0x199   : > { %4119 = vmatmul.bf16.vlgmr.msrb.gmra.mxu0 %v4060_v22  ;;  %v13368_v42 = vpop.f32.mrf.mxu2  ;;  %3092 = vmatmul.bf16.vlgmr.msra.gmra.mxu3 %v3033_v45  ;;  %v3497_v22 = vunpack.c.l.b16 %v3473_v23  ;;  %v11794_v26 = vld [vmem:[#allocation2 + $0x34] sm:$0x30] }
 0x19a   : > { %3572 = vmatpush.bf16.msrb.mxu3 %v11776_v28 }
 0x19b   : > { %v13388_v25 = vpop.f32.mrf.mxu3  ;;  %3896 = vmatpush.bf16.msra.mxu2 %v11809_v43  ;;  %3793 = vmatpush.bf16.msra.mxu1 %v11796_v56  ;;  %v13464_v54 = vpack.c.b16 %v3497_v22, %v3496_v47  ;;  %v9594_v56 = vld [vmem:[#allocation2 + $0x34] sm:$0xf]  ;;  %v3503_v43 = vshll.u32 %v12181_v18, 16  ;;  %v11757_v22 = vld [vmem:[#allocation2 + $0x18] sm:$0xff] }
 0x19c   : > { %5048 = vmatpush.bf16.msrb.mxu0 %v11896_v38  ;;  %v13466_v38 = vld [vmem:[#allocation2 + $0x4] sm:$0xff]   ;;  %v9595_v63 = vor.u32 %v11794_v26, %v9594_v56  ;;  %v3501_v26 = vshrl.u32 %v12181_v18, 16 }
 0x19d   : > { %v11889_v18 = vld [vmem:[%s14928_s5 + $0x180] sm:$0xff] }
 0x19e   : > { %v13386_v59 = vpop.f32.mrf.mxu0  ;;  %v13390_v61 = vpop.f32.mrf.mxu1  ;;  %3993 = vmatpush.bf16.msra.mxu3 %v11818_v55  ;;  %v9590_v55 = vld [vmem:[#allocation2 + $0x2c] sm:$0xe]  ;;  %v3729_v23 = vshrl.u32 %v9595_v63, 16 }
 0x19f   : > { %3794 = vmatpush.bf16.msra.mxu1 %v11795_v4  ;;  %3897 = vmatpush.bf16.msra.mxu2 %v11808_v5  ;;  %v11891_v4 = vld [vmem:[%s14928_s5 + $0x190] sm:$0xff] }
 0x1a0   : > { %5049 = vmatpush.bf16.msrb.mxu0 %v11895_v34  ;;  %v11804_v34 = vld [vmem:[%s14928_s5 + $0x148] sm:$0xff] }
 0x1a1   : > { %3384 = vmatmul.bf16.vlgmr.msrb.gmra.mxu1 %v3325_v0  ;;  %v13403_v19 = vpop.f32.mrf.mxu2  ;;  %v11833_v0 = vld [vmem:[%s14928_s5 + $0x220] sm:$0xff] }
 0x1a2   : > { %3994 = vmatpush.bf16.msra.mxu3 %v11817_v7  ;;  %v3508_v7 = vshll.u32 %v13464_v54, 16 }
 0x1a3   : > { %4219 = vmatpush.bf16.msrb.mxu1 %v11836_v27  ;;  %v13422_v9 = vpop.f32.mrf.mxu3  ;;  %3898 = vmatpush.bf16.msra.mxu2 %v11807_v50  ;;  %v9591_v27 = vor.u32 %v11793_v29, %v9590_v55  ;;  %v11832_v50 = vld [vmem:[%s14928_s5 + $0x218] sm:$0xff]  ;;  %v3731_v55 = vrot.slane %v3729_v23, 1  ;;  %v618_v23 = vld [vmem:[#allocation3] sm:$0xf] }
 0x1a4   : > { %5050 = vmatpush.bf16.msrb.mxu0 %v11894_v37  ;;  %v4442_v37 = vunpack.c.l.b16 %v13466_v38 }
 0x1a5   : > { %v3721_v29 = vshrl.u32 %v9591_v27, 16  ;;  %v3724_v56 = vshll.u32 %v9591_v27, 16  ;;  %v11830_v27 = vld [vmem:[%s14928_s5 + $0x208] sm:$0xff] }
 0x1a6   : > { %v13417_v62 = vpop.f32.mrf.mxu0  ;;  %v13424_v12 = vpop.f32.mrf.mxu1  ;;  %2979 = vmatmul.bf16.gmra.mxu2 %v13329_v39  ;;  %3995 = vmatpush.bf16.msra.mxu3 %v11816_v8  ;;  %v11806_v39 = vld [vmem:[%s14928_s5 + $0x158] sm:$0xff]  ;;  %v3505_v8 = vrot.slane %v3503_v43, 1 }
 0x1a7   : > { %4220 = vmatpush.bf16.msrb.mxu1 %v11835_v14  ;;  %3899 = vmatpush.bf16.msra.mxu2 %v11806_v39  ;;  %v3732_v14 = vshll.u32 %v9595_v63, 16 }
 0x1a8   : > { %5051 = vmatpush.bf16.msrb.mxu0 %v11893_v33  ;;  %v11803_v33 = vld [vmem:[%s14928_s5 + $0x140] sm:$0xff]  ;;  %v13507_v43 = vor.u32 %v3505_v8, %v3501_v26 }
 0x1a9   : > { %4124 = vmatmul.bf16.gmra.mxu0 %v13334_v6  ;;  %v13439_v11 = vpop.f32.mrf.mxu2  ;;  %v11815_v6 = vld [vmem:[%s14928_s5 + $0x1a0] sm:$0xff]  ;;  %3097 = vmatmul.bf16.gmra.mxu3 %v13352_v24  ;;  %v11814_v24 = vld [vmem:[%s14928_s5 + $0x198] sm:$0xff]  ;;  %v3734_v63 = vrot.slane %v3732_v14, 2 }
 0x1aa   : > { %3996 = vmatpush.bf16.msra.mxu3 %v11815_v6  ;;  %v4548_v6 = vpack.c.b16 %v12150_v30, %v4442_v37  ;;  %v11852_v30 = vld [vmem:[%s14928_s5 + $0x78] sm:$0xff] }
 0x1ab   : > { %4221 = vmatpush.bf16.msrb.mxu1 %v11834_v40  ;;  %3900 = vmatpush.bf16.msra.mxu2 %v11805_v57  ;;  %v11890_v40 = vld [vmem:[%s14928_s5 + $0x188] sm:$0xff]  ;;  %v3735_v8 = vor.u32 %v3734_v63, %v3731_v55  ;;  %v14948_v63 = vunpack.c.h.b16 %v13466_v38 }
 0x1ac   : > { %v13458_v28 = vpop.f32.mrf.mxu3  ;;  %5052 = vmatpush.bf16.msrb.mxu0 %v11892_v60  ;;  %v11812_v60 = vld [vmem:[%s14928_s5 + $0x188] sm:$0xff] }
 0x1ae   : > { %v2355_v36 = vpop.f32.mrf.mxu0  ;;  %v13460_v45 = vpop.f32.mrf.mxu1  ;;  %3997 = vmatpush.bf16.msra.mxu3 %v11814_v24  ;;  %v3510_v24 = vrot.slane %v3508_v7, 1  ;;  %v3726_v7 = vrot.slane %v3724_v56, 2  ;;  %v10130_v56 = vld [vmem:[#allocation2 + $0xc] sm:$0xf] }
 0x1af   : > { %4222 = vmatpush.bf16.msrb.mxu1 %v11833_v0  ;;  %3901 = vmatpush.bf16.msra.mxu2 %v11804_v34  ;;  %v11811_v0 = vld [vmem:[%s14928_s5 + $0x180] sm:$0xff] }
 0x1b0   : > { %5053 = vmatpush.bf16.msrb.mxu0 %v11891_v4  ;;  %v3511_v34 = vsel %vm14982_vm3, %v13507_v43, %v3510_v24  ;;  %vm14983_vm3 = vcmask 1044480  }
 0x1b1   : > { %3389 = vmatmul.bf16.gmra.mxu1 %v13381_v58  ;;  %v1360_v5 = vpop.f32.mrf.mxu2  ;;  %v11813_v58 = vld [vmem:[%s14928_s5 + $0x190] sm:$0xff] }
 0x1b2   : > { %3998 = vmatpush.bf16.msra.mxu3 %v11813_v58  ;;  %v3723_v5 = vrot.slane %v3721_v29, 1  ;;  %v11851_v58 = vld [vmem:[%s14928_s5 + $0x70] sm:$0xff]  ;;  %v4951_v29 = vld [vmem:[#allocation2 + $0x4] sm:$0xc] }
 0x1b3   : > { %4223 = vmatpush.bf16.msrb.mxu1 %v11832_v50  ;;  %3902 = vmatpush.bf16.msra.mxu2 %v11803_v33  ;;  %v11844_v50 = vld [vmem:[%s14928_s5 + $0x38] sm:$0xff]  ;;  %v619_v33 = vsel %vm12450_vm6, 0, %v618_v23 }
 0x1b4   : > { %v1467_v57 = vpop.f32.mrf.mxu3  ;;  %5054 = vmatpush.bf16.msrb.mxu0 %v11890_v40  ;;  %v3727_v40 = vor.u32 %v3726_v7, %v3723_v5  ;;  %620 = vst [vmem:[#allocation3] sm:$0xf] %v619_v33  ;;  %v4975_v5 = vunpack.c.l.b16 %v4951_v29 }
 0x1b6   : > { %v13489_v39 = vpop.f32.mrf.mxu0  ;;  %v1566_v36 = vpop.f32.mrf.mxu1  ;;  %3460 = vmatmul.bf16.vlgmr.msrb.gmra.mxu2 %v11757_v22  ;;  %3999 = vmatpush.bf16.msra.mxu3 %v11812_v60  ;;  %v3262_v60 = vld [vmem:[#allocation2 + $0x20] sm:$0xf]  ;;  %v3736_v57 = vsel %vm1945_vm7, %v3727_v40, %v3735_v8  ;;  %v3917_v40 = vld [vmem:[#allocation2 + $0x24] sm:$0x7] }
 0x1b7   : > { %4419 = vmatpush.bf16.msrb.mxu2 %v11852_v30  ;;  %4224 = vmatpush.bf16.msrb.mxu1 %v11831_v52  ;;  %v3399_v36 = vunpack.c.l.b16 %v3262_v60  ;;  %v11888_v52 = vld [vmem:[#allocation2 + $0xc] sm:$0x70] }
 0x1b8   : > { %5055 = vmatpush.bf16.msrb.mxu0 %v11889_v18  ;;  %v13547_v7 = vor.u32 %v11888_v52, %v10130_v56 }
 0x1b9   : > { %4608 = vmatmul.bf16.vlgmr.msra.gmra.mxu0 %v4548_v6  ;;  %v13515_v4 = vpop.f32.mrf.mxu2  ;;  %3573 = vmatmul.bf16.vlgmr.msrb.gmra.mxu3 %v3511_v34  ;;  %v3401_v55 = vpack.c.b16 %v3399_v36, %v3399_v36  ;;  %v3512_v34 = vshrl.u32 %v13464_v54, 16  ;;  %v1354_v54 = vadd.f32 %v13368_v42, %v13253_v2  ;;  %v11829_v2 = vld [vmem:[%s14928_s5 + $0x200] sm:$0xff]  ;;  %v11850_v42 = vld [vmem:[%s14928_s5 + $0x68] sm:$0xff] }
 0x1ba   : > { %4000 = vmatpush.bf16.msra.mxu3 %v11811_v0  ;;  %v4990_v23 = vshrl.u32 %v13547_v7, 16  ;;  %v4993_v33 = vshll.u32 %v13547_v7, 16 }
 0x1bb   : > { %4420 = vmatpush.bf16.msrb.mxu2 %v11851_v58  ;;  %4225 = vmatpush.bf16.msrb.mxu1 %v11830_v27  ;;  %v3514_v27 = vor.u32 %v3512_v34, %v3510_v24  ;;  %v4979_v58 = vpack.c.b16 %v14948_v63, %v4975_v5  ;;  %v3937_v24 = vunpack.c.l.b16 %v3917_v40  ;;  %v1469_v56 = vadd.f32 %v13388_v25, %v1354_v54  ;;  %v12182_v34 = vld [vmem:[#allocation2 + $0x18] sm:$0xf0]  ;;  %v12183_v63 = vld [vmem:[#allocation2 + $0x18] sm:$0x8]  ;;  %v11849_v54 = vld [vmem:[%s14928_s5 + $0x60] sm:$0xff] }
 0x1bc   : > { %v13532_v22 = vpop.f32.mrf.mxu3  ;;  %v4992_v52 = vrot.slane %v4990_v23, 2  ;;  %v11869_v23 = vld [vmem:[%s14928_s5 + $0xf8] sm:$0xff] }
 0x1bd   : > { %v4985_v36 = vshll.u32 %v4979_v58, 16  ;;  %v13571_v25 = vpack.c.b16 %v3937_v24, %v3496_v47  ;;  %v4164_v47 = vshll.u32 %v13427_v13, 16 }
 0x1be   : > { %v13528_v14 = vpop.f32.mrf.mxu0  ;;  %v13534_v6 = vpop.f32.mrf.mxu1  ;;  %4514 = vmatpush.bf16.msrb.mxu3 %v11844_v50 }
 0x1bf   : > { %4226 = vmatpush.bf16.msrb.mxu1 %v11829_v2  ;;  %4421 = vmatpush.bf16.msrb.mxu2 %v11850_v42 }
 0x1c1   : > { %3795 = vmatmul.bf16.vlgmr.msra.gmra.mxu1 %v3736_v57  ;;  %v13537_v26 = vpop.f32.mrf.mxu2  ;;  %v4982_v57 = vshrl.u32 %v4979_v58, 16 }
 0x1c3   : > { %v4984_v5 = vrot.slane %v4982_v57, 2  ;;  %4718 = vmatpush.bf16.msra.mxu1 %v11869_v23  ;;  %v1356_v57 = vadd.f32 %v13403_v19, %v13283_v48  ;;  %4422 = vmatpush.bf16.msrb.mxu2 %v11849_v54  ;;  %v621_v54 = vld [vmem:[#allocation3 + $0xc] sm:$0x8] }
 0x1c4   : > { %v13542_v18 = vpop.f32.mrf.mxu3 }
 0x1c5   : > { %v1470_v42 = vadd.f32 %v13422_v9, %v1356_v57  ;;  %v11848_v9 = vld [vmem:[%s14928_s5 + $0x58] sm:$0xff] }
 0x1c6   : > { %v13539_v30 = vpop.f32.mrf.mxu0  ;;  %v13544_v0 = vpop.f32.mrf.mxu1  ;;  %3465 = vmatmul.bf16.gmra.mxu2 %v3401_v55  ;;  %v4995_v55 = vrot.slane %v4993_v33, 3  ;;  %v1568_v33 = vadd.f32 %v13390_v61, %v1469_v56  ;;  %v11842_v56 = vld [vmem:[%s14928_s5 + $0x28] sm:$0xff] }
 0x1c7   : > { %4423 = vmatpush.bf16.msrb.mxu2 %v11848_v9  ;;  %v13653_v9 = vld [vmem:[#allocation2 + $0x20] sm:$0xff]  }
 0x1c8   : > { %v13580_v40 = vor.u32 %v4995_v55, %v4992_v52 }
 0x1c9   : > { %4613 = vmatmul.bf16.gmra.mxu0 %v13317_v20  ;;  %v13552_v50 = vpop.f32.mrf.mxu2  ;;  %3578 = vmatmul.bf16.gmra.mxu3 %v3514_v27  ;;  %v4987_v27 = vrot.slane %v4985_v36, 3  ;;  %v1687_v36 = vadd.f32 %v13515_v4, %v1568_v33  ;;  %v1569_v33 = vadd.f32 %v13424_v12, %v1470_v42  ;;  %v1359_v12 = vadd.f32 %v13439_v11, %v13315_v3 }
 0x1cb   : > { %v4988_v24 = vor.u32 %v4987_v27, %v4984_v5  ;;  %v4166_v5 = vrot.slane %v4164_v47, 4  ;;  %v11868_v27 = vld [vmem:[%s14928_s5 + $0xf0] sm:$0xff]  ;;  %v11867_v47 = vld [vmem:[%s14928_s5 + $0xe8] sm:$0xff]  ;;  %v1471_v11 = vadd.f32 %v13458_v28, %v1359_v12  ;;  %v11865_v12 = vld [vmem:[%s14928_s5 + $0xd8] sm:$0xff] }
 0x1cc   : > { %v13558_v29 = vpop.f32.mrf.mxu3  ;;  %4719 = vmatpush.bf16.msra.mxu1 %v11868_v27 }
 0x1cd   : > { %v4997_v48 = vsel %vm1194_vm13, %v4988_v24, %v13580_v40  ;;  %v622_v24 = vsel %vm12460_vm9, 0, %v621_v54  ;;  %v1570_v28 = vadd.f32 %v13460_v45, %v1471_v11  ;;  %v11839_v54 = vld [vmem:[%s14928_s5 + $0x10] sm:$0xff]  ;;  %v11838_v11 = vld [vmem:[%s14928_s5 + $0x8] sm:$0xff] }
 0x1ce   : > { %v2775_v60 = vpop.f32.mrf.mxu0  ;;  %v13560_v20 = vpop.f32.mrf.mxu1  ;;  %623 = vst [vmem:[#allocation3 + $0xc] sm:$0x8] %v622_v24 }
 0x1cf   : > { %v12184_v60 = vor.u32 %v12183_v63, %v12182_v34  ;;  %v4161_v63 = vshrl.u32 %v13427_v13, 16  ;;  %v3941_v13 = vrot.slane %v13571_v25, 3  ;;  %v1689_v45 = vadd.f32 %v13552_v50, %v1570_v28  ;;  %v11845_v50 = vld [vmem:[%s14928_s5 + $0x40] sm:$0xff] }
 0x1d0   : > { %4720 = vmatpush.bf16.msra.mxu1 %v11867_v47 }
 0x1d1   : > { %3800 = vmatmul.bf16.gmra.mxu1 %v3735_v8  ;;  %v1685_v58 = vpop.f32.mrf.mxu2  ;;  %v11843_v8 = vld [vmem:[%s14928_s5 + $0x30] sm:$0xff]  ;;  %v4153_v34 = vshrl.u32 %v12184_v60, 16  ;;  %v4156_v2 = vshll.u32 %v12184_v60, 16  ;;  %v3940_v19 = vrot.slane %v12184_v60, 3  ;;  %v4163_v4 = vrot.slane %v4161_v63, 3 }
 0x1d2   : > { %4515 = vmatpush.bf16.msrb.mxu3 %v11843_v8  ;;  %v1805_v58 = vadd.f32 %v13532_v22, %v1687_v36  ;;  %v11847_v36 = vld [vmem:[%s14928_s5 + $0x50] sm:$0xff] }
 0x1d3   : > { %v3942_v60 = vsel %vm14983_vm3, %v3940_v19, %v3941_v13  ;;  %v4155_v8 = vrot.slane %v4153_v34, 3  ;;  %v4158_v23 = vrot.slane %v4156_v2, 4  ;;  %v13618_v57 = vor.u32 %v4166_v5, %v4163_v4  ;;  %v11840_v34 = vld [vmem:[%s14928_s5 + $0x18] sm:$0xff]  ;;  %4424 = vmatpush.bf16.msrb.mxu2 %v11847_v36 }
 0x1d4   : > { %v1803_v52 = vpop.f32.mrf.mxu3  ;;  %v1911_v63 = vadd.f32 %v13534_v6, %v1805_v58  ;;  %v1688_v6 = vadd.f32 %v13537_v26, %v1569_v33  ;;  %vm14984_vm3 = vsmask.f32 4352  ;;  %v13661_v33 = vpop.permute.xlu0 %2162 }
 0x1d5   : > { %v13631_v52 = vld [vmem:[%s14929_s6] ss:$0 sm:$0xff]  ;;  %v4159_v3 = vor.u32 %v4158_v23, %v4155_v8  ;;  %v11846_v23 = vld [vmem:[%s14928_s5 + $0x48] sm:$0xff] }
 0x1d6   : > { %v13590_v61 = vpop.f32.mrf.mxu0  ;;  %v1909_v55 = vpop.f32.mrf.mxu1  ;;  %3903 = vmatmul.bf16.vlgmr.msra.gmra.mxu2 %v12950_v44  ;;  %4516 = vmatpush.bf16.msrb.mxu3 %v11842_v56  ;;  %v11841_v44 = vld [vmem:[%s14928_s5 + $0x20] sm:$0xff]  ;;  %v1806_v26 = vadd.f32 %v13542_v18, %v1688_v6 }
 0x1d7   : > { %v4168_v19 = vsel %vm14984_vm3, %v4159_v3, %v13618_v57  ;;  %v11866_v8 = vld [vmem:[%s14928_s5 + $0xe0] sm:$0xff]  ;;  %4425 = vmatpush.bf16.msrb.mxu2 %v11846_v23  ;;  %v11879_v3 = vld [vmem:[%s14928_s5 + $0x138] sm:$0xff]  ;;  %v13707_v23 = vpop.permute.xlu1 %2167  ;;  %vm14985_vm3 = vsmask.f32 7424 }
 0x1d8   : > { %v1912_v18 = vadd.f32 %v13544_v0, %v1806_v26  ;;  %4721 = vmatpush.bf16.msra.mxu1 %v11866_v8  ;;  %v2214_v8 = vld [vmem:[#allocation3] sm:$0x8] }
 0x1d9   : > { %5056 = vmatmul.bf16.vlgmr.msrb.gmra.mxu0 %v4997_v48  ;;  %v2022_v22 = vpop.f32.mrf.mxu2  ;;  %4001 = vmatmul.bf16.vlgmr.msra.gmra.mxu3 %v3942_v60  ;;  %v13645_v48 = vld [vmem:[%s14930_s7] ss:$0 sm:$0xff]  ;;  %v4304_v60 = vld [vmem:[#allocation2] sm:$0x8] }
 0x1da   : > { %v2031_v56 = vadd.f32 %v2022_v22, %v1911_v63  ;;  %4517 = vmatpush.bf16.msrb.mxu3 %v11841_v44  ;;  %v12250_v44 = vld [vmem:[#allocation2 + $0x20] sm:$0xf]   ;;  %v12257_v22 = vld [vmem:[#allocation2 + $0x20] sm:$0x10]  ;;  %v4441_v6 = vunpack.c.l.b16 %v4304_v60  ;;  %v13702_v60 = vld [vmem:[#allocation2 + $0x30] sm:$0xf] }
 0x1db   : > { %4426 = vmatpush.bf16.msrb.mxu2 %v11845_v50 }
 0x1dc   : > { %v2131_v2 = vpop.f32.mrf.mxu3  ;;  %v4445_v26 = vpack.c.b16 %v4442_v37, %v4441_v6  ;;  %4722 = vmatpush.bf16.msra.mxu1 %v11865_v12  ;;  %v11878_v37 = vld [vmem:[%s14928_s5 + $0x130] sm:$0xff] }
 0x1dd   : > { %v2140_v58 = vadd.f32 %v2131_v2, %v2031_v56  ;;  %v1807_v56 = vadd.f32 %v13558_v29, %v1689_v45 }
 0x1de   : > { %v13633_v55 = vpop.f32.mrf.mxu0  ;;  %v13638_v42 = vpop.f32.mrf.mxu1  ;;  %4518 = vmatpush.bf16.msrb.mxu3 %v11840_v34 }
 0x1df   : > { %v2147_v4 = vmul.f32 %v13631_v52, %v2140_v58  ;;  %4836 = vmatpush.bf16.msra.mxu2 %v11879_v3 }
 0x1e1   : > { %4227 = vmatmul.bf16.vlgmr.msrb.gmra.mxu1 %v4168_v19  ;;  %v2024_v5 = vpop.f32.mrf.mxu2  ;;  %v2154_v27 = vadd.f32 %v13645_v48, %v2147_v4  ;;  %v13693_v4 = vor.u32 %v12257_v22, %v12250_v44  ;;  %v4448_v44 = vshrl.u32 %v4445_v26, 16  ;;  %v4451_v22 = vshll.u32 %v4445_v26, 16 }
 0x1e2   : > { %v2032_v63 = vadd.f32 %v2024_v5, %v1912_v18  ;;  %4519 = vmatpush.bf16.msrb.mxu3 %v11839_v54  ;;  %v11887_v54 = vld [vmem:[%s14928_s5 + $0x178] sm:$0xff] }
 0x1e3   : > { %v2157_v0 = vmax.f32 %v2154_v27, 0.0  ;;  %v4621_v27 = vld [vmem:[#allocation2 + $0x2c] sm:$0xe]  ;;  %v4362_v6 = vshll.u32 %v13693_v4, 16  ;;  %4837 = vmatpush.bf16.msra.mxu2 %v11878_v37  ;;  %v11886_v37 = vld [vmem:[%s14928_s5 + $0x170] sm:$0xff] }
 0x1e4   : > { %v2133_v36 = vpop.f32.mrf.mxu3 }
 0x1e5   : > { %v2175_v34 = vmul.f32 %v13661_v33, %v2157_v0  ;;  %v2141_v2 = vadd.f32 %v2133_v36, %v2032_v63  ;;  %v11861_v36 = vld [vmem:[#allocation2 + $0x34] sm:$0x30] }
 0x1e6   : > { %v13664_v47 = vpop.f32.mrf.mxu0  ;;  %v13669_v24 = vpop.f32.mrf.mxu1  ;;  %3908 = vmatmul.bf16.gmra.mxu2 %v12929_v17  ;;  %v11864_v17 = vld [vmem:[%s14928_s5 + $0xd0] sm:$0xff]  ;;  %4520 = vmatpush.bf16.msrb.mxu3 %v11838_v11  ;;  %v4646_v11 = vunpack.c.l.b16 %v13702_v60 }
 0x1e7   : > { %v2178_v29 = vpack.c.bf16 %v2175_v34, %v2175_v34  ;;  %v2148_v58 = vmul.f32 %v13631_v52, %v2141_v2  ;;  %4723 = vmatpush.bf16.msra.mxu1 %v11864_v17  ;;  %v12239_v34 = vld [vmem:[#allocation2 + $0x8] sm:$0xff]   ;;  %v9974_v17 = vld [vmem:[#allocation2 + $0x34] sm:$0xf] }
 0x1e8   : > { %v4456_v2 = vshrl.u32 %v12239_v34, 16  ;;  %v4459_v3 = vshll.u32 %v12239_v34, 16 }
 0x1e9   : > { %5061 = vmatmul.bf16.gmra.mxu0 %v13580_v40  ;;  %v2027_v19 = vpop.f32.mrf.mxu2  ;;  %v1913_v40 = vadd.f32 %v13560_v20, %v1807_v56  ;;  %v2182_v5 = vshll.u32 %v2178_v29, 16  ;;  %v2185_v28 = vshrl.u32 %v2178_v29, 16  ;;  %v2155_v18 = vadd.f32 %v13645_v48, %v2148_v58  ;;  %4006 = vmatmul.bf16.gmra.mxu3 %v3941_v13  ;;  %v11837_v20 = vld [vmem:[%s14928_s5] sm:$0xff]  ;;  %v11863_v56 = vld [vmem:[%s14928_s5 + $0xc8] sm:$0xff] }
 0x1ea   : > { %4521 = vmatpush.bf16.msrb.mxu3 %v11837_v20  ;;  %v4458_v20 = vrot.slane %v4456_v2, 3 }
 0x1eb   : > { %v2184_v25 = vrot.slane %v2182_v5, 5  ;;  %v2187_v13 = vrot.slane %v2185_v28, 4  ;;  %v2158_v45 = vmax.f32 %v2155_v18, 0.0  ;;  %v2033_v0 = vadd.f32 %v2027_v19, %v1913_v40  ;;  %v11877_v19 = vld [vmem:[%s14928_s5 + $0x128] sm:$0xff]  ;;  %4724 = vmatpush.bf16.msra.mxu1 %v11863_v56  ;;  %v13748_v56 = vpop.permute.xlu2 %2172 }
 0x1ec   : > { %v2136_v12 = vpop.f32.mrf.mxu3  ;;  %v4450_v40 = vrot.slane %v4448_v44, 3  ;;  %v4453_v5 = vrot.slane %v4451_v22, 4  ;;  %v4645_v28 = vunpack.c.l.b16 %v4621_v27  ;;  %v13725_v18 = vor.u32 %v11861_v36, %v9974_v17  ;;  %v11862_v27 = vld [vmem:[%s14928_s5 + $0xc0] sm:$0xff]  ;;  %4838 = vmatpush.bf16.msra.mxu2 %v11877_v19 }
 0x1ed   : > { %v2215_v26 = vsel %vm12460_vm9, %v2184_v25, %v2214_v8  ;;  %v2176_v29 = vmul.f32 %v13707_v23, %v2158_v45  ;;  %v2142_v58 = vadd.f32 %v2136_v12, %v2033_v0  ;;  %v13732_v0 = vrot.slane %v4362_v6, 1  ;;  %v11876_v6 = vld [vmem:[%s14928_s5 + $0x120] sm:$0xff] }
 0x1ee   : > { %v3194_v63 = vpop.f32.mrf.mxu0  ;;  %v13712_v50 = vpop.f32.mrf.mxu1  ;;  %2216 = vst [vmem:[#allocation3] sm:$0x8] %v2215_v26  ;;  %4930 = vmatpush.bf16.msra.mxu3 %v11887_v54  ;;  %v4461_v44 = vrot.slane %v4459_v3, 4  ;;  %v4454_v54 = vor.u32 %v4453_v5, %v4450_v40  ;;  %v4660_v36 = vshrl.u32 %v13725_v18, 16  ;;  %v4663_v12 = vshll.u32 %v13725_v18, 16 }
 0x1ef   : > { %v2188_v63 = vor.u32 %v2187_v13, %v2184_v25  ;;  %v2179_v34 = vpack.c.bf16 %v2176_v29, %v2176_v29  ;;  %v2149_v8 = vmul.f32 %v13631_v52, %v2142_v58  ;;  %v4649_v52 = vpack.c.b16 %v4646_v11, %v4645_v28  ;;  %v11904_v13 = vld [vmem:[%s14928_s5 + $0x1f8] sm:$0xff]  ;;  %v11885_v58 = vld [vmem:[%s14928_s5 + $0x168] sm:$0xff]  ;;  %4725 = vmatpush.bf16.msra.mxu1 %v11862_v27  ;;  %v11884_v27 = vld [vmem:[%s14928_s5 + $0x160] sm:$0xff] }
 0x1f0   : > { %v4365_v40 = vsel %vm14985_vm3, %v13507_v43, %v13732_v0  ;;  %v13758_v5 = vor.u32 %v4461_v44, %v4458_v20  ;;  %4839 = vmatpush.bf16.msra.mxu2 %v11876_v6  ;;  %v11875_v43 = vld [vmem:[%s14928_s5 + $0x118] sm:$0xff]  ;;  %vm14986_vm3 = vsmask.f32 4352  ;;  %v11902_v6 = vld [vmem:[%s14928_s5 + $0x1e8] sm:$0xff] }
 0x1f1   : > { %4232 = vmatmul.bf16.gmra.mxu1 %v13618_v57  ;;  %v2029_v45 = vpop.f32.mrf.mxu2  ;;  %v2191_v22 = vshll.u32 %v2179_v34, 16  ;;  %v2195_v57 = vshrl.u32 %v2179_v34, 16  ;;  %v2156_v25 = vadd.f32 %v13645_v48, %v2149_v8  ;;  %v2189_v2 = vrot.slane %v2188_v63, 4 }
 0x1f2   : > { %4931 = vmatpush.bf16.msra.mxu3 %v11886_v37  ;;  %v4652_v28 = vshrl.u32 %v4649_v52, 16  ;;  %v4655_v63 = vshll.u32 %v4649_v52, 16  ;;  %v11903_v37 = vld [vmem:[%s14928_s5 + $0x1f0] sm:$0xff]  ;;  %v4662_v45 = vrot.slane %v4660_v36, 1 }
 0x1f3   : > { %v2193_v3 = vrot.slane %v2191_v22, 5  ;;  %v2197_v26 = vrot.slane %v2195_v57, 4  ;;  %v2159_v48 = vmax.f32 %v2156_v25, 0.0  ;;  %5160 = vmatpush.bf16.msrb.mxu1 %v11904_v13  ;;  %v4665_v22 = vrot.slane %v4663_v12, 2 }
 0x1f4   : > { %v2138_v19 = vpop.f32.mrf.mxu3  ;;  %v4463_v57 = vsel %vm14986_vm3, %v4454_v54, %v13758_v5  ;;  %v4654_v25 = vrot.slane %v4652_v28, 1  ;;  %v4657_v13 = vrot.slane %v4655_v63, 2  ;;  %4840 = vmatpush.bf16.msra.mxu2 %v11875_v43 }
 0x1f5   : > { %v2194_v34 = vsel %vm12509_vm0, %v2189_v2, %v2193_v3  ;;  %v2177_v8 = vmul.f32 %v13748_v56, %v2159_v48  ;;  %v2198_v20 = vor.u32 %v2197_v26, %v2193_v3  ;;  %v640_v2 = vld [vmem:[#allocation3 + $0x18] sm:$0x1]  ;;  %v13779_v3 = vor.u32 %v4665_v22, %v4662_v45  ;;  %v11874_v26 = vld [vmem:[%s14928_s5 + $0x110] sm:$0xff]  ;;  %v11901_v45 = vld [vmem:[%s14928_s5 + $0x1e0] sm:$0xff] }
 0x1f6   : > { %v13750_v29 = vpop.f32.mrf.mxu0  ;;  %v2450_v17 = vpop.f32.mrf.mxu1  ;;  %4427 = vmatmul.bf16.vlgmr.msrb.gmra.mxu2 %v4365_v40  ;;  %2217 = vst [vmem:[#allocation3 + $0x4] sm:$0xf] %v2194_v34  ;;  %4932 = vmatpush.bf16.msra.mxu3 %v11885_v58  ;;  %v641_v54 = vsel %vm12479_vm12, 0, %v640_v2  ;;  %v11883_v40 = vld [vmem:[%s14928_s5 + $0x158] sm:$0xff]  ;;  %v4658_v34 = vor.u32 %v4657_v13, %v4654_v25  ;;  %v2219_v22 = vld [vmem:[#allocation3 + $0xc] sm:$0xf] }
 0x1f7   : > { %v2180_v44 = vpack.c.bf16 %v2177_v8, %v2177_v8  ;;  %5161 = vmatpush.bf16.msrb.mxu1 %v11903_v37  ;;  %v2199_v48 = vrot.slane %v2198_v20, 4  ;;  %642 = vst [vmem:[#allocation3 + $0x18] sm:$0x1] %v641_v54  ;;  %v11873_v20 = vld [vmem:[%s14928_s5 + $0x108] sm:$0xff]  ;;  %v4366_v13 = vshrl.u32 %v13693_v4, 16 }
 0x1f8   : > { %v4667_v43 = vsel %vm1945_vm7, %v4658_v34, %v13779_v3  ;;  %4841 = vmatpush.bf16.msra.mxu2 %v11874_v26  ;;  %v11870_v2 = vld [vmem:[#allocation2 + $0x40] sm:$0xf0]  ;;  %v11881_v4 = vld [vmem:[%s14928_s5 + $0x148] sm:$0xff] }
 0x1f9   : > { %v13772_v52 = vpop.f32.mrf.mxu2  ;;  %v2201_v36 = vshll.u32 %v2180_v44, 16  ;;  %v2205_v12 = vshrl.u32 %v2180_v44, 16  ;;  %4522 = vmatmul.bf16.vlgmr.msrb.gmra.mxu3 %v4463_v57  ;;  %v4368_v54 = vor.u32 %v4366_v13, %v13732_v0  ;;  %v11899_v0 = vld [vmem:[%s14928_s5 + $0x1d0] sm:$0xff] }
 0x1fa   : > { %4933 = vmatpush.bf16.msra.mxu3 %v11884_v27  ;;  %v11882_v27 = vld [vmem:[%s14928_s5 + $0x150] sm:$0xff] }
 0x1fb   : > { %v2203_v58 = vrot.slane %v2201_v36, 5  ;;  %v2207_v19 = vrot.slane %v2205_v12, 4  ;;  %5162 = vmatpush.bf16.msrb.mxu1 %v11902_v6  ;;  %v11900_v36 = vld [vmem:[%s14928_s5 + $0x1d8] sm:$0xff]  ;;  %v11871_v12 = vld [vmem:[#allocation2 + $0x48] sm:$0x70]  ;;  %v11872_v6 = vld [vmem:[%s14928_s5 + $0x100] sm:$0xff] }
 0x1fc   : > { %v13791_v28 = vpop.f32.mrf.mxu3  ;;  %4842 = vmatpush.bf16.msra.mxu2 %v11873_v20 }
 0x1fd   : > { %v2204_v8 = vsel %vm12509_vm0, %v2199_v48, %v2203_v58  ;;  %v2208_v37 = vor.u32 %v2207_v19, %v2203_v58  ;;  %v10030_v48 = vld [vmem:[#allocation2 + $0x48] sm:$0xf]  ;;  %v11912_v58 = vld [vmem:[%s14928_s5 + $0x238] sm:$0xff] }
 0x1fe   : > { %v13786_v17 = vpop.f32.mrf.mxu0  ;;  %v13793_v63 = vpop.f32.mrf.mxu1  ;;  %2218 = vst [vmem:[#allocation3 + $0x8] sm:$0xf] %v2204_v8  ;;  %4934 = vmatpush.bf16.msra.mxu3 %v11883_v40  ;;  %v10031_v34 = vor.u32 %v11871_v12, %v10030_v48  ;;  %v10026_v8 = vld [vmem:[#allocation2 + $0x40] sm:$0xc]  ;;  %v12187_v48 = vld [vmem:[#allocation2 + $0x18] sm:$0xf0] }
 0x1ff   : > { %v2209_v44 = vrot.slane %v2208_v37, 4  ;;  %5163 = vmatpush.bf16.msrb.mxu1 %v11901_v45  ;;  %v10027_v37 = vor.u32 %v11870_v2, %v10026_v8  ;;  %v11880_v45 = vld [vmem:[%s14928_s5 + $0x140] sm:$0xff]  ;;  %v12188_v8 = vld [vmem:[#allocation2 + $0x18] sm:$0x8] }
 0x200   : > { %4843 = vmatpush.bf16.msra.mxu2 %v11872_v6  ;;  %v4778_v20 = vshrl.u32 %v10031_v34, 16 }
 0x201   : > { %4726 = vmatmul.bf16.vlgmr.msra.gmra.mxu1 %v4667_v43  ;;  %v13808_v57 = vpop.f32.mrf.mxu2  ;;  %v2220_v25 = vsel %vm12450_vm6, %v2209_v44, %v2219_v22  ;;  %v11911_v22 = vld [vmem:[%s14928_s5 + $0x230] sm:$0xff]  ;;  %v4781_v44 = vshll.u32 %v10031_v34, 16  ;;  %v4773_v13 = vshll.u32 %v10027_v37, 16 }
 0x202   : > { %2221 = vst [vmem:[#allocation3 + $0xc] sm:$0xf] %v2220_v25  ;;  %4935 = vmatpush.bf16.msra.mxu3 %v11882_v27  ;;  %v11898_v27 = vld [vmem:[%s14928_s5 + $0x1c8] sm:$0xff]  ;;  %v4770_v25 = vshrl.u32 %v10027_v37, 16  ;;  %v4780_v2 = vrot.slane %v4778_v20, 2 }
 0x203   : > { %5164 = vmatpush.bf16.msrb.mxu1 %v11900_v36  ;;  %v4775_v34 = vrot.slane %v4773_v13, 3 }
 0x204   : > { %v13828_v19 = vpop.f32.mrf.mxu3  ;;  %5254 = vmatpush.bf16.msrb.mxu2 %v11912_v58  ;;  %v4772_v58 = vrot.slane %v4770_v25, 2 }
 0x206   : > { %v13819_v26 = vpop.f32.mrf.mxu0  ;;  %v13830_v40 = vpop.f32.mrf.mxu1  ;;  %4432 = vmatmul.bf16.gmra.mxu2 %v4368_v54  ;;  %4936 = vmatpush.bf16.msra.mxu3 %v11881_v4  ;;  %v4783_v54 = vrot.slane %v4781_v44, 3  ;;  %v2444_v4 = vadd.f32 %v13638_v42, %v13342_v10  ;;  %v4776_v44 = vor.u32 %v4775_v34, %v4772_v58  ;;  %v11897_v42 = vld [vmem:[%s14928_s5 + $0x1c0] sm:$0xff] }
 0x207   : > { %5165 = vmatpush.bf16.msrb.mxu1 %v11899_v0 }
 0x208   : > { %5255 = vmatpush.bf16.msrb.mxu2 %v11911_v22  ;;  %v2543_v0 = vadd.f32 %v13772_v52, %v2444_v4  ;;  %v11910_v52 = vld [vmem:[%s14928_s5 + $0x228] sm:$0xff]  ;;  %v11909_v4 = vld [vmem:[%s14928_s5 + $0x220] sm:$0xff] }
 0x209   : > { %v13841_v43 = vpop.f32.mrf.mxu2  ;;  %4527 = vmatmul.bf16.gmra.mxu3 %v13758_v5  ;;  %v4857_v5 = vld [vmem:[#allocation2 + $0x2c] sm:$0xc] }
 0x20a   : > { %4937 = vmatpush.bf16.msra.mxu3 %v11880_v45  ;;  %v13855_v45 = vor.u32 %v4783_v54, %v4780_v2  ;;  %v4875_v22 = vunpack.c.l.b16 %v4857_v5  ;;  %v2661_v20 = vadd.f32 %v13791_v28, %v2543_v0 }
 0x20b   : > { %5166 = vmatpush.bf16.msrb.mxu1 %v11898_v27  ;;  %v5105_v27 = vshll.u32 %v13653_v9, 16 }
 0x20c   : > { %v13847_v12 = vpop.f32.mrf.mxu3  ;;  %v4876_v10 = vpack.c.b16 %v4646_v11, %v4875_v22  ;;  %v4785_v60 = vsel %vm1194_vm13, %v4776_v44, %v13855_v45  ;;  %v4878_v11 = vrot.slane %v13725_v18, 2  ;;  %5256 = vmatpush.bf16.msrb.mxu2 %v11910_v52  ;;  %v2777_v5 = vadd.f32 %v13489_v39, %v2661_v20 }
 0x20d   : > { %v5107_v34 = vrot.slane %v5105_v27, 4 }
 0x20e   : > { %v3685_v36 = vpop.f32.mrf.mxu0  ;;  %v13849_v6 = vpop.f32.mrf.mxu1  ;;  %v2866_v44 = vadd.f32 %v13793_v63, %v2777_v5  ;;  %v11907_v63 = vld [vmem:[%s14928_s5 + $0x210] sm:$0xff] }
 0x20f   : > { %v12189_v36 = vor.u32 %v12188_v8, %v12187_v48  ;;  %5167 = vmatpush.bf16.msrb.mxu1 %v11897_v42  ;;  %v4877_v48 = vrot.slane %v4876_v10, 2 }
 0x210   : > { %5257 = vmatpush.bf16.msrb.mxu2 %v11909_v4 }
 0x211   : > { %4731 = vmatmul.bf16.gmra.mxu1 %v13779_v3  ;;  %v2541_v37 = vpop.f32.mrf.mxu2  ;;  %v5102_v3 = vshrl.u32 %v13653_v9, 16  ;;  %v5094_v2 = vshrl.u32 %v12189_v36, 16  ;;  %v5097_v54 = vshll.u32 %v12189_v36, 16  ;;  %v2446_v9 = vadd.f32 %v13669_v24, %v13386_v59  ;;  %v11908_v24 = vld [vmem:[%s14928_s5 + $0x218] sm:$0xff] }
 0x212   : > { %v4879_v37 = vsel %vm1839_vm1, %v4877_v48, %v4878_v11 }
 0x213   : > { %v5104_v58 = vrot.slane %v5102_v3, 3  ;;  %v2544_v0 = vadd.f32 %v13808_v57, %v2446_v9  ;;  %v5096_v22 = vrot.slane %v5094_v2, 3  ;;  %v5099_v36 = vrot.slane %v5097_v54, 4  ;;  %v12227_v54 = vld [vmem:[%s14930_s7] ss:$0 sm:$0xff] }
 0x214   : > { %v2659_v13 = vpop.f32.mrf.mxu3  ;;  %5258 = vmatpush.bf16.msrb.mxu2 %v11908_v24 }
 0x215   : > { %v2662_v59 = vadd.f32 %v13828_v19, %v2544_v0  ;;  %v13885_v39 = vor.u32 %v5107_v34, %v5104_v58  ;;  %v5100_v52 = vor.u32 %v5099_v36, %v5096_v22  ;;  %v2449_v19 = vadd.f32 %v13712_v50, %v13417_v62  ;;  %v12226_v13 = vld [vmem:[%s14929_s6] ss:$0 sm:$0xff]  ;;  %v11948_v22 = vld [vmem:[%s14931_s8 + $0xf8] sm:$0xff] }
 0x216   : > { %v13868_v25 = vpop.f32.mrf.mxu0  ;;  %v2864_v28 = vpop.f32.mrf.mxu1  ;;  %4844 = vmatmul.bf16.vlgmr.msra.gmra.mxu2 %v4785_v60 }
 0x217   : > { %v2778_v3 = vadd.f32 %v13528_v14, %v2662_v59  ;;  %v5109_v28 = vsel %vm14986_vm3, %v5100_v52, %v13885_v39  ;;  %v2545_v60 = vadd.f32 %v13841_v43, %v2449_v19  ;;  %vm14988_vm3 = vcmask 1044480  }
 0x218   : > { %5259 = vmatpush.bf16.msrb.mxu2 %v11907_v63 }
 0x219   : > { %v2975_v8 = vpop.f32.mrf.mxu2  ;;  %4938 = vmatmul.bf16.vlgmr.msra.gmra.mxu3 %v4879_v37  ;;  %v2867_v14 = vadd.f32 %v13830_v40, %v2778_v3  ;;  %v2663_v50 = vadd.f32 %v13847_v12, %v2545_v60  ;;  %v11905_v40 = vld [vmem:[%s14928_s5 + $0x200] sm:$0xff]  ;;  %v14987_v60 = vunpack.c.h.b16 %v13466_v38 }
 0x21a   : > { %v2984_v57 = vadd.f32 %v2975_v8, %v2866_v44 }
 0x21b   : > { %v2779_v34 = vadd.f32 %v13539_v30, %v2663_v50 }
 0x21c   : > { %v3093_v10 = vpop.f32.mrf.mxu3 }
 0x21d   : > { %v3102_v27 = vadd.f32 %v3093_v10, %v2984_v57  ;;  %v2868_v30 = vadd.f32 %v13849_v6, %v2779_v34 }
 0x21e   : > { %v13890_v20 = vpop.f32.mrf.mxu0  ;;  %v13892_v42 = vpop.f32.mrf.mxu1 }
 0x21f   : > { %v3196_v2 = vadd.f32 %v13590_v61, %v3102_v27  ;;  %v11906_v61 = vld [vmem:[%s14928_s5 + $0x208] sm:$0xff] }
 0x220   : > { %5260 = vmatpush.bf16.msrb.mxu2 %v11906_v61 }
 0x221   : > { %5168 = vmatmul.bf16.vlgmr.msrb.gmra.mxu1 %v5109_v28  ;;  %v2977_v62 = vpop.f32.mrf.mxu2  ;;  %v3203_v4 = vmul.f32 %v12226_v13, %v3196_v2 }
 0x222   : > { %v2985_v5 = vadd.f32 %v2977_v62, %v2867_v14 }
 0x223   : > { %v3210_v9 = vadd.f32 %v12227_v54, %v3203_v4  ;;  %v11946_v4 = vld [vmem:[%s14931_s8 + $0xe8] sm:$0xff] }
 0x224   : > { %v3095_v43 = vpop.f32.mrf.mxu3  ;;  %5261 = vmatpush.bf16.msrb.mxu2 %v11905_v40 }
 0x225   : > { %v3213_v0 = vmax.f32 %v3210_v9, 0.0  ;;  %v3103_v8 = vadd.f32 %v3095_v43, %v2985_v5  ;;  %v5202_v5 = vrot.slane %v13547_v7, 3 }
 0x226   : > { %v13912_v48 = vpop.f32.mrf.mxu0  ;;  %v13917_v58 = vpop.f32.mrf.mxu1  ;;  %4849 = vmatmul.bf16.gmra.mxu2 %v13855_v45  ;;  %v5181_v45 = vld [vmem:[#allocation2 + $0x4] sm:$0x8] }
 0x227   : > { %v3216_v12 = vmul.f32 %v3213_v0, %v13661_v33  ;;  %v3197_v37 = vadd.f32 %v13633_v55, %v3103_v8  ;;  %v11947_v55 = vld [vmem:[%s14931_s8 + $0xf0] sm:$0xff]  ;;  %v5199_v6 = vunpack.c.l.b16 %v5181_v45 }
 0x228   : > { %5743 = vmatpush.bf16.msra.mxu2 %v11948_v22 }
 0x229   : > { %v2980_v36 = vpop.f32.mrf.mxu2  ;;  %v3219_v44 = vpack.c.bf16 %v3216_v12, %v3216_v12  ;;  %v3204_v59 = vmul.f32 %v12226_v13, %v3197_v37  ;;  %4943 = vmatmul.bf16.gmra.mxu3 %v4878_v11  ;;  %v3252_v11 = vld [vmem:[#allocation3 + $0x18] sm:$0xf]  ;;  %v5200_v2 = vpack.c.b16 %v14987_v60, %v5199_v6 }
 0x22a   : > { %v2986_v10 = vadd.f32 %v2980_v36, %v2868_v30 }
 0x22b   : > { %v3223_v24 = vshrl.u32 %v3219_v44, 16  ;;  %v3211_v57 = vadd.f32 %v12227_v54, %v3204_v59  ;;  %v3226_v27 = vshll.u32 %v3219_v44, 16  ;;  %v5201_v34 = vrot.slane %v5200_v2, 3 }
 0x22c   : > { %v3098_v63 = vpop.f32.mrf.mxu3  ;;  %5744 = vmatpush.bf16.msra.mxu2 %v11947_v55 }
 0x22d   : > { %v3225_v3 = vrot.slane %v3223_v24, 7  ;;  %v3214_v28 = vmax.f32 %v3211_v57, 0.0  ;;  %v3104_v18 = vadd.f32 %v3098_v63, %v2986_v10  ;;  %v5203_v7 = vsel %vm14988_vm3, %v5201_v34, %v5202_v5  ;;  %v11943_v10 = vld [vmem:[%s14931_s8 + $0xd0] sm:$0xff] }
 0x22e   : > { %v4127_v52 = vpop.f32.mrf.mxu0  ;;  %v13935_v19 = vpop.f32.mrf.mxu1 }
 0x22f   : > { %v3228_v62 = vor.u32 %v3226_v27, %v3225_v3  ;;  %v3217_v14 = vmul.f32 %v3214_v28, %v13707_v23  ;;  %v3198_v50 = vadd.f32 %v13664_v47, %v3104_v18 }
 0x230   : > { %5745 = vmatpush.bf16.msra.mxu2 %v11946_v4 }
 0x231   : > { %5173 = vmatmul.bf16.gmra.mxu1 %v13885_v39  ;;  %v2982_v9 = vpop.f32.mrf.mxu2  ;;  %v3253_v61 = vsel %vm12492_vm14, %v3228_v62, %v3252_v11  ;;  %v3220_v38 = vpack.c.bf16 %v3217_v14, %v3217_v14  ;;  %v3205_v43 = vmul.f32 %v12226_v13, %v3198_v50  ;;  %v11945_v39 = vld [vmem:[%s14931_s8 + $0xe0] sm:$0xff]  ;;  %v3229_v13 = vrot.slane %v3225_v3, 4  ;;  %v3257_v3 = vld [vmem:[#allocation3 + $0x24] sm:$0x1]  ;;  %v11942_v11 = vld [vmem:[%s14931_s8 + $0xc8] sm:$0xff] }
 0x232   : > { %3254 = vst [vmem:[#allocation3 + $0x18] sm:$0xf] %v3253_v61  ;;  %v11941_v50 = vld [vmem:[%s14931_s8 + $0xc0] sm:$0xff] }
 0x233   : > { %v3231_v0 = vshrl.u32 %v3220_v38, 16  ;;  %v3212_v8 = vadd.f32 %v12227_v54, %v3205_v43  ;;  %v3234_v53 = vshll.u32 %v3220_v38, 16  ;;  %v11944_v54 = vld [vmem:[%s14931_s8 + $0xd8] sm:$0xff] }
 0x234   : > { %v3100_v40 = vpop.f32.mrf.mxu3  ;;  %5746 = vmatpush.bf16.msra.mxu2 %v11945_v39 }
 0x235   : > { %v3233_v37 = vrot.slane %v3231_v0, 7  ;;  %v3215_v22 = vmax.f32 %v3212_v8, 0.0 }
 0x236   : > { %v13948_v47 = vpop.f32.mrf.mxu0  ;;  %v3392_v12 = vpop.f32.mrf.mxu1  ;;  %5262 = vmatmul.bf16.vlgmr.msrb.gmra.mxu2 %v5203_v7 }
 0x237   : > { %v3236_v36 = vor.u32 %v3234_v53, %v3233_v37  ;;  %v3218_v30 = vmul.f32 %v3215_v22, %v13748_v56  ;;  %v3238_v27 = vrot.slane %v3233_v37, 4 }
 0x238   : > { %5747 = vmatpush.bf16.msra.mxu2 %v11944_v54 }
 0x239   : > { %v3461_v44 = vpop.f32.mrf.mxu2  ;;  %v3237_v59 = vsel %vm12545_vm8, %v3229_v13, %v3236_v36  ;;  %v3221_v45 = vpack.c.bf16 %v3218_v30, %v3218_v30 }
 0x23a   : > { %3255 = vst [vmem:[#allocation3 + $0x1c] sm:$0xf] %v3237_v59  ;;  %v3462_v41 = vadd.f32 %v3461_v44, %v13892_v42 }
 0x23b   : > { %v3240_v24 = vshrl.u32 %v3221_v45, 16  ;;  %v3243_v6 = vshll.u32 %v3221_v45, 16 }
 0x23c   : > { %v3574_v52 = vpop.f32.mrf.mxu3  ;;  %5748 = vmatpush.bf16.msra.mxu2 %v11943_v10 }
 0x23d   : > { %v3242_v63 = vrot.slane %v3240_v24, 7  ;;  %v3583_v0 = vadd.f32 %v3574_v52, %v3462_v41 }
 0x23e   : > { %v13960_v57 = vpop.f32.mrf.mxu0  ;;  %v3796_v55 = vpop.f32.mrf.mxu1 }
 0x23f   : > { %v3245_v28 = vor.u32 %v3243_v6, %v3242_v63  ;;  %v3247_v18 = vrot.slane %v3242_v63, 4  ;;  %v3687_v7 = vadd.f32 %v13750_v29, %v3583_v0  ;;  %v12228_v29 = vld [vmem:[%s14929_s6] ss:$0 sm:$0xff] }
 0x240   : > { %5749 = vmatpush.bf16.msra.mxu2 %v11942_v11  ;;  %v12229_v6 = vld [vmem:[%s14930_s7] ss:$0 sm:$0xff] }
 0x241   : > { %v3463_v60 = vpop.f32.mrf.mxu2  ;;  %v3246_v2 = vsel %vm12545_vm8, %v3238_v27, %v3245_v28  ;;  %v3258_v62 = vsel %vm12479_vm12, %v3247_v18, %v3257_v3  ;;  %v11940_v39 = vld [vmem:[#allocation3 + $0x18] sm:$0xff]  ;;  %v3805_v53 = vadd.f32 %v3796_v55, %v3687_v7  ;;  %vm14990_vm12 = vmmov %vm14988_vm3  ;;  %vm6617_vm8 = vcmask 1046528  }
 0x242   : > { %3256 = vst [vmem:[#allocation3 + $0x20] sm:$0xf] %v3246_v2  ;;  %v3464_v37 = vadd.f32 %v3463_v60, %v13917_v58  ;;  %v11931_v2 = vld [vmem:[%s14931_s8 + $0x78] sm:$0xff]  ;;  %v11929_v7 = vld [vmem:[%s14931_s8 + $0x68] sm:$0xff] }
 0x243   : > { %3259 = vst [vmem:[#allocation3 + $0x24] sm:$0x1] %v3258_v62  ;;  %v11987_v62 = vld [vmem:[%s14931_s8 + $0x1f8] sm:$0xff]  ;;  %5457 = vmatpush.bf16.msrb.mxu3 %v11931_v2 }
 0x244   : > { %v3576_v4 = vpop.f32.mrf.mxu3  ;;  %5750 = vmatpush.bf16.msra.mxu2 %v11941_v50 }
 0x245   : > { %v3584_v22 = vadd.f32 %v3576_v4, %v3464_v37  ;;  %v11985_v37 = vld [vmem:[%s14931_s8 + $0x1e8] sm:$0xff] }
 0x246   : > { %v13972_v14 = vpop.f32.mrf.mxu0  ;;  %v3798_v9 = vpop.f32.mrf.mxu1  ;;  %5267 = vmatmul.bf16.gmra.mxu2 %v5202_v5 }
 0x247   : > { %v3688_v44 = vadd.f32 %v13786_v17, %v3584_v22 }
 0x248   : > { %6203 = vmatpush.bf16.msrb.mxu2 %v11987_v62  ;;  %v11926_v62 = vld [vmem:[%s14931_s8 + $0x50] sm:$0xff] }
 0x249   : > { %v3466_v61 = vpop.f32.mrf.mxu2  ;;  %v5667_v54 = vld [vmem:[#allocation3 + $0x20] sm:$0xf]  ;;  %v3806_v52 = vadd.f32 %v3798_v9, %v3688_v44  ;;  %v4296_v44 = vld [vmem:[#allocation3 + $0x2c] sm:$0xe] }
 0x24a   : > { %v3467_v45 = vadd.f32 %v3466_v61, %v13935_v19  ;;  %v5690_v58 = vunpack.c.l.b16 %v5667_v54  ;;  %v11986_v61 = vld [vmem:[%s14931_s8 + $0x1f0] sm:$0xff] }
 0x24c   : > { %v3579_v21 = vpop.f32.mrf.mxu3  ;;  %v5692_v19 = vpack.c.b16 %v5690_v58, %v5690_v58  ;;  %6204 = vmatpush.bf16.msrb.mxu2 %v11986_v61 }
 0x24d   : > { %v3585_v55 = vadd.f32 %v3579_v21, %v3467_v45  ;;  %v11928_v45 = vld [vmem:[%s14931_s8 + $0x60] sm:$0xff] }
 0x24e   : > { %v4616_v38 = vpop.f32.mrf.mxu0  ;;  %v3801_v43 = vpop.f32.mrf.mxu1 }
 0x24f   : > { %v3689_v18 = vadd.f32 %v13819_v26, %v3585_v55  ;;  %v11930_v26 = vld [vmem:[%s14931_s8 + $0x70] sm:$0xff] }
 0x250   : > { %5458 = vmatpush.bf16.msrb.mxu3 %v11930_v26  ;;  %6205 = vmatpush.bf16.msrb.mxu2 %v11985_v37  ;;  %v11980_v37 = vld [vmem:[%s14931_s8 + $0x1c0] sm:$0xff] }
 0x251   : > { %v3468_v34 = vpop.f32.mrf.mxu2  ;;  %v3807_v38 = vadd.f32 %v3801_v43, %v3689_v18 }
 0x254   : > { %v3581_v40 = vpop.f32.mrf.mxu3  ;;  %5459 = vmatpush.bf16.msrb.mxu3 %v11929_v7  ;;  %v11924_v7 = vld [vmem:[%s14931_s8 + $0x40] sm:$0xff] }
 0x256   : > { %v13978_v8 = vpop.f32.mrf.mxu0  ;;  %v3803_v12 = vpop.f32.mrf.mxu1  ;;  %5751 = vmatmul.bf16.vlgmr.msra.gmra.mxu2 %v11940_v39 }
 0x258   : > { %5460 = vmatpush.bf16.msrb.mxu3 %v11928_v45 }
 0x259   : > { %v3904_v5 = vpop.f32.mrf.mxu2 }
 0x25a   : > { %v3913_v13 = vadd.f32 %v3904_v5, %v3805_v53 }
 0x25c   : > { %v4002_v30 = vpop.f32.mrf.mxu3 }
 0x25d   : > { %v4011_v59 = vadd.f32 %v4002_v30, %v3913_v13 }
 0x25e   : > { %v13982_v36 = vpop.f32.mrf.mxu0  ;;  %v4228_v42 = vpop.f32.mrf.mxu1 }
 0x25f   : > { %v4129_v24 = vadd.f32 %v13868_v25, %v4011_v59 }
 0x261   : > { %v3906_v10 = vpop.f32.mrf.mxu2  ;;  %v4237_v63 = vadd.f32 %v4228_v42, %v4129_v24  ;;  %v11984_v24 = vld [vmem:[%s14931_s8 + $0x1e0] sm:$0xff] }
 0x262   : > { %v3914_v17 = vadd.f32 %v3906_v10, %v3806_v52  ;;  %6206 = vmatpush.bf16.msrb.mxu2 %v11984_v24 }
 0x263   : > { %v4244_v3 = vmul.f32 %v12228_v29, %v4237_v63 }
 0x264   : > { %v4004_v28 = vpop.f32.mrf.mxu3 }
 0x265   : > { %v4251_v11 = vadd.f32 %v12229_v6, %v4244_v3  ;;  %v4012_v60 = vadd.f32 %v4004_v28, %v3914_v17  ;;  %v11983_v28 = vld [vmem:[%s14931_s8 + $0x1d8] sm:$0xff] }
 0x266   : > { %v13993_v27 = vpop.f32.mrf.mxu0  ;;  %v4230_v25 = vpop.f32.mrf.mxu1  ;;  %5756 = vmatmul.bf16.gmra.mxu2 %v5692_v19  ;;  %v11927_v19 = vld [vmem:[%s14931_s8 + $0x58] sm:$0xff] }
 0x267   : > { %v4254_v50 = vmax.f32 %v4251_v11, 0.0  ;;  %v4130_v4 = vadd.f32 %v13890_v20, %v4012_v60  ;;  %5461 = vmatpush.bf16.msrb.mxu3 %v11927_v19  ;;  %6207 = vmatpush.bf16.msrb.mxu2 %v11983_v28 }
 0x269   : > { %v3909_v9 = vpop.f32.mrf.mxu2  ;;  %v4257_v21 = vmul.f32 %v4254_v50, %v13661_v33  ;;  %v4238_v41 = vadd.f32 %v4230_v25, %v4130_v4  ;;  %v11982_v50 = vld [vmem:[%s14931_s8 + $0x1d0] sm:$0xff] }
 0x26a   : > { %v3915_v39 = vadd.f32 %v3909_v9, %v3807_v38 }
 0x26b   : > { %v4260_v34 = vpack.c.bf16 %v4257_v21, %v4257_v21  ;;  %v4245_v0 = vmul.f32 %v12228_v29, %v4238_v41  ;;  %5462 = vmatpush.bf16.msrb.mxu3 %v11926_v62  ;;  %6208 = vmatpush.bf16.msrb.mxu2 %v11982_v50  ;;  %v11925_v41 = vld [vmem:[%s14931_s8 + $0x48] sm:$0xff]  ;;  %v11955_v62 = vld [vmem:[%s14931_s8 + $0x120] sm:$0xff] }
 0x26c   : > { %v4007_v20 = vpop.f32.mrf.mxu3 }
 0x26d   : > { %v4264_v43 = vshrl.u32 %v4260_v34, 16  ;;  %v4267_v5 = vshll.u32 %v4260_v34, 16  ;;  %v4252_v53 = vadd.f32 %v12229_v6, %v4245_v0  ;;  %v4013_v22 = vadd.f32 %v4007_v20, %v3915_v39  ;;  %v11981_v34 = vld [vmem:[%s14931_s8 + $0x1c8] sm:$0xff] }
 0x26e   : > { %v5064_v40 = vpop.f32.mrf.mxu0  ;;  %v4233_v12 = vpop.f32.mrf.mxu1 }
 0x26f   : > { %v4266_v13 = vrot.slane %v4264_v43, 6  ;;  %v4269_v30 = vrot.slane %v4267_v5, 7  ;;  %v4255_v42 = vmax.f32 %v4252_v53, 0.0  ;;  %v4131_v54 = vadd.f32 %v13912_v48, %v4013_v22  ;;  %5463 = vmatpush.bf16.msrb.mxu3 %v11925_v41  ;;  %6209 = vmatpush.bf16.msrb.mxu2 %v11981_v34  ;;  %v11958_v53 = vld [vmem:[%s14931_s8 + $0x138] sm:$0xff]  ;;  %v4301_v22 = vld [vmem:[#allocation3 + $0x38] sm:$0x3] }
 0x271   : > { %v3911_v59 = vpop.f32.mrf.mxu2  ;;  %v4270_v58 = vor.u32 %v4269_v30, %v4266_v13  ;;  %v4258_v10 = vmul.f32 %v4255_v42, %v13707_v23  ;;  %v4239_v52 = vadd.f32 %v4233_v12, %v4131_v54  ;;  %v10278_v13 = vld [vmem:[#allocation3 + $0x28] sm:$0xc] }
 0x273   : > { %v4297_v55 = vsel %vm12517_vm5, %v4270_v58, %v4296_v44  ;;  %v4261_v48 = vpack.c.bf16 %v4258_v10, %v4258_v10  ;;  %v4246_v63 = vmul.f32 %v12228_v29, %v4239_v52  ;;  %v4271_v4 = vrot.slane %v4270_v58, 4  ;;  %5464 = vmatpush.bf16.msrb.mxu3 %v11924_v7  ;;  %6210 = vmatpush.bf16.msrb.mxu2 %v11980_v37  ;;  %v11957_v10 = vld [vmem:[%s14931_s8 + $0x130] sm:$0xff] }
 0x274   : > { %4298 = vst [vmem:[#allocation3 + $0x2c] sm:$0xe] %v4297_v55  ;;  %v4009_v3 = vpop.f32.mrf.mxu3  ;;  %vm14992_vm5 = vsmask.f32 7424 }
 0x275   : > { %v4273_v25 = vshrl.u32 %v4261_v48, 16  ;;  %v4276_v18 = vshll.u32 %v4261_v48, 16  ;;  %v4253_v11 = vadd.f32 %v12229_v6, %v4246_v63  ;;  %v11956_v63 = vld [vmem:[%s14931_s8 + $0x128] sm:$0xff] }
 0x276   : > { %v4235_v17 = vpop.f32.mrf.mxu1 }
 0x277   : > { %v4275_v46 = vrot.slane %v4273_v25, 6  ;;  %v4278_v60 = vrot.slane %v4276_v18, 7  ;;  %v4256_v2 = vmax.f32 %v4253_v11, 0.0  ;;  %5862 = vmatpush.bf16.msra.mxu3 %v11958_v53 }
 0x279   : > { %v14032_v29 = vpop.f32.mrf.mxu2  ;;  %v4279_v9 = vor.u32 %v4278_v60, %v4275_v46  ;;  %v4259_v26 = vmul.f32 %v4256_v2, %v13748_v56 }
 0x27b   : > { %v4280_v6 = vsel %vm12629_vm10, %v4271_v4, %v4279_v9  ;;  %v4262_v61 = vpack.c.bf16 %v4259_v26, %v4259_v26  ;;  %v4281_v43 = vrot.slane %v4279_v9, 4  ;;  %v11922_v30 = vld [vmem:[#allocation3 + $0x28] sm:$0xf0]  ;;  %5863 = vmatpush.bf16.msra.mxu3 %v11957_v10 }
 0x27c   : > { %4299 = vst [vmem:[#allocation3 + $0x30] sm:$0xf] %v4280_v6  ;;  %v14043_v38 = vpop.f32.mrf.mxu3  ;;  %v10279_v58 = vor.u32 %v11922_v30, %v10278_v13  ;;  %v10634_v49 = vld [vmem:[#allocation3 + $0x2c] sm:$0xe] }
 0x27d   : > { %v4283_v0 = vshrl.u32 %v4262_v61, 16  ;;  %v4286_v39 = vshll.u32 %v4262_v61, 16 }
 0x27e   : > { %v14045_v21 = vpop.f32.mrf.mxu1  ;;  %v5391_v48 = vshrl.u32 %v10279_v58, 16  ;;  %v5394_v3 = vshll.u32 %v10279_v58, 16 }
 0x27f   : > { %v4285_v40 = vrot.slane %v4283_v0, 6  ;;  %v4288_v20 = vrot.slane %v4286_v39, 7  ;;  %5864 = vmatpush.bf16.msra.mxu3 %v11956_v63  ;;  %v11951_v63 = vld [vmem:[%s14931_s8 + $0x100] sm:$0xff] }
 0x280   : > { %v5393_v46 = vrot.slane %v5391_v48, 2  ;;  %v5396_v50 = vrot.slane %v5394_v3, 3 }
 0x281   : > { %v14053_v12 = vpop.f32.mrf.mxu2  ;;  %v4289_v5 = vor.u32 %v4288_v20, %v4285_v40 }
 0x282   : > { %v5397_v20 = vor.u32 %v5396_v50, %v5393_v46  ;;  %v10470_v46 = vld [vmem:[#allocation3] sm:$0x8] }
 0x283   : > { %v4290_v42 = vsel %vm12629_vm10, %v4281_v43, %v4289_v5  ;;  %v4291_v54 = vrot.slane %v4289_v5, 4  ;;  %v11978_v45 = vld [vmem:[#allocation3 + $0x2c] sm:$0xf0]  ;;  %5865 = vmatpush.bf16.msra.mxu3 %v11955_v62  ;;  %v11954_v5 = vld [vmem:[%s14931_s8 + $0x118] sm:$0xff] }
 0x284   : > { %4300 = vst [vmem:[#allocation3 + $0x34] sm:$0xf] %v4290_v42  ;;  %v14066_v44 = vpop.f32.mrf.mxu3  ;;  %v10635_v52 = vor.u32 %v11978_v45, %v10634_v49  ;;  %v10282_v1 = vld [vmem:[#allocation3 + $0x30] sm:$0xf]  ;;  %v11952_v49 = vld [vmem:[%s14931_s8 + $0x108] sm:$0xff] }
 0x285   : > { %v4302_v24 = vsel %vm12374_vm2, %v4291_v54, %v4301_v22  ;;  %v684_v54 = vld [vmem:[#allocation3 + $0x40] sm:$0x7]  ;;  %vm14989_vm2 = vsmask.f32 4352 }
 0x286   : > { %v14068_v59 = vpop.f32.mrf.mxu1  ;;  %4303 = vst [vmem:[#allocation3 + $0x38] sm:$0x3] %v4302_v24  ;;  %v6137_v19 = vshrl.u32 %v10635_v52, 16  ;;  %v6140_v28 = vshll.u32 %v10635_v52, 16  ;;  %v11953_v24 = vld [vmem:[%s14931_s8 + $0x110] sm:$0xff]  ;;  %v685_v58 = vsel %vm12556_vm11, 0, %v684_v54  ;;  %vm14991_vm14 = vmmov %vm14989_vm2 }
 0x287   : > { %5866 = vmatpush.bf16.msra.mxu3 %v11954_v5  ;;  %686 = vst [vmem:[#allocation3 + $0x40] sm:$0x7] %v685_v58  ;;  %v12230_v54 = vld [vmem:[%s14929_s6] ss:$0 sm:$0xff]  ;;  %vm14995_vm10 = vmmov %vm14989_vm2 }
 0x288   : > { %v6139_v6 = vrot.slane %v6137_v19, 1  ;;  %v6142_v61 = vrot.slane %v6140_v28, 2 }
 0x289   : > { %v14075_v55 = vpop.f32.mrf.mxu2 }
 0x28a   : > { %v6143_v30 = vor.u32 %v6142_v61, %v6139_v6 }
 0x28b   : > { %v11923_v17 = vld [vmem:[#allocation3 + $0x30] sm:$0x70]  ;;  %5867 = vmatpush.bf16.msra.mxu3 %v11953_v24 }
 0x28c   : > { %v14080_v25 = vpop.f32.mrf.mxu3  ;;  %v10283_v11 = vor.u32 %v11923_v17, %v10282_v1  ;;  %v10638_v60 = vld [vmem:[#allocation3 + $0x34] sm:$0xf]  ;;  %v4524_v1 = vadd.f32 %v14043_v38, %v14032_v29  ;;  %v11949_v17 = vld [vmem:[#allocation3] sm:$0xf0]  ;;  %v4526_v29 = vadd.f32 %v14066_v44, %v14053_v12 }
 0x28d   : > { %v11979_v2 = vld [vmem:[#allocation3 + $0x34] sm:$0x30] }
 0x28e   : > { %v14082_v18 = vpop.f32.mrf.mxu1  ;;  %v5399_v4 = vshrl.u32 %v10283_v11, 16  ;;  %v5402_v9 = vshll.u32 %v10283_v11, 16  ;;  %v10639_v26 = vor.u32 %v11979_v2, %v10638_v60  ;;  %v11950_v11 = vld [vmem:[#allocation3 + $0x8] sm:$0xff]  ;;  %v10471_v60 = vor.u32 %v11949_v17, %v10470_v46 }
 0x28f   : > { %5868 = vmatpush.bf16.msra.mxu3 %v11952_v49  ;;  %v4618_v2 = vadd.f32 %v13948_v47, %v4524_v1  ;;  %v5804_v50 = vshrl.u32 %v11950_v11, 16  ;;  %v4619_v47 = vadd.f32 %v13960_v57, %v4526_v29  ;;  %v11939_v49 = vld [vmem:[%s14931_s8 + $0xb8] sm:$0xff]  ;;  %v11938_v1 = vld [vmem:[%s14931_s8 + $0xb0] sm:$0xff] }
 0x290   : > { %v5401_v34 = vrot.slane %v5399_v4, 2  ;;  %v5404_v0 = vrot.slane %v5402_v9, 3  ;;  %v6145_v39 = vshrl.u32 %v10639_v26, 16  ;;  %v6148_v40 = vshll.u32 %v10639_v26, 16  ;;  %5644 = vmatpush.bf16.msra.mxu1 %v11939_v49 }
 0x291   : > { %v4435_v41 = vpop.f32.mrf.mxu2  ;;  %v5807_v4 = vshll.u32 %v11950_v11, 16  ;;  %v5796_v9 = vshrl.u32 %v10471_v60, 16  ;;  %v5799_v26 = vshll.u32 %v10471_v60, 16  ;;  %v4736_v6 = vadd.f32 %v14045_v21, %v4618_v2  ;;  %v11919_v2 = vld [vmem:[%s14931_s8 + $0x28] sm:$0xff] }
 0x292   : > { %v5405_v7 = vor.u32 %v5404_v0, %v5401_v34  ;;  %v6147_v37 = vrot.slane %v6145_v39, 1  ;;  %v6150_v43 = vrot.slane %v6148_v40, 2  ;;  %v5806_v41 = vrot.slane %v5804_v50, 3 }
 0x293   : > { %5869 = vmatpush.bf16.msra.mxu3 %v11951_v63  ;;  %v5809_v34 = vrot.slane %v5807_v4, 4  ;;  %v5798_v39 = vrot.slane %v5796_v9, 3  ;;  %v5801_v40 = vrot.slane %v5799_v26, 4  ;;  %v4737_v5 = vadd.f32 %v14068_v59, %v4619_v47 }
 0x294   : > { %v4530_v53 = vpop.f32.mrf.mxu3  ;;  %v5406_v13 = vsel %vm1194_vm13, %v5397_v20, %v5405_v7  ;;  %v6151_v42 = vor.u32 %v6150_v43, %v6147_v37  ;;  %v4529_v21 = vadd.f32 %v14080_v25, %v14075_v55  ;;  %5645 = vmatpush.bf16.msra.mxu1 %v11938_v1 }
 0x295   : > { %5465 = vmatmul.bf16.vlgmr.msrb.gmra.mxu3 %v5406_v13  ;;  %v5810_v37 = vor.u32 %v5809_v34, %v5806_v41  ;;  %v5802_v43 = vor.u32 %v5801_v40, %v5798_v39  ;;  %v5331_v41 = vld [vmem:[#allocation3 + $0x40] sm:$0xc]  ;;  %v11936_v39 = vld [vmem:[%s14931_s8 + $0xa0] sm:$0xff] }
 0x296   : > { %v4734_v22 = vpop.f32.mrf.mxu1  ;;  %v6152_v45 = vsel %vm1945_vm7, %v6143_v30, %v6151_v42  ;;  %v4620_v30 = vadd.f32 %v13972_v14, %v4529_v21  ;;  %v11921_v14 = vld [vmem:[%s14931_s8 + $0x38] sm:$0xff] }
 0x297   : > { %6211 = vmatmul.bf16.vlgmr.msrb.gmra.mxu2 %v6152_v45  ;;  %v5811_v22 = vsel %vm14989_vm2, %v5802_v43, %v5810_v37  ;;  %5538 = vmatpush.bf16.msra.mxu0 %v11921_v14  ;;  %v11935_v21 = vld [vmem:[%s14931_s8 + $0x98] sm:$0xff] }
 0x298   : > { %v4738_v55 = vadd.f32 %v14082_v18, %v4620_v30  ;;  %v11995_v18 = vld [vmem:[%s14931_s8 + $0x238] sm:$0xff] }
 0x299   : > { %v4845_v10 = vpop.f32.mrf.mxu2  ;;  %6312 = vmatpush.bf16.msrb.mxu3 %v11995_v18 }
 0x29a   : > { %v4854_v0 = vadd.f32 %v4845_v10, %v4736_v6 }
 0x29c   : > { %v4939_v52 = vpop.f32.mrf.mxu3 }
 0x29d   : > { %v4948_v20 = vadd.f32 %v4939_v52, %v4854_v0  ;;  %v11918_v0 = vld [vmem:[%s14931_s8 + $0x20] sm:$0xff] }
 0x29e   : > { %v5169_v48 = vpop.f32.mrf.mxu1 }
 0x29f   : > { %v5066_v12 = vadd.f32 %v13978_v8, %v4948_v20  ;;  %v12231_v8 = vld [vmem:[%s14930_s7] ss:$0 sm:$0xff] }
 0x2a1   : > { %v4847_v3 = vpop.f32.mrf.mxu2  ;;  %v5178_v57 = vadd.f32 %v5169_v48, %v5066_v12 }
 0x2a2   : > { %v4855_v13 = vadd.f32 %v4847_v3, %v4737_v5  ;;  %v11917_v5 = vld [vmem:[%s14931_s8 + $0x18] sm:$0xff] }
 0x2a4   : > { %v4941_v19 = vpop.f32.mrf.mxu3 }
 0x2a5   : > { %5470 = vmatmul.bf16.gmra.mxu3 %v5405_v7 }
 0x2a6   : > { %v5171_v28 = vpop.f32.mrf.mxu1 }
 0x2a7   : > { %6216 = vmatmul.bf16.gmra.mxu2 %v6151_v42  ;;  %v4949_v42 = vadd.f32 %v4941_v19, %v4855_v13 }
 0x2a9   : > { %v4850_v62 = vpop.f32.mrf.mxu2  ;;  %v5067_v25 = vadd.f32 %v13982_v36, %v4949_v42  ;;  %v11920_v36 = vld [vmem:[%s14931_s8 + $0x30] sm:$0xff] }
 0x2aa   : > { %v4856_v58 = vadd.f32 %v4850_v62, %v4738_v55  ;;  %5539 = vmatpush.bf16.msra.mxu0 %v11920_v36  ;;  %v11937_v62 = vld [vmem:[%s14931_s8 + $0xa8] sm:$0xff]  ;;  %v11916_v42 = vld [vmem:[%s14931_s8 + $0x10] sm:$0xff]  ;;  %v11932_v36 = vld [vmem:[%s14931_s8 + $0x80] sm:$0xff] }
 0x2ab   : > { %v5179_v52 = vadd.f32 %v5171_v28, %v5067_v25  ;;  %v11994_v28 = vld [vmem:[%s14931_s8 + $0x230] sm:$0xff]  ;;  %5646 = vmatpush.bf16.msra.mxu1 %v11937_v62 }
 0x2ac   : > { %v4944_v38 = vpop.f32.mrf.mxu3  ;;  %6313 = vmatpush.bf16.msrb.mxu3 %v11994_v28  ;;  %v11990_v55 = vld [vmem:[%s14931_s8 + $0x210] sm:$0xff]  ;;  %v11977_v28 = vld [vmem:[%s14931_s8 + $0x1b8] sm:$0xff] }
 0x2ad   : > { %v4950_v48 = vadd.f32 %v4944_v38, %v4856_v58  ;;  %v11915_v58 = vld [vmem:[%s14931_s8 + $0x8] sm:$0xff]  ;;  %v10318_v62 = vld [vmem:[#allocation3 + $0x3c] sm:$0x8] }
 0x2ae   : > { %v5174_v61 = vpop.f32.mrf.mxu1  ;;  %5540 = vmatpush.bf16.msra.mxu0 %v11919_v2 }
 0x2af   : > { %v5068_v11 = vadd.f32 %v13993_v27, %v4950_v48  ;;  %v11993_v27 = vld [vmem:[%s14931_s8 + $0x228] sm:$0xff]  ;;  %5647 = vmatpush.bf16.msra.mxu1 %v11936_v39 }
 0x2b0   : > { %6314 = vmatpush.bf16.msrb.mxu3 %v11993_v27 }
 0x2b1   : > { %v4852_v7 = vpop.f32.mrf.mxu2  ;;  %v5180_v26 = vadd.f32 %v5174_v61, %v5068_v11  ;;  %v11992_v61 = vld [vmem:[%s14931_s8 + $0x220] sm:$0xff] }
 0x2b2   : > { %5541 = vmatpush.bf16.msra.mxu0 %v11918_v0  ;;  %v5336_v11 = vld [vmem:[#allocation3 + $0x4c] sm:$0x7] }
 0x2b3   : > { %5648 = vmatpush.bf16.msra.mxu1 %v11935_v21 }
 0x2b4   : > { %v4946_v44 = vpop.f32.mrf.mxu3  ;;  %6315 = vmatpush.bf16.msrb.mxu3 %v11992_v61 }
 0x2b5   : > { %5870 = vmatmul.bf16.vlgmr.msra.gmra.mxu3 %v5811_v22 }
 0x2b6   : > { %v5176_v53 = vpop.f32.mrf.mxu1  ;;  %5542 = vmatpush.bf16.msra.mxu0 %v11917_v5 }
 0x2b8   : > { %6316 = vmatpush.bf16.msrb.mxu3 %v11991_v51 }
 0x2b9   : > { %v5263_v59 = vpop.f32.mrf.mxu2 }
 0x2ba   : > { %v5272_v45 = vadd.f32 %v5263_v59, %v5178_v57  ;;  %5543 = vmatpush.bf16.msra.mxu0 %v11916_v42 }
 0x2bc   : > { %v5279_v24 = vmul.f32 %v12230_v54, %v5272_v45  ;;  %6317 = vmatpush.bf16.msrb.mxu3 %v11990_v55 }
 0x2be   : > { %v5286_v10 = vadd.f32 %v12231_v8, %v5279_v24  ;;  %5544 = vmatpush.bf16.msra.mxu0 %v11915_v58 }
 0x2c0   : > { %v5289_v63 = vmax.f32 %v5286_v10, 0.0  ;;  %v11933_v10 = vld [vmem:[%s14931_s8 + $0x88] sm:$0xff] }
 0x2c1   : > { %v5265_v3 = vpop.f32.mrf.mxu2 }
 0x2c2   : > { %v5292_v17 = vmul.f32 %v5289_v63, %v13661_v33  ;;  %v5273_v19 = vadd.f32 %v5265_v3, %v5179_v52  ;;  %v11989_v52 = vld [vmem:[%s14931_s8 + $0x208] sm:$0xff]  ;;  %v11914_v3 = vld [vmem:[%s14931_s8] sm:$0xff] }
 0x2c3   : > { %6318 = vmatpush.bf16.msrb.mxu3 %v11989_v52  ;;  %5545 = vmatpush.bf16.msra.mxu0 %v11914_v3  ;;  %v11963_v3 = vld [vmem:[%s14931_s8 + $0x150] sm:$0xff] }
 0x2c4   : > { %v5295_v46 = vpack.c.bf16 %v5292_v17, %v5292_v17  ;;  %v5280_v60 = vmul.f32 %v12230_v54, %v5273_v19  ;;  %v11968_v19 = vld [vmem:[%s14931_s8 + $0x178] sm:$0xff] }
 0x2c5   : > { %5875 = vmatmul.bf16.gmra.mxu3 %v5810_v37 }
 0x2c6   : > { %v5299_v50 = vshrl.u32 %v5295_v46, 16  ;;  %v5302_v4 = vshll.u32 %v5295_v46, 16  ;;  %v5287_v9 = vadd.f32 %v12231_v8, %v5280_v60  ;;  %v11988_v46 = vld [vmem:[%s14931_s8 + $0x200] sm:$0xff] }
 0x2c7   : > { %5979 = vmatpush.bf16.msrb.mxu0 %v11968_v19  ;;  %6319 = vmatpush.bf16.msrb.mxu3 %v11988_v46  ;;  %v11962_v46 = vld [vmem:[%s14931_s8 + $0x148] sm:$0xff] }
 0x2c8   : > { %v5301_v6 = vrot.slane %v5299_v50, 5  ;;  %v5304_v29 = vrot.slane %v5302_v4, 6  ;;  %v5290_v38 = vmax.f32 %v5287_v9, 0.0  ;;  %v11967_v9 = vld [vmem:[%s14931_s8 + $0x170] sm:$0xff] }
 0x2c9   : > { %v5268_v34 = vpop.f32.mrf.mxu2 }
 0x2ca   : > { %v5305_v40 = vor.u32 %v5304_v29, %v5301_v6  ;;  %v5293_v47 = vmul.f32 %v5290_v38, %v13707_v23  ;;  %v5274_v20 = vadd.f32 %v5268_v34, %v5180_v26  ;;  %v11975_v29 = vld [vmem:[%s14931_s8 + $0x1a8] sm:$0xff] }
 0x2cb   : > { %5980 = vmatpush.bf16.msrb.mxu0 %v11967_v9  ;;  %v11959_v9 = vld [vmem:[#allocation3 + $0x18] sm:$0xff] }
 0x2cc   : > { %v5332_v7 = vsel %vm12566_vm4, %v5305_v40, %v5331_v41  ;;  %v5296_v37 = vpack.c.bf16 %v5293_v47, %v5293_v47  ;;  %v5281_v43 = vmul.f32 %v12230_v54, %v5274_v20  ;;  %v11934_v54 = vld [vmem:[%s14931_s8 + $0x90] sm:$0xff]  ;;  %v5306_v59 = vrot.slane %v5305_v40, 4  ;;  %vm14994_vm4 = vmmov %vm14992_vm5 }
 0x2cd   : > { %5333 = vst [vmem:[#allocation3 + $0x40] sm:$0xc] %v5332_v7  ;;  %5649 = vmatpush.bf16.msra.mxu1 %v11934_v54 }
 0x2ce   : > { %v5308_v12 = vshrl.u32 %v5296_v37, 16  ;;  %v5311_v44 = vshll.u32 %v5296_v37, 16  ;;  %v5288_v53 = vadd.f32 %v12231_v8, %v5281_v43  ;;  %v11965_v37 = vld [vmem:[%s14931_s8 + $0x160] sm:$0xff] }
 0x2cf   : > { %5981 = vmatpush.bf16.msrb.mxu0 %v11966_v32  ;;  %v11974_v43 = vld [vmem:[%s14931_s8 + $0x1a0] sm:$0xff] }
 0x2d0   : > { %v5310_v22 = vrot.slane %v5308_v12, 5  ;;  %v5313_v13 = vrot.slane %v5311_v44, 6  ;;  %v5291_v30 = vmax.f32 %v5288_v53, 0.0 }
 0x2d1   : > { %v5270_v57 = vpop.f32.mrf.mxu2  ;;  %5650 = vmatpush.bf16.msra.mxu1 %v11933_v10 }
 0x2d2   : > { %v5314_v45 = vor.u32 %v5313_v13, %v5310_v22  ;;  %v5294_v8 = vmul.f32 %v5291_v30, %v13748_v56 }
 0x2d3   : > { %5982 = vmatpush.bf16.msrb.mxu0 %v11965_v37 }
 0x2d4   : > { %v5315_v25 = vsel %vm12727_vm15, %v5306_v59, %v5314_v45  ;;  %v5297_v24 = vpack.c.bf16 %v5294_v8, %v5294_v8  ;;  %v5316_v1 = vrot.slane %v5314_v45, 4  ;;  %v11913_v50 = vld [vmem:[#allocation3 + $0x3c] sm:$0xf0]  ;;  %v11964_v59 = vld [vmem:[%s14931_s8 + $0x158] sm:$0xff] }
 0x2d5   : > { %5334 = vst [vmem:[#allocation3 + $0x44] sm:$0xf] %v5315_v25  ;;  %5651 = vmatpush.bf16.msra.mxu1 %v11932_v36  ;;  %v10319_v27 = vor.u32 %v11913_v50, %v10318_v62  ;;  %v10582_v41 = vld [vmem:[#allocation3 + $0x40] sm:$0xc]  ;;  %v11973_v45 = vld [vmem:[%s14931_s8 + $0x198] sm:$0xff]  ;;  %v11970_v62 = vld [vmem:[%s14931_s8 + $0x180] sm:$0xff] }
 0x2d6   : > { %v5318_v14 = vshrl.u32 %v5297_v24, 16  ;;  %v5321_v49 = vshll.u32 %v5297_v24, 16  ;;  %v11972_v36 = vld [vmem:[%s14931_s8 + $0x190] sm:$0xff] }
 0x2d7   : > { %v5578_v38 = vshrl.u32 %v10319_v27, 16  ;;  %v5581_v40 = vshll.u32 %v10319_v27, 16  ;;  %v5485_v61 = vrot.slane %v10319_v27, 3  ;;  %5983 = vmatpush.bf16.msrb.mxu0 %v11964_v59  ;;  %v10530_v50 = vld [vmem:[#allocation3 + $0x20] sm:$0xf] }
 0x2d8   : > { %v5320_v48 = vrot.slane %v5318_v14, 5  ;;  %v5323_v63 = vrot.slane %v5321_v49, 6 }
 0x2d9   : > { %v14195_v18 = vpop.f32.mrf.mxu2  ;;  %6084 = vmatpush.bf16.msrb.mxu1 %v11977_v28  ;;  %v5580_v44 = vrot.slane %v5578_v38, 3  ;;  %v5583_v53 = vrot.slane %v5581_v40, 4 }
 0x2da   : > { %v5324_v17 = vor.u32 %v5323_v63, %v5320_v48 }
 0x2db   : > { %v5584_v49 = vor.u32 %v5583_v53, %v5580_v44  ;;  %5984 = vmatpush.bf16.msrb.mxu0 %v11963_v3  ;;  %v12003_v3 = vld [vmem:[%s14934_s11 + $0x38] sm:$0xff] }
 0x2dc   : > { %v5325_v60 = vsel %vm12727_vm15, %v5316_v1, %v5324_v17  ;;  %v5326_v2 = vrot.slane %v5324_v17, 4  ;;  %v11969_v6 = vld [vmem:[#allocation3 + $0x40] sm:$0xf0]  ;;  %vm14996_vm15 = vmmov %vm14988_vm3 }
 0x2dd   : > { %5335 = vst [vmem:[#allocation3 + $0x48] sm:$0xf] %v5325_v60  ;;  %6085 = vmatpush.bf16.msrb.mxu1 %v11976_v16  ;;  %v12254_v0 = vld [vmem:[#allocation3 + $0x44] sm:$0xf]   ;;  %v14232_v20 = vor.u32 %v11969_v6, %v10582_v41  ;;  %v11971_v60 = vld [vmem:[%s14931_s8 + $0x188] sm:$0xff]  ;;  %v5917_v6 = vshll.u32 %v11959_v9, 16 }
 0x2de   : > { %v5337_v4 = vsel %vm12556_vm11, %v5326_v2, %v5336_v11  ;;  %v11961_v2 = vld [vmem:[%s14931_s8 + $0x140] sm:$0xff]  ;;  %v5915_v41 = vshrl.u32 %v11959_v9, 16  ;;  %vm14993_vm11 = vmmov %vm14988_vm3 }
 0x2df   : > { %5338 = vst [vmem:[#allocation3 + $0x4c] sm:$0x7] %v5337_v4  ;;  %v6246_v51 = vshrl.u32 %v14232_v20, 16  ;;  %v6249_v22 = vshll.u32 %v14232_v20, 16  ;;  %5985 = vmatpush.bf16.msrb.mxu0 %v11962_v46  ;;  %v11960_v4 = vld [vmem:[#allocation3 + $0x20] sm:$0x10] }
 0x2e0   : > { %v10531_v16 = vor.u32 %v11960_v4, %v10530_v50  ;;  %v5919_v38 = vrot.slane %v5917_v6, 1 }
 0x2e1   : > { %v14222_v26 = vpop.f32.mrf.mxu2  ;;  %6086 = vmatpush.bf16.msrb.mxu1 %v11975_v29  ;;  %v6248_v58 = vrot.slane %v6246_v51, 2  ;;  %v6251_v10 = vrot.slane %v6249_v22, 3 }
 0x2e2   : > { %v5922_v32 = vshll.u32 %v10531_v16, 16  ;;  %v5926_v37 = vshrl.u32 %v10531_v16, 16 }
 0x2e3   : > { %v6252_v17 = vor.u32 %v6251_v10, %v6248_v58  ;;  %5986 = vmatpush.bf16.msrb.mxu0 %v11961_v2  ;;  %v12002_v2 = vld [vmem:[%s14934_s11 + $0x30] sm:$0xff] }
 0x2e4   : > { %v5341_v34 = vld [vmem:[#allocation3 + $0x44] sm:$0xff]  }
 0x2e5   : > { %v12258_v39 = vld [vmem:[#allocation3 + $0x44] sm:$0x70]  ;;  %v5586_v57 = vshrl.u32 %v5341_v34, 16  ;;  %v5589_v42 = vshll.u32 %v5341_v34, 16  ;;  %6087 = vmatpush.bf16.msrb.mxu1 %v11974_v43  ;;  %v5924_v34 = vrot.slane %v5922_v32, 1 }
 0x2e6   : > { %v14230_v47 = vld [vmem:[#allocation3 + $0x48] sm:$0xf]  ;;  %v6224_v7 = vld [vmem:[#allocation3 + $0x4c] sm:$0x7]  ;;  %v12255_v5 = vor.u32 %v12258_v39, %v12254_v0  ;;  %v5920_v39 = vor.u32 %v5919_v38, %v5915_v41 }
 0x2e7   : > { %v6027_v21 = vunpack.c.l.b16 %v14230_v47  ;;  %v6243_v12 = vunpack.c.l.b16 %v6224_v7  ;;  %v5588_v55 = vrot.slane %v5586_v57, 3  ;;  %v5591_v25 = vrot.slane %v5589_v42, 4  ;;  %v6003_v27 = vld [vmem:[#allocation3 + $0x4c] sm:$0x3] }
 0x2e8   : > { %v5486_v30 = vrot.slane %v12255_v5, 3  ;;  %v6028_v29 = vunpack.c.l.b16 %v6003_v27  ;;  %v5925_v40 = vsel %vm14992_vm5, %v5920_v39, %v5924_v34  ;;  %v5928_v5 = vor.u32 %v5926_v37, %v5924_v34  ;;  %v12001_v27 = vld [vmem:[%s14934_s11 + $0x28] sm:$0xff] }
 0x2e9   : > { %v14243_v13 = vpop.f32.mrf.mxu2  ;;  %v6244_v54 = vpack.c.b16 %v6243_v12, %v6027_v21  ;;  %v5592_v52 = vor.u32 %v5591_v25, %v5588_v55  ;;  %6088 = vmatpush.bf16.msrb.mxu1 %v11973_v45  ;;  %v691_v45 = vld [vmem:[#allocation4] sm:$0xf] }
 0x2ea   : > { %v5487_v8 = vsel %vm14990_vm12, %v5485_v61, %v5486_v30  ;;  %v6030_v0 = vpack.c.b16 %v6028_v29, %v6027_v21  ;;  %v6031_v61 = vrot.slane %v14232_v20, 2  ;;  %v14299_v29 = vld [vmem:[%s14932_s9] ss:$0 sm:$0xff] }
 0x2eb   : > { %v6254_v24 = vshrl.u32 %v6244_v54, 16  ;;  %5546 = vmatmul.bf16.vlgmr.msra.gmra.mxu0 %v5487_v8  ;;  %v6257_v14 = vshll.u32 %v6244_v54, 16  ;;  %v5593_v1 = vsel %vm14991_vm14, %v5584_v49, %v5592_v52  ;;  %v692_v8 = vsel %vm12450_vm6, 0, %v691_v45  ;;  %v12010_v45 = vld [vmem:[%s14934_s11 + $0x70] sm:$0xff] }
 0x2ec   : > { %5652 = vmatmul.bf16.vlgmr.msra.gmra.mxu1 %v5593_v1  ;;  %v6032_v47 = vrot.slane %v6030_v0, 2  ;;  %693 = vst [vmem:[#allocation4] sm:$0xf] %v692_v8 }
 0x2ed   : > { %v6256_v48 = vrot.slane %v6254_v24, 2  ;;  %v6259_v63 = vrot.slane %v6257_v14, 3  ;;  %6089 = vmatpush.bf16.msrb.mxu1 %v11972_v36 }
 0x2ee   : > { %v6033_v7 = vsel %vm1839_vm1, %v6031_v61, %v6032_v47 }
 0x2ef   : > { %v6260_v19 = vor.u32 %v6259_v63, %v6256_v48 }
 0x2f1   : > { %v5759_v28 = vpop.f32.mrf.mxu2  ;;  %v6261_v11 = vsel %vm1194_vm13, %v6252_v17, %v6260_v19  ;;  %6090 = vmatpush.bf16.msrb.mxu1 %v11971_v60 }
 0x2f2   : > { %6320 = vmatmul.bf16.vlgmr.msrb.gmra.mxu3 %v6261_v11 }
 0x2f5   : > { %6091 = vmatpush.bf16.msrb.mxu1 %v11970_v62  ;;  %v694_v62 = vld [vmem:[#allocation4 + $0xc] sm:$0x8] }
 0x2f6   : > { %v695_v4 = vsel %vm12460_vm9, 0, %v694_v62 }
 0x2f7   : > { %696 = vst [vmem:[#allocation4 + $0xc] sm:$0x8] %v695_v4  ;;  %v12008_v4 = vld [vmem:[%s14934_s11 + $0x60] sm:$0xff] }
 0x2f9   : > { %6578 = vmatpush.bf16.msra.mxu1 %v12003_v3  ;;  %v12009_v3 = vld [vmem:[%s14934_s11 + $0x68] sm:$0xff] }
 0x2fb   : > { %5551 = vmatmul.bf16.gmra.mxu0 %v5486_v30 }
 0x2fc   : > { %5657 = vmatmul.bf16.gmra.mxu1 %v5592_v52 }
 0x2fd   : > { %6579 = vmatpush.bf16.msra.mxu1 %v12002_v2 }
 0x301   : > { %6580 = vmatpush.bf16.msra.mxu1 %v12001_v27 }
 0x302   : > { %6325 = vmatmul.bf16.gmra.mxu3 %v6260_v19 }
 0x30b   : > { %5987 = vmatmul.bf16.vlgmr.msrb.gmra.mxu0 %v5925_v40 }
 0x30c   : > { %6092 = vmatmul.bf16.vlgmr.msrb.gmra.mxu1 %v6033_v7 }
 0x318   : > { %v5466_v43 = vpop.f32.mrf.mxu3 }
 0x31a   : > { %v6212_v12 = vpop.f32.mrf.mxu2 }
 0x31b   : > { %5992 = vmatmul.bf16.gmra.mxu0 %v5928_v5  ;;  %v12019_v5 = vld [vmem:[%s14934_s11 + $0xb8] sm:$0xff] }
 0x31c   : > { %6097 = vmatmul.bf16.gmra.mxu1 %v6032_v47  ;;  %6671 = vmatpush.bf16.msra.mxu2 %v12019_v5  ;;  %v12022_v5 = vld [vmem:[%s14934_s11 + $0xd0] sm:$0xff] }
 0x320   : > { %v5468_v44 = vpop.f32.mrf.mxu3 }
 0x322   : > { %v6214_v53 = vpop.f32.mrf.mxu2 }
 0x328   : > { %v5471_v51 = vpop.f32.mrf.mxu3 }
 0x32a   : > { %v14275_v21 = vpop.f32.mrf.mxu2 }
 0x330   : > { %v5473_v22 = vpop.f32.mrf.mxu3 }
 0x332   : > { %v6219_v30 = vpop.f32.mrf.mxu2 }
 0x333   : > { %v11999_v30 = vld [vmem:[%s14934_s11 + $0x18] sm:$0xff] }
 0x338   : > { %v5871_v57 = vpop.f32.mrf.mxu3 }
 0x340   : > { %v5873_v42 = vpop.f32.mrf.mxu3 }
 0x348   : > { %v14277_v54 = vpop.f32.mrf.mxu3 }
 0x350   : > { %v5878_v20 = vpop.f32.mrf.mxu3 }
 0x368   : > { %v5547_v59 = vpop.f32.mrf.mxu0 }
 0x369   : > { %v5653_v55 = vpop.f32.mrf.mxu1  ;;  %v5548_v52 = vadd.f32 %v5547_v59, %v5466_v43  ;;  %v12000_v43 = vld [vmem:[%s14934_s11 + $0x20] sm:$0xff]  ;;  %v12026_v59 = vld [vmem:[%s14934_s11 + $0xf0] sm:$0xff] }
 0x36a   : > { %6581 = vmatpush.bf16.msra.mxu1 %v12000_v43  ;;  %v12042_v43 = vld [vmem:[%s14934_s11 + $0x170] sm:$0xff] }
 0x36b   : > { %v5662_v63 = vadd.f32 %v5653_v55, %v5548_v52 }
 0x36d   : > { %v5761_v1 = vadd.f32 %v14195_v18, %v5662_v63  ;;  %v6389_v63 = vld [vmem:[#allocation4] sm:$0x8] }
 0x36e   : > { %6582 = vmatpush.bf16.msra.mxu1 %v11999_v30 }
 0x36f   : > { %v5880_v46 = vadd.f32 %v5871_v57, %v5761_v1  ;;  %v12018_v57 = vld [vmem:[%s14934_s11 + $0xb0] sm:$0xff] }
 0x370   : > { %v5549_v25 = vpop.f32.mrf.mxu0  ;;  %6672 = vmatpush.bf16.msra.mxu2 %v12018_v57  ;;  %v12041_v57 = vld [vmem:[%s14934_s11 + $0x168] sm:$0xff] }
 0x371   : > { %v5655_v24 = vpop.f32.mrf.mxu1  ;;  %v5550_v19 = vadd.f32 %v5549_v25, %v5468_v44 }
 0x373   : > { %v5663_v11 = vadd.f32 %v5655_v24, %v5550_v19 }
 0x375   : > { %v6321_v58 = vpop.f32.mrf.mxu3  ;;  %v5762_v9 = vadd.f32 %v14222_v26, %v5663_v11  ;;  %v14304_v26 = vld [vmem:[%s14933_s10] ss:$0 sm:$0xff] }
 0x377   : > { %v5881_v0 = vadd.f32 %v5873_v42, %v5762_v9 }
 0x378   : > { %v5552_v10 = vpop.f32.mrf.mxu0 }
 0x379   : > { %v5658_v14 = vpop.f32.mrf.mxu1  ;;  %v5553_v6 = vadd.f32 %v5552_v10, %v5471_v51  ;;  %v12027_v51 = vld [vmem:[%s14934_s11 + $0xf8] sm:$0xff] }
 0x37a   : > { %6770 = vmatpush.bf16.msra.mxu3 %v12027_v51 }
 0x37b   : > { %v5664_v41 = vadd.f32 %v5658_v14, %v5553_v6  ;;  %v12015_v6 = vld [vmem:[%s14934_s11 + $0x98] sm:$0xff] }
 0x37d   : > { %v6323_v49 = vpop.f32.mrf.mxu3  ;;  %v5763_v61 = vadd.f32 %v14243_v13, %v5664_v41  ;;  %v12011_v13 = vld [vmem:[%s14934_s11 + $0x78] sm:$0xff] }
 0x37e   : > { %6509 = vmatpush.bf16.msra.mxu0 %v12011_v13  ;;  %6771 = vmatpush.bf16.msra.mxu3 %v12026_v59  ;;  %v12013_v13 = vld [vmem:[%s14934_s11 + $0x88] sm:$0xff] }
 0x37f   : > { %v5882_v20 = vadd.f32 %v14277_v54, %v5763_v61  ;;  %v11998_v54 = vld [vmem:[%s14934_s11 + $0x10] sm:$0xff] }
 0x380   : > { %v5554_v48 = vpop.f32.mrf.mxu0  ;;  %6583 = vmatpush.bf16.msra.mxu1 %v11998_v54  ;;  %v12040_v54 = vld [vmem:[%s14934_s11 + $0x160] sm:$0xff] }
 0x381   : > { %v5660_v36 = vpop.f32.mrf.mxu1  ;;  %v12025_v48 = vld [vmem:[%s14934_s11 + $0xe8] sm:$0xff] }
 0x382   : > { %6510 = vmatpush.bf16.msra.mxu0 %v12010_v45  ;;  %6772 = vmatpush.bf16.msra.mxu3 %v12025_v48  ;;  %v12059_v48 = vld [vmem:[%s14934_s11 + $0x1f8] sm:$0xff] }
 0x385   : > { %v14285_v17 = vpop.f32.mrf.mxu3 }
 0x386   : > { %6511 = vmatpush.bf16.msra.mxu0 %v12009_v3 }
 0x388   : > { %v5988_v28 = vpop.f32.mrf.mxu0 }
 0x389   : > { %v5997_v60 = vadd.f32 %v5988_v28, %v5880_v46  ;;  %v6093_v50 = vpop.f32.mrf.mxu1  ;;  %v11997_v46 = vld [vmem:[%s14934_s11 + $0x8] sm:$0xff] }
 0x38a   : > { %6584 = vmatpush.bf16.msra.mxu1 %v11997_v46  ;;  %6512 = vmatpush.bf16.msra.mxu0 %v12008_v4  ;;  %v12033_v4 = vld [vmem:[%s14934_s11 + $0x128] sm:$0xff] }
 0x38b   : > { %v6102_v18 = vadd.f32 %v6093_v50, %v5997_v60  ;;  %v12016_v60 = vld [vmem:[%s14934_s11 + $0xa0] sm:$0xff] }
 0x38d   : > { %v6328_v16 = vpop.f32.mrf.mxu3  ;;  %v6221_v32 = vadd.f32 %v6212_v12, %v6102_v18 }
 0x38f   : > { %v6330_v34 = vadd.f32 %v6321_v58, %v6221_v32  ;;  %v12017_v58 = vld [vmem:[%s14934_s11 + $0xa8] sm:$0xff] }
 0x390   : > { %v5990_v38 = vpop.f32.mrf.mxu0  ;;  %6673 = vmatpush.bf16.msra.mxu2 %v12017_v58  ;;  %v12020_v58 = vld [vmem:[%s14934_s11 + $0xc0] sm:$0xff] }
 0x391   : > { %v6337_v39 = vmul.f32 %v14299_v29, %v6330_v34  ;;  %v5998_v40 = vadd.f32 %v5990_v38, %v5881_v0  ;;  %v6095_v47 = vpop.f32.mrf.mxu1  ;;  %v12023_v34 = vld [vmem:[%s14934_s11 + $0xd8] sm:$0xff] }
 0x392   : > { %v12007_v0 = vld [vmem:[%s14934_s11 + $0x58] sm:$0xff] }
 0x393   : > { %v6344_v7 = vadd.f32 %v14304_v26, %v6337_v39  ;;  %v6103_v37 = vadd.f32 %v6095_v47, %v5998_v40  ;;  %6513 = vmatpush.bf16.msra.mxu0 %v12007_v0  ;;  %v12048_v0 = vld [vmem:[%s14934_s11 + $0x1a0] sm:$0xff] }
 0x394   : > { %6674 = vmatpush.bf16.msra.mxu2 %v12016_v60 }
 0x395   : > { %v6347_v12 = vmax.f32 %v6344_v7, 0.0  ;;  %v6222_v44 = vadd.f32 %v6214_v53, %v6103_v37 }
 0x397   : > { %v6350_v53 = vmul.f32 %v6347_v12, %v13661_v33  ;;  %v6331_v42 = vadd.f32 %v6323_v49, %v6222_v44  ;;  %v12006_v12 = vld [vmem:[%s14934_s11 + $0x50] sm:$0xff] }
 0x398   : > { %v5993_v22 = vpop.f32.mrf.mxu0  ;;  %6675 = vmatpush.bf16.msra.mxu2 %v12015_v6  ;;  %6514 = vmatpush.bf16.msra.mxu0 %v12006_v12 }
 0x399   : > { %v6353_v8 = vpack.c.bf16 %v6350_v53, %v6350_v53  ;;  %v6338_v55 = vmul.f32 %v14299_v29, %v6331_v42  ;;  %v5999_v25 = vadd.f32 %v5993_v22, %v5882_v20  ;;  %v6098_v24 = vpop.f32.mrf.mxu1  ;;  %v12021_v53 = vld [vmem:[%s14934_s11 + $0xc8] sm:$0xff] }
 0x39a   : > { %v12005_v42 = vld [vmem:[%s14934_s11 + $0x48] sm:$0xff] }
 0x39b   : > { %v6357_v10 = vshll.u32 %v6353_v8, 16  ;;  %v6360_v14 = vshrl.u32 %v6353_v8, 16  ;;  %v6345_v49 = vadd.f32 %v14304_v26, %v6338_v55  ;;  %v6104_v52 = vadd.f32 %v6098_v24, %v5999_v25  ;;  %v12012_v8 = vld [vmem:[%s14934_s11 + $0x80] sm:$0xff] }
 0x39c   : > { %6515 = vmatpush.bf16.msra.mxu0 %v12005_v42 }
 0x39d   : > { %v6359_v36 = vrot.slane %v6357_v10, 5  ;;  %v6362_v1 = vrot.slane %v6360_v14, 4  ;;  %v6348_v19 = vmax.f32 %v6345_v49, 0.0  ;;  %v6223_v28 = vadd.f32 %v14275_v21, %v6104_v52  ;;  %v12024_v21 = vld [vmem:[%s14934_s11 + $0xe0] sm:$0xff]  ;;  %v6394_v10 = vld [vmem:[#allocation4 + $0xc] sm:$0xf] }
 0x39e   : > { %6773 = vmatpush.bf16.msra.mxu3 %v12024_v21  ;;  %v12004_v14 = vld [vmem:[%s14934_s11 + $0x40] sm:$0xff]  ;;  %v12051_v49 = vld [vmem:[%s14934_s11 + $0x1b8] sm:$0xff]  ;;  %v12057_v21 = vld [vmem:[%s14934_s11 + $0x1e8] sm:$0xff] }
 0x39f   : > { %v6390_v2 = vsel %vm12460_vm9, %v6359_v36, %v6389_v63  ;;  %v6351_v62 = vmul.f32 %v6348_v19, %v13707_v23  ;;  %v6332_v50 = vadd.f32 %v14285_v17, %v6223_v28  ;;  %v6363_v9 = vor.u32 %v6362_v1, %v6359_v36  ;;  %v11996_v17 = vld [vmem:[%s14934_s11] sm:$0xff]  ;;  %v12035_v63 = vld [vmem:[%s14934_s11 + $0x138] sm:$0xff]  ;;  %v12050_v1 = vld [vmem:[%s14934_s11 + $0x1b0] sm:$0xff] }
 0x3a0   : > { %v5995_v11 = vpop.f32.mrf.mxu0  ;;  %6391 = vst [vmem:[#allocation4] sm:$0x8] %v6390_v2  ;;  %6585 = vmatpush.bf16.msra.mxu1 %v11996_v17  ;;  %v12039_v36 = vld [vmem:[%s14934_s11 + $0x158] sm:$0xff]  ;;  %6516 = vmatpush.bf16.msra.mxu0 %v12004_v14  ;;  %v12058_v19 = vld [vmem:[%s14934_s11 + $0x1f0] sm:$0xff] }
 0x3a1   : > { %v6354_v18 = vpack.c.bf16 %v6351_v62, %v6351_v62  ;;  %v6339_v16 = vmul.f32 %v14299_v29, %v6332_v50  ;;  %v6100_v27 = vpop.f32.mrf.mxu1  ;;  %v12043_v29 = vld [vmem:[%s14934_s11 + $0x178] sm:$0xff]  ;;  %v6364_v39 = vrot.slane %v6363_v9, 4  ;;  %v12034_v28 = vld [vmem:[%s14934_s11 + $0x130] sm:$0xff]  ;;  %v12049_v62 = vld [vmem:[%s14934_s11 + $0x1a8] sm:$0xff] }
 0x3a2   : > { %6774 = vmatpush.bf16.msra.mxu3 %v12023_v34  ;;  %v12038_v2 = vld [vmem:[%s14934_s11 + $0x150] sm:$0xff]  ;;  %v7095_v14 = vld [vmem:[#allocation4 + $0x10] sm:$0x7] }
 0x3a3   : > { %v6366_v32 = vshll.u32 %v6354_v18, 16  ;;  %v6370_v38 = vshrl.u32 %v6354_v18, 16  ;;  %v6346_v41 = vadd.f32 %v14304_v26, %v6339_v16  ;;  %v12014_v26 = vld [vmem:[%s14934_s11 + $0x90] sm:$0xff]  ;;  %v12037_v16 = vld [vmem:[%s14934_s11 + $0x148] sm:$0xff] }
 0x3a4   : > { %6969 = vmatpush.bf16.msrb.mxu1 %v12043_v29  ;;  %6676 = vmatpush.bf16.msra.mxu2 %v12014_v26 }
 0x3a5   : > { %v6368_v40 = vrot.slane %v6366_v32, 5  ;;  %v6372_v47 = vrot.slane %v6370_v38, 4  ;;  %v6349_v61 = vmax.f32 %v6346_v41, 0.0  ;;  %6879 = vmatpush.bf16.msrb.mxu0 %v12035_v63 }
 0x3a6   : > { %6775 = vmatpush.bf16.msra.mxu3 %v12022_v5 }
 0x3a7   : > { %v6369_v7 = vsel %vm12509_vm0, %v6364_v39, %v6368_v40  ;;  %v6352_v37 = vmul.f32 %v6349_v61, %v13748_v56  ;;  %v6373_v44 = vor.u32 %v6372_v47, %v6368_v40  ;;  %v6596_v11 = vld [vmem:[#allocation4] sm:$0xe]  ;;  %v12056_v39 = vld [vmem:[%s14934_s11 + $0x1e0] sm:$0xff] }
 0x3a8   : > { %6392 = vst [vmem:[#allocation4 + $0x4] sm:$0xf] %v6369_v7  ;;  %6970 = vmatpush.bf16.msrb.mxu1 %v12042_v43  ;;  %6677 = vmatpush.bf16.msra.mxu2 %v12013_v13  ;;  %v6692_v60 = vld [vmem:[#allocation4] sm:$0x8]  ;;  %v6615_v50 = vunpack.c.l.b16 %v6596_v11  ;;  %v12032_v40 = vld [vmem:[%s14934_s11 + $0x120] sm:$0xff] }
 0x3a9   : > { %v6355_v51 = vpack.c.bf16 %v6352_v37, %v6352_v37  ;;  %v6374_v20 = vrot.slane %v6373_v44, 4  ;;  %6880 = vmatpush.bf16.msrb.mxu0 %v12034_v28  ;;  %v6713_v18 = vunpack.c.l.b16 %v6692_v60  ;;  %v12036_v13 = vld [vmem:[%s14934_s11 + $0x140] sm:$0xff]  ;;  %v12067_v60 = vld [vmem:[%s14934_s11 + $0x238] sm:$0xff] }
 0x3aa   : > { %6776 = vmatpush.bf16.msra.mxu3 %v12021_v53 }
 0x3ab   : > { %v6376_v22 = vshll.u32 %v6355_v51, 16  ;;  %v6380_v30 = vshrl.u32 %v6355_v51, 16 }
 0x3ac   : > { %6971 = vmatpush.bf16.msrb.mxu1 %v12041_v57  ;;  %6678 = vmatpush.bf16.msra.mxu2 %v12012_v8  ;;  %v12046_v8 = vld [vmem:[%s14934_s11 + $0x190] sm:$0xff] }
 0x3ad   : > { %v6378_v59 = vrot.slane %v6376_v22, 5  ;;  %v6382_v45 = vrot.slane %v6380_v30, 4  ;;  %6881 = vmatpush.bf16.msrb.mxu0 %v12033_v4  ;;  %v12047_v22 = vld [vmem:[%s14934_s11 + $0x198] sm:$0xff]  ;;  %v12066_v4 = vld [vmem:[%s14934_s11 + $0x230] sm:$0xff] }
 0x3ae   : > { %6777 = vmatpush.bf16.msra.mxu3 %v12020_v58  ;;  %v12055_v30 = vld [vmem:[%s14934_s11 + $0x1d8] sm:$0xff]  ;;  %v12029_v58 = vld [vmem:[%s14934_s11 + $0x108] sm:$0xff] }
 0x3af   : > { %v6379_v55 = vsel %vm12509_vm0, %v6374_v20, %v6378_v59  ;;  %v6383_v25 = vor.u32 %v6382_v45, %v6378_v59  ;;  %v14415_v24 = vld [vmem:[#allocation4] sm:$0xff]   ;;  %v12031_v59 = vld [vmem:[%s14934_s11 + $0x118] sm:$0xff] }
 0x3b0   : > { %6393 = vst [vmem:[#allocation4 + $0x8] sm:$0xf] %v6379_v55  ;;  %6586 = vmatmul.bf16.vlgmr.msra.gmra.mxu1 %v14415_v24  ;;  %7074 = vmatpush.bf16.msrb.mxu2 %v12051_v49  ;;  %v14451_v46 = vunpack.c.h.b16 %v14415_v24  ;;  %v6447_v9 = vshll.u32 %v14415_v24, 16  ;;  %v6445_v37 = vshrl.u32 %v14415_v24, 16  ;;  %v12054_v55 = vld [vmem:[%s14934_s11 + $0x1d0] sm:$0xff]  ;;  %v12045_v24 = vld [vmem:[%s14934_s11 + $0x188] sm:$0xff] }
 0x3b1   : > { %v6384_v52 = vrot.slane %v6383_v25, 4  ;;  %6972 = vmatpush.bf16.msrb.mxu1 %v12040_v54  ;;  %6882 = vmatpush.bf16.msrb.mxu0 %v12032_v40  ;;  %v12030_v25 = vld [vmem:[%s14934_s11 + $0x110] sm:$0xff]  ;;  %v12053_v54 = vld [vmem:[%s14934_s11 + $0x1c8] sm:$0xff]  ;;  %v12044_v49 = vld [vmem:[%s14934_s11 + $0x180] sm:$0xff] }
 0x3b2   : > { %7183 = vmatpush.bf16.msrb.mxu3 %v12059_v48  ;;  %v6616_v6 = vpack.c.b16 %v14451_v46, %v6615_v50  ;;  %v14473_v38 = vpack.c.b16 %v14451_v46, %v6713_v18  ;;  %v6449_v47 = vrot.slane %v6447_v9, 1  ;;  %v6990_v48 = vld [vmem:[#allocation4 + $0x4] sm:$0xc] }
 0x3b3   : > { %v6395_v3 = vsel %vm12450_vm6, %v6384_v52, %v6394_v10  ;;  %v12052_v52 = vld [vmem:[%s14934_s11 + $0x1c0] sm:$0xff]  ;;  %v7015_v11 = vunpack.c.l.b16 %v6990_v48 }
 0x3b4   : > { %6396 = vst [vmem:[#allocation4 + $0xc] sm:$0xf] %v6395_v3  ;;  %7075 = vmatpush.bf16.msrb.mxu2 %v12050_v1  ;;  %v6618_v43 = vrot.slane %v6616_v6, 1  ;;  %v6717_v12 = vrot.slane %v14473_v38, 3  ;;  %v6450_v42 = vor.u32 %v6449_v47, %v6445_v37  ;;  %v12028_v3 = vld [vmem:[%s14934_s11 + $0x100] sm:$0xff] }
 0x3b5   : > { %6973 = vmatpush.bf16.msrb.mxu1 %v12039_v36  ;;  %6883 = vmatpush.bf16.msrb.mxu0 %v12031_v59  ;;  %v12062_v59 = vld [vmem:[%s14934_s11 + $0x210] sm:$0xff] }
 0x3b6   : > { %7184 = vmatpush.bf16.msrb.mxu3 %v12058_v19  ;;  %v7114_v19 = vunpack.c.l.b16 %v7095_v14 }
 0x3b8   : > { %7076 = vmatpush.bf16.msrb.mxu2 %v12049_v62 }
 0x3b9   : > { %6974 = vmatpush.bf16.msrb.mxu1 %v12038_v2  ;;  %6884 = vmatpush.bf16.msrb.mxu0 %v12030_v25  ;;  %v6993_v2 = vld [vmem:[#allocation4 + $0x10] sm:$0x3] }
 0x3ba   : > { %7185 = vmatpush.bf16.msrb.mxu3 %v12057_v21  ;;  %v7018_v9 = vunpack.c.l.b16 %v6993_v2 }
 0x3bb   : > { %v14469_v27 = vld [vmem:[#allocation4 + $0x8] sm:$0xff]  }
 0x3bc   : > { %v6416_v17 = vld [vmem:[#allocation4 + $0xc] sm:$0x1]  ;;  %v14476_v41 = vunpack.c.l.b16 %v14469_v27  ;;  %7077 = vmatpush.bf16.msrb.mxu2 %v12048_v0  ;;  %v6810_v28 = vunpack.c.h.b16 %v14469_v27  ;;  %v6813_v0 = vshrl.u32 %v14473_v38, 16 }
 0x3bd   : > { %v6693_v32 = vld [vmem:[#allocation4 + $0xc] sm:$0x7]  ;;  %v6441_v29 = vunpack.c.l.b16 %v6416_v17  ;;  %6975 = vmatpush.bf16.msrb.mxu1 %v12037_v16  ;;  %6885 = vmatpush.bf16.msrb.mxu0 %v12029_v58 }
 0x3be   : > { %v6714_v34 = vunpack.c.l.b16 %v6693_v32  ;;  %v6527_v61 = vpack.c.b16 %v14476_v41, %v14476_v41  ;;  %7186 = vmatpush.bf16.msrb.mxu3 %v12056_v39  ;;  %v14533_v10 = vld [vmem:[#allocation4 + $0x8] sm:$0xff]   ;;  %v6917_v63 = vpack.c.b16 %v14476_v41, %v14451_v46  ;;  %v6821_v32 = vshrl.u32 %v14469_v27, 16 }
 0x3bf   : > { %v14490_v26 = vpack.c.b16 %v6441_v29, %v14476_v41  ;;  %v12170_v36 = vunpack.c.l.b16 %v14533_v10  ;;  %v12171_v1 = vunpack.c.h.b16 %v14533_v10  ;;  %v12065_v29 = vld [vmem:[%s14934_s11 + $0x228] sm:$0xff]  ;;  %v6816_v39 = vshll.u32 %v14473_v38, 16 }
 0x3c0   : > { %v14493_v7 = vpack.c.b16 %v6714_v34, %v14476_v41  ;;  %6591 = vmatmul.bf16.gmra.mxu1 %v6527_v61  ;;  %7078 = vmatpush.bf16.msrb.mxu2 %v12047_v22  ;;  %v6824_v41 = vshll.u32 %v14469_v27, 16  ;;  %v12064_v27 = vld [vmem:[%s14934_s11 + $0x220] sm:$0xff] }
 0x3c1   : > { %v6619_v5 = vrot.slane %v14490_v26, 1  ;;  %v6452_v51 = vshll.u32 %v14490_v26, 16  ;;  %6976 = vmatpush.bf16.msrb.mxu1 %v12036_v13  ;;  %v6456_v46 = vshrl.u32 %v14490_v26, 16  ;;  %6886 = vmatpush.bf16.msrb.mxu0 %v12028_v3  ;;  %v7019_v62 = vpack.c.b16 %v12170_v36, %v7015_v11 }
 0x3c2   : > { %v6718_v44 = vrot.slane %v14493_v7, 3  ;;  %7187 = vmatpush.bf16.msrb.mxu3 %v12055_v30  ;;  %v7115_v50 = vpack.c.b16 %v7114_v19, %v12171_v1  ;;  %v7020_v34 = vpack.c.b16 %v7018_v9, %v12171_v1  ;;  %v6823_v7 = vrot.slane %v6821_v32, 3  ;;  %v12063_v30 = vld [vmem:[%s14934_s11 + $0x218] sm:$0xff] }
 0x3c3   : > { %v6620_v57 = vsel %vm6617_vm8, %v6618_v43, %v6619_v5  ;;  %v6454_v20 = vrot.slane %v6452_v51, 1  ;;  %v7117_v18 = vshrl.u32 %v7019_v62, 16  ;;  %v7120_v16 = vshll.u32 %v7019_v62, 16 }
 0x3c4   : > { %v6719_v53 = vsel %vm14993_vm11, %v6717_v12, %v6718_v44  ;;  %6679 = vmatmul.bf16.vlgmr.msra.gmra.mxu2 %v6620_v57  ;;  %v7125_v17 = vshrl.u32 %v7115_v50, 16  ;;  %v7128_v6 = vshll.u32 %v7115_v50, 16  ;;  %v6826_v37 = vrot.slane %v6824_v41, 4 }
 0x3c5   : > { %6778 = vmatmul.bf16.vlgmr.msra.gmra.mxu3 %v6719_v53  ;;  %v6455_v45 = vsel %vm14994_vm4, %v6450_v42, %v6454_v20  ;;  %7079 = vmatpush.bf16.msrb.mxu2 %v12046_v8  ;;  %v6458_v21 = vor.u32 %v6456_v46, %v6454_v20  ;;  %v7119_v40 = vrot.slane %v7117_v18, 2  ;;  %v7122_v47 = vrot.slane %v7120_v16, 3  ;;  %v12060_v8 = vld [vmem:[%s14934_s11 + $0x200] sm:$0xff] }
 0x3c6   : > { %6517 = vmatmul.bf16.vlgmr.msra.gmra.mxu0 %v6455_v45  ;;  %7188 = vmatpush.bf16.msrb.mxu3 %v12054_v55  ;;  %v7127_v61 = vrot.slane %v7125_v17, 2  ;;  %v7130_v26 = vrot.slane %v7128_v6, 3  ;;  %v6918_v43 = vpack.c.b16 %v6810_v28, %v6810_v28  ;;  %v6815_v12 = vrot.slane %v6813_v0, 3  ;;  %v12061_v45 = vld [vmem:[%s14934_s11 + $0x208] sm:$0xff]  ;;  %v699_v18 = vld [vmem:[#allocation5] sm:$0xf] }
 0x3c7   : > { %7278 = vmatpush.bf16.msra.mxu0 %v12067_v60  ;;  %v7123_v51 = vor.u32 %v7122_v47, %v7119_v40  ;;  %v6818_v22 = vrot.slane %v6816_v39, 4  ;;  %v6827_v38 = vor.u32 %v6826_v37, %v6823_v7  ;;  %v7204_v55 = vld [vmem:[#allocation4 + $0x4] sm:$0x8]  ;;  %v7226_v58 = vrot.slane %v7115_v50, 3  ;;  %v12075_v37 = vld [vmem:[%s14937_s14 + $0x38] sm:$0xff] }
 0x3c8   : > { %v7131_v13 = vor.u32 %v7130_v26, %v7127_v61  ;;  %v7223_v25 = vunpack.c.l.b16 %v7204_v55  ;;  %v700_v16 = vsel %vm12450_vm6, 0, %v699_v18 }
 0x3c9   : > { %7080 = vmatpush.bf16.msrb.mxu2 %v12045_v24  ;;  %v6819_v42 = vor.u32 %v6818_v22, %v6815_v12  ;;  %701 = vst [vmem:[#allocation5] sm:$0xf] %v700_v16  ;;  %v12074_v12 = vld [vmem:[%s14937_s14 + $0x30] sm:$0xff] }
 0x3ca   : > { %7189 = vmatpush.bf16.msrb.mxu3 %v12053_v54  ;;  %v7132_v53 = vsel %vm1194_vm13, %v7123_v51, %v7131_v13  ;;  %v7224_v24 = vpack.c.b16 %v12170_v36, %v7223_v25 }
 0x3cb   : > { %7279 = vmatpush.bf16.msra.mxu0 %v12066_v4  ;;  %v6828_v20 = vsel %vm14995_vm10, %v6819_v42, %v6827_v38 }
 0x3cc   : > { %v7225_v54 = vrot.slane %v7224_v24, 3  ;;  %v14607_v24 = vld [vmem:[%s14935_s12] ss:$0 sm:$0xff] }
 0x3cd   : > { %7081 = vmatpush.bf16.msrb.mxu2 %v12044_v49 }
 0x3ce   : > { %7190 = vmatpush.bf16.msrb.mxu3 %v12052_v52  ;;  %v7227_v14 = vsel %vm14996_vm15, %v7225_v54, %v7226_v58 }
 0x3cf   : > { %7280 = vmatpush.bf16.msra.mxu0 %v12065_v29 }
 0x3d0   : > { %6977 = vmatmul.bf16.vlgmr.msrb.gmra.mxu1 %v6917_v63 }
 0x3d1   : > { %7544 = vmatpush.bf16.msra.mxu2 %v12075_v37  ;;  %v12068_v37 = vld [vmem:[%s14937_s14] sm:$0xff] }
 0x3d3   : > { %7281 = vmatpush.bf16.msra.mxu0 %v12064_v27 }
 0x3d4   : > { %6684 = vmatmul.bf16.gmra.mxu2 %v6619_v5  ;;  %v7021_v5 = vrot.slane %v7019_v62, 2 }
 0x3d5   : > { %6783 = vmatmul.bf16.gmra.mxu3 %v6718_v44  ;;  %v7022_v44 = vrot.slane %v7020_v34, 2  ;;  %7545 = vmatpush.bf16.msra.mxu2 %v12074_v12 }
 0x3d6   : > { %6522 = vmatmul.bf16.gmra.mxu0 %v6458_v21 }
 0x3d7   : > { %v7023_v57 = vsel %vm1839_vm1, %v7021_v5, %v7022_v44  ;;  %7282 = vmatpush.bf16.msra.mxu0 %v12063_v30 }
 0x3db   : > { %7283 = vmatpush.bf16.msra.mxu0 %v12062_v59 }
 0x3df   : > { %7284 = vmatpush.bf16.msra.mxu0 %v12061_v45 }
 0x3e0   : > { %6982 = vmatmul.bf16.gmra.mxu1 %v6918_v43 }
 0x3e3   : > { %7285 = vmatpush.bf16.msra.mxu0 %v12060_v8  ;;  %v12072_v8 = vld [vmem:[%s14937_s14 + $0x20] sm:$0xff] }
 0x3e4   : > { %7082 = vmatmul.bf16.vlgmr.msrb.gmra.mxu2 %v7023_v57  ;;  %v12073_v57 = vld [vmem:[%s14937_s14 + $0x28] sm:$0xff] }
 0x3e5   : > { %7191 = vmatmul.bf16.vlgmr.msrb.gmra.mxu3 %v7132_v53  ;;  %v702_v53 = vld [vmem:[#allocation5 + $0xc] sm:$0x8]  ;;  %7546 = vmatpush.bf16.msra.mxu2 %v12073_v57 }
 0x3e6   : > { %6887 = vmatmul.bf16.vlgmr.msrb.gmra.mxu0 %v6828_v20  ;;  %v703_v59 = vsel %vm12460_vm9, 0, %v702_v53 }
 0x3e7   : > { %704 = vst [vmem:[#allocation5 + $0xc] sm:$0x8] %v703_v59  ;;  %v12079_v59 = vld [vmem:[%s14937_s14 + $0x58] sm:$0xff] }
 0x3e9   : > { %7547 = vmatpush.bf16.msra.mxu2 %v12072_v8 }
 0x3f4   : > { %7087 = vmatmul.bf16.gmra.mxu2 %v7022_v44 }
 0x3f5   : > { %7196 = vmatmul.bf16.gmra.mxu3 %v7131_v13 }
 0x3f6   : > { %6892 = vmatmul.bf16.gmra.mxu0 %v6827_v38 }
 0x406   : > { %7286 = vmatmul.bf16.vlgmr.msra.gmra.mxu0 %v7227_v14 }
 0x416   : > { %7291 = vmatmul.bf16.gmra.mxu0 %v7226_v58 }
 0x42d   : > { %v6587_v49 = vpop.f32.mrf.mxu1 }
 0x435   : > { %v6589_v52 = vpop.f32.mrf.mxu1 }
 0x43d   : > { %v6592_v48 = vpop.f32.mrf.mxu1 }
 0x443   : > { %v6518_v63 = vpop.f32.mrf.mxu0 }
 0x444   : > { %v6588_v34 = vadd.f32 %v6587_v49, %v6518_v63  ;;  %v14612_v49 = vld [vmem:[%s14936_s13] ss:$0 sm:$0xff] }
 0x445   : > { %v6594_v3 = vpop.f32.mrf.mxu1 }
 0x447   : > { %v6680_v1 = vpop.f32.mrf.mxu2 }
 0x448   : > { %v6779_v19 = vpop.f32.mrf.mxu3  ;;  %v6689_v40 = vadd.f32 %v6680_v1, %v6588_v34  ;;  %v12071_v1 = vld [vmem:[%s14937_s14 + $0x18] sm:$0xff]  ;;  %v12097_v34 = vld [vmem:[%s14937_s14 + $0xe8] sm:$0xff] }
 0x449   : > { %7548 = vmatpush.bf16.msra.mxu2 %v12071_v1 }
 0x44a   : > { %v6788_v61 = vadd.f32 %v6779_v19, %v6689_v40  ;;  %v12091_v19 = vld [vmem:[%s14937_s14 + $0xb8] sm:$0xff] }
 0x44b   : > { %v6520_v28 = vpop.f32.mrf.mxu0  ;;  %7636 = vmatpush.bf16.msra.mxu3 %v12091_v19 }
 0x44c   : > { %v6590_v26 = vadd.f32 %v6589_v52, %v6520_v28  ;;  %v12099_v28 = vld [vmem:[%s14937_s14 + $0xf8] sm:$0xff] }
 0x44d   : > { %v6978_v11 = vpop.f32.mrf.mxu1  ;;  %7735 = vmatpush.bf16.msrb.mxu0 %v12099_v28  ;;  %v12093_v28 = vld [vmem:[%s14937_s14 + $0xc8] sm:$0xff] }
 0x44f   : > { %v6682_v60 = vpop.f32.mrf.mxu2 }
 0x450   : > { %v6781_v46 = vpop.f32.mrf.mxu3  ;;  %v6690_v5 = vadd.f32 %v6682_v60, %v6590_v26 }
 0x452   : > { %v6789_v13 = vadd.f32 %v6781_v46, %v6690_v5 }
 0x453   : > { %v6523_v2 = vpop.f32.mrf.mxu0 }
 0x454   : > { %v6593_v22 = vadd.f32 %v6592_v48, %v6523_v2  ;;  %v12083_v2 = vld [vmem:[%s14937_s14 + $0x78] sm:$0xff] }
 0x455   : > { %v6980_v10 = vpop.f32.mrf.mxu1  ;;  %7475 = vmatpush.bf16.msra.mxu1 %v12083_v2 }
 0x457   : > { %v6685_v36 = vpop.f32.mrf.mxu2 }
 0x458   : > { %v6784_v62 = vpop.f32.mrf.mxu3  ;;  %v6691_v45 = vadd.f32 %v6685_v36, %v6593_v22  ;;  %v12070_v36 = vld [vmem:[%s14937_s14 + $0x10] sm:$0xff] }
 0x459   : > { %7549 = vmatpush.bf16.msra.mxu2 %v12070_v36  ;;  %v12084_v36 = vld [vmem:[%s14937_s14 + $0x80] sm:$0xff] }
 0x45a   : > { %v6790_v58 = vadd.f32 %v6784_v62, %v6691_v45  ;;  %v12090_v62 = vld [vmem:[%s14937_s14 + $0xb0] sm:$0xff] }
 0x45b   : > { %v6525_v50 = vpop.f32.mrf.mxu0  ;;  %7637 = vmatpush.bf16.msra.mxu3 %v12090_v62 }
 0x45d   : > { %v6983_v21 = vpop.f32.mrf.mxu1 }
 0x45f   : > { %v6687_v4 = vpop.f32.mrf.mxu2 }
 0x460   : > { %v6786_v9 = vpop.f32.mrf.mxu3 }
 0x461   : > { %v12082_v9 = vld [vmem:[%s14937_s14 + $0x70] sm:$0xff] }
 0x462   : > { %7476 = vmatpush.bf16.msra.mxu1 %v12082_v9  ;;  %v12111_v9 = vld [vmem:[%s14937_s14 + $0x158] sm:$0xff] }
 0x463   : > { %v6888_v17 = vpop.f32.mrf.mxu0 }
 0x464   : > { %v6897_v7 = vadd.f32 %v6888_v17, %v6788_v61 }
 0x465   : > { %v6985_v6 = vpop.f32.mrf.mxu1 }
 0x466   : > { %v6987_v44 = vadd.f32 %v6978_v11, %v6897_v7  ;;  %v12089_v6 = vld [vmem:[%s14937_s14 + $0xa8] sm:$0xff] }
 0x467   : > { %v7083_v32 = vpop.f32.mrf.mxu2  ;;  %7638 = vmatpush.bf16.msra.mxu3 %v12089_v6  ;;  %v12107_v6 = vld [vmem:[%s14937_s14 + $0x138] sm:$0xff] }
 0x468   : > { %v7192_v41 = vpop.f32.mrf.mxu3  ;;  %v7092_v38 = vadd.f32 %v7083_v32, %v6987_v44  ;;  %v12096_v44 = vld [vmem:[%s14937_s14 + $0xe0] sm:$0xff] }
 0x46a   : > { %v7201_v55 = vadd.f32 %v7192_v41, %v7092_v38  ;;  %v12087_v38 = vld [vmem:[%s14937_s14 + $0x98] sm:$0xff] }
 0x46b   : > { %v6890_v29 = vpop.f32.mrf.mxu0 }
 0x46c   : > { %v6898_v30 = vadd.f32 %v6890_v29, %v6789_v13  ;;  %v12080_v13 = vld [vmem:[%s14937_s14 + $0x60] sm:$0xff] }
 0x46e   : > { %v6988_v25 = vadd.f32 %v6980_v10, %v6898_v30 }
 0x46f   : > { %v7085_v0 = vpop.f32.mrf.mxu2 }
 0x470   : > { %v7194_v39 = vpop.f32.mrf.mxu3  ;;  %v7093_v52 = vadd.f32 %v7085_v0, %v6988_v25  ;;  %v7355_v0 = vld [vmem:[#allocation5] sm:$0x8] }
 0x472   : > { %v7202_v11 = vadd.f32 %v7194_v39, %v7093_v52  ;;  %v12081_v39 = vld [vmem:[%s14937_s14 + $0x68] sm:$0xff] }
 0x473   : > { %v6893_v47 = vpop.f32.mrf.mxu0  ;;  %7477 = vmatpush.bf16.msra.mxu1 %v12081_v39  ;;  %v12113_v52 = vld [vmem:[%s14937_s14 + $0x168] sm:$0xff] }
 0x474   : > { %v6899_v48 = vadd.f32 %v6893_v47, %v6790_v58 }
 0x476   : > { %v6989_v60 = vadd.f32 %v6983_v21, %v6899_v48  ;;  %v12098_v21 = vld [vmem:[%s14937_s14 + $0xf0] sm:$0xff] }
 0x477   : > { %v7088_v27 = vpop.f32.mrf.mxu2  ;;  %7736 = vmatpush.bf16.msrb.mxu0 %v12098_v21  ;;  %7478 = vmatpush.bf16.msra.mxu1 %v12080_v13  ;;  %v12078_v48 = vld [vmem:[%s14937_s14 + $0x50] sm:$0xff]  ;;  %v12092_v21 = vld [vmem:[%s14937_s14 + $0xc0] sm:$0xff] }
 0x478   : > { %v14591_v43 = vpop.f32.mrf.mxu3  ;;  %v7094_v18 = vadd.f32 %v7088_v27, %v6989_v60  ;;  %v12088_v27 = vld [vmem:[%s14937_s14 + $0xa0] sm:$0xff]  ;;  %v12077_v60 = vld [vmem:[%s14937_s14 + $0x48] sm:$0xff] }
 0x479   : > { %7639 = vmatpush.bf16.msra.mxu3 %v12088_v27 }
 0x47a   : > { %v7203_v40 = vadd.f32 %v14591_v43, %v7094_v18  ;;  %v7360_v18 = vld [vmem:[#allocation5 + $0xc] sm:$0xf] }
 0x47b   : > { %v6895_v51 = vpop.f32.mrf.mxu0  ;;  %7737 = vmatpush.bf16.msrb.mxu0 %v12097_v34  ;;  %7479 = vmatpush.bf16.msra.mxu1 %v12079_v59  ;;  %v12106_v34 = vld [vmem:[%s14937_s14 + $0x130] sm:$0xff] }
 0x47c   : > { %v12115_v51 = vld [vmem:[%s14937_s14 + $0x178] sm:$0xff] }
 0x47d   : > { %7640 = vmatpush.bf16.msra.mxu3 %v12087_v38 }
 0x47f   : > { %v7090_v42 = vpop.f32.mrf.mxu2  ;;  %7738 = vmatpush.bf16.msrb.mxu0 %v12096_v44  ;;  %7480 = vmatpush.bf16.msra.mxu1 %v12078_v48 }
 0x480   : > { %v7199_v20 = vpop.f32.mrf.mxu3  ;;  %v12095_v42 = vld [vmem:[%s14937_s14 + $0xd8] sm:$0xff] }
 0x481   : > { %v12114_v20 = vld [vmem:[%s14937_s14 + $0x170] sm:$0xff] }
 0x483   : > { %v7287_v54 = vpop.f32.mrf.mxu0  ;;  %7739 = vmatpush.bf16.msrb.mxu0 %v12095_v42  ;;  %7481 = vmatpush.bf16.msra.mxu1 %v12077_v60  ;;  %v12117_v60 = vld [vmem:[%s14937_s14 + $0x188] sm:$0xff] }
 0x484   : > { %v7296_v14 = vadd.f32 %v7287_v54, %v7201_v55  ;;  %v12086_v54 = vld [vmem:[%s14937_s14 + $0x90] sm:$0xff] }
 0x485   : > { %7641 = vmatpush.bf16.msra.mxu3 %v12086_v54 }
 0x486   : > { %v7303_v63 = vmul.f32 %v14607_v24, %v7296_v14 }
 0x487   : > { %7482 = vmatpush.bf16.msra.mxu1 %v12076_v15 }
 0x488   : > { %v7310_v3 = vadd.f32 %v14612_v49, %v7303_v63 }
 0x48a   : > { %v7313_v46 = vmax.f32 %v7310_v3, 0.0 }
 0x48b   : > { %v7289_v10 = vpop.f32.mrf.mxu0  ;;  %7844 = vmatpush.bf16.msrb.mxu1 %v12107_v6 }
 0x48c   : > { %v7316_v50 = vmul.f32 %v7313_v46, %v13661_v33  ;;  %v7297_v4 = vadd.f32 %v7289_v10, %v7202_v11  ;;  %v12069_v33 = vld [vmem:[%s14937_s14 + $0x8] sm:$0xff]  ;;  %v12112_v11 = vld [vmem:[%s14937_s14 + $0x160] sm:$0xff] }
 0x48d   : > { %7550 = vmatpush.bf16.msra.mxu2 %v12069_v33  ;;  %v12131_v33 = vld [vmem:[%s14937_s14 + $0x1f8] sm:$0xff] }
 0x48e   : > { %v7319_v16 = vpack.c.bf16 %v7316_v50, %v7316_v50  ;;  %v7304_v17 = vmul.f32 %v14607_v24, %v7297_v4 }
 0x48f   : > { %7845 = vmatpush.bf16.msrb.mxu1 %v12106_v34 }
 0x490   : > { %v7323_v32 = vshll.u32 %v7319_v16, 16  ;;  %v7326_v41 = vshrl.u32 %v7319_v16, 16  ;;  %v7311_v29 = vadd.f32 %v14612_v49, %v7304_v17  ;;  %v12123_v16 = vld [vmem:[%s14937_s14 + $0x1b8] sm:$0xff] }
 0x491   : > { %7551 = vmatpush.bf16.msra.mxu2 %v12068_v37  ;;  %v12105_v37 = vld [vmem:[%s14937_s14 + $0x128] sm:$0xff] }
 0x492   : > { %v7325_v47 = vrot.slane %v7323_v32, 5  ;;  %v7328_v61 = vrot.slane %v7326_v41, 4  ;;  %v7314_v26 = vmax.f32 %v7311_v29, 0.0  ;;  %v12110_v41 = vld [vmem:[%s14937_s14 + $0x150] sm:$0xff] }
 0x493   : > { %v7292_v7 = vpop.f32.mrf.mxu0  ;;  %v12122_v29 = vld [vmem:[%s14937_s14 + $0x1b0] sm:$0xff]  ;;  %7846 = vmatpush.bf16.msrb.mxu1 %v12105_v37 }
 0x494   : > { %v7356_v5 = vsel %vm12460_vm9, %v7325_v47, %v7355_v0  ;;  %v7317_v12 = vmul.f32 %v7314_v26, %v13707_v23  ;;  %v7298_v43 = vadd.f32 %v7292_v7, %v7203_v40  ;;  %v7329_v35 = vor.u32 %v7328_v61, %v7325_v47  ;;  %v12109_v47 = vld [vmem:[%s14937_s14 + $0x148] sm:$0xff]  ;;  %vm14998_vm9 = vmmov %vm14994_vm4 }
 0x495   : > { %7357 = vst [vmem:[#allocation5] sm:$0x8] %v7356_v5  ;;  %7934 = vmatpush.bf16.msrb.mxu2 %v12115_v51  ;;  %v12121_v61 = vld [vmem:[%s14937_s14 + $0x1a8] sm:$0xff] }
 0x496   : > { %v7320_v22 = vpack.c.bf16 %v7317_v12, %v7317_v12  ;;  %v7305_v23 = vmul.f32 %v14607_v24, %v7298_v43  ;;  %v7330_v45 = vrot.slane %v7329_v35, 4  ;;  %v12129_v7 = vld [vmem:[%s14937_s14 + $0x1e8] sm:$0xff]  ;;  %v12108_v12 = vld [vmem:[%s14937_s14 + $0x140] sm:$0xff] }
 0x498   : > { %v7332_v30 = vshll.u32 %v7320_v22, 16  ;;  %v7336_v57 = vshrl.u32 %v7320_v22, 16  ;;  %v7312_v53 = vadd.f32 %v14612_v49, %v7305_v23  ;;  %v12094_v49 = vld [vmem:[%s14937_s14 + $0xd0] sm:$0xff] }
 0x499   : > { %7935 = vmatpush.bf16.msrb.mxu2 %v12114_v20  ;;  %7740 = vmatpush.bf16.msrb.mxu0 %v12094_v49  ;;  %v12127_v49 = vld [vmem:[%s14937_s14 + $0x1d8] sm:$0xff] }
 0x49a   : > { %v7334_v8 = vrot.slane %v7332_v30, 5  ;;  %v7338_v55 = vrot.slane %v7336_v57, 4  ;;  %v7315_v25 = vmax.f32 %v7312_v53, 0.0  ;;  %v12120_v30 = vld [vmem:[%s14937_s14 + $0x1a0] sm:$0xff] }
 0x49b   : > { %v7294_v24 = vpop.f32.mrf.mxu0  ;;  %v12128_v57 = vld [vmem:[%s14937_s14 + $0x1e0] sm:$0xff] }
 0x49c   : > { %v7335_v58 = vsel %vm12509_vm0, %v7330_v45, %v7334_v8  ;;  %v7318_v14 = vmul.f32 %v7315_v25, %v13748_v56  ;;  %v7339_v63 = vor.u32 %v7338_v55, %v7334_v8  ;;  %v12085_v56 = vld [vmem:[%s14937_s14 + $0x88] sm:$0xff]  ;;  %v7562_v0 = vld [vmem:[#allocation5] sm:$0xe] }
 0x49d   : > { %7358 = vst [vmem:[#allocation5 + $0x4] sm:$0xf] %v7335_v58  ;;  %7936 = vmatpush.bf16.msrb.mxu2 %v12113_v52  ;;  %7642 = vmatpush.bf16.msra.mxu3 %v12085_v56  ;;  %v7657_v40 = vld [vmem:[#allocation5] sm:$0x8]  ;;  %v7581_v26 = vunpack.c.l.b16 %v7562_v0  ;;  %v12103_v56 = vld [vmem:[%s14937_s14 + $0x118] sm:$0xff] }
 0x49e   : > { %v7321_v3 = vpack.c.bf16 %v7318_v14, %v7318_v14  ;;  %v7340_v46 = vrot.slane %v7339_v63, 4  ;;  %7741 = vmatpush.bf16.msrb.mxu0 %v12093_v28  ;;  %v7678_v5 = vunpack.c.l.b16 %v7657_v40  ;;  %v12104_v53 = vld [vmem:[%s14937_s14 + $0x120] sm:$0xff]  ;;  %v12119_v14 = vld [vmem:[%s14937_s14 + $0x198] sm:$0xff]  ;;  %v12126_v28 = vld [vmem:[%s14937_s14 + $0x1d0] sm:$0xff] }
 0x49f   : > { %7847 = vmatpush.bf16.msrb.mxu1 %v12104_v53  ;;  %v12137_v40 = vld [vmem:[%s14937_s14 + $0x228] sm:$0xff] }
 0x4a0   : > { %v7342_v1 = vshll.u32 %v7321_v3, 16  ;;  %v7346_v19 = vshrl.u32 %v7321_v3, 16 }
 0x4a1   : > { %7937 = vmatpush.bf16.msrb.mxu2 %v12112_v11  ;;  %7643 = vmatpush.bf16.msra.mxu3 %v12084_v36  ;;  %v12102_v11 = vld [vmem:[%s14937_s14 + $0x110] sm:$0xff] }
 0x4a2   : > { %v7344_v2 = vrot.slane %v7342_v1, 5  ;;  %v7348_v10 = vrot.slane %v7346_v19, 4  ;;  %7742 = vmatpush.bf16.msrb.mxu0 %v12092_v21  ;;  %v12118_v19 = vld [vmem:[%s14937_s14 + $0x190] sm:$0xff]  ;;  %v12139_v21 = vld [vmem:[%s14937_s14 + $0x238] sm:$0xff] }
 0x4a3   : > { %7848 = vmatpush.bf16.msrb.mxu1 %v12103_v56  ;;  %v8060_v36 = vld [vmem:[#allocation5 + $0x10] sm:$0x7] }
 0x4a4   : > { %v7345_v62 = vsel %vm12509_vm0, %v7340_v46, %v7344_v2  ;;  %v7349_v50 = vor.u32 %v7348_v10, %v7344_v2  ;;  %v14720_v4 = vld [vmem:[#allocation5] sm:$0xff]   ;;  %v12125_v46 = vld [vmem:[%s14937_s14 + $0x1c8] sm:$0xff]  ;;  %vm14999_vm0 = vmmov %vm14989_vm2 }
 0x4a5   : > { %7359 = vst [vmem:[#allocation5 + $0x8] sm:$0xf] %v7345_v62  ;;  %7552 = vmatmul.bf16.vlgmr.msra.gmra.mxu2 %v14720_v4  ;;  %8039 = vmatpush.bf16.msrb.mxu3 %v12123_v16  ;;  %v14756_v39 = vunpack.c.h.b16 %v14720_v4  ;;  %v7413_v27 = vshll.u32 %v14720_v4, 16  ;;  %v7411_v8 = vshrl.u32 %v14720_v4, 16  ;;  %v12101_v2 = vld [vmem:[%s14937_s14 + $0x108] sm:$0xff]  ;;  %v12116_v62 = vld [vmem:[%s14937_s14 + $0x180] sm:$0xff] }
 0x4a6   : > { %v7350_v17 = vrot.slane %v7349_v50, 4  ;;  %7938 = vmatpush.bf16.msrb.mxu2 %v12111_v9  ;;  %8148 = vmatpush.bf16.msra.mxu0 %v12131_v33  ;;  %v12124_v50 = vld [vmem:[%s14937_s14 + $0x1c0] sm:$0xff] }
 0x4a7   : > { %v7582_v51 = vpack.c.b16 %v14756_v39, %v7581_v26  ;;  %v14778_v35 = vpack.c.b16 %v14756_v39, %v7678_v5  ;;  %v7415_v42 = vrot.slane %v7413_v27, 1  ;;  %7849 = vmatpush.bf16.msrb.mxu1 %v12102_v11  ;;  %v7955_v4 = vld [vmem:[#allocation5 + $0x4] sm:$0xc] }
 0x4a8   : > { %v7361_v32 = vsel %vm12450_vm6, %v7350_v17, %v7360_v18  ;;  %vm14997_vm6 = vmmov %vm14988_vm3  ;;  %v12100_v18 = vld [vmem:[%s14937_s14 + $0x100] sm:$0xff]  ;;  %v8079_v17 = vunpack.c.l.b16 %v8060_v36  ;;  %v7980_v6 = vunpack.c.l.b16 %v7955_v4 }
 0x4a9   : > { %7362 = vst [vmem:[#allocation5 + $0xc] sm:$0xf] %v7361_v32  ;;  %8040 = vmatpush.bf16.msrb.mxu3 %v12122_v29  ;;  %v7583_v55 = vrot.slane %v7582_v51, 1  ;;  %v7682_v24 = vrot.slane %v14778_v35, 3  ;;  %v7416_v63 = vor.u32 %v7415_v42, %v7411_v8  ;;  %v7958_v29 = vld [vmem:[#allocation5 + $0x10] sm:$0x3] }
 0x4aa   : > { %7939 = vmatpush.bf16.msrb.mxu2 %v12110_v41  ;;  %8149 = vmatpush.bf16.msra.mxu0 %v12130_v31  ;;  %v12138_v41 = vld [vmem:[%s14937_s14 + $0x230] sm:$0xff]  ;;  %v12136_v51 = vld [vmem:[%s14937_s14 + $0x220] sm:$0xff] }
 0x4ab   : > { %7850 = vmatpush.bf16.msrb.mxu1 %v12101_v2 }
 0x4ad   : > { %8041 = vmatpush.bf16.msrb.mxu3 %v12121_v61 }
 0x4ae   : > { %7940 = vmatpush.bf16.msrb.mxu2 %v12109_v47  ;;  %8150 = vmatpush.bf16.msra.mxu0 %v12129_v7 }
 0x4af   : > { %7851 = vmatpush.bf16.msrb.mxu1 %v12100_v18 }
 0x4b0   : > { %v14774_v43 = vld [vmem:[#allocation5 + $0x8] sm:$0xff]  }
 0x4b1   : > { %v7382_v44 = vld [vmem:[#allocation5 + $0xc] sm:$0x1]  ;;  %v7406_v22 = vunpack.c.l.b16 %v14774_v43  ;;  %8042 = vmatpush.bf16.msrb.mxu3 %v12120_v30  ;;  %v7775_v33 = vunpack.c.h.b16 %v14774_v43  ;;  %v7786_v37 = vshrl.u32 %v14774_v43, 16  ;;  %v7789_v27 = vshll.u32 %v14774_v43, 16 }
 0x4b2   : > { %v7658_v13 = vld [vmem:[#allocation5 + $0xc] sm:$0x7]  ;;  %v7407_v23 = vunpack.c.l.b16 %v7382_v44  ;;  %7941 = vmatpush.bf16.msrb.mxu2 %v12108_v12  ;;  %8151 = vmatpush.bf16.msra.mxu0 %v12128_v57  ;;  %v7778_v12 = vshrl.u32 %v14778_v35, 16  ;;  %v7781_v44 = vshll.u32 %v14778_v35, 16  ;;  %v12135_v35 = vld [vmem:[%s14937_s14 + $0x218] sm:$0xff] }
 0x4b3   : > { %v7679_v38 = vunpack.c.l.b16 %v7658_v13  ;;  %v7493_v20 = vpack.c.b16 %v7406_v22, %v7406_v22  ;;  %v14826_v10 = vld [vmem:[#allocation5 + $0x8] sm:$0xff]   ;;  %v7882_v9 = vpack.c.b16 %v7406_v22, %v14756_v39  ;;  %v7983_v39 = vunpack.c.l.b16 %v7958_v29 }
 0x4b4   : > { %v14790_v59 = vpack.c.b16 %v7407_v23, %v7406_v22  ;;  %v12178_v15 = vunpack.c.l.b16 %v14826_v10  ;;  %v12179_v16 = vunpack.c.h.b16 %v14826_v10  ;;  %v7788_v30 = vrot.slane %v7786_v37, 3  ;;  %v12143_v37 = vld [vmem:[%s14940_s17 + $0x18] sm:$0xff] }
 0x4b5   : > { %v7681_v45 = vpack.c.b16 %v7679_v38, %v7406_v22  ;;  %7557 = vmatmul.bf16.gmra.mxu2 %v7493_v20  ;;  %8043 = vmatpush.bf16.msrb.mxu3 %v12119_v14  ;;  %v7791_v57 = vrot.slane %v7789_v27, 4  ;;  %v7883_v53 = vpack.c.b16 %v7775_v33, %v7775_v33  ;;  %v7780_v42 = vrot.slane %v7778_v12, 3  ;;  %v12147_v33 = vld [vmem:[%s14940_s17 + $0x38] sm:$0xff] }
 0x4b6   : > { %v7584_v25 = vrot.slane %v14790_v59, 1  ;;  %v7418_v58 = vshll.u32 %v14790_v59, 16  ;;  %8152 = vmatpush.bf16.msra.mxu0 %v12127_v49  ;;  %v7422_v32 = vshrl.u32 %v14790_v59, 16  ;;  %v7984_v31 = vpack.c.b16 %v12178_v15, %v7980_v6  ;;  %v12133_v49 = vld [vmem:[%s14937_s14 + $0x208] sm:$0xff]  ;;  %12200 = vmatpush.bf16.msra.mxu2 %v12147_v33 }
 0x4b7   : > { %v7683_v54 = vrot.slane %v7681_v45, 3  ;;  %v14850_v34 = vpack.c.b16 %v8079_v17, %v12179_v16  ;;  %v7985_v5 = vpack.c.b16 %v7983_v39, %v12179_v16  ;;  %v7783_v8 = vrot.slane %v7781_v44, 4  ;;  %v12144_v39 = vld [vmem:[%s14940_s17 + $0x20] sm:$0xff]  ;;  %v12142_v44 = vld [vmem:[%s14940_s17 + $0x10] sm:$0xff] }
 0x4b8   : > { %v7585_v52 = vsel %vm6617_vm8, %v7583_v55, %v7584_v25  ;;  %v7420_v3 = vrot.slane %v7418_v58, 1  ;;  %v8082_v47 = vshrl.u32 %v7984_v31, 16  ;;  %v8085_v61 = vshll.u32 %v7984_v31, 16 }
 0x4b9   : > { %v7684_v48 = vsel %vm14997_vm6, %v7682_v24, %v7683_v54  ;;  %7644 = vmatmul.bf16.vlgmr.msra.gmra.mxu3 %v7585_v52  ;;  %v8090_v26 = vshrl.u32 %v14850_v34, 16  ;;  %v8093_v7 = vshll.u32 %v14850_v34, 16  ;;  %v7986_v43 = vrot.slane %v7984_v31, 2  ;;  %v12132_v52 = vld [vmem:[%s14937_s14 + $0x200] sm:$0xff]  ;;  %v12145_v31 = vld [vmem:[%s14940_s17 + $0x28] sm:$0xff] }
 0x4ba   : > { %7743 = vmatmul.bf16.vlgmr.msrb.gmra.mxu0 %v7684_v48  ;;  %v7421_v1 = vsel %vm14998_vm9, %v7416_v63, %v7420_v3  ;;  %8044 = vmatpush.bf16.msrb.mxu3 %v12118_v19  ;;  %v7424_v0 = vor.u32 %v7422_v32, %v7420_v3  ;;  %v8084_v13 = vrot.slane %v8082_v47, 2  ;;  %v8087_v22 = vrot.slane %v8085_v61, 3  ;;  %v8169_v48 = vld [vmem:[#allocation5 + $0x4] sm:$0x8]  ;;  %v12146_v32 = vld [vmem:[%s14940_s17 + $0x30] sm:$0xff] }
 0x4bb   : > { %7483 = vmatmul.bf16.vlgmr.msra.gmra.mxu1 %v7421_v1  ;;  %8153 = vmatpush.bf16.msra.mxu0 %v12126_v28  ;;  %v8092_v23 = vrot.slane %v8090_v26, 2  ;;  %v8095_v38 = vrot.slane %v8093_v7, 3  ;;  %v7987_v20 = vrot.slane %v7985_v5, 2  ;;  %v7792_v55 = vor.u32 %v7791_v57, %v7788_v30  ;;  %v12140_v57 = vld [vmem:[%s14940_s17] sm:$0xff] }
 0x4bc   : > { %8243 = vmatpush.bf16.msra.mxu1 %v12139_v21  ;;  %v8088_v59 = vor.u32 %v8087_v22, %v8084_v13  ;;  %v7784_v58 = vor.u32 %v7783_v8, %v7780_v42  ;;  %v8188_v63 = vunpack.c.l.b16 %v8169_v48  ;;  %v8191_v56 = vrot.slane %v14850_v34, 3  ;;  %12201 = vmatpush.bf16.msra.mxu2 %v12146_v32 }
 0x4bd   : > { %v8096_v45 = vor.u32 %v8095_v38, %v8092_v23  ;;  %v7988_v24 = vsel %vm1839_vm1, %v7986_v43, %v7987_v20  ;;  %v12141_v38 = vld [vmem:[%s14940_s17 + $0x8] sm:$0xff] }
 0x4be   : > { %8045 = vmatpush.bf16.msrb.mxu3 %v12117_v60  ;;  %v7793_v14 = vsel %vm14999_vm0, %v7784_v58, %v7792_v55  ;;  %v8189_v3 = vpack.c.b16 %v12178_v15, %v8188_v63 }
 0x4bf   : > { %8154 = vmatpush.bf16.msra.mxu0 %v12125_v46 }
 0x4c0   : > { %8244 = vmatpush.bf16.msra.mxu1 %v12138_v41  ;;  %v8190_v1 = vrot.slane %v8189_v3, 3  ;;  %12202 = vmatpush.bf16.msra.mxu2 %v12145_v31 }
 0x4c2   : > { %8046 = vmatpush.bf16.msrb.mxu3 %v12116_v62 }
 0x4c3   : > { %8155 = vmatpush.bf16.msra.mxu0 %v12124_v50 }
 0x4c4   : > { %8245 = vmatpush.bf16.msra.mxu1 %v12137_v40  ;;  %12203 = vmatpush.bf16.msra.mxu2 %v12144_v39 }
 0x4c5   : > { %7942 = vmatmul.bf16.vlgmr.msrb.gmra.mxu2 %v7882_v9 }
 0x4c6   : > { %12192 = vmatpush.bf16.msra.mxu3 %v12139_v21 }
 0x4c7   : > { %8351 = vmatpush.bf16.msrb.mxu0 %v12147_v33 }
 0x4c8   : > { %8246 = vmatpush.bf16.msra.mxu1 %v12136_v51  ;;  %12204 = vmatpush.bf16.msra.mxu2 %v12143_v37 }
 0x4c9   : > { %7649 = vmatmul.bf16.gmra.mxu3 %v7584_v25  ;;  %v12134_v25 = vld [vmem:[%s14937_s14 + $0x210] sm:$0xff] }
 0x4ca   : > { %7748 = vmatmul.bf16.gmra.mxu0 %v7683_v54  ;;  %12193 = vmatpush.bf16.msra.mxu3 %v12138_v41  ;;  %v8097_v54 = vsel %vm1194_vm13, %v8088_v59, %v8096_v45  ;;  %vm15000_vm13 = vmmov %vm14988_vm3 }
 0x4cb   : > { %7488 = vmatmul.bf16.gmra.mxu1 %v7424_v0  ;;  %v8192_v19 = vsel %vm15000_vm13, %v8190_v1, %v8191_v56  ;;  %8352 = vmatpush.bf16.msrb.mxu0 %v12146_v32 }
 0x4cc   : > { %8247 = vmatpush.bf16.msra.mxu1 %v12135_v35  ;;  %12205 = vmatpush.bf16.msra.mxu2 %v12142_v44 }
 0x4ce   : > { %12194 = vmatpush.bf16.msra.mxu3 %v12137_v40 }
 0x4cf   : > { %8353 = vmatpush.bf16.msrb.mxu0 %v12145_v31 }
 0x4d0   : > { %8248 = vmatpush.bf16.msra.mxu1 %v12134_v25  ;;  %12206 = vmatpush.bf16.msra.mxu2 %v12141_v38 }
 0x4d2   : > { %12195 = vmatpush.bf16.msra.mxu3 %v12136_v51 }
 0x4d3   : > { %8354 = vmatpush.bf16.msrb.mxu0 %v12144_v39 }
 0x4d4   : > { %8249 = vmatpush.bf16.msra.mxu1 %v12133_v49  ;;  %12207 = vmatpush.bf16.msra.mxu2 %v12140_v57 }
 0x4d5   : > { %7947 = vmatmul.bf16.gmra.mxu2 %v7883_v53 }
 0x4d6   : > { %12196 = vmatpush.bf16.msra.mxu3 %v12135_v35 }
 0x4d7   : > { %8355 = vmatpush.bf16.msrb.mxu0 %v12143_v37 }
 0x4d8   : > { %8250 = vmatpush.bf16.msra.mxu1 %v12132_v52 }
 0x4d9   : > { %8047 = vmatmul.bf16.vlgmr.msrb.gmra.mxu3 %v7988_v24 }
 0x4da   : > { %8156 = vmatmul.bf16.vlgmr.msra.gmra.mxu0 %v8097_v54  ;;  %12197 = vmatpush.bf16.msra.mxu3 %v12134_v25 }
 0x4db   : > { %7852 = vmatmul.bf16.vlgmr.msrb.gmra.mxu1 %v7793_v14  ;;  %8356 = vmatpush.bf16.msrb.mxu0 %v12142_v44 }
 0x4de   : > { %12198 = vmatpush.bf16.msra.mxu3 %v12133_v49 }
 0x4df   : > { %8357 = vmatpush.bf16.msrb.mxu0 %v12141_v38 }
 0x4e2   : > { %12199 = vmatpush.bf16.msra.mxu3 %v12132_v52 }
 0x4e3   : > { %8358 = vmatpush.bf16.msrb.mxu0 %v12140_v57 }
 0x4e9   : > { %8052 = vmatmul.bf16.gmra.mxu3 %v7987_v20 }
 0x4ea   : > { %8161 = vmatmul.bf16.gmra.mxu0 %v8096_v45 }
 0x4eb   : > { %7857 = vmatmul.bf16.gmra.mxu1 %v7792_v55 }
 0x4f9   : > { %8256 = vmatmul.bf16.vlgmr.msra.gmra.mxu3 %v8191_v56  ;;  %v12236_v56 = vld [vmem:[%s14938_s15] ss:$0 sm:$0xff] }
 0x4fb   : > { %8251 = vmatmul.bf16.vlgmr.msra.gmra.mxu1 %v8192_v19 }
 0x528   : > { %v7553_v28 = vpop.f32.mrf.mxu2 }
 0x530   : > { %v7555_v11 = vpop.f32.mrf.mxu2 }
 0x537   : > { %v7744_v60 = vpop.f32.mrf.mxu0 }
 0x538   : > { %v7484_v46 = vpop.f32.mrf.mxu1  ;;  %v7558_v2 = vpop.f32.mrf.mxu2 }
 0x539   : > { %v7554_v36 = vadd.f32 %v7553_v28, %v7484_v46 }
 0x53c   : > { %v7645_v62 = vpop.f32.mrf.mxu3 }
 0x53d   : > { %v7654_v50 = vadd.f32 %v7645_v62, %v7554_v36 }
 0x53f   : > { %v7746_v4 = vpop.f32.mrf.mxu0  ;;  %v7753_v21 = vadd.f32 %v7744_v60, %v7654_v50  ;;  %v12237_v60 = vld [vmem:[%s14939_s16] ss:$0 sm:$0xff] }
 0x540   : > { %v7486_v9 = vpop.f32.mrf.mxu1  ;;  %v7560_v10 = vpop.f32.mrf.mxu2 }
 0x541   : > { %v7556_v30 = vadd.f32 %v7555_v11, %v7486_v9 }
 0x544   : > { %v7647_v18 = vpop.f32.mrf.mxu3 }
 0x545   : > { %v7655_v43 = vadd.f32 %v7647_v18, %v7556_v30 }
 0x547   : > { %v7749_v15 = vpop.f32.mrf.mxu0  ;;  %v7754_v55 = vadd.f32 %v7746_v4, %v7655_v43 }
 0x548   : > { %v7489_v16 = vpop.f32.mrf.mxu1  ;;  %v7943_v17 = vpop.f32.mrf.mxu2 }
 0x549   : > { %v7559_v13 = vadd.f32 %v7558_v2, %v7489_v16 }
 0x54c   : > { %v7650_v6 = vpop.f32.mrf.mxu3 }
 0x54d   : > { %v7656_v23 = vadd.f32 %v7650_v6, %v7559_v13  ;;  %v12238_v6 = vld [vmem:[%s14941_s18] ss:$0 sm:$0xff] }
 0x54f   : > { %v7751_v41 = vpop.f32.mrf.mxu0  ;;  %v7755_v35 = vadd.f32 %v7749_v15, %v7656_v23 }
 0x550   : > { %v7491_v29 = vpop.f32.mrf.mxu1  ;;  %v7945_v34 = vpop.f32.mrf.mxu2 }
 0x554   : > { %v7652_v0 = vpop.f32.mrf.mxu3 }
 0x557   : > { %v8157_v40 = vpop.f32.mrf.mxu0 }
 0x558   : > { %v7853_v47 = vpop.f32.mrf.mxu1  ;;  %v7948_v61 = vpop.f32.mrf.mxu2 }
 0x559   : > { %v7862_v42 = vadd.f32 %v7853_v47, %v7753_v21 }
 0x55b   : > { %v7952_v8 = vadd.f32 %v7943_v17, %v7862_v42 }
 0x55c   : > { %v8048_v26 = vpop.f32.mrf.mxu3 }
 0x55d   : > { %v8057_v58 = vadd.f32 %v8048_v26, %v7952_v8 }
 0x55f   : > { %v8159_v7 = vpop.f32.mrf.mxu0  ;;  %v8166_v48 = vadd.f32 %v8157_v40, %v8057_v58 }
 0x560   : > { %v7855_v27 = vpop.f32.mrf.mxu1  ;;  %v7950_v5 = vpop.f32.mrf.mxu2 }
 0x561   : > { %v7863_v25 = vadd.f32 %v7855_v27, %v7754_v55 }
 0x563   : > { %v7953_v14 = vadd.f32 %v7945_v34, %v7863_v25 }
 0x564   : > { %v8050_v12 = vpop.f32.mrf.mxu3 }
 0x565   : > { %v8058_v63 = vadd.f32 %v8050_v12, %v7953_v14 }
 0x567   : > { %v8162_v51 = vpop.f32.mrf.mxu0  ;;  %v8167_v2 = vadd.f32 %v8159_v7, %v8058_v63 }
 0x568   : > { %v7858_v22 = vpop.f32.mrf.mxu1 }
 0x569   : > { %v7864_v59 = vadd.f32 %v7858_v22, %v7755_v35 }
 0x56b   : > { %v7954_v24 = vadd.f32 %v7948_v61, %v7864_v59 }
 0x56c   : > { %v8053_v53 = vpop.f32.mrf.mxu3 }
 0x56d   : > { %v8059_v49 = vadd.f32 %v8053_v53, %v7954_v24 }
 0x56f   : > { %v8164_v20 = vpop.f32.mrf.mxu0  ;;  %v8168_v1 = vadd.f32 %v8162_v51, %v8059_v49 }
 0x570   : > { %v7860_v45 = vpop.f32.mrf.mxu1 }
 0x574   : > { %v8055_v54 = vpop.f32.mrf.mxu3 }
 0x578   : > { %v8252_v52 = vpop.f32.mrf.mxu1 }
 0x579   : > { %v8261_v3 = vadd.f32 %v8252_v52, %v8166_v48 }
 0x57b   : > { %v8268_v11 = vmul.f32 %v12236_v56, %v8261_v3 }
 0x57c   : > { %v8257_v19 = vpop.f32.mrf.mxu3 }
 0x57d   : > { %v8263_v28 = vadd.f32 %v8257_v19, %v8168_v1  ;;  %v8275_v4 = vadd.f32 %v12237_v60, %v8268_v11 }
 0x57f   : > { %v8270_v46 = vmul.f32 %v12236_v56, %v8263_v28  ;;  %v8278_v16 = vmax.f32 %v8275_v4, 0.0 }
 0x580   : > { %v8254_v36 = vpop.f32.mrf.mxu1 }
 0x581   : > { %v8277_v62 = vadd.f32 %v12237_v60, %v8270_v46  ;;  %v8262_v50 = vadd.f32 %v8254_v36, %v8167_v2 }
 0x583   : > { %v8280_v21 = vmax.f32 %v8277_v62, 0.0  ;;  %v8269_v9 = vmul.f32 %v12236_v56, %v8262_v50 }
 0x584   : > { %v8259_v10 = vpop.f32.mrf.mxu3 }
 0x585   : > { %v8282_v18 = vpack.c.bf16 %v8280_v21, %v8280_v21  ;;  %v8276_v15 = vadd.f32 %v12237_v60, %v8269_v9 }
 0x587   : > { %v8279_v17 = vmax.f32 %v8276_v15, 0.0  ;;  %8364 = vmatmul.bf16.vlgmr.msra.gmra.mxu2 %v8282_v18 }
 0x589   : > { %v8281_v33 = vpack.c.bf16 %v8279_v17, %v8278_v16 }
 0x58b   : > { %8359 = vmatmul.bf16.vlgmr.msrb.gmra.mxu0 %v8281_v33 }
 0x608   : > { %v8360_v32 = vpop.f32.mrf.mxu0 }
 0x609   : > { %v8361_v41 = vadd.f32 %v12238_v6, %v8360_v32 }
 0x60a   : > { %v8365_v29 = vpop.f32.mrf.mxu2 }
 0x60b   : > { %8369 = vst [vmem:[%s602_s29] sm:$0xff] %v8361_v41  ;;  %v8366_v31 = vadd.f32 %v12238_v6, %v8365_v29 }
 0x60d   : > { %8371 = vst [vmem:[%s602_s29 + $0x10] sm:$0xff] %v8366_v31 }
 0x610   : > { %v8362_v34 = vpop.f32.mrf.mxu0 }
 0x611   : > { %v8363_v0 = vadd.f32 %v12238_v6, %v8362_v34 }
 0x612   : > { %v8367_v39 = vpop.f32.mrf.mxu2 }
 0x613   : > { %8370 = vst [vmem:[%s602_s29 + $0x8] sm:$0xff] %v8363_v0 }
 0x614 PF: > { %s29_s0 = sadd.s32 1, %s12261_s0  }
 0x615   : > { %p26_p4 = scmp.ge.s32.totalorder %s29_s0, 4  }
 0x617   :  { %28 = sbr.rel (!%p26_p4) target bundleno = 5 (0x5), region = 158 }

</bundles_post_ra>
